<compile_context>
chip_gen: v5e
topology: v5e:2x2
jax: 0.10.0
libtpu: 0.0.40
codegen_flags: <defaults>
</compile_context>

<pallas_src>
import jax
import jax.numpy as jnp
from jax.experimental import pallas as pl
from jax.experimental.pallas import tpu as pltpu

IMG = 32            # spatial size implied by Linear(320,160): 32 -> 16 -> 8 -> 4
LANES = IMG * IMG   # per-image flattened spatial extent, kept on the lane axis


# ----------------------------------------------------------------------------
# Fused kernel: one grid step == one image.
# ----------------------------------------------------------------------------
def convnn_kernel(x_ref, w1_ref, b1_ref, w2_ref, b2_ref, w3_ref, b3_ref,
                  send_ref, w1s_ref, b1r_ref, w2t_ref, b2r_ref, o_ref):
    lane = jax.lax.broadcasted_iota(jnp.int32, (1, LANES), 1)

    def conv3x3_pool2_relu(x, w_taps_ref, b_ref, log2s, side):
        """Conv2d(3x3,'same') -> MaxPool2d(2) -> ReLU, in dilated flat layout.

        x: (Cin_pad, LANES) f32.  Valid cells (h, w) of the current side x side
        grid live at lane s*(32*h + w) with s = 2**log2s.  Returns
        (Cout_pad, LANES) whose valid cells live at scale 2*s.
        """
        s = 1 << log2s
        cout_pad = w_taps_ref.shape[1]
        hh = lane >> (5 + log2s)             # = h at valid lanes
        ww = (lane >> log2s) & (IMG - 1)     # = w at valid lanes
        acc = jnp.zeros((cout_pad, LANES), jnp.float32)
        for tap in range(9):
            dy, dx = tap // 3 - 1, tap % 3 - 1
            off = s * (dy * IMG + dx)
            if off == 0:
                src = x
            else:
                src = pltpu.roll(x, shift=(-off) % LANES, axis=1)
                valid = ((hh + dy >= 0) & (hh + dy < side) &
                         (ww + dx >= 0) & (ww + dx < side))
                src = src * valid.astype(jnp.float32)   # 'same' zero padding
            acc = acc + jnp.dot(w_taps_ref[tap], src,
                                preferred_element_type=jnp.float32)
        y = acc + b_ref[...]                              # bias (Cout_pad, 1)
        # 2x2 / stride-2 max pool via two roll+max steps (pooled cell (h',w')
        # lands on lane 2*s*(32*h' + w')), then ReLU (same order as the module).
        m = jnp.maximum(y, pltpu.roll(y, shift=LANES - s, axis=1))
        m = jnp.maximum(m, pltpu.roll(m, shift=LANES - IMG * s, axis=1))
        return jnp.maximum(m, 0.0)

    x0 = x_ref[0]                                          # (3, 1024)
    a1 = conv3x3_pool2_relu(x0, w1_ref, b1_ref, 0, 32)     # (8, 1024)
    a2 = conv3x3_pool2_relu(a1, w2_ref, b2_ref, 1, 16)     # (16, 1024)
    a3 = conv3x3_pool2_relu(a2, w3_ref, b3_ref, 2, 8)      # (24, 1024)

    # Gather the 16 valid 4x4 cells with one 0/1 selection matmul -> (24, 16),
    # column order q = 4*h + w (matches PyTorch's NCHW flatten per channel).
    p3 = jnp.dot(a3, send_ref[...], preferred_element_type=jnp.float32)

    # Flatten + Linear(320, 160): contract over (channel, position) as 20
    # tiny per-channel dots -- no in-kernel reshape / transpose needed.
    y1 = b1r_ref[...]                                      # (1, 160)
    for c in range(20):
        y1 = y1 + jnp.dot(p3[c:c + 1, :], w1s_ref[c],
                          preferred_element_type=jnp.float32)
    y1 = jnp.maximum(y1, 0.0)

    # Linear(160, 10) + ReLU + Softmax(dim=1)
    y2 = jnp.dot(y1, w2t_ref[...], preferred_element_type=jnp.float32)
    y2 = jnp.maximum(y2 + b2r_ref[...], 0.0)               # (1, 10)
    z = y2 - jnp.max(y2, axis=-1, keepdims=True)
    e = jnp.exp(z)
    # exact reciprocal kept for parity (approx=True would be ~2^-12 relative)
    inv = pl.reciprocal(jnp.sum(e, axis=-1, keepdims=True), approx=False)
    o_ref[0] = e * inv


# ----------------------------------------------------------------------------
# Parameters: deterministic synthetic init (torch layouts) + one-time packing.
# ----------------------------------------------------------------------------
def init_params(key):
    ks = jax.random.split(key, 10)

    def w(k, shape, scale):
        return (scale * jax.random.normal(k, shape)).astype(jnp.float32)

    return {
        "conv1_w": w(ks[0], (5, 3, 3, 3), 0.2),    "conv1_b": w(ks[1], (5,), 0.1),
        "conv2_w": w(ks[2], (10, 5, 3, 3), 0.15),  "conv2_b": w(ks[3], (10,), 0.1),
        "conv3_w": w(ks[4], (20, 10, 3, 3), 0.1),  "conv3_b": w(ks[5], (20,), 0.1),
        "fc1_w": w(ks[6], (160, 320), 0.05),       "fc1_b": w(ks[7], (160,), 0.1),
        "fc2_w": w(ks[8], (10, 160), 0.05),        "fc2_b": w(ks[9], (10,), 0.1),
    }


def pack_params(p):
    """Hoisted, one-time weight packing (tap-major conv weights, padded
    channel dims to sublane multiples, pre-transposed FC weights)."""

    def pack_conv(w, cout_pad, cin_pad):
        cout, cin, kh, kw = w.shape
        taps = jnp.transpose(w, (2, 3, 0, 1)).reshape(kh * kw, cout, cin)
        return jnp.pad(taps, ((0, 0), (0, cout_pad - cout), (0, cin_pad - cin)))

    def pack_bias(b, cout_pad):
        return jnp.pad(b, (0, cout_pad - b.shape[0])).reshape(cout_pad, 1)

    # 0/1 matrix selecting the 16 valid 4x4 cells (lane 256*h + 8*w) into
    # flatten order q = 4*h + w.
    h3 = jnp.arange(4)
    w3 = jnp.arange(4)
    src_lanes = (256 * h3[:, None] + 8 * w3[None, :]).reshape(16)
    send = jnp.zeros((LANES, 16), jnp.float32)
    send = send.at[src_lanes, jnp.arange(16)].set(1.0)

    return {
        "w1": pack_conv(p["conv1_w"], 8, 3),   "b1": pack_bias(p["conv1_b"], 8),
        "w2": pack_conv(p["conv2_w"], 16, 8),  "b2": pack_bias(p["conv2_b"], 16),
        "w3": pack_conv(p["conv3_w"], 24, 16), "b3": pack_bias(p["conv3_b"], 24),
        "send": send,
        # fc1 (160, 320) -> (20, 16, 160) per-channel blocks; column ordering
        # matches PyTorch's flatten of (N, 20, 4, 4): f = c*16 + h*4 + w.
        "w1s": jnp.transpose(p["fc1_w"], (1, 0)).reshape(20, 16, 160),
        "b1r": p["fc1_b"].reshape(1, 160),
        "w2t": jnp.transpose(p["fc2_w"], (1, 0)),      # (160, 10)
        "b2r": p["fc2_b"].reshape(1, 10),
    }


# ----------------------------------------------------------------------------
# Forward: one fused pallas_call, grid over the batch.
# ----------------------------------------------------------------------------
def convnn_forward(packed, x_nchw):
    n = x_nchw.shape[0]
    xr = x_nchw.astype(jnp.float32).reshape(n, 3, LANES)   # (N, 3, 1024)

    out = pl.pallas_call(
        convnn_kernel,
        out_shape=jax.ShapeDtypeStruct((n, 1, 10), jnp.float32),
        grid=(n,),
        in_specs=[
            pl.BlockSpec((1, 3, LANES), lambda i: (i, 0, 0)),   # image i
            pl.BlockSpec((9, 8, 3), lambda i: (0, 0, 0)),       # conv1 taps
            pl.BlockSpec((8, 1), lambda i: (0, 0)),             # conv1 bias
            pl.BlockSpec((9, 16, 8), lambda i: (0, 0, 0)),      # conv2 taps
            pl.BlockSpec((16, 1), lambda i: (0, 0)),            # conv2 bias
            pl.BlockSpec((9, 24, 16), lambda i: (0, 0, 0)),     # conv3 taps
            pl.BlockSpec((24, 1), lambda i: (0, 0)),            # conv3 bias
            pl.BlockSpec((LANES, 16), lambda i: (0, 0)),        # 4x4 gather
            pl.BlockSpec((20, 16, 160), lambda i: (0, 0, 0)),   # fc1 blocks
            pl.BlockSpec((1, 160), lambda i: (0, 0)),           # fc1 bias
            pl.BlockSpec((160, 10), lambda i: (0, 0)),          # fc2 weight^T
            pl.BlockSpec((1, 10), lambda i: (0, 0)),            # fc2 bias
        ],
        out_specs=pl.BlockSpec((1, 1, 10), lambda i: (i, 0, 0)),
        compiler_params=pltpu.CompilerParams(
            dimension_semantics=("parallel",)),
    )(xr, packed["w1"], packed["b1"], packed["w2"], packed["b2"],
      packed["w3"], packed["b3"], packed["send"], packed["w1s"],
      packed["b1r"], packed["w2t"], packed["b2r"])

    return out.reshape(n, 10)


if __name__ == "__main__":
    key = jax.random.PRNGKey(0)
    k_x, k_p = jax.random.split(key)
    # Linear(320, 160) implies 3x32x32 inputs (CIFAR-like); batch=2.
    x = jax.random.normal(k_x, (2, 3, 32, 32), dtype=jnp.float32)
    params = init_params(k_p)
    packed = pack_params(params)

    out = convnn_forward(packed, x)
    out = jax.block_until_ready(out)

    assert out.shape == (2, 10), out.shape
    assert bool(jnp.all(jnp.isfinite(out)))
    # softmax rows sum to 1
    assert bool(jnp.allclose(jnp.sum(out, axis=-1), 1.0, atol=1e-5))
    print("KERNEL_OK")
</pallas_src>

<mosaic_0001>
module attributes {stable_mosaic.version = 11 : i64} {
  func.func @convnn_kernel(%arg0: i32, %arg1: memref<1x3x1024xf32, #tpu.memory_space<vmem>>, %arg2: memref<9x8x3xf32, #tpu.memory_space<vmem>>, %arg3: memref<8x1xf32, #tpu.memory_space<vmem>>, %arg4: memref<9x16x8xf32, #tpu.memory_space<vmem>>, %arg5: memref<16x1xf32, #tpu.memory_space<vmem>>, %arg6: memref<9x24x16xf32, #tpu.memory_space<vmem>>, %arg7: memref<24x1xf32, #tpu.memory_space<vmem>>, %arg8: memref<1024x16xf32, #tpu.memory_space<vmem>>, %arg9: memref<20x16x160xf32, #tpu.memory_space<vmem>>, %arg10: memref<1x160xf32, #tpu.memory_space<vmem>>, %arg11: memref<160x10xf32, #tpu.memory_space<vmem>>, %arg12: memref<1x10xf32, #tpu.memory_space<vmem>>, %arg13: memref<1x1x10xf32, #tpu.memory_space<vmem>>) attributes {dimension_semantics = [#tpu.dimension_semantics<parallel>], iteration_bounds = array<i64: 2>, scalar_prefetch = 0 : i64, scratch_operands = 0 : i64, tpu.core_type = #tpu.core_type<tc>, window_params = [{transform_indices = @transform_0, window_bounds = array<i64: 1, 3, 1024>}, {pipeline_mode = #tpu.pipeline_mode<synchronous>, transform_indices = @transform_1, window_bounds = array<i64: 9, 8, 3>}, {pipeline_mode = #tpu.pipeline_mode<synchronous>, transform_indices = @transform_2, window_bounds = array<i64: 8, 1>}, {pipeline_mode = #tpu.pipeline_mode<synchronous>, transform_indices = @transform_3, window_bounds = array<i64: 9, 16, 8>}, {pipeline_mode = #tpu.pipeline_mode<synchronous>, transform_indices = @transform_4, window_bounds = array<i64: 16, 1>}, {pipeline_mode = #tpu.pipeline_mode<synchronous>, transform_indices = @transform_5, window_bounds = array<i64: 9, 24, 16>}, {pipeline_mode = #tpu.pipeline_mode<synchronous>, transform_indices = @transform_6, window_bounds = array<i64: 24, 1>}, {pipeline_mode = #tpu.pipeline_mode<synchronous>, transform_indices = @transform_7, window_bounds = array<i64: 1024, 16>}, {pipeline_mode = #tpu.pipeline_mode<synchronous>, transform_indices = @transform_8, window_bounds = array<i64: 20, 16, 160>}, {pipeline_mode = #tpu.pipeline_mode<synchronous>, transform_indices = @transform_9, window_bounds = array<i64: 1, 160>}, {pipeline_mode = #tpu.pipeline_mode<synchronous>, transform_indices = @transform_10, window_bounds = array<i64: 160, 10>}, {pipeline_mode = #tpu.pipeline_mode<synchronous>, transform_indices = @transform_11, window_bounds = array<i64: 1, 10>}, {transform_indices = @transform_12, window_bounds = array<i64: 1, 1, 10>}]} {
    %0 = tpu.iota {dimensions = array<i32: 1>} : vector<1x1024xi32>
    %c0 = arith.constant 0 : index
    %c0_0 = arith.constant 0 : index
    %c0_1 = arith.constant 0 : index
    %1 = vector.load %arg1[%c0, %c0_0, %c0_1] : memref<1x3x1024xf32, #tpu.memory_space<vmem>>, vector<1x3x1024xf32>
    %2 = vector.shape_cast %1 : vector<1x3x1024xf32> to vector<3x1024xf32>
    %c5_i32 = arith.constant 5 : i32
    %3 = vector.broadcast %c5_i32 : i32 to vector<1x1024xi32>
    %4 = arith.shrsi %0, %3 : vector<1x1024xi32>
    %c0_i32 = arith.constant 0 : i32
    %5 = vector.broadcast %c0_i32 : i32 to vector<1x1024xi32>
    %6 = arith.shrsi %0, %5 : vector<1x1024xi32>
    %c31_i32 = arith.constant 31 : i32
    %7 = vector.broadcast %c31_i32 : i32 to vector<1x1024xi32>
    %8 = arith.andi %6, %7 : vector<1x1024xi32>
    %cst = arith.constant 0.000000e+00 : f32
    %9 = vector.broadcast %cst : f32 to vector<8x1024xf32>
    %c33_i32 = arith.constant 33 : i32
    %10 = tpu.dynamic_rotate %2 by %c33_i32 dim 1 : vector<3x1024xf32>, i32 -> vector<3x1024xf32>
    %c-1_i32 = arith.constant -1 : i32
    %11 = vector.broadcast %c-1_i32 : i32 to vector<1x1024xi32>
    %12 = arith.addi %4, %11 : vector<1x1024xi32>
    %c0_i32_2 = arith.constant 0 : i32
    %13 = vector.broadcast %c0_i32_2 : i32 to vector<1x1024xi32>
    %14 = arith.cmpi sge, %12, %13 : vector<1x1024xi32>
    %c-1_i32_3 = arith.constant -1 : i32
    %15 = vector.broadcast %c-1_i32_3 : i32 to vector<1x1024xi32>
    %16 = arith.addi %4, %15 : vector<1x1024xi32>
    %c32_i32 = arith.constant 32 : i32
    %17 = vector.broadcast %c32_i32 : i32 to vector<1x1024xi32>
    %18 = arith.cmpi slt, %16, %17 : vector<1x1024xi32>
    %19 = arith.andi %14, %18 : vector<1x1024xi1>
    %c-1_i32_4 = arith.constant -1 : i32
    %20 = vector.broadcast %c-1_i32_4 : i32 to vector<1x1024xi32>
    %21 = arith.addi %8, %20 : vector<1x1024xi32>
    %c0_i32_5 = arith.constant 0 : i32
    %22 = vector.broadcast %c0_i32_5 : i32 to vector<1x1024xi32>
    %23 = arith.cmpi sge, %21, %22 : vector<1x1024xi32>
    %24 = arith.andi %19, %23 : vector<1x1024xi1>
    %c-1_i32_6 = arith.constant -1 : i32
    %25 = vector.broadcast %c-1_i32_6 : i32 to vector<1x1024xi32>
    %26 = arith.addi %8, %25 : vector<1x1024xi32>
    %c32_i32_7 = arith.constant 32 : i32
    %27 = vector.broadcast %c32_i32_7 : i32 to vector<1x1024xi32>
    %28 = arith.cmpi slt, %26, %27 : vector<1x1024xi32>
    %29 = arith.andi %24, %28 : vector<1x1024xi1>
    %30 = arith.extui %29 : vector<1x1024xi1> to vector<1x1024xi32>
    %31 = arith.sitofp %30 : vector<1x1024xi32> to vector<1x1024xf32>
    %32 = vector.broadcast %31 : vector<1x1024xf32> to vector<3x1024xf32>
    %33 = arith.mulf %10, %32 : vector<3x1024xf32>
    %c0_8 = arith.constant 0 : index
    %c0_9 = arith.constant 0 : index
    %c0_10 = arith.constant 0 : index
    %34 = vector.load %arg2[%c0_8, %c0_9, %c0_10] : memref<9x8x3xf32, #tpu.memory_space<vmem>>, vector<1x8x3xf32>
    %35 = vector.shape_cast %34 : vector<1x8x3xf32> to vector<8x3xf32>
    %cst_11 = arith.constant dense<0.000000e+00> : vector<8x1024xf32>
    %36 = tpu.matmul %35, %33, %cst_11 {dimension_numbers = #tpu.dot_dimension_numbers<[1], [0], [0], [1], [0, 0, 1, 1], [], []>} : vector<8x3xf32>, vector<3x1024xf32>, vector<8x1024xf32> -> vector<8x1024xf32>
    %37 = arith.addf %9, %36 : vector<8x1024xf32>
    %c32_i32_12 = arith.constant 32 : i32
    %38 = tpu.dynamic_rotate %2 by %c32_i32_12 dim 1 : vector<3x1024xf32>, i32 -> vector<3x1024xf32>
    %c-1_i32_13 = arith.constant -1 : i32
    %39 = vector.broadcast %c-1_i32_13 : i32 to vector<1x1024xi32>
    %40 = arith.addi %4, %39 : vector<1x1024xi32>
    %c0_i32_14 = arith.constant 0 : i32
    %41 = vector.broadcast %c0_i32_14 : i32 to vector<1x1024xi32>
    %42 = arith.cmpi sge, %40, %41 : vector<1x1024xi32>
    %c-1_i32_15 = arith.constant -1 : i32
    %43 = vector.broadcast %c-1_i32_15 : i32 to vector<1x1024xi32>
    %44 = arith.addi %4, %43 : vector<1x1024xi32>
    %c32_i32_16 = arith.constant 32 : i32
    %45 = vector.broadcast %c32_i32_16 : i32 to vector<1x1024xi32>
    %46 = arith.cmpi slt, %44, %45 : vector<1x1024xi32>
    %47 = arith.andi %42, %46 : vector<1x1024xi1>
    %c0_i32_17 = arith.constant 0 : i32
    %48 = vector.broadcast %c0_i32_17 : i32 to vector<1x1024xi32>
    %49 = arith.addi %8, %48 : vector<1x1024xi32>
    %c0_i32_18 = arith.constant 0 : i32
    %50 = vector.broadcast %c0_i32_18 : i32 to vector<1x1024xi32>
    %51 = arith.cmpi sge, %49, %50 : vector<1x1024xi32>
    %52 = arith.andi %47, %51 : vector<1x1024xi1>
    %c0_i32_19 = arith.constant 0 : i32
    %53 = vector.broadcast %c0_i32_19 : i32 to vector<1x1024xi32>
    %54 = arith.addi %8, %53 : vector<1x1024xi32>
    %c32_i32_20 = arith.constant 32 : i32
    %55 = vector.broadcast %c32_i32_20 : i32 to vector<1x1024xi32>
    %56 = arith.cmpi slt, %54, %55 : vector<1x1024xi32>
    %57 = arith.andi %52, %56 : vector<1x1024xi1>
    %58 = arith.extui %57 : vector<1x1024xi1> to vector<1x1024xi32>
    %59 = arith.sitofp %58 : vector<1x1024xi32> to vector<1x1024xf32>
    %60 = vector.broadcast %59 : vector<1x1024xf32> to vector<3x1024xf32>
    %61 = arith.mulf %38, %60 : vector<3x1024xf32>
    %c1 = arith.constant 1 : index
    %c0_21 = arith.constant 0 : index
    %c0_22 = arith.constant 0 : index
    %62 = vector.load %arg2[%c1, %c0_21, %c0_22] : memref<9x8x3xf32, #tpu.memory_space<vmem>>, vector<1x8x3xf32>
    %63 = vector.shape_cast %62 : vector<1x8x3xf32> to vector<8x3xf32>
    %cst_23 = arith.constant dense<0.000000e+00> : vector<8x1024xf32>
    %64 = tpu.matmul %63, %61, %cst_23 {dimension_numbers = #tpu.dot_dimension_numbers<[1], [0], [0], [1], [0, 0, 1, 1], [], []>} : vector<8x3xf32>, vector<3x1024xf32>, vector<8x1024xf32> -> vector<8x1024xf32>
    %65 = arith.addf %37, %64 : vector<8x1024xf32>
    %c31_i32_24 = arith.constant 31 : i32
    %66 = tpu.dynamic_rotate %2 by %c31_i32_24 dim 1 : vector<3x1024xf32>, i32 -> vector<3x1024xf32>
    %c-1_i32_25 = arith.constant -1 : i32
    %67 = vector.broadcast %c-1_i32_25 : i32 to vector<1x1024xi32>
    %68 = arith.addi %4, %67 : vector<1x1024xi32>
    %c0_i32_26 = arith.constant 0 : i32
    %69 = vector.broadcast %c0_i32_26 : i32 to vector<1x1024xi32>
    %70 = arith.cmpi sge, %68, %69 : vector<1x1024xi32>
    %c-1_i32_27 = arith.constant -1 : i32
    %71 = vector.broadcast %c-1_i32_27 : i32 to vector<1x1024xi32>
    %72 = arith.addi %4, %71 : vector<1x1024xi32>
    %c32_i32_28 = arith.constant 32 : i32
    %73 = vector.broadcast %c32_i32_28 : i32 to vector<1x1024xi32>
    %74 = arith.cmpi slt, %72, %73 : vector<1x1024xi32>
    %75 = arith.andi %70, %74 : vector<1x1024xi1>
    %c1_i32 = arith.constant 1 : i32
    %76 = vector.broadcast %c1_i32 : i32 to vector<1x1024xi32>
    %77 = arith.addi %8, %76 : vector<1x1024xi32>
    %c0_i32_29 = arith.constant 0 : i32
    %78 = vector.broadcast %c0_i32_29 : i32 to vector<1x1024xi32>
    %79 = arith.cmpi sge, %77, %78 : vector<1x1024xi32>
    %80 = arith.andi %75, %79 : vector<1x1024xi1>
    %c1_i32_30 = arith.constant 1 : i32
    %81 = vector.broadcast %c1_i32_30 : i32 to vector<1x1024xi32>
    %82 = arith.addi %8, %81 : vector<1x1024xi32>
    %c32_i32_31 = arith.constant 32 : i32
    %83 = vector.broadcast %c32_i32_31 : i32 to vector<1x1024xi32>
    %84 = arith.cmpi slt, %82, %83 : vector<1x1024xi32>
    %85 = arith.andi %80, %84 : vector<1x1024xi1>
    %86 = arith.extui %85 : vector<1x1024xi1> to vector<1x1024xi32>
    %87 = arith.sitofp %86 : vector<1x1024xi32> to vector<1x1024xf32>
    %88 = vector.broadcast %87 : vector<1x1024xf32> to vector<3x1024xf32>
    %89 = arith.mulf %66, %88 : vector<3x1024xf32>
    %c2 = arith.constant 2 : index
    %c0_32 = arith.constant 0 : index
    %c0_33 = arith.constant 0 : index
    %90 = vector.load %arg2[%c2, %c0_32, %c0_33] : memref<9x8x3xf32, #tpu.memory_space<vmem>>, vector<1x8x3xf32>
    %91 = vector.shape_cast %90 : vector<1x8x3xf32> to vector<8x3xf32>
    %cst_34 = arith.constant dense<0.000000e+00> : vector<8x1024xf32>
    %92 = tpu.matmul %91, %89, %cst_34 {dimension_numbers = #tpu.dot_dimension_numbers<[1], [0], [0], [1], [0, 0, 1, 1], [], []>} : vector<8x3xf32>, vector<3x1024xf32>, vector<8x1024xf32> -> vector<8x1024xf32>
    %93 = arith.addf %65, %92 : vector<8x1024xf32>
    %c1_i32_35 = arith.constant 1 : i32
    %94 = tpu.dynamic_rotate %2 by %c1_i32_35 dim 1 : vector<3x1024xf32>, i32 -> vector<3x1024xf32>
    %c0_i32_36 = arith.constant 0 : i32
    %95 = vector.broadcast %c0_i32_36 : i32 to vector<1x1024xi32>
    %96 = arith.addi %4, %95 : vector<1x1024xi32>
    %c0_i32_37 = arith.constant 0 : i32
    %97 = vector.broadcast %c0_i32_37 : i32 to vector<1x1024xi32>
    %98 = arith.cmpi sge, %96, %97 : vector<1x1024xi32>
    %c0_i32_38 = arith.constant 0 : i32
    %99 = vector.broadcast %c0_i32_38 : i32 to vector<1x1024xi32>
    %100 = arith.addi %4, %99 : vector<1x1024xi32>
    %c32_i32_39 = arith.constant 32 : i32
    %101 = vector.broadcast %c32_i32_39 : i32 to vector<1x1024xi32>
    %102 = arith.cmpi slt, %100, %101 : vector<1x1024xi32>
    %103 = arith.andi %98, %102 : vector<1x1024xi1>
    %c-1_i32_40 = arith.constant -1 : i32
    %104 = vector.broadcast %c-1_i32_40 : i32 to vector<1x1024xi32>
    %105 = arith.addi %8, %104 : vector<1x1024xi32>
    %c0_i32_41 = arith.constant 0 : i32
    %106 = vector.broadcast %c0_i32_41 : i32 to vector<1x1024xi32>
    %107 = arith.cmpi sge, %105, %106 : vector<1x1024xi32>
    %108 = arith.andi %103, %107 : vector<1x1024xi1>
    %c-1_i32_42 = arith.constant -1 : i32
    %109 = vector.broadcast %c-1_i32_42 : i32 to vector<1x1024xi32>
    %110 = arith.addi %8, %109 : vector<1x1024xi32>
    %c32_i32_43 = arith.constant 32 : i32
    %111 = vector.broadcast %c32_i32_43 : i32 to vector<1x1024xi32>
    %112 = arith.cmpi slt, %110, %111 : vector<1x1024xi32>
    %113 = arith.andi %108, %112 : vector<1x1024xi1>
    %114 = arith.extui %113 : vector<1x1024xi1> to vector<1x1024xi32>
    %115 = arith.sitofp %114 : vector<1x1024xi32> to vector<1x1024xf32>
    %116 = vector.broadcast %115 : vector<1x1024xf32> to vector<3x1024xf32>
    %117 = arith.mulf %94, %116 : vector<3x1024xf32>
    %c3 = arith.constant 3 : index
    %c0_44 = arith.constant 0 : index
    %c0_45 = arith.constant 0 : index
    %118 = vector.load %arg2[%c3, %c0_44, %c0_45] : memref<9x8x3xf32, #tpu.memory_space<vmem>>, vector<1x8x3xf32>
    %119 = vector.shape_cast %118 : vector<1x8x3xf32> to vector<8x3xf32>
    %cst_46 = arith.constant dense<0.000000e+00> : vector<8x1024xf32>
    %120 = tpu.matmul %119, %117, %cst_46 {dimension_numbers = #tpu.dot_dimension_numbers<[1], [0], [0], [1], [0, 0, 1, 1], [], []>} : vector<8x3xf32>, vector<3x1024xf32>, vector<8x1024xf32> -> vector<8x1024xf32>
    %121 = arith.addf %93, %120 : vector<8x1024xf32>
    %c4 = arith.constant 4 : index
    %c0_47 = arith.constant 0 : index
    %c0_48 = arith.constant 0 : index
    %122 = vector.load %arg2[%c4, %c0_47, %c0_48] : memref<9x8x3xf32, #tpu.memory_space<vmem>>, vector<1x8x3xf32>
    %123 = vector.shape_cast %122 : vector<1x8x3xf32> to vector<8x3xf32>
    %cst_49 = arith.constant dense<0.000000e+00> : vector<8x1024xf32>
    %124 = tpu.matmul %123, %2, %cst_49 {dimension_numbers = #tpu.dot_dimension_numbers<[1], [0], [0], [1], [0, 0, 1, 1], [], []>} : vector<8x3xf32>, vector<3x1024xf32>, vector<8x1024xf32> -> vector<8x1024xf32>
    %125 = arith.addf %121, %124 : vector<8x1024xf32>
    %c1023_i32 = arith.constant 1023 : i32
    %126 = tpu.dynamic_rotate %2 by %c1023_i32 dim 1 : vector<3x1024xf32>, i32 -> vector<3x1024xf32>
    %c0_i32_50 = arith.constant 0 : i32
    %127 = vector.broadcast %c0_i32_50 : i32 to vector<1x1024xi32>
    %128 = arith.addi %4, %127 : vector<1x1024xi32>
    %c0_i32_51 = arith.constant 0 : i32
    %129 = vector.broadcast %c0_i32_51 : i32 to vector<1x1024xi32>
    %130 = arith.cmpi sge, %128, %129 : vector<1x1024xi32>
    %c0_i32_52 = arith.constant 0 : i32
    %131 = vector.broadcast %c0_i32_52 : i32 to vector<1x1024xi32>
    %132 = arith.addi %4, %131 : vector<1x1024xi32>
    %c32_i32_53 = arith.constant 32 : i32
    %133 = vector.broadcast %c32_i32_53 : i32 to vector<1x1024xi32>
    %134 = arith.cmpi slt, %132, %133 : vector<1x1024xi32>
    %135 = arith.andi %130, %134 : vector<1x1024xi1>
    %c1_i32_54 = arith.constant 1 : i32
    %136 = vector.broadcast %c1_i32_54 : i32 to vector<1x1024xi32>
    %137 = arith.addi %8, %136 : vector<1x1024xi32>
    %c0_i32_55 = arith.constant 0 : i32
    %138 = vector.broadcast %c0_i32_55 : i32 to vector<1x1024xi32>
    %139 = arith.cmpi sge, %137, %138 : vector<1x1024xi32>
    %140 = arith.andi %135, %139 : vector<1x1024xi1>
    %c1_i32_56 = arith.constant 1 : i32
    %141 = vector.broadcast %c1_i32_56 : i32 to vector<1x1024xi32>
    %142 = arith.addi %8, %141 : vector<1x1024xi32>
    %c32_i32_57 = arith.constant 32 : i32
    %143 = vector.broadcast %c32_i32_57 : i32 to vector<1x1024xi32>
    %144 = arith.cmpi slt, %142, %143 : vector<1x1024xi32>
    %145 = arith.andi %140, %144 : vector<1x1024xi1>
    %146 = arith.extui %145 : vector<1x1024xi1> to vector<1x1024xi32>
    %147 = arith.sitofp %146 : vector<1x1024xi32> to vector<1x1024xf32>
    %148 = vector.broadcast %147 : vector<1x1024xf32> to vector<3x1024xf32>
    %149 = arith.mulf %126, %148 : vector<3x1024xf32>
    %c5 = arith.constant 5 : index
    %c0_58 = arith.constant 0 : index
    %c0_59 = arith.constant 0 : index
    %150 = vector.load %arg2[%c5, %c0_58, %c0_59] : memref<9x8x3xf32, #tpu.memory_space<vmem>>, vector<1x8x3xf32>
    %151 = vector.shape_cast %150 : vector<1x8x3xf32> to vector<8x3xf32>
    %cst_60 = arith.constant dense<0.000000e+00> : vector<8x1024xf32>
    %152 = tpu.matmul %151, %149, %cst_60 {dimension_numbers = #tpu.dot_dimension_numbers<[1], [0], [0], [1], [0, 0, 1, 1], [], []>} : vector<8x3xf32>, vector<3x1024xf32>, vector<8x1024xf32> -> vector<8x1024xf32>
    %153 = arith.addf %125, %152 : vector<8x1024xf32>
    %c993_i32 = arith.constant 993 : i32
    %154 = tpu.dynamic_rotate %2 by %c993_i32 dim 1 : vector<3x1024xf32>, i32 -> vector<3x1024xf32>
    %c1_i32_61 = arith.constant 1 : i32
    %155 = vector.broadcast %c1_i32_61 : i32 to vector<1x1024xi32>
    %156 = arith.addi %4, %155 : vector<1x1024xi32>
    %c0_i32_62 = arith.constant 0 : i32
    %157 = vector.broadcast %c0_i32_62 : i32 to vector<1x1024xi32>
    %158 = arith.cmpi sge, %156, %157 : vector<1x1024xi32>
    %c1_i32_63 = arith.constant 1 : i32
    %159 = vector.broadcast %c1_i32_63 : i32 to vector<1x1024xi32>
    %160 = arith.addi %4, %159 : vector<1x1024xi32>
    %c32_i32_64 = arith.constant 32 : i32
    %161 = vector.broadcast %c32_i32_64 : i32 to vector<1x1024xi32>
    %162 = arith.cmpi slt, %160, %161 : vector<1x1024xi32>
    %163 = arith.andi %158, %162 : vector<1x1024xi1>
    %c-1_i32_65 = arith.constant -1 : i32
    %164 = vector.broadcast %c-1_i32_65 : i32 to vector<1x1024xi32>
    %165 = arith.addi %8, %164 : vector<1x1024xi32>
    %c0_i32_66 = arith.constant 0 : i32
    %166 = vector.broadcast %c0_i32_66 : i32 to vector<1x1024xi32>
    %167 = arith.cmpi sge, %165, %166 : vector<1x1024xi32>
    %168 = arith.andi %163, %167 : vector<1x1024xi1>
    %c-1_i32_67 = arith.constant -1 : i32
    %169 = vector.broadcast %c-1_i32_67 : i32 to vector<1x1024xi32>
    %170 = arith.addi %8, %169 : vector<1x1024xi32>
    %c32_i32_68 = arith.constant 32 : i32
    %171 = vector.broadcast %c32_i32_68 : i32 to vector<1x1024xi32>
    %172 = arith.cmpi slt, %170, %171 : vector<1x1024xi32>
    %173 = arith.andi %168, %172 : vector<1x1024xi1>
    %174 = arith.extui %173 : vector<1x1024xi1> to vector<1x1024xi32>
    %175 = arith.sitofp %174 : vector<1x1024xi32> to vector<1x1024xf32>
    %176 = vector.broadcast %175 : vector<1x1024xf32> to vector<3x1024xf32>
    %177 = arith.mulf %154, %176 : vector<3x1024xf32>
    %c6 = arith.constant 6 : index
    %c0_69 = arith.constant 0 : index
    %c0_70 = arith.constant 0 : index
    %178 = vector.load %arg2[%c6, %c0_69, %c0_70] : memref<9x8x3xf32, #tpu.memory_space<vmem>>, vector<1x8x3xf32>
    %179 = vector.shape_cast %178 : vector<1x8x3xf32> to vector<8x3xf32>
    %cst_71 = arith.constant dense<0.000000e+00> : vector<8x1024xf32>
    %180 = tpu.matmul %179, %177, %cst_71 {dimension_numbers = #tpu.dot_dimension_numbers<[1], [0], [0], [1], [0, 0, 1, 1], [], []>} : vector<8x3xf32>, vector<3x1024xf32>, vector<8x1024xf32> -> vector<8x1024xf32>
    %181 = arith.addf %153, %180 : vector<8x1024xf32>
    %c992_i32 = arith.constant 992 : i32
    %182 = tpu.dynamic_rotate %2 by %c992_i32 dim 1 : vector<3x1024xf32>, i32 -> vector<3x1024xf32>
    %c1_i32_72 = arith.constant 1 : i32
    %183 = vector.broadcast %c1_i32_72 : i32 to vector<1x1024xi32>
    %184 = arith.addi %4, %183 : vector<1x1024xi32>
    %c0_i32_73 = arith.constant 0 : i32
    %185 = vector.broadcast %c0_i32_73 : i32 to vector<1x1024xi32>
    %186 = arith.cmpi sge, %184, %185 : vector<1x1024xi32>
    %c1_i32_74 = arith.constant 1 : i32
    %187 = vector.broadcast %c1_i32_74 : i32 to vector<1x1024xi32>
    %188 = arith.addi %4, %187 : vector<1x1024xi32>
    %c32_i32_75 = arith.constant 32 : i32
    %189 = vector.broadcast %c32_i32_75 : i32 to vector<1x1024xi32>
    %190 = arith.cmpi slt, %188, %189 : vector<1x1024xi32>
    %191 = arith.andi %186, %190 : vector<1x1024xi1>
    %c0_i32_76 = arith.constant 0 : i32
    %192 = vector.broadcast %c0_i32_76 : i32 to vector<1x1024xi32>
    %193 = arith.addi %8, %192 : vector<1x1024xi32>
    %c0_i32_77 = arith.constant 0 : i32
    %194 = vector.broadcast %c0_i32_77 : i32 to vector<1x1024xi32>
    %195 = arith.cmpi sge, %193, %194 : vector<1x1024xi32>
    %196 = arith.andi %191, %195 : vector<1x1024xi1>
    %c0_i32_78 = arith.constant 0 : i32
    %197 = vector.broadcast %c0_i32_78 : i32 to vector<1x1024xi32>
    %198 = arith.addi %8, %197 : vector<1x1024xi32>
    %c32_i32_79 = arith.constant 32 : i32
    %199 = vector.broadcast %c32_i32_79 : i32 to vector<1x1024xi32>
    %200 = arith.cmpi slt, %198, %199 : vector<1x1024xi32>
    %201 = arith.andi %196, %200 : vector<1x1024xi1>
    %202 = arith.extui %201 : vector<1x1024xi1> to vector<1x1024xi32>
    %203 = arith.sitofp %202 : vector<1x1024xi32> to vector<1x1024xf32>
    %204 = vector.broadcast %203 : vector<1x1024xf32> to vector<3x1024xf32>
    %205 = arith.mulf %182, %204 : vector<3x1024xf32>
    %c7 = arith.constant 7 : index
    %c0_80 = arith.constant 0 : index
    %c0_81 = arith.constant 0 : index
    %206 = vector.load %arg2[%c7, %c0_80, %c0_81] : memref<9x8x3xf32, #tpu.memory_space<vmem>>, vector<1x8x3xf32>
    %207 = vector.shape_cast %206 : vector<1x8x3xf32> to vector<8x3xf32>
    %cst_82 = arith.constant dense<0.000000e+00> : vector<8x1024xf32>
    %208 = tpu.matmul %207, %205, %cst_82 {dimension_numbers = #tpu.dot_dimension_numbers<[1], [0], [0], [1], [0, 0, 1, 1], [], []>} : vector<8x3xf32>, vector<3x1024xf32>, vector<8x1024xf32> -> vector<8x1024xf32>
    %209 = arith.addf %181, %208 : vector<8x1024xf32>
    %c991_i32 = arith.constant 991 : i32
    %210 = tpu.dynamic_rotate %2 by %c991_i32 dim 1 : vector<3x1024xf32>, i32 -> vector<3x1024xf32>
    %c1_i32_83 = arith.constant 1 : i32
    %211 = vector.broadcast %c1_i32_83 : i32 to vector<1x1024xi32>
    %212 = arith.addi %4, %211 : vector<1x1024xi32>
    %c0_i32_84 = arith.constant 0 : i32
    %213 = vector.broadcast %c0_i32_84 : i32 to vector<1x1024xi32>
    %214 = arith.cmpi sge, %212, %213 : vector<1x1024xi32>
    %c1_i32_85 = arith.constant 1 : i32
    %215 = vector.broadcast %c1_i32_85 : i32 to vector<1x1024xi32>
    %216 = arith.addi %4, %215 : vector<1x1024xi32>
    %c32_i32_86 = arith.constant 32 : i32
    %217 = vector.broadcast %c32_i32_86 : i32 to vector<1x1024xi32>
    %218 = arith.cmpi slt, %216, %217 : vector<1x1024xi32>
    %219 = arith.andi %214, %218 : vector<1x1024xi1>
    %c1_i32_87 = arith.constant 1 : i32
    %220 = vector.broadcast %c1_i32_87 : i32 to vector<1x1024xi32>
    %221 = arith.addi %8, %220 : vector<1x1024xi32>
    %c0_i32_88 = arith.constant 0 : i32
    %222 = vector.broadcast %c0_i32_88 : i32 to vector<1x1024xi32>
    %223 = arith.cmpi sge, %221, %222 : vector<1x1024xi32>
    %224 = arith.andi %219, %223 : vector<1x1024xi1>
    %c1_i32_89 = arith.constant 1 : i32
    %225 = vector.broadcast %c1_i32_89 : i32 to vector<1x1024xi32>
    %226 = arith.addi %8, %225 : vector<1x1024xi32>
    %c32_i32_90 = arith.constant 32 : i32
    %227 = vector.broadcast %c32_i32_90 : i32 to vector<1x1024xi32>
    %228 = arith.cmpi slt, %226, %227 : vector<1x1024xi32>
    %229 = arith.andi %224, %228 : vector<1x1024xi1>
    %230 = arith.extui %229 : vector<1x1024xi1> to vector<1x1024xi32>
    %231 = arith.sitofp %230 : vector<1x1024xi32> to vector<1x1024xf32>
    %232 = vector.broadcast %231 : vector<1x1024xf32> to vector<3x1024xf32>
    %233 = arith.mulf %210, %232 : vector<3x1024xf32>
    %c8 = arith.constant 8 : index
    %c0_91 = arith.constant 0 : index
    %c0_92 = arith.constant 0 : index
    %234 = vector.load %arg2[%c8, %c0_91, %c0_92] : memref<9x8x3xf32, #tpu.memory_space<vmem>>, vector<1x8x3xf32>
    %235 = vector.shape_cast %234 : vector<1x8x3xf32> to vector<8x3xf32>
    %cst_93 = arith.constant dense<0.000000e+00> : vector<8x1024xf32>
    %236 = tpu.matmul %235, %233, %cst_93 {dimension_numbers = #tpu.dot_dimension_numbers<[1], [0], [0], [1], [0, 0, 1, 1], [], []>} : vector<8x3xf32>, vector<3x1024xf32>, vector<8x1024xf32> -> vector<8x1024xf32>
    %237 = arith.addf %209, %236 : vector<8x1024xf32>
    %c0_94 = arith.constant 0 : index
    %c0_95 = arith.constant 0 : index
    %238 = vector.load %arg3[%c0_94, %c0_95] : memref<8x1xf32, #tpu.memory_space<vmem>>, vector<8x1xf32>
    %239 = vector.broadcast %238 : vector<8x1xf32> to vector<8x1024xf32>
    %240 = arith.addf %237, %239 : vector<8x1024xf32>
    %c1023_i32_96 = arith.constant 1023 : i32
    %241 = tpu.dynamic_rotate %240 by %c1023_i32_96 dim 1 : vector<8x1024xf32>, i32 -> vector<8x1024xf32>
    %242 = arith.maximumf %240, %241 : vector<8x1024xf32>
    %c992_i32_97 = arith.constant 992 : i32
    %243 = tpu.dynamic_rotate %242 by %c992_i32_97 dim 1 : vector<8x1024xf32>, i32 -> vector<8x1024xf32>
    %244 = arith.maximumf %242, %243 : vector<8x1024xf32>
    %cst_98 = arith.constant 0.000000e+00 : f32
    %245 = vector.broadcast %cst_98 : f32 to vector<8x1024xf32>
    %246 = arith.maximumf %244, %245 : vector<8x1024xf32>
    %c6_i32 = arith.constant 6 : i32
    %247 = vector.broadcast %c6_i32 : i32 to vector<1x1024xi32>
    %248 = arith.shrsi %0, %247 : vector<1x1024xi32>
    %c1_i32_99 = arith.constant 1 : i32
    %249 = vector.broadcast %c1_i32_99 : i32 to vector<1x1024xi32>
    %250 = arith.shrsi %0, %249 : vector<1x1024xi32>
    %c31_i32_100 = arith.constant 31 : i32
    %251 = vector.broadcast %c31_i32_100 : i32 to vector<1x1024xi32>
    %252 = arith.andi %250, %251 : vector<1x1024xi32>
    %cst_101 = arith.constant 0.000000e+00 : f32
    %253 = vector.broadcast %cst_101 : f32 to vector<16x1024xf32>
    %c66_i32 = arith.constant 66 : i32
    %254 = tpu.dynamic_rotate %246 by %c66_i32 dim 1 : vector<8x1024xf32>, i32 -> vector<8x1024xf32>
    %c-1_i32_102 = arith.constant -1 : i32
    %255 = vector.broadcast %c-1_i32_102 : i32 to vector<1x1024xi32>
    %256 = arith.addi %248, %255 : vector<1x1024xi32>
    %c0_i32_103 = arith.constant 0 : i32
    %257 = vector.broadcast %c0_i32_103 : i32 to vector<1x1024xi32>
    %258 = arith.cmpi sge, %256, %257 : vector<1x1024xi32>
    %c-1_i32_104 = arith.constant -1 : i32
    %259 = vector.broadcast %c-1_i32_104 : i32 to vector<1x1024xi32>
    %260 = arith.addi %248, %259 : vector<1x1024xi32>
    %c16_i32 = arith.constant 16 : i32
    %261 = vector.broadcast %c16_i32 : i32 to vector<1x1024xi32>
    %262 = arith.cmpi slt, %260, %261 : vector<1x1024xi32>
    %263 = arith.andi %258, %262 : vector<1x1024xi1>
    %c-1_i32_105 = arith.constant -1 : i32
    %264 = vector.broadcast %c-1_i32_105 : i32 to vector<1x1024xi32>
    %265 = arith.addi %252, %264 : vector<1x1024xi32>
    %c0_i32_106 = arith.constant 0 : i32
    %266 = vector.broadcast %c0_i32_106 : i32 to vector<1x1024xi32>
    %267 = arith.cmpi sge, %265, %266 : vector<1x1024xi32>
    %268 = arith.andi %263, %267 : vector<1x1024xi1>
    %c-1_i32_107 = arith.constant -1 : i32
    %269 = vector.broadcast %c-1_i32_107 : i32 to vector<1x1024xi32>
    %270 = arith.addi %252, %269 : vector<1x1024xi32>
    %c16_i32_108 = arith.constant 16 : i32
    %271 = vector.broadcast %c16_i32_108 : i32 to vector<1x1024xi32>
    %272 = arith.cmpi slt, %270, %271 : vector<1x1024xi32>
    %273 = arith.andi %268, %272 : vector<1x1024xi1>
    %274 = arith.extui %273 : vector<1x1024xi1> to vector<1x1024xi32>
    %275 = arith.sitofp %274 : vector<1x1024xi32> to vector<1x1024xf32>
    %276 = vector.broadcast %275 : vector<1x1024xf32> to vector<8x1024xf32>
    %277 = arith.mulf %254, %276 : vector<8x1024xf32>
    %c0_109 = arith.constant 0 : index
    %c0_110 = arith.constant 0 : index
    %c0_111 = arith.constant 0 : index
    %278 = vector.load %arg4[%c0_109, %c0_110, %c0_111] : memref<9x16x8xf32, #tpu.memory_space<vmem>>, vector<1x16x8xf32>
    %279 = vector.shape_cast %278 : vector<1x16x8xf32> to vector<16x8xf32>
    %cst_112 = arith.constant dense<0.000000e+00> : vector<16x1024xf32>
    %280 = tpu.matmul %279, %277, %cst_112 {dimension_numbers = #tpu.dot_dimension_numbers<[1], [0], [0], [1], [0, 0, 1, 1], [], []>} : vector<16x8xf32>, vector<8x1024xf32>, vector<16x1024xf32> -> vector<16x1024xf32>
    %281 = arith.addf %253, %280 : vector<16x1024xf32>
    %c64_i32 = arith.constant 64 : i32
    %282 = tpu.dynamic_rotate %246 by %c64_i32 dim 1 : vector<8x1024xf32>, i32 -> vector<8x1024xf32>
    %c-1_i32_113 = arith.constant -1 : i32
    %283 = vector.broadcast %c-1_i32_113 : i32 to vector<1x1024xi32>
    %284 = arith.addi %248, %283 : vector<1x1024xi32>
    %c0_i32_114 = arith.constant 0 : i32
    %285 = vector.broadcast %c0_i32_114 : i32 to vector<1x1024xi32>
    %286 = arith.cmpi sge, %284, %285 : vector<1x1024xi32>
    %c-1_i32_115 = arith.constant -1 : i32
    %287 = vector.broadcast %c-1_i32_115 : i32 to vector<1x1024xi32>
    %288 = arith.addi %248, %287 : vector<1x1024xi32>
    %c16_i32_116 = arith.constant 16 : i32
    %289 = vector.broadcast %c16_i32_116 : i32 to vector<1x1024xi32>
    %290 = arith.cmpi slt, %288, %289 : vector<1x1024xi32>
    %291 = arith.andi %286, %290 : vector<1x1024xi1>
    %c0_i32_117 = arith.constant 0 : i32
    %292 = vector.broadcast %c0_i32_117 : i32 to vector<1x1024xi32>
    %293 = arith.addi %252, %292 : vector<1x1024xi32>
    %c0_i32_118 = arith.constant 0 : i32
    %294 = vector.broadcast %c0_i32_118 : i32 to vector<1x1024xi32>
    %295 = arith.cmpi sge, %293, %294 : vector<1x1024xi32>
    %296 = arith.andi %291, %295 : vector<1x1024xi1>
    %c0_i32_119 = arith.constant 0 : i32
    %297 = vector.broadcast %c0_i32_119 : i32 to vector<1x1024xi32>
    %298 = arith.addi %252, %297 : vector<1x1024xi32>
    %c16_i32_120 = arith.constant 16 : i32
    %299 = vector.broadcast %c16_i32_120 : i32 to vector<1x1024xi32>
    %300 = arith.cmpi slt, %298, %299 : vector<1x1024xi32>
    %301 = arith.andi %296, %300 : vector<1x1024xi1>
    %302 = arith.extui %301 : vector<1x1024xi1> to vector<1x1024xi32>
    %303 = arith.sitofp %302 : vector<1x1024xi32> to vector<1x1024xf32>
    %304 = vector.broadcast %303 : vector<1x1024xf32> to vector<8x1024xf32>
    %305 = arith.mulf %282, %304 : vector<8x1024xf32>
    %c1_121 = arith.constant 1 : index
    %c0_122 = arith.constant 0 : index
    %c0_123 = arith.constant 0 : index
    %306 = vector.load %arg4[%c1_121, %c0_122, %c0_123] : memref<9x16x8xf32, #tpu.memory_space<vmem>>, vector<1x16x8xf32>
    %307 = vector.shape_cast %306 : vector<1x16x8xf32> to vector<16x8xf32>
    %cst_124 = arith.constant dense<0.000000e+00> : vector<16x1024xf32>
    %308 = tpu.matmul %307, %305, %cst_124 {dimension_numbers = #tpu.dot_dimension_numbers<[1], [0], [0], [1], [0, 0, 1, 1], [], []>} : vector<16x8xf32>, vector<8x1024xf32>, vector<16x1024xf32> -> vector<16x1024xf32>
    %309 = arith.addf %281, %308 : vector<16x1024xf32>
    %c62_i32 = arith.constant 62 : i32
    %310 = tpu.dynamic_rotate %246 by %c62_i32 dim 1 : vector<8x1024xf32>, i32 -> vector<8x1024xf32>
    %c-1_i32_125 = arith.constant -1 : i32
    %311 = vector.broadcast %c-1_i32_125 : i32 to vector<1x1024xi32>
    %312 = arith.addi %248, %311 : vector<1x1024xi32>
    %c0_i32_126 = arith.constant 0 : i32
    %313 = vector.broadcast %c0_i32_126 : i32 to vector<1x1024xi32>
    %314 = arith.cmpi sge, %312, %313 : vector<1x1024xi32>
    %c-1_i32_127 = arith.constant -1 : i32
    %315 = vector.broadcast %c-1_i32_127 : i32 to vector<1x1024xi32>
    %316 = arith.addi %248, %315 : vector<1x1024xi32>
    %c16_i32_128 = arith.constant 16 : i32
    %317 = vector.broadcast %c16_i32_128 : i32 to vector<1x1024xi32>
    %318 = arith.cmpi slt, %316, %317 : vector<1x1024xi32>
    %319 = arith.andi %314, %318 : vector<1x1024xi1>
    %c1_i32_129 = arith.constant 1 : i32
    %320 = vector.broadcast %c1_i32_129 : i32 to vector<1x1024xi32>
    %321 = arith.addi %252, %320 : vector<1x1024xi32>
    %c0_i32_130 = arith.constant 0 : i32
    %322 = vector.broadcast %c0_i32_130 : i32 to vector<1x1024xi32>
    %323 = arith.cmpi sge, %321, %322 : vector<1x1024xi32>
    %324 = arith.andi %319, %323 : vector<1x1024xi1>
    %c1_i32_131 = arith.constant 1 : i32
    %325 = vector.broadcast %c1_i32_131 : i32 to vector<1x1024xi32>
    %326 = arith.addi %252, %325 : vector<1x1024xi32>
    %c16_i32_132 = arith.constant 16 : i32
    %327 = vector.broadcast %c16_i32_132 : i32 to vector<1x1024xi32>
    %328 = arith.cmpi slt, %326, %327 : vector<1x1024xi32>
    %329 = arith.andi %324, %328 : vector<1x1024xi1>
    %330 = arith.extui %329 : vector<1x1024xi1> to vector<1x1024xi32>
    %331 = arith.sitofp %330 : vector<1x1024xi32> to vector<1x1024xf32>
    %332 = vector.broadcast %331 : vector<1x1024xf32> to vector<8x1024xf32>
    %333 = arith.mulf %310, %332 : vector<8x1024xf32>
    %c2_133 = arith.constant 2 : index
    %c0_134 = arith.constant 0 : index
    %c0_135 = arith.constant 0 : index
    %334 = vector.load %arg4[%c2_133, %c0_134, %c0_135] : memref<9x16x8xf32, #tpu.memory_space<vmem>>, vector<1x16x8xf32>
    %335 = vector.shape_cast %334 : vector<1x16x8xf32> to vector<16x8xf32>
    %cst_136 = arith.constant dense<0.000000e+00> : vector<16x1024xf32>
    %336 = tpu.matmul %335, %333, %cst_136 {dimension_numbers = #tpu.dot_dimension_numbers<[1], [0], [0], [1], [0, 0, 1, 1], [], []>} : vector<16x8xf32>, vector<8x1024xf32>, vector<16x1024xf32> -> vector<16x1024xf32>
    %337 = arith.addf %309, %336 : vector<16x1024xf32>
    %c2_i32 = arith.constant 2 : i32
    %338 = tpu.dynamic_rotate %246 by %c2_i32 dim 1 : vector<8x1024xf32>, i32 -> vector<8x1024xf32>
    %c0_i32_137 = arith.constant 0 : i32
    %339 = vector.broadcast %c0_i32_137 : i32 to vector<1x1024xi32>
    %340 = arith.addi %248, %339 : vector<1x1024xi32>
    %c0_i32_138 = arith.constant 0 : i32
    %341 = vector.broadcast %c0_i32_138 : i32 to vector<1x1024xi32>
    %342 = arith.cmpi sge, %340, %341 : vector<1x1024xi32>
    %c0_i32_139 = arith.constant 0 : i32
    %343 = vector.broadcast %c0_i32_139 : i32 to vector<1x1024xi32>
    %344 = arith.addi %248, %343 : vector<1x1024xi32>
    %c16_i32_140 = arith.constant 16 : i32
    %345 = vector.broadcast %c16_i32_140 : i32 to vector<1x1024xi32>
    %346 = arith.cmpi slt, %344, %345 : vector<1x1024xi32>
    %347 = arith.andi %342, %346 : vector<1x1024xi1>
    %c-1_i32_141 = arith.constant -1 : i32
    %348 = vector.broadcast %c-1_i32_141 : i32 to vector<1x1024xi32>
    %349 = arith.addi %252, %348 : vector<1x1024xi32>
    %c0_i32_142 = arith.constant 0 : i32
    %350 = vector.broadcast %c0_i32_142 : i32 to vector<1x1024xi32>
    %351 = arith.cmpi sge, %349, %350 : vector<1x1024xi32>
    %352 = arith.andi %347, %351 : vector<1x1024xi1>
    %c-1_i32_143 = arith.constant -1 : i32
    %353 = vector.broadcast %c-1_i32_143 : i32 to vector<1x1024xi32>
    %354 = arith.addi %252, %353 : vector<1x1024xi32>
    %c16_i32_144 = arith.constant 16 : i32
    %355 = vector.broadcast %c16_i32_144 : i32 to vector<1x1024xi32>
    %356 = arith.cmpi slt, %354, %355 : vector<1x1024xi32>
    %357 = arith.andi %352, %356 : vector<1x1024xi1>
    %358 = arith.extui %357 : vector<1x1024xi1> to vector<1x1024xi32>
    %359 = arith.sitofp %358 : vector<1x1024xi32> to vector<1x1024xf32>
    %360 = vector.broadcast %359 : vector<1x1024xf32> to vector<8x1024xf32>
    %361 = arith.mulf %338, %360 : vector<8x1024xf32>
    %c3_145 = arith.constant 3 : index
    %c0_146 = arith.constant 0 : index
    %c0_147 = arith.constant 0 : index
    %362 = vector.load %arg4[%c3_145, %c0_146, %c0_147] : memref<9x16x8xf32, #tpu.memory_space<vmem>>, vector<1x16x8xf32>
    %363 = vector.shape_cast %362 : vector<1x16x8xf32> to vector<16x8xf32>
    %cst_148 = arith.constant dense<0.000000e+00> : vector<16x1024xf32>
    %364 = tpu.matmul %363, %361, %cst_148 {dimension_numbers = #tpu.dot_dimension_numbers<[1], [0], [0], [1], [0, 0, 1, 1], [], []>} : vector<16x8xf32>, vector<8x1024xf32>, vector<16x1024xf32> -> vector<16x1024xf32>
    %365 = arith.addf %337, %364 : vector<16x1024xf32>
    %c4_149 = arith.constant 4 : index
    %c0_150 = arith.constant 0 : index
    %c0_151 = arith.constant 0 : index
    %366 = vector.load %arg4[%c4_149, %c0_150, %c0_151] : memref<9x16x8xf32, #tpu.memory_space<vmem>>, vector<1x16x8xf32>
    %367 = vector.shape_cast %366 : vector<1x16x8xf32> to vector<16x8xf32>
    %cst_152 = arith.constant dense<0.000000e+00> : vector<16x1024xf32>
    %368 = tpu.matmul %367, %246, %cst_152 {dimension_numbers = #tpu.dot_dimension_numbers<[1], [0], [0], [1], [0, 0, 1, 1], [], []>} : vector<16x8xf32>, vector<8x1024xf32>, vector<16x1024xf32> -> vector<16x1024xf32>
    %369 = arith.addf %365, %368 : vector<16x1024xf32>
    %c1022_i32 = arith.constant 1022 : i32
    %370 = tpu.dynamic_rotate %246 by %c1022_i32 dim 1 : vector<8x1024xf32>, i32 -> vector<8x1024xf32>
    %c0_i32_153 = arith.constant 0 : i32
    %371 = vector.broadcast %c0_i32_153 : i32 to vector<1x1024xi32>
    %372 = arith.addi %248, %371 : vector<1x1024xi32>
    %c0_i32_154 = arith.constant 0 : i32
    %373 = vector.broadcast %c0_i32_154 : i32 to vector<1x1024xi32>
    %374 = arith.cmpi sge, %372, %373 : vector<1x1024xi32>
    %c0_i32_155 = arith.constant 0 : i32
    %375 = vector.broadcast %c0_i32_155 : i32 to vector<1x1024xi32>
    %376 = arith.addi %248, %375 : vector<1x1024xi32>
    %c16_i32_156 = arith.constant 16 : i32
    %377 = vector.broadcast %c16_i32_156 : i32 to vector<1x1024xi32>
    %378 = arith.cmpi slt, %376, %377 : vector<1x1024xi32>
    %379 = arith.andi %374, %378 : vector<1x1024xi1>
    %c1_i32_157 = arith.constant 1 : i32
    %380 = vector.broadcast %c1_i32_157 : i32 to vector<1x1024xi32>
    %381 = arith.addi %252, %380 : vector<1x1024xi32>
    %c0_i32_158 = arith.constant 0 : i32
    %382 = vector.broadcast %c0_i32_158 : i32 to vector<1x1024xi32>
    %383 = arith.cmpi sge, %381, %382 : vector<1x1024xi32>
    %384 = arith.andi %379, %383 : vector<1x1024xi1>
    %c1_i32_159 = arith.constant 1 : i32
    %385 = vector.broadcast %c1_i32_159 : i32 to vector<1x1024xi32>
    %386 = arith.addi %252, %385 : vector<1x1024xi32>
    %c16_i32_160 = arith.constant 16 : i32
    %387 = vector.broadcast %c16_i32_160 : i32 to vector<1x1024xi32>
    %388 = arith.cmpi slt, %386, %387 : vector<1x1024xi32>
    %389 = arith.andi %384, %388 : vector<1x1024xi1>
    %390 = arith.extui %389 : vector<1x1024xi1> to vector<1x1024xi32>
    %391 = arith.sitofp %390 : vector<1x1024xi32> to vector<1x1024xf32>
    %392 = vector.broadcast %391 : vector<1x1024xf32> to vector<8x1024xf32>
    %393 = arith.mulf %370, %392 : vector<8x1024xf32>
    %c5_161 = arith.constant 5 : index
    %c0_162 = arith.constant 0 : index
    %c0_163 = arith.constant 0 : index
    %394 = vector.load %arg4[%c5_161, %c0_162, %c0_163] : memref<9x16x8xf32, #tpu.memory_space<vmem>>, vector<1x16x8xf32>
    %395 = vector.shape_cast %394 : vector<1x16x8xf32> to vector<16x8xf32>
    %cst_164 = arith.constant dense<0.000000e+00> : vector<16x1024xf32>
    %396 = tpu.matmul %395, %393, %cst_164 {dimension_numbers = #tpu.dot_dimension_numbers<[1], [0], [0], [1], [0, 0, 1, 1], [], []>} : vector<16x8xf32>, vector<8x1024xf32>, vector<16x1024xf32> -> vector<16x1024xf32>
    %397 = arith.addf %369, %396 : vector<16x1024xf32>
    %c962_i32 = arith.constant 962 : i32
    %398 = tpu.dynamic_rotate %246 by %c962_i32 dim 1 : vector<8x1024xf32>, i32 -> vector<8x1024xf32>
    %c1_i32_165 = arith.constant 1 : i32
    %399 = vector.broadcast %c1_i32_165 : i32 to vector<1x1024xi32>
    %400 = arith.addi %248, %399 : vector<1x1024xi32>
    %c0_i32_166 = arith.constant 0 : i32
    %401 = vector.broadcast %c0_i32_166 : i32 to vector<1x1024xi32>
    %402 = arith.cmpi sge, %400, %401 : vector<1x1024xi32>
    %c1_i32_167 = arith.constant 1 : i32
    %403 = vector.broadcast %c1_i32_167 : i32 to vector<1x1024xi32>
    %404 = arith.addi %248, %403 : vector<1x1024xi32>
    %c16_i32_168 = arith.constant 16 : i32
    %405 = vector.broadcast %c16_i32_168 : i32 to vector<1x1024xi32>
    %406 = arith.cmpi slt, %404, %405 : vector<1x1024xi32>
    %407 = arith.andi %402, %406 : vector<1x1024xi1>
    %c-1_i32_169 = arith.constant -1 : i32
    %408 = vector.broadcast %c-1_i32_169 : i32 to vector<1x1024xi32>
    %409 = arith.addi %252, %408 : vector<1x1024xi32>
    %c0_i32_170 = arith.constant 0 : i32
    %410 = vector.broadcast %c0_i32_170 : i32 to vector<1x1024xi32>
    %411 = arith.cmpi sge, %409, %410 : vector<1x1024xi32>
    %412 = arith.andi %407, %411 : vector<1x1024xi1>
    %c-1_i32_171 = arith.constant -1 : i32
    %413 = vector.broadcast %c-1_i32_171 : i32 to vector<1x1024xi32>
    %414 = arith.addi %252, %413 : vector<1x1024xi32>
    %c16_i32_172 = arith.constant 16 : i32
    %415 = vector.broadcast %c16_i32_172 : i32 to vector<1x1024xi32>
    %416 = arith.cmpi slt, %414, %415 : vector<1x1024xi32>
    %417 = arith.andi %412, %416 : vector<1x1024xi1>
    %418 = arith.extui %417 : vector<1x1024xi1> to vector<1x1024xi32>
    %419 = arith.sitofp %418 : vector<1x1024xi32> to vector<1x1024xf32>
    %420 = vector.broadcast %419 : vector<1x1024xf32> to vector<8x1024xf32>
    %421 = arith.mulf %398, %420 : vector<8x1024xf32>
    %c6_173 = arith.constant 6 : index
    %c0_174 = arith.constant 0 : index
    %c0_175 = arith.constant 0 : index
    %422 = vector.load %arg4[%c6_173, %c0_174, %c0_175] : memref<9x16x8xf32, #tpu.memory_space<vmem>>, vector<1x16x8xf32>
    %423 = vector.shape_cast %422 : vector<1x16x8xf32> to vector<16x8xf32>
    %cst_176 = arith.constant dense<0.000000e+00> : vector<16x1024xf32>
    %424 = tpu.matmul %423, %421, %cst_176 {dimension_numbers = #tpu.dot_dimension_numbers<[1], [0], [0], [1], [0, 0, 1, 1], [], []>} : vector<16x8xf32>, vector<8x1024xf32>, vector<16x1024xf32> -> vector<16x1024xf32>
    %425 = arith.addf %397, %424 : vector<16x1024xf32>
    %c960_i32 = arith.constant 960 : i32
    %426 = tpu.dynamic_rotate %246 by %c960_i32 dim 1 : vector<8x1024xf32>, i32 -> vector<8x1024xf32>
    %c1_i32_177 = arith.constant 1 : i32
    %427 = vector.broadcast %c1_i32_177 : i32 to vector<1x1024xi32>
    %428 = arith.addi %248, %427 : vector<1x1024xi32>
    %c0_i32_178 = arith.constant 0 : i32
    %429 = vector.broadcast %c0_i32_178 : i32 to vector<1x1024xi32>
    %430 = arith.cmpi sge, %428, %429 : vector<1x1024xi32>
    %c1_i32_179 = arith.constant 1 : i32
    %431 = vector.broadcast %c1_i32_179 : i32 to vector<1x1024xi32>
    %432 = arith.addi %248, %431 : vector<1x1024xi32>
    %c16_i32_180 = arith.constant 16 : i32
    %433 = vector.broadcast %c16_i32_180 : i32 to vector<1x1024xi32>
    %434 = arith.cmpi slt, %432, %433 : vector<1x1024xi32>
    %435 = arith.andi %430, %434 : vector<1x1024xi1>
    %c0_i32_181 = arith.constant 0 : i32
    %436 = vector.broadcast %c0_i32_181 : i32 to vector<1x1024xi32>
    %437 = arith.addi %252, %436 : vector<1x1024xi32>
    %c0_i32_182 = arith.constant 0 : i32
    %438 = vector.broadcast %c0_i32_182 : i32 to vector<1x1024xi32>
    %439 = arith.cmpi sge, %437, %438 : vector<1x1024xi32>
    %440 = arith.andi %435, %439 : vector<1x1024xi1>
    %c0_i32_183 = arith.constant 0 : i32
    %441 = vector.broadcast %c0_i32_183 : i32 to vector<1x1024xi32>
    %442 = arith.addi %252, %441 : vector<1x1024xi32>
    %c16_i32_184 = arith.constant 16 : i32
    %443 = vector.broadcast %c16_i32_184 : i32 to vector<1x1024xi32>
    %444 = arith.cmpi slt, %442, %443 : vector<1x1024xi32>
    %445 = arith.andi %440, %444 : vector<1x1024xi1>
    %446 = arith.extui %445 : vector<1x1024xi1> to vector<1x1024xi32>
    %447 = arith.sitofp %446 : vector<1x1024xi32> to vector<1x1024xf32>
    %448 = vector.broadcast %447 : vector<1x1024xf32> to vector<8x1024xf32>
    %449 = arith.mulf %426, %448 : vector<8x1024xf32>
    %c7_185 = arith.constant 7 : index
    %c0_186 = arith.constant 0 : index
    %c0_187 = arith.constant 0 : index
    %450 = vector.load %arg4[%c7_185, %c0_186, %c0_187] : memref<9x16x8xf32, #tpu.memory_space<vmem>>, vector<1x16x8xf32>
    %451 = vector.shape_cast %450 : vector<1x16x8xf32> to vector<16x8xf32>
    %cst_188 = arith.constant dense<0.000000e+00> : vector<16x1024xf32>
    %452 = tpu.matmul %451, %449, %cst_188 {dimension_numbers = #tpu.dot_dimension_numbers<[1], [0], [0], [1], [0, 0, 1, 1], [], []>} : vector<16x8xf32>, vector<8x1024xf32>, vector<16x1024xf32> -> vector<16x1024xf32>
    %453 = arith.addf %425, %452 : vector<16x1024xf32>
    %c958_i32 = arith.constant 958 : i32
    %454 = tpu.dynamic_rotate %246 by %c958_i32 dim 1 : vector<8x1024xf32>, i32 -> vector<8x1024xf32>
    %c1_i32_189 = arith.constant 1 : i32
    %455 = vector.broadcast %c1_i32_189 : i32 to vector<1x1024xi32>
    %456 = arith.addi %248, %455 : vector<1x1024xi32>
    %c0_i32_190 = arith.constant 0 : i32
    %457 = vector.broadcast %c0_i32_190 : i32 to vector<1x1024xi32>
    %458 = arith.cmpi sge, %456, %457 : vector<1x1024xi32>
    %c1_i32_191 = arith.constant 1 : i32
    %459 = vector.broadcast %c1_i32_191 : i32 to vector<1x1024xi32>
    %460 = arith.addi %248, %459 : vector<1x1024xi32>
    %c16_i32_192 = arith.constant 16 : i32
    %461 = vector.broadcast %c16_i32_192 : i32 to vector<1x1024xi32>
    %462 = arith.cmpi slt, %460, %461 : vector<1x1024xi32>
    %463 = arith.andi %458, %462 : vector<1x1024xi1>
    %c1_i32_193 = arith.constant 1 : i32
    %464 = vector.broadcast %c1_i32_193 : i32 to vector<1x1024xi32>
    %465 = arith.addi %252, %464 : vector<1x1024xi32>
    %c0_i32_194 = arith.constant 0 : i32
    %466 = vector.broadcast %c0_i32_194 : i32 to vector<1x1024xi32>
    %467 = arith.cmpi sge, %465, %466 : vector<1x1024xi32>
    %468 = arith.andi %463, %467 : vector<1x1024xi1>
    %c1_i32_195 = arith.constant 1 : i32
    %469 = vector.broadcast %c1_i32_195 : i32 to vector<1x1024xi32>
    %470 = arith.addi %252, %469 : vector<1x1024xi32>
    %c16_i32_196 = arith.constant 16 : i32
    %471 = vector.broadcast %c16_i32_196 : i32 to vector<1x1024xi32>
    %472 = arith.cmpi slt, %470, %471 : vector<1x1024xi32>
    %473 = arith.andi %468, %472 : vector<1x1024xi1>
    %474 = arith.extui %473 : vector<1x1024xi1> to vector<1x1024xi32>
    %475 = arith.sitofp %474 : vector<1x1024xi32> to vector<1x1024xf32>
    %476 = vector.broadcast %475 : vector<1x1024xf32> to vector<8x1024xf32>
    %477 = arith.mulf %454, %476 : vector<8x1024xf32>
    %c8_197 = arith.constant 8 : index
    %c0_198 = arith.constant 0 : index
    %c0_199 = arith.constant 0 : index
    %478 = vector.load %arg4[%c8_197, %c0_198, %c0_199] : memref<9x16x8xf32, #tpu.memory_space<vmem>>, vector<1x16x8xf32>
    %479 = vector.shape_cast %478 : vector<1x16x8xf32> to vector<16x8xf32>
    %cst_200 = arith.constant dense<0.000000e+00> : vector<16x1024xf32>
    %480 = tpu.matmul %479, %477, %cst_200 {dimension_numbers = #tpu.dot_dimension_numbers<[1], [0], [0], [1], [0, 0, 1, 1], [], []>} : vector<16x8xf32>, vector<8x1024xf32>, vector<16x1024xf32> -> vector<16x1024xf32>
    %481 = arith.addf %453, %480 : vector<16x1024xf32>
    %c0_201 = arith.constant 0 : index
    %c0_202 = arith.constant 0 : index
    %482 = vector.load %arg5[%c0_201, %c0_202] : memref<16x1xf32, #tpu.memory_space<vmem>>, vector<16x1xf32>
    %483 = vector.broadcast %482 : vector<16x1xf32> to vector<16x1024xf32>
    %484 = arith.addf %481, %483 : vector<16x1024xf32>
    %c1022_i32_203 = arith.constant 1022 : i32
    %485 = tpu.dynamic_rotate %484 by %c1022_i32_203 dim 1 : vector<16x1024xf32>, i32 -> vector<16x1024xf32>
    %486 = arith.maximumf %484, %485 : vector<16x1024xf32>
    %c960_i32_204 = arith.constant 960 : i32
    %487 = tpu.dynamic_rotate %486 by %c960_i32_204 dim 1 : vector<16x1024xf32>, i32 -> vector<16x1024xf32>
    %488 = arith.maximumf %486, %487 : vector<16x1024xf32>
    %cst_205 = arith.constant 0.000000e+00 : f32
    %489 = vector.broadcast %cst_205 : f32 to vector<16x1024xf32>
    %490 = arith.maximumf %488, %489 : vector<16x1024xf32>
    %c7_i32 = arith.constant 7 : i32
    %491 = vector.broadcast %c7_i32 : i32 to vector<1x1024xi32>
    %492 = arith.shrsi %0, %491 : vector<1x1024xi32>
    %c2_i32_206 = arith.constant 2 : i32
    %493 = vector.broadcast %c2_i32_206 : i32 to vector<1x1024xi32>
    %494 = arith.shrsi %0, %493 : vector<1x1024xi32>
    %c31_i32_207 = arith.constant 31 : i32
    %495 = vector.broadcast %c31_i32_207 : i32 to vector<1x1024xi32>
    %496 = arith.andi %494, %495 : vector<1x1024xi32>
    %cst_208 = arith.constant 0.000000e+00 : f32
    %497 = vector.broadcast %cst_208 : f32 to vector<24x1024xf32>
    %c132_i32 = arith.constant 132 : i32
    %498 = tpu.dynamic_rotate %490 by %c132_i32 dim 1 : vector<16x1024xf32>, i32 -> vector<16x1024xf32>
    %c-1_i32_209 = arith.constant -1 : i32
    %499 = vector.broadcast %c-1_i32_209 : i32 to vector<1x1024xi32>
    %500 = arith.addi %492, %499 : vector<1x1024xi32>
    %c0_i32_210 = arith.constant 0 : i32
    %501 = vector.broadcast %c0_i32_210 : i32 to vector<1x1024xi32>
    %502 = arith.cmpi sge, %500, %501 : vector<1x1024xi32>
    %c-1_i32_211 = arith.constant -1 : i32
    %503 = vector.broadcast %c-1_i32_211 : i32 to vector<1x1024xi32>
    %504 = arith.addi %492, %503 : vector<1x1024xi32>
    %c8_i32 = arith.constant 8 : i32
    %505 = vector.broadcast %c8_i32 : i32 to vector<1x1024xi32>
    %506 = arith.cmpi slt, %504, %505 : vector<1x1024xi32>
    %507 = arith.andi %502, %506 : vector<1x1024xi1>
    %c-1_i32_212 = arith.constant -1 : i32
    %508 = vector.broadcast %c-1_i32_212 : i32 to vector<1x1024xi32>
    %509 = arith.addi %496, %508 : vector<1x1024xi32>
    %c0_i32_213 = arith.constant 0 : i32
    %510 = vector.broadcast %c0_i32_213 : i32 to vector<1x1024xi32>
    %511 = arith.cmpi sge, %509, %510 : vector<1x1024xi32>
    %512 = arith.andi %507, %511 : vector<1x1024xi1>
    %c-1_i32_214 = arith.constant -1 : i32
    %513 = vector.broadcast %c-1_i32_214 : i32 to vector<1x1024xi32>
    %514 = arith.addi %496, %513 : vector<1x1024xi32>
    %c8_i32_215 = arith.constant 8 : i32
    %515 = vector.broadcast %c8_i32_215 : i32 to vector<1x1024xi32>
    %516 = arith.cmpi slt, %514, %515 : vector<1x1024xi32>
    %517 = arith.andi %512, %516 : vector<1x1024xi1>
    %518 = arith.extui %517 : vector<1x1024xi1> to vector<1x1024xi32>
    %519 = arith.sitofp %518 : vector<1x1024xi32> to vector<1x1024xf32>
    %520 = vector.broadcast %519 : vector<1x1024xf32> to vector<16x1024xf32>
    %521 = arith.mulf %498, %520 : vector<16x1024xf32>
    %c0_216 = arith.constant 0 : index
    %c0_217 = arith.constant 0 : index
    %c0_218 = arith.constant 0 : index
    %522 = vector.load %arg6[%c0_216, %c0_217, %c0_218] : memref<9x24x16xf32, #tpu.memory_space<vmem>>, vector<1x24x16xf32>
    %523 = vector.shape_cast %522 : vector<1x24x16xf32> to vector<24x16xf32>
    %cst_219 = arith.constant dense<0.000000e+00> : vector<24x1024xf32>
    %524 = tpu.matmul %523, %521, %cst_219 {dimension_numbers = #tpu.dot_dimension_numbers<[1], [0], [0], [1], [0, 0, 1, 1], [], []>} : vector<24x16xf32>, vector<16x1024xf32>, vector<24x1024xf32> -> vector<24x1024xf32>
    %525 = arith.addf %497, %524 : vector<24x1024xf32>
    %c128_i32 = arith.constant 128 : i32
    %526 = tpu.dynamic_rotate %490 by %c128_i32 dim 1 : vector<16x1024xf32>, i32 -> vector<16x1024xf32>
    %c-1_i32_220 = arith.constant -1 : i32
    %527 = vector.broadcast %c-1_i32_220 : i32 to vector<1x1024xi32>
    %528 = arith.addi %492, %527 : vector<1x1024xi32>
    %c0_i32_221 = arith.constant 0 : i32
    %529 = vector.broadcast %c0_i32_221 : i32 to vector<1x1024xi32>
    %530 = arith.cmpi sge, %528, %529 : vector<1x1024xi32>
    %c-1_i32_222 = arith.constant -1 : i32
    %531 = vector.broadcast %c-1_i32_222 : i32 to vector<1x1024xi32>
    %532 = arith.addi %492, %531 : vector<1x1024xi32>
    %c8_i32_223 = arith.constant 8 : i32
    %533 = vector.broadcast %c8_i32_223 : i32 to vector<1x1024xi32>
    %534 = arith.cmpi slt, %532, %533 : vector<1x1024xi32>
    %535 = arith.andi %530, %534 : vector<1x1024xi1>
    %c0_i32_224 = arith.constant 0 : i32
    %536 = vector.broadcast %c0_i32_224 : i32 to vector<1x1024xi32>
    %537 = arith.addi %496, %536 : vector<1x1024xi32>
    %c0_i32_225 = arith.constant 0 : i32
    %538 = vector.broadcast %c0_i32_225 : i32 to vector<1x1024xi32>
    %539 = arith.cmpi sge, %537, %538 : vector<1x1024xi32>
    %540 = arith.andi %535, %539 : vector<1x1024xi1>
    %c0_i32_226 = arith.constant 0 : i32
    %541 = vector.broadcast %c0_i32_226 : i32 to vector<1x1024xi32>
    %542 = arith.addi %496, %541 : vector<1x1024xi32>
    %c8_i32_227 = arith.constant 8 : i32
    %543 = vector.broadcast %c8_i32_227 : i32 to vector<1x1024xi32>
    %544 = arith.cmpi slt, %542, %543 : vector<1x1024xi32>
    %545 = arith.andi %540, %544 : vector<1x1024xi1>
    %546 = arith.extui %545 : vector<1x1024xi1> to vector<1x1024xi32>
    %547 = arith.sitofp %546 : vector<1x1024xi32> to vector<1x1024xf32>
    %548 = vector.broadcast %547 : vector<1x1024xf32> to vector<16x1024xf32>
    %549 = arith.mulf %526, %548 : vector<16x1024xf32>
    %c1_228 = arith.constant 1 : index
    %c0_229 = arith.constant 0 : index
    %c0_230 = arith.constant 0 : index
    %550 = vector.load %arg6[%c1_228, %c0_229, %c0_230] : memref<9x24x16xf32, #tpu.memory_space<vmem>>, vector<1x24x16xf32>
    %551 = vector.shape_cast %550 : vector<1x24x16xf32> to vector<24x16xf32>
    %cst_231 = arith.constant dense<0.000000e+00> : vector<24x1024xf32>
    %552 = tpu.matmul %551, %549, %cst_231 {dimension_numbers = #tpu.dot_dimension_numbers<[1], [0], [0], [1], [0, 0, 1, 1], [], []>} : vector<24x16xf32>, vector<16x1024xf32>, vector<24x1024xf32> -> vector<24x1024xf32>
    %553 = arith.addf %525, %552 : vector<24x1024xf32>
    %c124_i32 = arith.constant 124 : i32
    %554 = tpu.dynamic_rotate %490 by %c124_i32 dim 1 : vector<16x1024xf32>, i32 -> vector<16x1024xf32>
    %c-1_i32_232 = arith.constant -1 : i32
    %555 = vector.broadcast %c-1_i32_232 : i32 to vector<1x1024xi32>
    %556 = arith.addi %492, %555 : vector<1x1024xi32>
    %c0_i32_233 = arith.constant 0 : i32
    %557 = vector.broadcast %c0_i32_233 : i32 to vector<1x1024xi32>
    %558 = arith.cmpi sge, %556, %557 : vector<1x1024xi32>
    %c-1_i32_234 = arith.constant -1 : i32
    %559 = vector.broadcast %c-1_i32_234 : i32 to vector<1x1024xi32>
    %560 = arith.addi %492, %559 : vector<1x1024xi32>
    %c8_i32_235 = arith.constant 8 : i32
    %561 = vector.broadcast %c8_i32_235 : i32 to vector<1x1024xi32>
    %562 = arith.cmpi slt, %560, %561 : vector<1x1024xi32>
    %563 = arith.andi %558, %562 : vector<1x1024xi1>
    %c1_i32_236 = arith.constant 1 : i32
    %564 = vector.broadcast %c1_i32_236 : i32 to vector<1x1024xi32>
    %565 = arith.addi %496, %564 : vector<1x1024xi32>
    %c0_i32_237 = arith.constant 0 : i32
    %566 = vector.broadcast %c0_i32_237 : i32 to vector<1x1024xi32>
    %567 = arith.cmpi sge, %565, %566 : vector<1x1024xi32>
    %568 = arith.andi %563, %567 : vector<1x1024xi1>
    %c1_i32_238 = arith.constant 1 : i32
    %569 = vector.broadcast %c1_i32_238 : i32 to vector<1x1024xi32>
    %570 = arith.addi %496, %569 : vector<1x1024xi32>
    %c8_i32_239 = arith.constant 8 : i32
    %571 = vector.broadcast %c8_i32_239 : i32 to vector<1x1024xi32>
    %572 = arith.cmpi slt, %570, %571 : vector<1x1024xi32>
    %573 = arith.andi %568, %572 : vector<1x1024xi1>
    %574 = arith.extui %573 : vector<1x1024xi1> to vector<1x1024xi32>
    %575 = arith.sitofp %574 : vector<1x1024xi32> to vector<1x1024xf32>
    %576 = vector.broadcast %575 : vector<1x1024xf32> to vector<16x1024xf32>
    %577 = arith.mulf %554, %576 : vector<16x1024xf32>
    %c2_240 = arith.constant 2 : index
    %c0_241 = arith.constant 0 : index
    %c0_242 = arith.constant 0 : index
    %578 = vector.load %arg6[%c2_240, %c0_241, %c0_242] : memref<9x24x16xf32, #tpu.memory_space<vmem>>, vector<1x24x16xf32>
    %579 = vector.shape_cast %578 : vector<1x24x16xf32> to vector<24x16xf32>
    %cst_243 = arith.constant dense<0.000000e+00> : vector<24x1024xf32>
    %580 = tpu.matmul %579, %577, %cst_243 {dimension_numbers = #tpu.dot_dimension_numbers<[1], [0], [0], [1], [0, 0, 1, 1], [], []>} : vector<24x16xf32>, vector<16x1024xf32>, vector<24x1024xf32> -> vector<24x1024xf32>
    %581 = arith.addf %553, %580 : vector<24x1024xf32>
    %c4_i32 = arith.constant 4 : i32
    %582 = tpu.dynamic_rotate %490 by %c4_i32 dim 1 : vector<16x1024xf32>, i32 -> vector<16x1024xf32>
    %c0_i32_244 = arith.constant 0 : i32
    %583 = vector.broadcast %c0_i32_244 : i32 to vector<1x1024xi32>
    %584 = arith.addi %492, %583 : vector<1x1024xi32>
    %c0_i32_245 = arith.constant 0 : i32
    %585 = vector.broadcast %c0_i32_245 : i32 to vector<1x1024xi32>
    %586 = arith.cmpi sge, %584, %585 : vector<1x1024xi32>
    %c0_i32_246 = arith.constant 0 : i32
    %587 = vector.broadcast %c0_i32_246 : i32 to vector<1x1024xi32>
    %588 = arith.addi %492, %587 : vector<1x1024xi32>
    %c8_i32_247 = arith.constant 8 : i32
    %589 = vector.broadcast %c8_i32_247 : i32 to vector<1x1024xi32>
    %590 = arith.cmpi slt, %588, %589 : vector<1x1024xi32>
    %591 = arith.andi %586, %590 : vector<1x1024xi1>
    %c-1_i32_248 = arith.constant -1 : i32
    %592 = vector.broadcast %c-1_i32_248 : i32 to vector<1x1024xi32>
    %593 = arith.addi %496, %592 : vector<1x1024xi32>
    %c0_i32_249 = arith.constant 0 : i32
    %594 = vector.broadcast %c0_i32_249 : i32 to vector<1x1024xi32>
    %595 = arith.cmpi sge, %593, %594 : vector<1x1024xi32>
    %596 = arith.andi %591, %595 : vector<1x1024xi1>
    %c-1_i32_250 = arith.constant -1 : i32
    %597 = vector.broadcast %c-1_i32_250 : i32 to vector<1x1024xi32>
    %598 = arith.addi %496, %597 : vector<1x1024xi32>
    %c8_i32_251 = arith.constant 8 : i32
    %599 = vector.broadcast %c8_i32_251 : i32 to vector<1x1024xi32>
    %600 = arith.cmpi slt, %598, %599 : vector<1x1024xi32>
    %601 = arith.andi %596, %600 : vector<1x1024xi1>
    %602 = arith.extui %601 : vector<1x1024xi1> to vector<1x1024xi32>
    %603 = arith.sitofp %602 : vector<1x1024xi32> to vector<1x1024xf32>
    %604 = vector.broadcast %603 : vector<1x1024xf32> to vector<16x1024xf32>
    %605 = arith.mulf %582, %604 : vector<16x1024xf32>
    %c3_252 = arith.constant 3 : index
    %c0_253 = arith.constant 0 : index
    %c0_254 = arith.constant 0 : index
    %606 = vector.load %arg6[%c3_252, %c0_253, %c0_254] : memref<9x24x16xf32, #tpu.memory_space<vmem>>, vector<1x24x16xf32>
    %607 = vector.shape_cast %606 : vector<1x24x16xf32> to vector<24x16xf32>
    %cst_255 = arith.constant dense<0.000000e+00> : vector<24x1024xf32>
    %608 = tpu.matmul %607, %605, %cst_255 {dimension_numbers = #tpu.dot_dimension_numbers<[1], [0], [0], [1], [0, 0, 1, 1], [], []>} : vector<24x16xf32>, vector<16x1024xf32>, vector<24x1024xf32> -> vector<24x1024xf32>
    %609 = arith.addf %581, %608 : vector<24x1024xf32>
    %c4_256 = arith.constant 4 : index
    %c0_257 = arith.constant 0 : index
    %c0_258 = arith.constant 0 : index
    %610 = vector.load %arg6[%c4_256, %c0_257, %c0_258] : memref<9x24x16xf32, #tpu.memory_space<vmem>>, vector<1x24x16xf32>
    %611 = vector.shape_cast %610 : vector<1x24x16xf32> to vector<24x16xf32>
    %cst_259 = arith.constant dense<0.000000e+00> : vector<24x1024xf32>
    %612 = tpu.matmul %611, %490, %cst_259 {dimension_numbers = #tpu.dot_dimension_numbers<[1], [0], [0], [1], [0, 0, 1, 1], [], []>} : vector<24x16xf32>, vector<16x1024xf32>, vector<24x1024xf32> -> vector<24x1024xf32>
    %613 = arith.addf %609, %612 : vector<24x1024xf32>
    %c1020_i32 = arith.constant 1020 : i32
    %614 = tpu.dynamic_rotate %490 by %c1020_i32 dim 1 : vector<16x1024xf32>, i32 -> vector<16x1024xf32>
    %c0_i32_260 = arith.constant 0 : i32
    %615 = vector.broadcast %c0_i32_260 : i32 to vector<1x1024xi32>
    %616 = arith.addi %492, %615 : vector<1x1024xi32>
    %c0_i32_261 = arith.constant 0 : i32
    %617 = vector.broadcast %c0_i32_261 : i32 to vector<1x1024xi32>
    %618 = arith.cmpi sge, %616, %617 : vector<1x1024xi32>
    %c0_i32_262 = arith.constant 0 : i32
    %619 = vector.broadcast %c0_i32_262 : i32 to vector<1x1024xi32>
    %620 = arith.addi %492, %619 : vector<1x1024xi32>
    %c8_i32_263 = arith.constant 8 : i32
    %621 = vector.broadcast %c8_i32_263 : i32 to vector<1x1024xi32>
    %622 = arith.cmpi slt, %620, %621 : vector<1x1024xi32>
    %623 = arith.andi %618, %622 : vector<1x1024xi1>
    %c1_i32_264 = arith.constant 1 : i32
    %624 = vector.broadcast %c1_i32_264 : i32 to vector<1x1024xi32>
    %625 = arith.addi %496, %624 : vector<1x1024xi32>
    %c0_i32_265 = arith.constant 0 : i32
    %626 = vector.broadcast %c0_i32_265 : i32 to vector<1x1024xi32>
    %627 = arith.cmpi sge, %625, %626 : vector<1x1024xi32>
    %628 = arith.andi %623, %627 : vector<1x1024xi1>
    %c1_i32_266 = arith.constant 1 : i32
    %629 = vector.broadcast %c1_i32_266 : i32 to vector<1x1024xi32>
    %630 = arith.addi %496, %629 : vector<1x1024xi32>
    %c8_i32_267 = arith.constant 8 : i32
    %631 = vector.broadcast %c8_i32_267 : i32 to vector<1x1024xi32>
    %632 = arith.cmpi slt, %630, %631 : vector<1x1024xi32>
    %633 = arith.andi %628, %632 : vector<1x1024xi1>
    %634 = arith.extui %633 : vector<1x1024xi1> to vector<1x1024xi32>
    %635 = arith.sitofp %634 : vector<1x1024xi32> to vector<1x1024xf32>
    %636 = vector.broadcast %635 : vector<1x1024xf32> to vector<16x1024xf32>
    %637 = arith.mulf %614, %636 : vector<16x1024xf32>
    %c5_268 = arith.constant 5 : index
    %c0_269 = arith.constant 0 : index
    %c0_270 = arith.constant 0 : index
    %638 = vector.load %arg6[%c5_268, %c0_269, %c0_270] : memref<9x24x16xf32, #tpu.memory_space<vmem>>, vector<1x24x16xf32>
    %639 = vector.shape_cast %638 : vector<1x24x16xf32> to vector<24x16xf32>
    %cst_271 = arith.constant dense<0.000000e+00> : vector<24x1024xf32>
    %640 = tpu.matmul %639, %637, %cst_271 {dimension_numbers = #tpu.dot_dimension_numbers<[1], [0], [0], [1], [0, 0, 1, 1], [], []>} : vector<24x16xf32>, vector<16x1024xf32>, vector<24x1024xf32> -> vector<24x1024xf32>
    %641 = arith.addf %613, %640 : vector<24x1024xf32>
    %c900_i32 = arith.constant 900 : i32
    %642 = tpu.dynamic_rotate %490 by %c900_i32 dim 1 : vector<16x1024xf32>, i32 -> vector<16x1024xf32>
    %c1_i32_272 = arith.constant 1 : i32
    %643 = vector.broadcast %c1_i32_272 : i32 to vector<1x1024xi32>
    %644 = arith.addi %492, %643 : vector<1x1024xi32>
    %c0_i32_273 = arith.constant 0 : i32
    %645 = vector.broadcast %c0_i32_273 : i32 to vector<1x1024xi32>
    %646 = arith.cmpi sge, %644, %645 : vector<1x1024xi32>
    %c1_i32_274 = arith.constant 1 : i32
    %647 = vector.broadcast %c1_i32_274 : i32 to vector<1x1024xi32>
    %648 = arith.addi %492, %647 : vector<1x1024xi32>
    %c8_i32_275 = arith.constant 8 : i32
    %649 = vector.broadcast %c8_i32_275 : i32 to vector<1x1024xi32>
    %650 = arith.cmpi slt, %648, %649 : vector<1x1024xi32>
    %651 = arith.andi %646, %650 : vector<1x1024xi1>
    %c-1_i32_276 = arith.constant -1 : i32
    %652 = vector.broadcast %c-1_i32_276 : i32 to vector<1x1024xi32>
    %653 = arith.addi %496, %652 : vector<1x1024xi32>
    %c0_i32_277 = arith.constant 0 : i32
    %654 = vector.broadcast %c0_i32_277 : i32 to vector<1x1024xi32>
    %655 = arith.cmpi sge, %653, %654 : vector<1x1024xi32>
    %656 = arith.andi %651, %655 : vector<1x1024xi1>
    %c-1_i32_278 = arith.constant -1 : i32
    %657 = vector.broadcast %c-1_i32_278 : i32 to vector<1x1024xi32>
    %658 = arith.addi %496, %657 : vector<1x1024xi32>
    %c8_i32_279 = arith.constant 8 : i32
    %659 = vector.broadcast %c8_i32_279 : i32 to vector<1x1024xi32>
    %660 = arith.cmpi slt, %658, %659 : vector<1x1024xi32>
    %661 = arith.andi %656, %660 : vector<1x1024xi1>
    %662 = arith.extui %661 : vector<1x1024xi1> to vector<1x1024xi32>
    %663 = arith.sitofp %662 : vector<1x1024xi32> to vector<1x1024xf32>
    %664 = vector.broadcast %663 : vector<1x1024xf32> to vector<16x1024xf32>
    %665 = arith.mulf %642, %664 : vector<16x1024xf32>
    %c6_280 = arith.constant 6 : index
    %c0_281 = arith.constant 0 : index
    %c0_282 = arith.constant 0 : index
    %666 = vector.load %arg6[%c6_280, %c0_281, %c0_282] : memref<9x24x16xf32, #tpu.memory_space<vmem>>, vector<1x24x16xf32>
    %667 = vector.shape_cast %666 : vector<1x24x16xf32> to vector<24x16xf32>
    %cst_283 = arith.constant dense<0.000000e+00> : vector<24x1024xf32>
    %668 = tpu.matmul %667, %665, %cst_283 {dimension_numbers = #tpu.dot_dimension_numbers<[1], [0], [0], [1], [0, 0, 1, 1], [], []>} : vector<24x16xf32>, vector<16x1024xf32>, vector<24x1024xf32> -> vector<24x1024xf32>
    %669 = arith.addf %641, %668 : vector<24x1024xf32>
    %c896_i32 = arith.constant 896 : i32
    %670 = tpu.dynamic_rotate %490 by %c896_i32 dim 1 : vector<16x1024xf32>, i32 -> vector<16x1024xf32>
    %c1_i32_284 = arith.constant 1 : i32
    %671 = vector.broadcast %c1_i32_284 : i32 to vector<1x1024xi32>
    %672 = arith.addi %492, %671 : vector<1x1024xi32>
    %c0_i32_285 = arith.constant 0 : i32
    %673 = vector.broadcast %c0_i32_285 : i32 to vector<1x1024xi32>
    %674 = arith.cmpi sge, %672, %673 : vector<1x1024xi32>
    %c1_i32_286 = arith.constant 1 : i32
    %675 = vector.broadcast %c1_i32_286 : i32 to vector<1x1024xi32>
    %676 = arith.addi %492, %675 : vector<1x1024xi32>
    %c8_i32_287 = arith.constant 8 : i32
    %677 = vector.broadcast %c8_i32_287 : i32 to vector<1x1024xi32>
    %678 = arith.cmpi slt, %676, %677 : vector<1x1024xi32>
    %679 = arith.andi %674, %678 : vector<1x1024xi1>
    %c0_i32_288 = arith.constant 0 : i32
    %680 = vector.broadcast %c0_i32_288 : i32 to vector<1x1024xi32>
    %681 = arith.addi %496, %680 : vector<1x1024xi32>
    %c0_i32_289 = arith.constant 0 : i32
    %682 = vector.broadcast %c0_i32_289 : i32 to vector<1x1024xi32>
    %683 = arith.cmpi sge, %681, %682 : vector<1x1024xi32>
    %684 = arith.andi %679, %683 : vector<1x1024xi1>
    %c0_i32_290 = arith.constant 0 : i32
    %685 = vector.broadcast %c0_i32_290 : i32 to vector<1x1024xi32>
    %686 = arith.addi %496, %685 : vector<1x1024xi32>
    %c8_i32_291 = arith.constant 8 : i32
    %687 = vector.broadcast %c8_i32_291 : i32 to vector<1x1024xi32>
    %688 = arith.cmpi slt, %686, %687 : vector<1x1024xi32>
    %689 = arith.andi %684, %688 : vector<1x1024xi1>
    %690 = arith.extui %689 : vector<1x1024xi1> to vector<1x1024xi32>
    %691 = arith.sitofp %690 : vector<1x1024xi32> to vector<1x1024xf32>
    %692 = vector.broadcast %691 : vector<1x1024xf32> to vector<16x1024xf32>
    %693 = arith.mulf %670, %692 : vector<16x1024xf32>
    %c7_292 = arith.constant 7 : index
    %c0_293 = arith.constant 0 : index
    %c0_294 = arith.constant 0 : index
    %694 = vector.load %arg6[%c7_292, %c0_293, %c0_294] : memref<9x24x16xf32, #tpu.memory_space<vmem>>, vector<1x24x16xf32>
    %695 = vector.shape_cast %694 : vector<1x24x16xf32> to vector<24x16xf32>
    %cst_295 = arith.constant dense<0.000000e+00> : vector<24x1024xf32>
    %696 = tpu.matmul %695, %693, %cst_295 {dimension_numbers = #tpu.dot_dimension_numbers<[1], [0], [0], [1], [0, 0, 1, 1], [], []>} : vector<24x16xf32>, vector<16x1024xf32>, vector<24x1024xf32> -> vector<24x1024xf32>
    %697 = arith.addf %669, %696 : vector<24x1024xf32>
    %c892_i32 = arith.constant 892 : i32
    %698 = tpu.dynamic_rotate %490 by %c892_i32 dim 1 : vector<16x1024xf32>, i32 -> vector<16x1024xf32>
    %c1_i32_296 = arith.constant 1 : i32
    %699 = vector.broadcast %c1_i32_296 : i32 to vector<1x1024xi32>
    %700 = arith.addi %492, %699 : vector<1x1024xi32>
    %c0_i32_297 = arith.constant 0 : i32
    %701 = vector.broadcast %c0_i32_297 : i32 to vector<1x1024xi32>
    %702 = arith.cmpi sge, %700, %701 : vector<1x1024xi32>
    %c1_i32_298 = arith.constant 1 : i32
    %703 = vector.broadcast %c1_i32_298 : i32 to vector<1x1024xi32>
    %704 = arith.addi %492, %703 : vector<1x1024xi32>
    %c8_i32_299 = arith.constant 8 : i32
    %705 = vector.broadcast %c8_i32_299 : i32 to vector<1x1024xi32>
    %706 = arith.cmpi slt, %704, %705 : vector<1x1024xi32>
    %707 = arith.andi %702, %706 : vector<1x1024xi1>
    %c1_i32_300 = arith.constant 1 : i32
    %708 = vector.broadcast %c1_i32_300 : i32 to vector<1x1024xi32>
    %709 = arith.addi %496, %708 : vector<1x1024xi32>
    %c0_i32_301 = arith.constant 0 : i32
    %710 = vector.broadcast %c0_i32_301 : i32 to vector<1x1024xi32>
    %711 = arith.cmpi sge, %709, %710 : vector<1x1024xi32>
    %712 = arith.andi %707, %711 : vector<1x1024xi1>
    %c1_i32_302 = arith.constant 1 : i32
    %713 = vector.broadcast %c1_i32_302 : i32 to vector<1x1024xi32>
    %714 = arith.addi %496, %713 : vector<1x1024xi32>
    %c8_i32_303 = arith.constant 8 : i32
    %715 = vector.broadcast %c8_i32_303 : i32 to vector<1x1024xi32>
    %716 = arith.cmpi slt, %714, %715 : vector<1x1024xi32>
    %717 = arith.andi %712, %716 : vector<1x1024xi1>
    %718 = arith.extui %717 : vector<1x1024xi1> to vector<1x1024xi32>
    %719 = arith.sitofp %718 : vector<1x1024xi32> to vector<1x1024xf32>
    %720 = vector.broadcast %719 : vector<1x1024xf32> to vector<16x1024xf32>
    %721 = arith.mulf %698, %720 : vector<16x1024xf32>
    %c8_304 = arith.constant 8 : index
    %c0_305 = arith.constant 0 : index
    %c0_306 = arith.constant 0 : index
    %722 = vector.load %arg6[%c8_304, %c0_305, %c0_306] : memref<9x24x16xf32, #tpu.memory_space<vmem>>, vector<1x24x16xf32>
    %723 = vector.shape_cast %722 : vector<1x24x16xf32> to vector<24x16xf32>
    %cst_307 = arith.constant dense<0.000000e+00> : vector<24x1024xf32>
    %724 = tpu.matmul %723, %721, %cst_307 {dimension_numbers = #tpu.dot_dimension_numbers<[1], [0], [0], [1], [0, 0, 1, 1], [], []>} : vector<24x16xf32>, vector<16x1024xf32>, vector<24x1024xf32> -> vector<24x1024xf32>
    %725 = arith.addf %697, %724 : vector<24x1024xf32>
    %c0_308 = arith.constant 0 : index
    %c0_309 = arith.constant 0 : index
    %726 = vector.load %arg7[%c0_308, %c0_309] : memref<24x1xf32, #tpu.memory_space<vmem>>, vector<24x1xf32>
    %727 = vector.broadcast %726 : vector<24x1xf32> to vector<24x1024xf32>
    %728 = arith.addf %725, %727 : vector<24x1024xf32>
    %c1020_i32_310 = arith.constant 1020 : i32
    %729 = tpu.dynamic_rotate %728 by %c1020_i32_310 dim 1 : vector<24x1024xf32>, i32 -> vector<24x1024xf32>
    %730 = arith.maximumf %728, %729 : vector<24x1024xf32>
    %c896_i32_311 = arith.constant 896 : i32
    %731 = tpu.dynamic_rotate %730 by %c896_i32_311 dim 1 : vector<24x1024xf32>, i32 -> vector<24x1024xf32>
    %732 = arith.maximumf %730, %731 : vector<24x1024xf32>
    %cst_312 = arith.constant 0.000000e+00 : f32
    %733 = vector.broadcast %cst_312 : f32 to vector<24x1024xf32>
    %734 = arith.maximumf %732, %733 : vector<24x1024xf32>
    %c0_313 = arith.constant 0 : index
    %c0_314 = arith.constant 0 : index
    %735 = vector.load %arg8[%c0_313, %c0_314] : memref<1024x16xf32, #tpu.memory_space<vmem>>, vector<1024x16xf32>
    %cst_315 = arith.constant dense<0.000000e+00> : vector<24x16xf32>
    %736 = tpu.matmul %734, %735, %cst_315 {dimension_numbers = #tpu.dot_dimension_numbers<[1], [0], [0], [1], [0, 0, 1, 1], [], []>} : vector<24x1024xf32>, vector<1024x16xf32>, vector<24x16xf32> -> vector<24x16xf32>
    %c0_316 = arith.constant 0 : index
    %c0_317 = arith.constant 0 : index
    %737 = vector.load %arg10[%c0_316, %c0_317] : memref<1x160xf32, #tpu.memory_space<vmem>>, vector<1x160xf32>
    %738 = vector.extract_strided_slice %736 {offsets = [0, 0], sizes = [1, 16], strides = [1, 1]} : vector<24x16xf32> to vector<1x16xf32>
    %c0_318 = arith.constant 0 : index
    %c0_319 = arith.constant 0 : index
    %c0_320 = arith.constant 0 : index
    %739 = vector.load %arg9[%c0_318, %c0_319, %c0_320] : memref<20x16x160xf32, #tpu.memory_space<vmem>>, vector<1x16x160xf32>
    %740 = vector.shape_cast %739 : vector<1x16x160xf32> to vector<16x160xf32>
    %cst_321 = arith.constant dense<0.000000e+00> : vector<1x160xf32>
    %741 = tpu.matmul %738, %740, %cst_321 {dimension_numbers = #tpu.dot_dimension_numbers<[1], [0], [0], [1], [0, 0, 1, 1], [], []>} : vector<1x16xf32>, vector<16x160xf32>, vector<1x160xf32> -> vector<1x160xf32>
    %742 = arith.addf %737, %741 : vector<1x160xf32>
    %743 = vector.extract_strided_slice %736 {offsets = [1, 0], sizes = [1, 16], strides = [1, 1]} : vector<24x16xf32> to vector<1x16xf32>
    %c1_322 = arith.constant 1 : index
    %c0_323 = arith.constant 0 : index
    %c0_324 = arith.constant 0 : index
    %744 = vector.load %arg9[%c1_322, %c0_323, %c0_324] : memref<20x16x160xf32, #tpu.memory_space<vmem>>, vector<1x16x160xf32>
    %745 = vector.shape_cast %744 : vector<1x16x160xf32> to vector<16x160xf32>
    %cst_325 = arith.constant dense<0.000000e+00> : vector<1x160xf32>
    %746 = tpu.matmul %743, %745, %cst_325 {dimension_numbers = #tpu.dot_dimension_numbers<[1], [0], [0], [1], [0, 0, 1, 1], [], []>} : vector<1x16xf32>, vector<16x160xf32>, vector<1x160xf32> -> vector<1x160xf32>
    %747 = arith.addf %742, %746 : vector<1x160xf32>
    %748 = vector.extract_strided_slice %736 {offsets = [2, 0], sizes = [1, 16], strides = [1, 1]} : vector<24x16xf32> to vector<1x16xf32>
    %c2_326 = arith.constant 2 : index
    %c0_327 = arith.constant 0 : index
    %c0_328 = arith.constant 0 : index
    %749 = vector.load %arg9[%c2_326, %c0_327, %c0_328] : memref<20x16x160xf32, #tpu.memory_space<vmem>>, vector<1x16x160xf32>
    %750 = vector.shape_cast %749 : vector<1x16x160xf32> to vector<16x160xf32>
    %cst_329 = arith.constant dense<0.000000e+00> : vector<1x160xf32>
    %751 = tpu.matmul %748, %750, %cst_329 {dimension_numbers = #tpu.dot_dimension_numbers<[1], [0], [0], [1], [0, 0, 1, 1], [], []>} : vector<1x16xf32>, vector<16x160xf32>, vector<1x160xf32> -> vector<1x160xf32>
    %752 = arith.addf %747, %751 : vector<1x160xf32>
    %753 = vector.extract_strided_slice %736 {offsets = [3, 0], sizes = [1, 16], strides = [1, 1]} : vector<24x16xf32> to vector<1x16xf32>
    %c3_330 = arith.constant 3 : index
    %c0_331 = arith.constant 0 : index
    %c0_332 = arith.constant 0 : index
    %754 = vector.load %arg9[%c3_330, %c0_331, %c0_332] : memref<20x16x160xf32, #tpu.memory_space<vmem>>, vector<1x16x160xf32>
    %755 = vector.shape_cast %754 : vector<1x16x160xf32> to vector<16x160xf32>
    %cst_333 = arith.constant dense<0.000000e+00> : vector<1x160xf32>
    %756 = tpu.matmul %753, %755, %cst_333 {dimension_numbers = #tpu.dot_dimension_numbers<[1], [0], [0], [1], [0, 0, 1, 1], [], []>} : vector<1x16xf32>, vector<16x160xf32>, vector<1x160xf32> -> vector<1x160xf32>
    %757 = arith.addf %752, %756 : vector<1x160xf32>
    %758 = vector.extract_strided_slice %736 {offsets = [4, 0], sizes = [1, 16], strides = [1, 1]} : vector<24x16xf32> to vector<1x16xf32>
    %c4_334 = arith.constant 4 : index
    %c0_335 = arith.constant 0 : index
    %c0_336 = arith.constant 0 : index
    %759 = vector.load %arg9[%c4_334, %c0_335, %c0_336] : memref<20x16x160xf32, #tpu.memory_space<vmem>>, vector<1x16x160xf32>
    %760 = vector.shape_cast %759 : vector<1x16x160xf32> to vector<16x160xf32>
    %cst_337 = arith.constant dense<0.000000e+00> : vector<1x160xf32>
    %761 = tpu.matmul %758, %760, %cst_337 {dimension_numbers = #tpu.dot_dimension_numbers<[1], [0], [0], [1], [0, 0, 1, 1], [], []>} : vector<1x16xf32>, vector<16x160xf32>, vector<1x160xf32> -> vector<1x160xf32>
    %762 = arith.addf %757, %761 : vector<1x160xf32>
    %763 = vector.extract_strided_slice %736 {offsets = [5, 0], sizes = [1, 16], strides = [1, 1]} : vector<24x16xf32> to vector<1x16xf32>
    %c5_338 = arith.constant 5 : index
    %c0_339 = arith.constant 0 : index
    %c0_340 = arith.constant 0 : index
    %764 = vector.load %arg9[%c5_338, %c0_339, %c0_340] : memref<20x16x160xf32, #tpu.memory_space<vmem>>, vector<1x16x160xf32>
    %765 = vector.shape_cast %764 : vector<1x16x160xf32> to vector<16x160xf32>
    %cst_341 = arith.constant dense<0.000000e+00> : vector<1x160xf32>
    %766 = tpu.matmul %763, %765, %cst_341 {dimension_numbers = #tpu.dot_dimension_numbers<[1], [0], [0], [1], [0, 0, 1, 1], [], []>} : vector<1x16xf32>, vector<16x160xf32>, vector<1x160xf32> -> vector<1x160xf32>
    %767 = arith.addf %762, %766 : vector<1x160xf32>
    %768 = vector.extract_strided_slice %736 {offsets = [6, 0], sizes = [1, 16], strides = [1, 1]} : vector<24x16xf32> to vector<1x16xf32>
    %c6_342 = arith.constant 6 : index
    %c0_343 = arith.constant 0 : index
    %c0_344 = arith.constant 0 : index
    %769 = vector.load %arg9[%c6_342, %c0_343, %c0_344] : memref<20x16x160xf32, #tpu.memory_space<vmem>>, vector<1x16x160xf32>
    %770 = vector.shape_cast %769 : vector<1x16x160xf32> to vector<16x160xf32>
    %cst_345 = arith.constant dense<0.000000e+00> : vector<1x160xf32>
    %771 = tpu.matmul %768, %770, %cst_345 {dimension_numbers = #tpu.dot_dimension_numbers<[1], [0], [0], [1], [0, 0, 1, 1], [], []>} : vector<1x16xf32>, vector<16x160xf32>, vector<1x160xf32> -> vector<1x160xf32>
    %772 = arith.addf %767, %771 : vector<1x160xf32>
    %773 = vector.extract_strided_slice %736 {offsets = [7, 0], sizes = [1, 16], strides = [1, 1]} : vector<24x16xf32> to vector<1x16xf32>
    %c7_346 = arith.constant 7 : index
    %c0_347 = arith.constant 0 : index
    %c0_348 = arith.constant 0 : index
    %774 = vector.load %arg9[%c7_346, %c0_347, %c0_348] : memref<20x16x160xf32, #tpu.memory_space<vmem>>, vector<1x16x160xf32>
    %775 = vector.shape_cast %774 : vector<1x16x160xf32> to vector<16x160xf32>
    %cst_349 = arith.constant dense<0.000000e+00> : vector<1x160xf32>
    %776 = tpu.matmul %773, %775, %cst_349 {dimension_numbers = #tpu.dot_dimension_numbers<[1], [0], [0], [1], [0, 0, 1, 1], [], []>} : vector<1x16xf32>, vector<16x160xf32>, vector<1x160xf32> -> vector<1x160xf32>
    %777 = arith.addf %772, %776 : vector<1x160xf32>
    %778 = vector.extract_strided_slice %736 {offsets = [8, 0], sizes = [1, 16], strides = [1, 1]} : vector<24x16xf32> to vector<1x16xf32>
    %c8_350 = arith.constant 8 : index
    %c0_351 = arith.constant 0 : index
    %c0_352 = arith.constant 0 : index
    %779 = vector.load %arg9[%c8_350, %c0_351, %c0_352] : memref<20x16x160xf32, #tpu.memory_space<vmem>>, vector<1x16x160xf32>
    %780 = vector.shape_cast %779 : vector<1x16x160xf32> to vector<16x160xf32>
    %cst_353 = arith.constant dense<0.000000e+00> : vector<1x160xf32>
    %781 = tpu.matmul %778, %780, %cst_353 {dimension_numbers = #tpu.dot_dimension_numbers<[1], [0], [0], [1], [0, 0, 1, 1], [], []>} : vector<1x16xf32>, vector<16x160xf32>, vector<1x160xf32> -> vector<1x160xf32>
    %782 = arith.addf %777, %781 : vector<1x160xf32>
    %783 = vector.extract_strided_slice %736 {offsets = [9, 0], sizes = [1, 16], strides = [1, 1]} : vector<24x16xf32> to vector<1x16xf32>
    %c9 = arith.constant 9 : index
    %c0_354 = arith.constant 0 : index
    %c0_355 = arith.constant 0 : index
    %784 = vector.load %arg9[%c9, %c0_354, %c0_355] : memref<20x16x160xf32, #tpu.memory_space<vmem>>, vector<1x16x160xf32>
    %785 = vector.shape_cast %784 : vector<1x16x160xf32> to vector<16x160xf32>
    %cst_356 = arith.constant dense<0.000000e+00> : vector<1x160xf32>
    %786 = tpu.matmul %783, %785, %cst_356 {dimension_numbers = #tpu.dot_dimension_numbers<[1], [0], [0], [1], [0, 0, 1, 1], [], []>} : vector<1x16xf32>, vector<16x160xf32>, vector<1x160xf32> -> vector<1x160xf32>
    %787 = arith.addf %782, %786 : vector<1x160xf32>
    %788 = vector.extract_strided_slice %736 {offsets = [10, 0], sizes = [1, 16], strides = [1, 1]} : vector<24x16xf32> to vector<1x16xf32>
    %c10 = arith.constant 10 : index
    %c0_357 = arith.constant 0 : index
    %c0_358 = arith.constant 0 : index
    %789 = vector.load %arg9[%c10, %c0_357, %c0_358] : memref<20x16x160xf32, #tpu.memory_space<vmem>>, vector<1x16x160xf32>
    %790 = vector.shape_cast %789 : vector<1x16x160xf32> to vector<16x160xf32>
    %cst_359 = arith.constant dense<0.000000e+00> : vector<1x160xf32>
    %791 = tpu.matmul %788, %790, %cst_359 {dimension_numbers = #tpu.dot_dimension_numbers<[1], [0], [0], [1], [0, 0, 1, 1], [], []>} : vector<1x16xf32>, vector<16x160xf32>, vector<1x160xf32> -> vector<1x160xf32>
    %792 = arith.addf %787, %791 : vector<1x160xf32>
    %793 = vector.extract_strided_slice %736 {offsets = [11, 0], sizes = [1, 16], strides = [1, 1]} : vector<24x16xf32> to vector<1x16xf32>
    %c11 = arith.constant 11 : index
    %c0_360 = arith.constant 0 : index
    %c0_361 = arith.constant 0 : index
    %794 = vector.load %arg9[%c11, %c0_360, %c0_361] : memref<20x16x160xf32, #tpu.memory_space<vmem>>, vector<1x16x160xf32>
    %795 = vector.shape_cast %794 : vector<1x16x160xf32> to vector<16x160xf32>
    %cst_362 = arith.constant dense<0.000000e+00> : vector<1x160xf32>
    %796 = tpu.matmul %793, %795, %cst_362 {dimension_numbers = #tpu.dot_dimension_numbers<[1], [0], [0], [1], [0, 0, 1, 1], [], []>} : vector<1x16xf32>, vector<16x160xf32>, vector<1x160xf32> -> vector<1x160xf32>
    %797 = arith.addf %792, %796 : vector<1x160xf32>
    %798 = vector.extract_strided_slice %736 {offsets = [12, 0], sizes = [1, 16], strides = [1, 1]} : vector<24x16xf32> to vector<1x16xf32>
    %c12 = arith.constant 12 : index
    %c0_363 = arith.constant 0 : index
    %c0_364 = arith.constant 0 : index
    %799 = vector.load %arg9[%c12, %c0_363, %c0_364] : memref<20x16x160xf32, #tpu.memory_space<vmem>>, vector<1x16x160xf32>
    %800 = vector.shape_cast %799 : vector<1x16x160xf32> to vector<16x160xf32>
    %cst_365 = arith.constant dense<0.000000e+00> : vector<1x160xf32>
    %801 = tpu.matmul %798, %800, %cst_365 {dimension_numbers = #tpu.dot_dimension_numbers<[1], [0], [0], [1], [0, 0, 1, 1], [], []>} : vector<1x16xf32>, vector<16x160xf32>, vector<1x160xf32> -> vector<1x160xf32>
    %802 = arith.addf %797, %801 : vector<1x160xf32>
    %803 = vector.extract_strided_slice %736 {offsets = [13, 0], sizes = [1, 16], strides = [1, 1]} : vector<24x16xf32> to vector<1x16xf32>
    %c13 = arith.constant 13 : index
    %c0_366 = arith.constant 0 : index
    %c0_367 = arith.constant 0 : index
    %804 = vector.load %arg9[%c13, %c0_366, %c0_367] : memref<20x16x160xf32, #tpu.memory_space<vmem>>, vector<1x16x160xf32>
    %805 = vector.shape_cast %804 : vector<1x16x160xf32> to vector<16x160xf32>
    %cst_368 = arith.constant dense<0.000000e+00> : vector<1x160xf32>
    %806 = tpu.matmul %803, %805, %cst_368 {dimension_numbers = #tpu.dot_dimension_numbers<[1], [0], [0], [1], [0, 0, 1, 1], [], []>} : vector<1x16xf32>, vector<16x160xf32>, vector<1x160xf32> -> vector<1x160xf32>
    %807 = arith.addf %802, %806 : vector<1x160xf32>
    %808 = vector.extract_strided_slice %736 {offsets = [14, 0], sizes = [1, 16], strides = [1, 1]} : vector<24x16xf32> to vector<1x16xf32>
    %c14 = arith.constant 14 : index
    %c0_369 = arith.constant 0 : index
    %c0_370 = arith.constant 0 : index
    %809 = vector.load %arg9[%c14, %c0_369, %c0_370] : memref<20x16x160xf32, #tpu.memory_space<vmem>>, vector<1x16x160xf32>
    %810 = vector.shape_cast %809 : vector<1x16x160xf32> to vector<16x160xf32>
    %cst_371 = arith.constant dense<0.000000e+00> : vector<1x160xf32>
    %811 = tpu.matmul %808, %810, %cst_371 {dimension_numbers = #tpu.dot_dimension_numbers<[1], [0], [0], [1], [0, 0, 1, 1], [], []>} : vector<1x16xf32>, vector<16x160xf32>, vector<1x160xf32> -> vector<1x160xf32>
    %812 = arith.addf %807, %811 : vector<1x160xf32>
    %813 = vector.extract_strided_slice %736 {offsets = [15, 0], sizes = [1, 16], strides = [1, 1]} : vector<24x16xf32> to vector<1x16xf32>
    %c15 = arith.constant 15 : index
    %c0_372 = arith.constant 0 : index
    %c0_373 = arith.constant 0 : index
    %814 = vector.load %arg9[%c15, %c0_372, %c0_373] : memref<20x16x160xf32, #tpu.memory_space<vmem>>, vector<1x16x160xf32>
    %815 = vector.shape_cast %814 : vector<1x16x160xf32> to vector<16x160xf32>
    %cst_374 = arith.constant dense<0.000000e+00> : vector<1x160xf32>
    %816 = tpu.matmul %813, %815, %cst_374 {dimension_numbers = #tpu.dot_dimension_numbers<[1], [0], [0], [1], [0, 0, 1, 1], [], []>} : vector<1x16xf32>, vector<16x160xf32>, vector<1x160xf32> -> vector<1x160xf32>
    %817 = arith.addf %812, %816 : vector<1x160xf32>
    %818 = vector.extract_strided_slice %736 {offsets = [16, 0], sizes = [1, 16], strides = [1, 1]} : vector<24x16xf32> to vector<1x16xf32>
    %c16 = arith.constant 16 : index
    %c0_375 = arith.constant 0 : index
    %c0_376 = arith.constant 0 : index
    %819 = vector.load %arg9[%c16, %c0_375, %c0_376] : memref<20x16x160xf32, #tpu.memory_space<vmem>>, vector<1x16x160xf32>
    %820 = vector.shape_cast %819 : vector<1x16x160xf32> to vector<16x160xf32>
    %cst_377 = arith.constant dense<0.000000e+00> : vector<1x160xf32>
    %821 = tpu.matmul %818, %820, %cst_377 {dimension_numbers = #tpu.dot_dimension_numbers<[1], [0], [0], [1], [0, 0, 1, 1], [], []>} : vector<1x16xf32>, vector<16x160xf32>, vector<1x160xf32> -> vector<1x160xf32>
    %822 = arith.addf %817, %821 : vector<1x160xf32>
    %823 = vector.extract_strided_slice %736 {offsets = [17, 0], sizes = [1, 16], strides = [1, 1]} : vector<24x16xf32> to vector<1x16xf32>
    %c17 = arith.constant 17 : index
    %c0_378 = arith.constant 0 : index
    %c0_379 = arith.constant 0 : index
    %824 = vector.load %arg9[%c17, %c0_378, %c0_379] : memref<20x16x160xf32, #tpu.memory_space<vmem>>, vector<1x16x160xf32>
    %825 = vector.shape_cast %824 : vector<1x16x160xf32> to vector<16x160xf32>
    %cst_380 = arith.constant dense<0.000000e+00> : vector<1x160xf32>
    %826 = tpu.matmul %823, %825, %cst_380 {dimension_numbers = #tpu.dot_dimension_numbers<[1], [0], [0], [1], [0, 0, 1, 1], [], []>} : vector<1x16xf32>, vector<16x160xf32>, vector<1x160xf32> -> vector<1x160xf32>
    %827 = arith.addf %822, %826 : vector<1x160xf32>
    %828 = vector.extract_strided_slice %736 {offsets = [18, 0], sizes = [1, 16], strides = [1, 1]} : vector<24x16xf32> to vector<1x16xf32>
    %c18 = arith.constant 18 : index
    %c0_381 = arith.constant 0 : index
    %c0_382 = arith.constant 0 : index
    %829 = vector.load %arg9[%c18, %c0_381, %c0_382] : memref<20x16x160xf32, #tpu.memory_space<vmem>>, vector<1x16x160xf32>
    %830 = vector.shape_cast %829 : vector<1x16x160xf32> to vector<16x160xf32>
    %cst_383 = arith.constant dense<0.000000e+00> : vector<1x160xf32>
    %831 = tpu.matmul %828, %830, %cst_383 {dimension_numbers = #tpu.dot_dimension_numbers<[1], [0], [0], [1], [0, 0, 1, 1], [], []>} : vector<1x16xf32>, vector<16x160xf32>, vector<1x160xf32> -> vector<1x160xf32>
    %832 = arith.addf %827, %831 : vector<1x160xf32>
    %833 = vector.extract_strided_slice %736 {offsets = [19, 0], sizes = [1, 16], strides = [1, 1]} : vector<24x16xf32> to vector<1x16xf32>
    %c19 = arith.constant 19 : index
    %c0_384 = arith.constant 0 : index
    %c0_385 = arith.constant 0 : index
    %834 = vector.load %arg9[%c19, %c0_384, %c0_385] : memref<20x16x160xf32, #tpu.memory_space<vmem>>, vector<1x16x160xf32>
    %835 = vector.shape_cast %834 : vector<1x16x160xf32> to vector<16x160xf32>
    %cst_386 = arith.constant dense<0.000000e+00> : vector<1x160xf32>
    %836 = tpu.matmul %833, %835, %cst_386 {dimension_numbers = #tpu.dot_dimension_numbers<[1], [0], [0], [1], [0, 0, 1, 1], [], []>} : vector<1x16xf32>, vector<16x160xf32>, vector<1x160xf32> -> vector<1x160xf32>
    %837 = arith.addf %832, %836 : vector<1x160xf32>
    %cst_387 = arith.constant 0.000000e+00 : f32
    %838 = vector.broadcast %cst_387 : f32 to vector<1x160xf32>
    %839 = arith.maximumf %837, %838 : vector<1x160xf32>
    %c0_388 = arith.constant 0 : index
    %c0_389 = arith.constant 0 : index
    %840 = vector.load %arg11[%c0_388, %c0_389] : memref<160x10xf32, #tpu.memory_space<vmem>>, vector<160x10xf32>
    %cst_390 = arith.constant dense<0.000000e+00> : vector<1x10xf32>
    %841 = tpu.matmul %839, %840, %cst_390 {dimension_numbers = #tpu.dot_dimension_numbers<[1], [0], [0], [1], [0, 0, 1, 1], [], []>} : vector<1x160xf32>, vector<160x10xf32>, vector<1x10xf32> -> vector<1x10xf32>
    %c0_391 = arith.constant 0 : index
    %c0_392 = arith.constant 0 : index
    %842 = vector.load %arg12[%c0_391, %c0_392] : memref<1x10xf32, #tpu.memory_space<vmem>>, vector<1x10xf32>
    %843 = arith.addf %841, %842 : vector<1x10xf32>
    %cst_393 = arith.constant 0.000000e+00 : f32
    %844 = vector.broadcast %cst_393 : f32 to vector<1x10xf32>
    %845 = arith.maximumf %843, %844 : vector<1x10xf32>
    %cst_394 = arith.constant dense<0xFF800000> : vector<1xf32>
    %846 = vector.multi_reduction <maximumf>, %845, %cst_394 [1] : vector<1x10xf32> to vector<1xf32>
    %847 = vector.shape_cast %846 : vector<1xf32> to vector<1x1xf32>
    %848 = vector.broadcast %847 : vector<1x1xf32> to vector<1x10xf32>
    %849 = arith.subf %845, %848 : vector<1x10xf32>
    %850 = math.exp %849 : vector<1x10xf32>
    %cst_395 = arith.constant dense<0.000000e+00> : vector<1xf32>
    %851 = vector.multi_reduction <add>, %850, %cst_395 [1] : vector<1x10xf32> to vector<1xf32>
    %852 = vector.shape_cast %851 : vector<1xf32> to vector<1x1xf32>
    %853 = tpu.reciprocal %852 : vector<1x1xf32> -> vector<1x1xf32>
    %854 = vector.broadcast %853 : vector<1x1xf32> to vector<1x10xf32>
    %855 = arith.mulf %850, %854 : vector<1x10xf32>
    %c0_396 = arith.constant 0 : index
    %c0_397 = arith.constant 0 : index
    %c0_398 = arith.constant 0 : index
    %856 = vector.load %arg13[%c0_396, %c0_397, %c0_398] : memref<1x1x10xf32, #tpu.memory_space<vmem>>, vector<1x1x10xf32>
    %857 = vector.shape_cast %856 : vector<1x1x10xf32> to vector<1x10xf32>
    %858 = vector.shape_cast %855 : vector<1x10xf32> to vector<1x1x10xf32>
    tpu.vector_store %arg13[%c0_396, %c0_397, %c0_398], %858 {strides = array<i32>} : memref<1x1x10xf32, #tpu.memory_space<vmem>>, vector<1x1x10xf32>,
    return
  }
  func.func @transform_0(%arg0: i32) -> (i32, i32, i32) {
    %c0_i32 = arith.constant 0 : i32
    %c0_i32_0 = arith.constant 0 : i32
    %c0_i32_1 = arith.constant 0 : i32
    return %arg0, %c0_i32, %c0_i32_0 : i32, i32, i32
  }
  func.func @transform_1(%arg0: i32) -> (i32, i32, i32) {
    %c0_i32 = arith.constant 0 : i32
    %c0_i32_0 = arith.constant 0 : i32
    %c0_i32_1 = arith.constant 0 : i32
    %c0_i32_2 = arith.constant 0 : i32
    return %c0_i32, %c0_i32_0, %c0_i32_1 : i32, i32, i32
  }
  func.func @transform_2(%arg0: i32) -> (i32, i32) {
    %c0_i32 = arith.constant 0 : i32
    %c0_i32_0 = arith.constant 0 : i32
    %c0_i32_1 = arith.constant 0 : i32
    return %c0_i32, %c0_i32_0 : i32, i32
  }
  func.func @transform_3(%arg0: i32) -> (i32, i32, i32) {
    %c0_i32 = arith.constant 0 : i32
    %c0_i32_0 = arith.constant 0 : i32
    %c0_i32_1 = arith.constant 0 : i32
    %c0_i32_2 = arith.constant 0 : i32
    return %c0_i32, %c0_i32_0, %c0_i32_1 : i32, i32, i32
  }
  func.func @transform_4(%arg0: i32) -> (i32, i32) {
    %c0_i32 = arith.constant 0 : i32
    %c0_i32_0 = arith.constant 0 : i32
    %c0_i32_1 = arith.constant 0 : i32
    return %c0_i32, %c0_i32_0 : i32, i32
  }
  func.func @transform_5(%arg0: i32) -> (i32, i32, i32) {
    %c0_i32 = arith.constant 0 : i32
    %c0_i32_0 = arith.constant 0 : i32
    %c0_i32_1 = arith.constant 0 : i32
    %c0_i32_2 = arith.constant 0 : i32
    return %c0_i32, %c0_i32_0, %c0_i32_1 : i32, i32, i32
  }
  func.func @transform_6(%arg0: i32) -> (i32, i32) {
    %c0_i32 = arith.constant 0 : i32
    %c0_i32_0 = arith.constant 0 : i32
    %c0_i32_1 = arith.constant 0 : i32
    return %c0_i32, %c0_i32_0 : i32, i32
  }
  func.func @transform_7(%arg0: i32) -> (i32, i32) {
    %c0_i32 = arith.constant 0 : i32
    %c0_i32_0 = arith.constant 0 : i32
    %c0_i32_1 = arith.constant 0 : i32
    return %c0_i32, %c0_i32_0 : i32, i32
  }
  func.func @transform_8(%arg0: i32) -> (i32, i32, i32) {
    %c0_i32 = arith.constant 0 : i32
    %c0_i32_0 = arith.constant 0 : i32
    %c0_i32_1 = arith.constant 0 : i32
    %c0_i32_2 = arith.constant 0 : i32
    return %c0_i32, %c0_i32_0, %c0_i32_1 : i32, i32, i32
  }
  func.func @transform_9(%arg0: i32) -> (i32, i32) {
    %c0_i32 = arith.constant 0 : i32
    %c0_i32_0 = arith.constant 0 : i32
    %c0_i32_1 = arith.constant 0 : i32
    return %c0_i32, %c0_i32_0 : i32, i32
  }
  func.func @transform_10(%arg0: i32) -> (i32, i32) {
    %c0_i32 = arith.constant 0 : i32
    %c0_i32_0 = arith.constant 0 : i32
    %c0_i32_1 = arith.constant 0 : i32
    return %c0_i32, %c0_i32_0 : i32, i32
  }
  func.func @transform_11(%arg0: i32) -> (i32, i32) {
    %c0_i32 = arith.constant 0 : i32
    %c0_i32_0 = arith.constant 0 : i32
    %c0_i32_1 = arith.constant 0 : i32
    return %c0_i32, %c0_i32_0 : i32, i32
  }
  func.func @transform_12(%arg0: i32) -> (i32, i32, i32) {
    %c0_i32 = arith.constant 0 : i32
    %c0_i32_0 = arith.constant 0 : i32
    %c0_i32_1 = arith.constant 0 : i32
    return %arg0, %c0_i32, %c0_i32_0 : i32, i32, i32
  }
}

</mosaic_0001>

<bundles_post_ra>
// kernel: tpu_custom_call.1
= control target key start
LH: loop header
LB: loop body
LE: loop exit
PB: predicated region body
PF: predicated region fallthrough
CT: control target
= control target key end

     0   :  { %s18765_s0 = inlined_call_operand.vmem [shape: f32[2,3,1024], index: 0, kind: input, shape index: {}]   ;;  %s18766_s1 = inlined_call_operand.vmem [shape: f32[9,8,3], index: 1, kind: input, shape index: {}]   ;;  %s18767_s2 = inlined_call_operand.vmem [shape: f32[8,1], index: 2, kind: input, shape index: {}]   ;;  %s18768_s3 = inlined_call_operand.vmem [shape: f32[9,16,8], index: 3, kind: input, shape index: {}]   ;;  %s18769_s4 = inlined_call_operand.vmem [shape: f32[16,1], index: 4, kind: input, shape index: {}]   ;;  %s18770_s5 = inlined_call_operand.vmem [shape: f32[9,24,16], index: 5, kind: input, shape index: {}]   ;;  %s18771_s6 = inlined_call_operand.vmem [shape: f32[24,1], index: 6, kind: input, shape index: {}]   ;;  %s18772_s7 = inlined_call_operand.vmem [shape: f32[1024,16], index: 7, kind: input, shape index: {}]   ;;  %s18773_s8 = inlined_call_operand.vmem [shape: f32[20,16,160], index: 8, kind: input, shape index: {}]   ;;  %s18774_s9 = inlined_call_operand.vmem [shape: f32[1,160], index: 9, kind: input, shape index: {}]   ;;  %s18775_s10 = inlined_call_operand.vmem [shape: f32[160,10], index: 10, kind: input, shape index: {}]   ;;  %s18776_s11 = inlined_call_operand.vmem [shape: f32[1,10], index: 11, kind: input, shape index: {}]   ;;  %s18777_s12 = inlined_call_operand.hbm [shape: f32[2,1,10], index: 12, kind: output, shape index: {}]  }
   0x1   :  { %19063 = sst [smem:[#allocation116_spill]] %s18765_s0 }
   0x2   :  { %19064 = sst [smem:[#allocation117_spill]] %s18766_s1 }
   0x3   :  { %17 = vsyncpa [#allocation3], 0 }
   0x4   :  { %19 = vsyncpa [#allocation3 + $0x1], 0  ;;  %s11514_s21 = smov 0   ;;  %s11516_s22 = smov 0  }
   0x5   :  { %s11518_s23 = smov 0   ;;  %s11520_s24 = smov 0  }
   0x6 LB: > { %s11535_s25 = sadd.s32 4294967295, %s11430_s24   ;;  %s10375_s26 = sadd.s32 4294967294, %s11430_s24   ;;  %s11430_s24 = sphi %s11520_s24, %s20873_s24   ;;  %s11426_s23 = sphi %s11518_s23, %s20872_s23   ;;  %s11422_s22 = sphi %s11516_s22, %s20871_s22   ;;  %s11418_s21 = sphi %s11514_s21, %s20870_s21  }
   0x7   : > { %s11539_s27 = sadd.s32 1, %s11430_s24   ;;  %s289_s28 = sadd.s32 1, %s11426_s23 }
   0x8   : > { %s286_s29 = ssub.s32 %s11430_s24, %s11539_s27  ;;  %p299_p0 = scmp.ne.s32.totalorder %s11426_s23, %s11422_s22 }
   0x9   : > { %p287_p1 = scmp.eq.s32.totalorder %s286_s29, 0  ;;  %p300_p2 = scmp.eq.s32.totalorder %s11535_s25, 1 }
   0xa   : > { %p305_p3 = scmp.ne.s32.totalorder %s11422_s22, %s11418_s21  ;;  %p306_p4 = scmp.eq.s32.totalorder %s10375_s26, 1 }
   0xb   : > { %s11550_s30 = scalar_select %p287_p1, %s11426_s23, %s289_s28  }
   0xc   : > { %p11552_p5 = por %p300_p2, %p299_p0  ;;  %p11556_p6 = por %p306_p4, %p305_p3 }
   0xd   : > { %p10378_p7 = scmp.ge.s32.totalorder %s11430_s24, 1  ;;  %p365_p8 = scmp.lt.s32.totalorder %s11430_s24, 3 }
   0xf   : > { %p366_p9 = pnand %p10378_p7, %p365_p8 }
  0x11   : > { %369 = sbr.rel (%p366_p9) target bundleno = 3069 (0xbfd), region = 68 }
  0x16   : > { %p406_p10 = scmp.lt.s32.totalorder %s11535_s25, 1  ;;  %s19067_s0 = sld [smem:[#allocation116_spill]]  ;;  %v411_v60 = vlaneseq  ;;  %vm18806_vm11 = vcmask 1042432  }
  0x17   : > { %s11432_s20 = smov 33   ;;  %s11433_s26 = smov 32  }
  0x18   : > { %s407_s15 = scalar_select %p406_p10, %s11535_s25, 1  ;;  %v11653_v61 = vand.u32 127, %v411_v60 }
  0x19   : > { %s11434_s28 = smov 31   ;;  %s11435_s29 = smov 1  }
  0x1a   : > { %s11244_s16 = sshll.u32 %s407_s15, 5  ;;  %s11436_s15 = smov 127   ;;  %19068 = vst [vmem:[#allocation5_spill] sm:$0xff] %v11653_v61  ;;  %v11658_v63 = vadd.s32 128, %v11653_v61  ;;  %vm18785_vm8 = vcmp.lt.s32.totalorder %v11653_v61, 32 }
  0x1b   : > { %s19082_s1 = sld [smem:[#allocation117_spill]]  ;;  %s11444_s17 = smov 62  }
  0x1c   : > { %s410_s19 = scalar_lea.vmem %s19067_s0, %s11244_s16  ;;  %19069 = vst [vmem:[#allocation6_spill] sm:$0xff] %v11658_v63  ;;  %s11437_s16 = smov 97  }
  0x1d   : > { %v11567_v0 = vld [vmem:[%s410_s19 + $0x8] sm:$0x77]  ;;  %v11569_v1 = vld [vmem:[%s410_s19] sm:$0x77]  ;;  %v11571_v2 = vld [vmem:[%s410_s19 + $0x18] sm:$0x77] }
  0x1e   : > { %446 = vst [vmem:[#allocation1 + $0x10] ss:$2 sm:$0xff] %v11567_v0  ;;  %v11574_v3 = vld [vmem:[%s410_s19 + $0x10] sm:$0x77]  ;;  %s11439_s19 = smov 96   ;;  %s11445_s18 = smov 2  }
  0x1f   : > { %444 = vst [vmem:[#allocation1] ss:$2 sm:$0xff] %v11569_v1 }
  0x20   : > { %450 = vst [vmem:[#allocation1 + $0x30] ss:$2 sm:$0xff] %v11571_v2 }
  0x21   : > { %448 = vst [vmem:[#allocation1 + $0x20] ss:$2 sm:$0xff] %v11574_v3 }
  0x25   : > { %v454_v4 = vld.sshfl [vmem:[#allocation1 + $0x18] sm:$0xff pattern:$0x75316420]  ;;  %v453_v5 = vld.sshfl [vmem:[#allocation1 + $0x10] sm:$0xff pattern:$0x75316420] }
  0x26   : > { %473 = vrot.lane.b32.xlu1 %v454_v4, %s11432_s20  ;;  %471 = vrot.lane.b32.xlu0 %v453_v5, %s11432_s20  ;;  %591 = vst [vmem:[#allocation1 + $0x10] ss:$2 sm:$0xff] %v11567_v0  ;;  %v451_v6 = vld.sshfl [vmem:[#allocation1] sm:$0xff pattern:$0x75316420]  ;;  %v11661_v4 = vadd.s32 256, %v11653_v61 }
  0x27   : > { %v452_v7 = vld.sshfl [vmem:[#allocation1 + $0x8] sm:$0xff pattern:$0x75316420]  ;;  %v457_v8 = vld.sshfl [vmem:[#allocation1 + $0x30] sm:$0xff pattern:$0x75316420] }
  0x28   : > { %589 = vst [vmem:[#allocation1] ss:$2 sm:$0xff] %v11569_v1  ;;  %v458_v9 = vld.sshfl [vmem:[#allocation1 + $0x38] sm:$0xff pattern:$0x75316420]  ;;  %v11664_v5 = vadd.s32 768, %v11653_v61 }
  0x29   : > { %595 = vst [vmem:[#allocation1 + $0x30] ss:$2 sm:$0xff] %v11571_v2  ;;  %v455_v10 = vld.sshfl [vmem:[#allocation1 + $0x20] sm:$0xff pattern:$0x75316420] }
  0x2a   : > { %v456_v11 = vld.sshfl [vmem:[#allocation1 + $0x28] sm:$0xff pattern:$0x75316420]  ;;  %19070 = vst [vmem:[#allocation7_spill] sm:$0xff] %v11661_v4 }
  0x2b   : > { %593 = vst [vmem:[#allocation1 + $0x20] ss:$2 sm:$0xff] %v11574_v3 }
  0x2c   : > { %19071 = vst [vmem:[#allocation8_spill] sm:$0xff] %v11664_v5 }
  0x2d   : > { %v598_v12 = vld.sshfl [vmem:[#allocation1 + $0x10] sm:$0xff pattern:$0x75316420]  ;;  %v599_v13 = vld.sshfl [vmem:[#allocation1 + $0x18] sm:$0xff pattern:$0x75316420] }
  0x2e   : > { %616 = vrot.lane.b32.xlu1 %v598_v12, %s11433_s26  ;;  %1073 = vst [vmem:[#allocation1 + $0x10] ss:$2 sm:$0xff] %v11567_v0  ;;  %v11686_v12 = vadd.s32 384, %v11653_v61 }
  0x2f   : > { %v597_v14 = vld.sshfl [vmem:[#allocation1 + $0x8] sm:$0xff pattern:$0x75316420]  ;;  %v596_v15 = vld.sshfl [vmem:[#allocation1] sm:$0xff pattern:$0x75316420] }
  0x30   : > { %614 = vrot.lane.b32.xlu2 %v597_v14, %s11433_s26  ;;  %612 = vrot.lane.b32.xlu0 %v596_v15, %s11433_s26  ;;  %1071 = vst [vmem:[#allocation1] ss:$2 sm:$0xff] %v11569_v1  ;;  %v602_v16 = vld.sshfl [vmem:[#allocation1 + $0x30] sm:$0xff pattern:$0x75316420] }
  0x31   : > { %v603_v17 = vld.sshfl [vmem:[#allocation1 + $0x38] sm:$0xff pattern:$0x75316420]  ;;  %19072 = vst [vmem:[#allocation9_spill] sm:$0xff] %v11686_v12 }
  0x32   : > { %1077 = vst [vmem:[#allocation1 + $0x30] ss:$2 sm:$0xff] %v11571_v2  ;;  %v601_v18 = vld.sshfl [vmem:[#allocation1 + $0x28] sm:$0xff pattern:$0x75316420] }
  0x33   : > { %v600_v19 = vld.sshfl [vmem:[#allocation1 + $0x20] sm:$0xff pattern:$0x75316420] }
  0x34   : > { %1075 = vst [vmem:[#allocation1 + $0x20] ss:$2 sm:$0xff] %v11574_v3 }
  0x35   : > { %v1081_v20 = vld.sshfl [vmem:[#allocation1 + $0x18] sm:$0xff pattern:$0x75316420]  ;;  %v1080_v21 = vld.sshfl [vmem:[#allocation1 + $0x10] sm:$0xff pattern:$0x75316420] }
  0x36   : > { %618 = vrot.lane.b32.xlu1 %v599_v13, %s11433_s26  ;;  %1382 = vst [vmem:[#allocation1 + $0x10] ss:$2 sm:$0xff] %v11567_v0 }
  0x37   : > { %v1079_v23 = vld.sshfl [vmem:[#allocation1 + $0x8] sm:$0xff pattern:$0x75316420]  ;;  %v1078_v26 = vld.sshfl [vmem:[#allocation1] sm:$0xff pattern:$0x75316420] }
  0x38   : > { %624 = vrot.lane.b32.xlu2 %v602_v16, %s11433_s26  ;;  %626 = vrot.lane.b32.xlu0 %v603_v17, %s11433_s26  ;;  %1380 = vst [vmem:[#allocation1] ss:$2 sm:$0xff] %v11569_v1  ;;  %v11692_v16 = vadd.s32 896, %v11653_v61  ;;  %v11696_v17 = vshra.s32 %v11686_v12, 5 }
  0x39   : > { %v1084_v22 = vld.sshfl [vmem:[#allocation1 + $0x30] sm:$0xff pattern:$0x75316420]  ;;  %v1085_v25 = vld.sshfl [vmem:[#allocation1 + $0x38] sm:$0xff pattern:$0x75316420] }
  0x3a   : > { %1386 = vst [vmem:[#allocation1 + $0x30] ss:$2 sm:$0xff] %v11571_v2 }
  0x3b   : > { %v1083_v24 = vld.sshfl [vmem:[#allocation1 + $0x28] sm:$0xff pattern:$0x75316420]  ;;  %v1082_v27 = vld.sshfl [vmem:[#allocation1 + $0x20] sm:$0xff pattern:$0x75316420] }
  0x3c   : > { %1384 = vst [vmem:[#allocation1 + $0x20] ss:$2 sm:$0xff] %v11574_v3 }
  0x3d   : > { %v1389_v28 = vld.sshfl [vmem:[#allocation1 + $0x10] sm:$0xff pattern:$0x75316420]  ;;  %v1390_v29 = vld.sshfl [vmem:[#allocation1 + $0x18] sm:$0xff pattern:$0x75316420] }
  0x3e   : > { %469 = vrot.lane.b32.xlu1 %v452_v7, %s11432_s20  ;;  %1693 = vst [vmem:[#allocation1 + $0x10] ss:$2 sm:$0xff] %v11567_v0  ;;  %v11671_v7 = vshra.s32 %v11661_v4, 5 }
  0x3f   : > { %v1388_v34 = vld.sshfl [vmem:[#allocation1 + $0x8] sm:$0xff pattern:$0x75316420]  ;;  %v1387_v37 = vld.sshfl [vmem:[#allocation1] sm:$0xff pattern:$0x75316420] }
  0x40   : > { %622 = vrot.lane.b32.xlu2 %v601_v18, %s11433_s26  ;;  %620 = vrot.lane.b32.xlu0 %v600_v19, %s11433_s26  ;;  %1691 = vst [vmem:[#allocation1] ss:$2 sm:$0xff] %v11569_v1  ;;  %v494_v14 = vadd.s32 4294967295, %v11671_v7  ;;  %v11706_v19 = vshra.s32 %v11692_v16, 5 }
  0x41   : > { %v1394_v30 = vld.sshfl [vmem:[#allocation1 + $0x38] sm:$0xff pattern:$0x75316420]  ;;  %v1393_v31 = vld.sshfl [vmem:[#allocation1 + $0x30] sm:$0xff pattern:$0x75316420] }
  0x42   : > { %1697 = vst [vmem:[#allocation1 + $0x30] ss:$2 sm:$0xff] %v11571_v2  ;;  %vm502_vm2 = vcmp.ge.s32.totalorder %v494_v14, 0  ;;  %vm510_vm3 = vcmp.lt.s32.totalorder %v494_v14, 32 }
  0x43   : > { %v1391_v35 = vld.sshfl [vmem:[#allocation1 + $0x20] sm:$0xff pattern:$0x75316420]  ;;  %v1392_v36 = vld.sshfl [vmem:[#allocation1 + $0x28] sm:$0xff pattern:$0x75316420]  ;;  %vm11730_vm7 = vmand %vm502_vm2, %vm510_vm3 }
  0x44   : > { %1695 = vst [vmem:[#allocation1 + $0x20] ss:$2 sm:$0xff] %v11574_v3 }
  0x45   : > { %v11599_v32 = vld.sshfl [vmem:[#allocation1 + $0x10] sm:$0xff pattern:$0x75316420]  ;;  %v11601_v33 = vld.sshfl [vmem:[#allocation1 + $0x18] sm:$0xff pattern:$0x75316420] }
  0x46   : > { %467 = vrot.lane.b32.xlu1 %v451_v6, %s11432_s20  ;;  %1895 = vst [vmem:[#allocation1 + $0x10] ss:$2 sm:$0xff] %v11567_v0  ;;  %v11668_v6 = vshra.s32 %v11658_v63, 5 }
  0x47   : > { %v11622_v42 = vld.sshfl [vmem:[#allocation1] sm:$0xff pattern:$0x75316420]  ;;  %v11624_v43 = vld.sshfl [vmem:[#allocation1 + $0x8] sm:$0xff pattern:$0x75316420] }
  0x48   : > { %479 = vrot.lane.b32.xlu2 %v457_v8, %s11432_s20  ;;  %481 = vrot.lane.b32.xlu0 %v458_v9, %s11432_s20  ;;  %1893 = vst [vmem:[#allocation1] ss:$2 sm:$0xff] %v11569_v1  ;;  %v11674_v8 = vshra.s32 %v11664_v5, 5  ;;  %v493_v13 = vadd.s32 4294967295, %v11668_v6 }
  0x49   : > { %v11612_v38 = vld.sshfl [vmem:[#allocation1 + $0x30] sm:$0xff pattern:$0x75316420]  ;;  %v11614_v39 = vld.sshfl [vmem:[#allocation1 + $0x38] sm:$0xff pattern:$0x75316420] }
  0x4a   : > { %1899 = vst [vmem:[#allocation1 + $0x30] ss:$2 sm:$0xff] %v11571_v2  ;;  %v498_v15 = vadd.s32 4294967295, %v11674_v8  ;;  %vm501_vm0 = vcmp.ge.s32.totalorder %v493_v13, 0  ;;  %vm509_vm1 = vcmp.lt.s32.totalorder %v493_v13, 32  ;;  %v11796_v13 = vld [vmem:[%s19082_s1 + $0x8] sm:$0xff] }
  0x4b   : > { %v11617_v40 = vld.sshfl [vmem:[#allocation1 + $0x20] sm:$0xff pattern:$0x75316420]  ;;  %v11619_v41 = vld.sshfl [vmem:[#allocation1 + $0x28] sm:$0xff pattern:$0x75316420]  ;;  %vm11740_vm9 = vmand %vm501_vm0, %vm509_vm1 }
  0x4c   : > { %1897 = vst [vmem:[#allocation1 + $0x20] ss:$2 sm:$0xff] %v11574_v3  ;;  %vm506_vm4 = vcmp.ge.s32.totalorder %v498_v15, 0  ;;  %vm514_vm5 = vcmp.lt.s32.totalorder %v498_v15, 32  ;;  %vm18778_vm1 = vcmask 23552  }
  0x4d   : > { %v1903_v46 = vld.sshfl [vmem:[#allocation1 + $0x18] sm:$0xff pattern:$0x75316420]  ;;  %v1902_v48 = vld.sshfl [vmem:[#allocation1 + $0x10] sm:$0xff pattern:$0x75316420]  ;;  %vm11720_vm6 = vmand %vm506_vm4, %vm514_vm5 }
  0x4e   : > { %1100 = vrot.lane.b32.xlu1 %v1081_v20, %s11434_s28  ;;  %2180 = vst [vmem:[#allocation1 + $0x10] ss:$2 sm:$0xff] %v11567_v0  ;;  %vm18789_vm5 = vcmp.lt.s32.totalorder %v11653_v61, 33 }
  0x4f   : > { %v1900_v47 = vld.sshfl [vmem:[#allocation1] sm:$0xff pattern:$0x75316420]  ;;  %v1901_v49 = vld.sshfl [vmem:[#allocation1 + $0x8] sm:$0xff pattern:$0x75316420] }
  0x50   : > { %477 = vrot.lane.b32.xlu2 %v456_v11, %s11432_s20  ;;  %1098 = vrot.lane.b32.xlu0 %v1080_v21, %s11434_s28  ;;  %2178 = vst [vmem:[#allocation1] ss:$2 sm:$0xff] %v11569_v1 }
  0x51   : > { %v1907_v50 = vld.sshfl [vmem:[#allocation1 + $0x38] sm:$0xff pattern:$0x75316420]  ;;  %v1906_v51 = vld.sshfl [vmem:[#allocation1 + $0x30] sm:$0xff pattern:$0x75316420] }
  0x52   : > { %2184 = vst [vmem:[#allocation1 + $0x30] ss:$2 sm:$0xff] %v11571_v2 }
  0x53   : > { %v1904_v44 = vld.sshfl [vmem:[#allocation1 + $0x20] sm:$0xff pattern:$0x75316420]  ;;  %v11630_v45 = vld.sshfl [vmem:[#allocation1 + $0x28] sm:$0xff pattern:$0x75316420] }
  0x54   : > { %2182 = vst [vmem:[#allocation1 + $0x20] ss:$2 sm:$0xff] %v11574_v3 }
  0x55   : > { %v2188_v52 = vld.sshfl [vmem:[#allocation1 + $0x18] sm:$0xff pattern:$0x75316420]  ;;  %v2187_v53 = vld.sshfl [vmem:[#allocation1 + $0x10] sm:$0xff pattern:$0x75316420] }
  0x56   : > { %1106 = vrot.lane.b32.xlu1 %v1084_v22, %s11434_s28  ;;  %2497 = vst [vmem:[#allocation1 + $0x10] ss:$2 sm:$0xff] %v11567_v0 }
  0x57   : > { %v2185_v54 = vld.sshfl [vmem:[#allocation1] sm:$0xff pattern:$0x75316420]  ;;  %v11639_v55 = vld.sshfl [vmem:[#allocation1 + $0x8] sm:$0xff pattern:$0x75316420] }
  0x58   : > { %475 = vrot.lane.b32.xlu2 %v455_v10, %s11432_s20  ;;  %1096 = vrot.lane.b32.xlu0 %v1079_v23, %s11434_s28  ;;  %2495 = vst [vmem:[#allocation1] ss:$2 sm:$0xff] %v11569_v1  ;;  %s11446_s20 = smov 126  }
  0x59   : > { %v2191_v57 = vld.sshfl [vmem:[#allocation1 + $0x30] sm:$0xff pattern:$0x75316420]  ;;  %v11646_v58 = vld.sshfl [vmem:[#allocation1 + $0x38] sm:$0xff pattern:$0x75316420] }
  0x5a   : > { %2501 = vst [vmem:[#allocation1 + $0x30] ss:$2 sm:$0xff] %v11571_v2 }
  0x5b   : > { %v11644_v56 = vld.sshfl [vmem:[#allocation1 + $0x28] sm:$0xff pattern:$0x75316420]  ;;  %v2189_v59 = vld.sshfl [vmem:[#allocation1 + $0x20] sm:$0xff pattern:$0x75316420] }
  0x5c   : > { %2499 = vst [vmem:[#allocation1 + $0x20] ss:$2 sm:$0xff] %v11574_v3 }
  0x5d   : > { %v11678_v9 = vld.sshfl [vmem:[#allocation1 + $0x18] sm:$0xff pattern:$0x75316420]  ;;  %v11680_v10 = vld.sshfl [vmem:[#allocation1 + $0x10] sm:$0xff pattern:$0x75316420] }
  0x5e   : > { %1104 = vrot.lane.b32.xlu1 %v1083_v24, %s11434_s28  ;;  %2782 = vst [vmem:[#allocation1 + $0x10] ss:$2 sm:$0xff] %v11567_v0  ;;  %v11717_v24 = vshra.s32 %v11653_v61, 5 }
  0x5f   : > { %19073 = vst [vmem:[#allocation10_spill] sm:$0xff] %v11692_v16 }
  0x60   : > { %1108 = vrot.lane.b32.xlu2 %v1085_v25, %s11434_s28  ;;  %1094 = vrot.lane.b32.xlu0 %v1078_v26, %s11434_s28  ;;  %v11724_v26 = vld.sshfl [vmem:[#allocation1] sm:$0xff pattern:$0x75316420] }
  0x61   : > { %v11708_v20 = vld.sshfl [vmem:[#allocation1 + $0x38] sm:$0xff pattern:$0x75316420]  ;;  %v11710_v21 = vld.sshfl [vmem:[#allocation1 + $0x30] sm:$0xff pattern:$0x75316420] }
  0x62   : > { %2786 = vst [vmem:[#allocation1 + $0x30] ss:$2 sm:$0xff] %v11571_v2 }
  0x63   : > { %v11714_v23 = vld.sshfl [vmem:[#allocation1 + $0x20] sm:$0xff pattern:$0x75316420] }
  0x66   : > { %1102 = vrot.lane.b32.xlu1 %v1082_v27, %s11434_s28  ;;  %v11726_v27 = vld.sshfl [vmem:[#allocation1 + $0x8] sm:$0xff pattern:$0x75316420]  ;;  %s11440_s28 = smov 95  }
  0x67   : > { %2780 = vst [vmem:[#allocation1] ss:$2 sm:$0xff] %v11569_v1  ;;  %v18823_v1 = vmov 0.0  }
  0x68   : > { %1407 = vrot.lane.b32.xlu2 %v1389_v28, %s11435_s29  ;;  %1409 = vrot.lane.b32.xlu0 %v1390_v29, %s11435_s29  ;;  %v495_v28 = vadd.s32 4294967295, %v11696_v17 }
  0x6a   : > { %vm503_vm10 = vcmp.ge.s32.totalorder %v495_v28, 0  ;;  %vm511_vm14 = vcmp.lt.s32.totalorder %v495_v28, 32 }
  0x6b   : > { %vm11823_vm4 = vmand %vm503_vm10, %vm511_vm14 }
  0x6e   : > { %1417 = vrot.lane.b32.xlu1 %v1394_v30, %s11435_s29  ;;  %v11735_v30 = vld.sshfl [vmem:[#allocation1 + $0x28] sm:$0xff pattern:$0x75316420] }
  0x6f   : > { %2784 = vst [vmem:[#allocation1 + $0x20] ss:$2 sm:$0xff] %v11574_v3  ;;  %v18781_v3 = vand.u32 31, %v11686_v12 }
  0x70   : > { %1415 = vrot.lane.b32.xlu0 %v1393_v31, %s11435_s29  ;;  %1405 = vrot.lane.b32.xlu2 %v1388_v34, %s11435_s29  ;;  %v499_v31 = vadd.s32 4294967295, %v11706_v19 }
  0x72   : > { %vm507_vm12 = vcmp.ge.s32.totalorder %v499_v31, 0  ;;  %vm515_vm13 = vcmp.lt.s32.totalorder %v499_v31, 32 }
  0x73   : > { %vm11804_vm2 = vmand %vm507_vm12, %vm515_vm13 }
  0x74   : > { %v10396_v28 = vsel %vm11804_vm2, 1.0, %v18823_v1 }
  0x76   : > { %1411 = vrot.lane.b32.xlu1 %v1391_v35, %s11435_s29  ;;  %v10395_v35 = vsel %vm11720_vm6, 1.0, %v18823_v1 }
  0x78   : > { %1413 = vrot.lane.b32.xlu0 %v1392_v36, %s11435_s29  ;;  %1403 = vrot.lane.b32.xlu2 %v1387_v37, %s11435_s29  ;;  %v11755_v36 = vadd.s32 512, %v11653_v61  ;;  %v11758_v37 = vadd.s32 640, %v11653_v61 }
  0x7a   : > { %19080 = vst [vmem:[#allocation11_spill] sm:$0xff] %v11755_v36 }
  0x7b   : > { %19081 = vst [vmem:[#allocation12_spill] sm:$0xff] %v11758_v37 }
  0x7e   : > { %1916 = vrot.lane.b32.xlu1 %v1900_v47, %s11436_s15  ;;  %v10390_v47 = vsel %vm11740_vm9, 1.0, %v18823_v1 }
  0x80   : > { %1924 = vrot.lane.b32.xlu0 %v1904_v44, %s11436_s15  ;;  %1922 = vrot.lane.b32.xlu2 %v1903_v46, %s11436_s15  ;;  %v10391_v44 = vsel %vm11730_vm7, 1.0, %v18823_v1 }
  0x86   : > { %1918 = vrot.lane.b32.xlu1 %v1901_v49, %s11436_s15 }
  0x88   : > { %1930 = vrot.lane.b32.xlu0 %v1907_v50, %s11436_s15  ;;  %1920 = vrot.lane.b32.xlu2 %v1902_v48, %s11436_s15  ;;  %v18779_v48 = vand.u32 31, %v11664_v5 }
  0x8a   : > { %v11655_v62 = vpop.permute.xlu2 %614  ;;  %v11800_v14 = vadd.s32 4294967295, %v18779_v48 }
  0x8c   : > { %vm18782_vm10 = vcmp.ge.s32.totalorder %v11800_v14, 0 }
  0x8e   : > { %2209 = vrot.lane.b32.xlu1 %v2189_v59, %s11437_s16  ;;  %v11790_v59 = vadd.s32 4294967295, %v18781_v3 }
  0x90   : > { %2207 = vrot.lane.b32.xlu0 %v2188_v52, %s11437_s16  ;;  %1928 = vrot.lane.b32.xlu2 %v1906_v51, %s11436_s15  ;;  %v18780_v51 = vand.u32 31, %v11661_v4 }
  0x92   : > { %v11683_v11 = vpop.permute.xlu2 %624  ;;  %v11810_v15 = vadd.s32 4294967295, %v18780_v51 }
  0x94   : > { %vm18784_vm12 = vcmp.ge.s32.totalorder %v11810_v15, 0 }
  0x96   : > { %2205 = vrot.lane.b32.xlu1 %v2187_v53, %s11437_s16 }
  0x98   : > { %1926 = vrot.lane.b32.xlu2 %v11630_v45, %s11436_s15  ;;  %2201 = vrot.lane.b32.xlu0 %v2185_v54, %s11437_s16  ;;  %v11701_v0 = vpop.permute.xlu1 %473  ;;  %v11703_v18 = vpop.permute.xlu0 %471  ;;  %v492_v45 = vadd.s32 4294967295, %v11717_v24 }
  0x9a   : > { %v11712_v22 = vpop.permute.xlu2 %622  ;;  %vm500_vm15 = vcmp.ge.s32.totalorder %v492_v45, 0  ;;  %vm508_vm0 = vcmp.lt.s32.totalorder %v492_v45, 32 }
  0x9b   : > { %v630_v34 = vsel %vm18785_vm8, %v11712_v22, %v11683_v11  ;;  %vm11815_vm3 = vmand %vm500_vm15, %vm508_vm0 }
  0x9c   : > { %v691_v50 = vmul.f32 %v10395_v35, %v630_v34  ;;  %vm546_vm0 = vmand %vm11720_vm6, %vm18782_vm10  ;;  %v2793_v34 = vld.sshfl [vmem:[#allocation1 + $0x30] sm:$0xff pattern:$0x75316420] }
  0x9d   : > { %vm542_vm10 = vmand %vm11730_vm7, %vm18784_vm12 }
  0x9e   : > { %2213 = vrot.lane.b32.xlu1 %v2191_v57, %s11437_s16  ;;  %v11783_v57 = vshra.s32 %v11758_v37, 5 }
  0xa0   : > { %2203 = vrot.lane.b32.xlu0 %v11639_v55, %s11437_s16  ;;  %v617_v46 = vpop.permute.xlu1 %616  ;;  %2215 = vrot.lane.b32.xlu2 %v11646_v58, %s11437_s16  ;;  %v11780_v55 = vshra.s32 %v11755_v36, 5  ;;  %v497_v31 = vadd.s32 4294967295, %v11783_v57 }
  0xa1   : > { %v634_v49 = vsel %vm18785_vm8, %v11655_v62, %v617_v46 }
  0xa2   : > { %v11777_v52 = vpop.permute.xlu2 %479  ;;  %v613_v53 = vpop.permute.xlu0 %612  ;;  %v687_v54 = vmul.f32 %v10391_v44, %v634_v49  ;;  %v496_v35 = vadd.s32 4294967295, %v11780_v55 }
  0xa3   : > { %v635_v58 = vsel %vm18785_vm8, %v613_v53, %v11655_v62  ;;  %v2788_v62 = vld.sshfl [vmem:[#allocation1 + $0x8] sm:$0xff pattern:$0x75316420] }
  0xa4   : > { %v686_v60 = vmul.f32 %v10390_v47, %v635_v58  ;;  %10402 = vmatpush.msk.msra.mxu2 %vm18806_vm11, %v687_v54  ;;  %v10392_v47 = vsel %vm11823_vm4, 1.0, %v18823_v1  ;;  %vm504_vm13 = vcmp.ge.s32.totalorder %v496_v35, 0  ;;  %vm512_vm15 = vcmp.lt.s32.totalorder %v496_v35, 32 }
  0xa5   : > { %10403 = vmatmul.msk.f32.vlgmr.msra.gmra.mxu2 %vm18778_vm1, %v11796_v13  ;;  %vm11874_vm14 = vmand %vm504_vm13, %vm512_vm15  ;;  %vm19091_vm13 = vcmp.ge.s32.totalorder %v497_v31, 0 }
  0xa6   : > { %10410 = vmatpush.msk.msrb.mxu2 %vm18806_vm11, %v691_v50  ;;  %10400 = vmatpush.msk.msra.mxu1 %vm18806_vm11, %v686_v60  ;;  %v18787_v50 = vand.u32 31, %v11658_v63 }
  0xa7   : > { %2211 = vrot.lane.b32.xlu1 %v11644_v56, %s11437_s16  ;;  %10401 = vmatmul.msk.f32.vlgmr.msra.gmra.mxu1 %vm18778_vm1, %v11796_v13  ;;  %v18783_v56 = vand.u32 31, %v11758_v37  ;;  %vm513_vm1 = vcmp.lt.s32.totalorder %v497_v31, 32  ;;  %v19099_v31 = vand.u32 31, %v11653_v61 }
  0xa8   : > { %2526 = vrot.lane.b32.xlu0 %v11714_v23, %s11439_s19  ;;  %v619_v45 = vpop.permute.xlu1 %618  ;;  %2524 = vrot.lane.b32.xlu2 %v11678_v9, %s11439_s19  ;;  %v10389_v23 = vsel %vm11815_vm3, 1.0, %v18823_v1  ;;  %v18786_v9 = vand.u32 31, %v11755_v36  ;;  %v11880_v48 = vadd.s32 4294967295, %v18787_v50  ;;  %vm11892_vm15 = vmand %vm19091_vm13, %vm513_vm1 }
  0xa9   : > { %v633_v49 = vsel %vm18785_vm8, %v617_v46, %v619_v45  ;;  %v11862_v60 = vadd.s32 4294967295, %v18783_v56 }
  0xaa   : > { %v11851_v54 = vpop.permute.xlu2 %477  ;;  %v627_v58 = vpop.permute.xlu0 %626  ;;  %v688_v3 = vmul.f32 %v10392_v47, %v633_v49  ;;  %v19092_v49 = vmov 0 }
  0xab   : > { %v636_v46 = vsel %vm18785_vm8, %v627_v58, %v613_v53  ;;  %v629_v51 = vsel %vm18785_vm8, %v11683_v11, %v627_v58  ;;  %v18788_v53 = vand.u32 31, %v11692_v16  ;;  %v10387_v11 = vsel %vm546_vm0, 1.0, %v18823_v1 }
  0xac   : > { %v685_v35 = vmul.f32 %v10389_v23, %v636_v46  ;;  %v485_v47 = vsel %vm18789_vm5, %v11851_v54, %v11777_v52  ;;  %v19093_v49 = vsel %vm11892_vm15, 4294967295, %v19092_v49  ;;  %v11898_v23 = vadd.s32 4294967295, %v18786_v9 }
  0xad   : > { %vm19094_vm0 = vcmp.ge.s32.totalorder %v11790_v59, 0  ;;  %v692_v46 = vmul.f32 %v10396_v28, %v629_v51  ;;  %vm19097_vm8 = vcmask 23552   ;;  %vm18790_vm13 = vcmp.ge.s32.totalorder %v11862_v60, 0 }
  0xae   : > { %10398 = vmatpush.msk.msra.mxu3 %vm18806_vm11, %v685_v35  ;;  %vm11904_vm12 = vmand %vm11823_vm4, %vm19094_vm0  ;;  %v11915_v35 = vadd.s32 4294967295, %v19099_v31  ;;  %v10393_v51 = vsel %vm11874_vm14, 1.0, %v18823_v1  ;;  %v11926_v28 = vadd.s32 4294967295, %v18788_v53  ;;  %v586_v50 = vmul.f32 %v10387_v11, %v485_v47 }
  0xaf   : > { %2532 = vrot.lane.b32.xlu1 %v11708_v20, %s11439_s19  ;;  %10399 = vmatmul.msk.f32.vlgmr.msra.gmra.mxu3 %vm19097_vm8, %v11796_v13  ;;  %vm19098_vm1 = vmmov %vm19097_vm8  ;;  %v10383_v20 = vsel %vm542_vm10, 1.0, %v18823_v1  ;;  %vm18792_vm8 = vcmp.ge.s32.totalorder %v11880_v48, 0  ;;  %v10384_v31 = vsel %vm11904_vm12, 1.0, %v18823_v1 }
  0xb0   : > { %10411 = vmatmul.msk.f32.vlgmr.msrb.gmra.mxu2 %vm19098_vm1, %v11796_v13  ;;  %10404 = vmatpush.msk.msrb.mxu3 %vm18806_vm11, %v688_v3  ;;  %v470_v9 = vpop.permute.xlu1 %469  ;;  %vm545_vm0 = vmand %vm11892_vm15, %vm18790_vm13  ;;  %vm19100_vm1 = vcmp.lt.s32.totalorder %v11653_v61, 32  ;;  %vm18794_vm10 = vcmp.ge.s32.totalorder %v11915_v35, 0 }
  0xb1   : > { %2522 = vrot.lane.b32.xlu0 %v11680_v10, %s11439_s19  ;;  %v489_v3 = vsel %vm18789_vm5, %v470_v9, %v11703_v18  ;;  %2518 = vrot.lane.b32.xlu2 %v11724_v26, %s11439_s19  ;;  %v10394_v10 = vsel %vm11892_vm15, 1.0, %v18823_v1  ;;  %v488_v26 = vsel %vm18789_vm5, %v11703_v18, %v11701_v0  ;;  %vm19101_vm12 = vmmov %vm19100_vm1  ;;  %vm19102_vm15 = vcmp.ge.s32.totalorder %v11898_v23, 0 }
  0xb2   : > { %10412 = vmatpush.msk.msra.mxu3 %vm18806_vm11, %v692_v46  ;;  %v582_v11 = vmul.f32 %v10383_v20, %v489_v3  ;;  %v476_v47 = vpop.permute.xlu2 %475  ;;  %v621_v46 = vpop.permute.xlu0 %620  ;;  %vm541_vm5 = vmand %vm11740_vm9, %vm18792_vm8  ;;  %vm19106_vm8 = vcmask 23552  }
  0xb3   : > { %v631_v58 = vsel %vm19100_vm1, %v621_v46, %v11712_v22  ;;  %v632_v20 = vsel %vm19101_vm12, %v619_v45, %v621_v46  ;;  %vm11966_vm1 = vmand %vm11874_vm14, %vm19102_vm15  ;;  %v583_v22 = vmul.f32 %v10384_v31, %v488_v26  ;;  %v10386_v45 = vsel %vm545_vm0, 1.0, %v18823_v1 }
  0xb4   : > { %v689_v3 = vmul.f32 %v10393_v51, %v632_v20  ;;  %v690_v53 = vmul.f32 %v10394_v10, %v631_v58  ;;  %10418 = vmatpush.msk.msra.mxu2 %vm18806_vm11, %v582_v11  ;;  %vm19105_vm12 = vcmp.lt.s32.totalorder %v11653_v61, 33  ;;  %v2790_v10 = vld.sshfl [vmem:[#allocation1 + $0x18] sm:$0xff pattern:$0x75316420]  ;;  %vm540_vm15 = vmand %vm11815_vm3, %vm18794_vm10  ;;  %vm19108_vm0 = vcmp.ge.s32.totalorder %v11926_v28, 0 }
  0xb5   : > { %v486_v51 = vsel %vm19105_vm12, %v476_v47, %v11851_v54  ;;  %vm19107_vm13 = vmmov %vm19106_vm8  ;;  %v10382_v54 = vsel %vm541_vm5, 1.0, %v18823_v1  ;;  %vm19110_vm5 = vcmp.lt.s32.totalorder %v11653_v61, 33  ;;  %v10381_v58 = vsel %vm540_vm15, 1.0, %v18823_v1 }
  0xb6   : > { %10426 = vmatpush.msk.msrb.mxu2 %vm18806_vm11, %v586_v50  ;;  %10406 = vmatpush.msk.msra.mxu0 %vm18806_vm11, %v689_v3  ;;  %v11988_v50 = vld [vmem:[%s19082_s1] sm:$0xff]  ;;  %vm547_vm12 = vmand %vm11804_vm2, %vm19108_vm0  ;;  %v585_v46 = vmul.f32 %v10386_v45, %v486_v51  ;;  %v10385_v20 = vsel %vm11966_vm1, 1.0, %v18823_v1 }
  0xb7   : > { %10408 = vmatpush.msk.msrb.mxu1 %vm18806_vm11, %v690_v53  ;;  %10405 = vmatmul.msk.f32.vlgmr.msrb.gmra.mxu3 %vm19106_vm8, %v11796_v13  ;;  %v19109_v53 = vand.u32 31, %v11686_v12  ;;  %v10388_v45 = vsel %vm547_vm12, 1.0, %v18823_v1  ;;  %vm19112_vm0 = vmmov %vm19110_vm5 }
  0xb8   : > { %10407 = vmatmul.msk.f32.vlgmr.msra.gmra.mxu0 %vm19107_vm13, %v11796_v13  ;;  %10409 = vmatmul.msk.f32.vlgmr.msrb.gmra.mxu1 %vm19106_vm8, %v11796_v13  ;;  %v468_v11 = vpop.permute.xlu1 %467  ;;  %vm19111_vm13 = vmmov %vm19106_vm8 }
  0xb9   : > { %v11997_v31 = vadd.s32 1, %v19109_v53  ;;  %10420 = vmatpush.msk.msrb.mxu3 %vm18806_vm11, %v583_v22  ;;  %2809 = vrot.lane.b32.xlu1 %v2790_v10, %s11440_s28  ;;  %v490_v26 = vsel %vm19110_vm5, %v468_v11, %v470_v9  ;;  %vm19113_vm15 = vmmov %vm19112_vm0  ;;  %v19118_v53 = vand.u32 31, %v11661_v4 }
  0xba   : > { %2530 = vrot.lane.b32.xlu0 %v11710_v21, %s11439_s19  ;;  %10419 = vmatmul.msk.f32.vlgmr.msra.gmra.mxu2 %vm19111_vm13, %v11988_v50  ;;  %v581_v3 = vmul.f32 %v10382_v54, %v490_v26  ;;  %v12013_v22 = vpop.permute.xlu2 %1108  ;;  %v482_v51 = vpop.permute.xlu0 %481  ;;  %v487_v21 = vsel %vm19112_vm0, %v11701_v0, %v476_v47  ;;  %vm19114_vm1 = vmmov %vm19112_vm0  ;;  %v19115_v0 = vand.u32 31, %v11692_v16  ;;  %v2787_v47 = vld.sshfl [vmem:[#allocation1] sm:$0xff pattern:$0x75316420] }
  0xbb   : > { %2520 = vrot.lane.b32.xlu2 %v11726_v27, %s11439_s19  ;;  %v484_v9 = vsel %vm19113_vm15, %v11777_v52, %v482_v51  ;;  %v491_v18 = vsel %vm19114_vm1, %v482_v51, %v468_v11  ;;  %vm18793_vm8 = vcmp.lt.s32.totalorder %v11997_v31, 32  ;;  %v584_v27 = vmul.f32 %v10385_v20, %v487_v21  ;;  %vm19116_vm5 = vmmov %vm19111_vm13 }
  0xbc   : > { %v580_v10 = vmul.f32 %v10381_v58, %v491_v18  ;;  %10416 = vmatpush.msk.msra.mxu1 %vm18806_vm11, %v581_v3  ;;  %v587_v54 = vmul.f32 %v10388_v45, %v484_v9  ;;  %vm1154_vm12 = vmand %vm11823_vm4, %vm18793_vm8  ;;  %v12036_v52 = vadd.s32 1, %v19115_v0  ;;  %v12044_v11 = vadd.s32 1, %v19118_v53  ;;  %v2794_v9 = vld.sshfl [vmem:[#allocation1 + $0x38] sm:$0xff pattern:$0x75316420] }
  0xbd   : > { %vm19117_vm13 = vmmov %vm19116_vm5  ;;  %vm1110_vm4 = vcmp.lt.s32.totalorder %v11653_v61, 31  ;;  %v19121_v3 = vand.u32 31, %v11664_v5  ;;  %v19122_v51 = vand.u32 31, %v11653_v61  ;;  %v19123_v18 = vand.u32 31, %v11658_v63 }
  0xbe   : > { %10424 = vmatpush.msk.msrb.mxu1 %vm18806_vm11, %v585_v46  ;;  %10414 = vmatpush.msk.msrb.mxu0 %vm18806_vm11, %v580_v10  ;;  %vm19119_vm0 = vmmov %vm19116_vm5  ;;  %v2791_v46 = vld.sshfl [vmem:[#allocation1 + $0x20] sm:$0xff pattern:$0x75316420]  ;;  %vm18795_vm1 = vcmp.lt.s32.totalorder %v12036_v52, 32  ;;  %vm19124_vm8 = vcmask 23552  }
  0xbf   : > { %10413 = vmatmul.msk.f32.vlgmr.msra.gmra.mxu3 %vm19116_vm5, %v11796_v13  ;;  %v10433_v13 = vsel %vm1154_vm12, 1.0, %v18823_v1  ;;  %vm19120_vm15 = vmmov %vm19119_vm0  ;;  %vm18805_vm5 = vcmp.lt.s32.totalorder %v12044_v11, 32  ;;  %vm1430_vm12 = vcmp.ge.s32.totalorder %v11671_v7, 0  ;;  %v12071_v45 = vadd.s32 1, %v19121_v3 }
  0xc0   : > { %10415 = vmatmul.msk.f32.vlgmr.msrb.gmra.mxu0 %vm19117_vm13, %v11988_v50  ;;  %10417 = vmatmul.msk.f32.vlgmr.msra.gmra.mxu1 %vm19119_vm0, %v11988_v50  ;;  %v12049_v44 = vpop.permute.xlu1 %1100  ;;  %vm1438_vm13 = vcmp.lt.s32.totalorder %v11671_v7, 32  ;;  %vm1158_vm0 = vmand %vm11804_vm2, %vm18795_vm1  ;;  %v12079_v21 = vadd.s32 1, %v19122_v51  ;;  %v12087_v10 = vadd.s32 1, %v19123_v18  ;;  %v19132_v3 = vand.u32 31, %v11755_v36  ;;  %v12135_v18 = vld [vmem:[%s19082_s1 + $0x10] sm:$0xff] }
  0xc1   : > { %10422 = vmatpush.msk.msra.mxu0 %vm18806_vm11, %v584_v27  ;;  %10428 = vmatpush.msk.msra.mxu3 %vm18806_vm11, %v587_v54  ;;  %vm19125_vm10 = vmmov %vm19124_vm8  ;;  %v2789_v27 = vld.sshfl [vmem:[#allocation1 + $0x10] sm:$0xff pattern:$0x75316420]  ;;  %v10437_v0 = vsel %vm1158_vm0, 1.0, %v18823_v1 }
  0xc2   : > { %2528 = vrot.lane.b32.xlu0 %v11735_v30, %s11439_s19  ;;  %2803 = vrot.lane.b32.xlu1 %v2787_v47, %s11440_s28  ;;  %v12059_v26 = vpop.permute.xlu2 %1407  ;;  %v1099_v58 = vpop.permute.xlu0 %1098  ;;  %vm12093_vm2 = vmand %vm1430_vm12, %vm1438_vm13  ;;  %vm18797_vm13 = vcmp.lt.s32.totalorder %v12087_v10, 32  ;;  %v12130_v51 = vadd.s32 1, %v19132_v3 }
  0xc3   : > { %10427 = vmatmul.msk.f32.vlgmr.msrb.gmra.mxu2 %vm19120_vm15, %v11988_v50  ;;  %v1115_v20 = vsel %vm1110_vm4, %v1099_v58, %v12049_v44  ;;  %2811 = vrot.lane.b32.xlu2 %v2791_v46, %s11440_s28  ;;  %vm1153_vm15 = vmand %vm11730_vm7, %vm18805_vm5  ;;  %vm18796_vm7 = vcmp.lt.s32.totalorder %v12071_v45, 32  ;;  %vm1435_vm5 = vcmp.ge.s32.totalorder %v11706_v19, 0 }
  0xc4   : > { %v1178_v30 = vmul.f32 %v10433_v13, %v1115_v20  ;;  %vm19128_vm1 = vmmov %vm19124_vm8  ;;  %v10432_v53 = vsel %vm1153_vm15, 1.0, %v18823_v1  ;;  %vm1429_vm15 = vcmp.ge.s32.totalorder %v11668_v6, 0 }
  0xc5   : > { %vm12122_vm0 = vmand %vm11720_vm6, %vm18796_vm7 }
  0xc6   : > { %vm12145_vm7 = vmand %vm11740_vm9, %vm18797_vm13  ;;  %vm19138_vm9 = vcmask 23552   ;;  %v10436_v2 = vsel %vm12122_vm0, 1.0, %v18823_v1 }
  0xc7   : > { %10421 = vmatmul.msk.f32.vlgmr.msrb.gmra.mxu3 %vm19124_vm8, %v11988_v50  ;;  %vm18807_vm8 = vcmp.lt.s32.totalorder %v11653_v61, 1  ;;  %vm19139_vm13 = vmmov %vm19138_vm9 }
  0xc8   : > { %10423 = vmatmul.msk.f32.vlgmr.msra.gmra.mxu0 %vm19125_vm10, %v11988_v50  ;;  %10425 = vmatmul.msk.f32.vlgmr.msrb.gmra.mxu1 %vm19128_vm1, %v11988_v50  ;;  %v1107_v29 = vpop.permute.xlu1 %1106  ;;  %vm18804_vm10 = vcmp.lt.s32.totalorder %v12079_v21, 32  ;;  %vm19129_vm1 = vcmp.ge.s32.totalorder %v11810_v15, 0 }
  0xc9   : > { %10445 = vmatpush.msk.msrb.mxu3 %vm18806_vm11, %v1178_v30  ;;  %v1111_v47 = vsel %vm1110_vm4, %v1107_v29, %v12013_v22  ;;  %vm1454_vm12 = vmand %vm12093_vm2, %vm19129_vm1  ;;  %vm1437_vm1 = vcmp.lt.s32.totalorder %v11668_v6, 32  ;;  %v10431_v30 = vsel %vm12145_vm7, 1.0, %v18823_v1 }
  0xca   : > { %2817 = vrot.lane.b32.xlu0 %v2794_v9, %s11440_s28  ;;  %2805 = vrot.lane.b32.xlu1 %v2788_v62, %s11440_s28  ;;  %v1097_v46 = vpop.permute.xlu0 %1096  ;;  %v1406_v13 = vpop.permute.xlu2 %1405  ;;  %v1182_v9 = vmul.f32 %v10437_v0, %v1111_v47  ;;  %vm1151_vm6 = vmand %vm11815_vm3, %vm18804_vm10  ;;  %v19135_v62 = vand.u32 31, %v11758_v37  ;;  %v10457_v0 = vsel %vm1454_vm12, 1.0, %v18823_v1  ;;  %vm18802_vm12 = vcmp.lt.s32.totalorder %v12130_v51, 32 }
  0xcb   : > { %v1116_v20 = vsel %vm1110_vm4, %v1097_v46, %v1099_v58  ;;  %2807 = vrot.lane.b32.xlu2 %v2789_v27, %s11440_s28  ;;  %v1425_v47 = vsel %vm18807_vm8, %v1406_v13, %v12059_v26  ;;  %vm12158_vm3 = vmand %vm1429_vm15, %vm1437_vm1  ;;  %v10430_v3 = vsel %vm1151_vm6, 1.0, %v18823_v1  ;;  %vm1431_vm15 = vcmp.ge.s32.totalorder %v11696_v17, 0 }
  0xcc   : > { %v1177_v58 = vmul.f32 %v10432_v53, %v1116_v20  ;;  %v12151_v27 = vadd.s32 1, %v19135_v62  ;;  %v19136_v53 = vmov 0  ;;  %vm1439_vm1 = vcmp.lt.s32.totalorder %v11696_v17, 32 }
  0xcd   : > { %v19137_v53 = vsel %vm12158_vm3, 4294967295, %v19136_v53  ;;  %vm12201_vm7 = vmand %vm1431_vm15, %vm1439_vm1  ;;  %vm19146_vm15 = vcmp.ge.s32.totalorder %v11790_v59, 0 }
  0xce   : > { %10443 = vmatpush.msk.msra.mxu2 %vm18806_vm11, %v1177_v58  ;;  %v2792_v58 = vld.sshfl [vmem:[#allocation1 + $0x28] sm:$0xff pattern:$0x75316420]  ;;  %vm18803_vm6 = vcmp.lt.s32.totalorder %v12151_v27, 32  ;;  %vm1455_vm1 = vmand %vm12201_vm7, %vm19146_vm15 }
  0xcf   : > { %10429 = vmatmul.msk.f32.vlgmr.msra.gmra.mxu3 %vm19138_vm9, %v11988_v50  ;;  %10444 = vmatmul.msk.f32.vlgmr.msra.gmra.mxu2 %vm19139_vm13, %v12135_v18  ;;  %v1486_v50 = vmul.f32 %v10457_v0, %v1425_v47  ;;  %vm19140_vm13 = vcmp.ge.s32.totalorder %v11880_v48, 0  ;;  %vm12189_vm9 = vmand %vm11874_vm14, %vm18802_vm12  ;;  %vm19145_vm14 = vnez %v19093_v49  ;;  %vm1428_vm12 = vcmp.ge.s32.totalorder %v11717_v24, 0 }
  0xd0   : > { %10453 = vmatpush.msk.msra.mxu3 %vm18806_vm11, %v1182_v9  ;;  %v1105_v20 = vpop.permute.xlu1 %1104  ;;  %vm1453_vm0 = vmand %vm12158_vm3, %vm19140_vm13  ;;  %v10434_v49 = vsel %vm12189_vm9, 1.0, %v18823_v1 }
  0xd1   : > { %v1112_v62 = vsel %vm1110_vm4, %v1105_v20, %v1107_v29  ;;  %vm1156_vm13 = vmand %vm19145_vm14, %vm18803_vm6  ;;  %vm1436_vm14 = vcmp.lt.s32.totalorder %v11717_v24, 32  ;;  %vm19147_vm6 = vcmask 23552  }
  0xd2   : > { %2815 = vrot.lane.b32.xlu0 %v2793_v34, %s11440_s28  ;;  %v1181_v9 = vmul.f32 %v10436_v2, %v1112_v62  ;;  %v1095_v36 = vpop.permute.xlu0 %1094  ;;  %v1404_v37 = vpop.permute.xlu2 %1403 }
  0xd3   : > { %v1117_v25 = vsel %vm1110_vm4, %v1095_v36, %v1097_v46  ;;  %v1118_v0 = vsel %vm1110_vm4, %v12013_v22, %v1095_v36  ;;  %2813 = vrot.lane.b32.xlu2 %v2792_v58, %s11440_s28  ;;  %v10456_v36 = vsel %vm1453_vm0, 1.0, %v18823_v1  ;;  %v1426_v22 = vsel %vm18807_vm8, %v1404_v37, %v1406_v13  ;;  %vm19148_vm0 = vmmov %vm19147_vm6 }
  0xd4   : > { %v1175_v56 = vmul.f32 %v10430_v3, %v1118_v0  ;;  %v1176_v34 = vmul.f32 %v10431_v30, %v1117_v25  ;;  %10451 = vmatpush.msk.msrb.mxu2 %vm18806_vm11, %v1181_v9  ;;  %v10435_v46 = vsel %vm1156_vm13, 1.0, %v18823_v1  ;;  %vm19149_vm10 = vmmov %vm19148_vm0  ;;  %v1485_v2 = vmul.f32 %v10456_v36, %v1426_v22 }
  0xd5   : > { %vm19150_vm15 = vmmov %vm19148_vm0  ;;  %v19153_v0 = vmov 0 }
  0xd6   : > { %10468 = vmatpush.msk.msra.mxu2 %vm18806_vm11, %v1486_v50  ;;  %10439 = vmatpush.msk.msrb.mxu0 %vm18806_vm11, %v1175_v56  ;;  %v10458_v50 = vsel %vm1455_vm1, 1.0, %v18823_v1  ;;  %v10463_v56 = vld [vmem:[%s19082_s1 + $0x18] sm:$0xff]  ;;  %vm1432_vm1 = vcmp.ge.s32.totalorder %v11780_v55, 0 }
  0xd7   : > { %10441 = vmatpush.msk.msra.mxu1 %vm18806_vm11, %v1176_v34  ;;  %10440 = vmatmul.msk.f32.vlgmr.msrb.gmra.mxu0 %vm19147_vm6, %v12135_v18  ;;  %vm1443_vm6 = vcmp.lt.s32.totalorder %v11706_v19, 32 }
  0xd8   : > { %10442 = vmatmul.msk.f32.vlgmr.msra.gmra.mxu1 %vm19148_vm0, %v12135_v18  ;;  %10446 = vmatmul.msk.f32.vlgmr.msrb.gmra.mxu3 %vm19149_vm10, %v12135_v18  ;;  %v1103_v13 = vpop.permute.xlu1 %1102  ;;  %vm12244_vm10 = vmand %vm1428_vm12, %vm1436_vm14  ;;  %vm1440_vm14 = vcmp.lt.s32.totalorder %v11780_v55, 32 }
  0xd9   : > { %10452 = vmatmul.msk.f32.vlgmr.msrb.gmra.mxu2 %vm19150_vm15, %v12135_v18  ;;  %v1113_v3 = vsel %vm1110_vm4, %v1103_v13, %v1105_v20  ;;  %v1114_v58 = vsel %vm1110_vm4, %v12049_v44, %v1103_v13  ;;  %vm12253_vm9 = vmand %vm1435_vm5, %vm1443_vm6  ;;  %vm19155_vm4 = vcmp.ge.s32.totalorder %v11915_v35, 0  ;;  %vm19156_vm5 = vcmp.ge.s32.totalorder %v11926_v28, 0 }
  0xda   : > { %v1179_v30 = vmul.f32 %v10434_v49, %v1114_v58  ;;  %v1180_v9 = vmul.f32 %v10435_v46, %v1113_v3  ;;  %v1410_v29 = vpop.permute.xlu0 %1409  ;;  %v12248_v25 = vpop.permute.xlu2 %1922  ;;  %v19154_v0 = vsel %vm12253_vm9, 4294967295, %v19153_v0  ;;  %vm1452_vm12 = vmand %vm12244_vm10, %vm19155_vm4  ;;  %vm1433_vm6 = vcmp.ge.s32.totalorder %v11783_v57, 0 }
  0xdb   : > { %v1424_v20 = vsel %vm18807_vm8, %v12059_v26, %v1410_v29  ;;  %vm1459_vm13 = vmand %vm12253_vm9, %vm19156_vm5  ;;  %v10455_v26 = vsel %vm1452_vm12, 1.0, %v18823_v1  ;;  %vm1441_vm4 = vcmp.lt.s32.totalorder %v11783_v57, 32  ;;  %vm1434_vm8 = vcmp.ge.s32.totalorder %v11674_v8, 0 }
  0xdc   : > { %v1487_v44 = vmul.f32 %v10458_v50, %v1424_v20  ;;  %10447 = vmatpush.msk.msra.mxu0 %vm18806_vm11, %v1179_v30  ;;  %10449 = vmatpush.msk.msrb.mxu1 %vm18806_vm11, %v1180_v9  ;;  %vm19157_vm15 = vmmov %vm19148_vm0  ;;  %vm1442_vm9 = vcmp.lt.s32.totalorder %v11674_v8, 32  ;;  %v10462_v22 = vsel %vm1459_vm13, 1.0, %v18823_v1  ;;  %vm19168_vm13 = vcmask 1042432  }
  0xdd   : > { %vm19159_vm5 = vmmov %vm19148_vm0 }
  0xde   : > { %10466 = vmatpush.msk.msra.mxu1 %vm18806_vm11, %v1485_v2  ;;  %10470 = vmatpush.msk.msrb.mxu3 %vm18806_vm11, %v1487_v44  ;;  %vm19158_vm11 = vmmov %vm19148_vm0 }
  0xdf   : > { %10448 = vmatmul.msk.f32.vlgmr.msra.gmra.mxu0 %vm19148_vm0, %v12135_v18  ;;  %vm19160_vm0 = vcmp.lt.s32.totalorder %v11653_v61, 1  ;;  %vm12289_vm12 = vmand %vm1432_vm1, %vm1440_vm14  ;;  %vm19169_vm1 = vcmp.ge.s32.totalorder %v11898_v23, 0 }
  0xe0   : > { %10450 = vmatmul.msk.f32.vlgmr.msrb.gmra.mxu1 %vm19157_vm15, %v12135_v18  ;;  %10454 = vmatmul.msk.f32.vlgmr.msra.gmra.mxu3 %vm19158_vm11, %v12135_v18  ;;  %v1418_v34 = vpop.permute.xlu1 %1417  ;;  %vm12295_vm11 = vmand %vm1433_vm6, %vm1441_vm4  ;;  %vm19170_vm6 = vcmp.ge.s32.totalorder %v11862_v60, 0 }
  0xe1   : > { %10469 = vmatmul.msk.f32.vlgmr.msra.gmra.mxu2 %vm19159_vm5, %v10463_v56  ;;  %v1427_v36 = vsel %vm19160_vm0, %v1418_v34, %v1404_v37  ;;  %vm19165_vm15 = vmmov %vm19160_vm0 }
  0xe2   : > { %v1484_v46 = vmul.f32 %v10455_v26, %v1427_v36  ;;  %v1416_v13 = vpop.permute.xlu0 %1415  ;;  %v12293_v2 = vpop.permute.xlu2 %1920  ;;  %vm12301_vm5 = vmand %vm1434_vm8, %vm1442_vm9  ;;  %vm19172_vm8 = vcmp.ge.s32.totalorder %v11800_v14, 0 }
  0xe3   : > { %v1420_v3 = vsel %vm19165_vm15, %v1416_v13, %v1418_v34  ;;  %vm1456_vm14 = vmand %vm12289_vm12, %vm19169_vm1  ;;  %vm19173_vm15 = vcmask 23552   ;;  %vm19176_vm1 = vcmp.lt.s32.totalorder %v11653_v61, 1 }
  0xe4   : > { %v1491_v37 = vmul.f32 %v10462_v22, %v1420_v3  ;;  %10464 = vmatpush.msk.msrb.mxu0 %vm19168_vm13, %v1484_v46  ;;  %vm1457_vm4 = vmand %vm12295_vm11, %vm19170_vm6  ;;  %v10459_v50 = vsel %vm1456_vm14, 1.0, %v18823_v1 }
  0xe5   : > { %vm19171_vm0 = vmmov %vm19168_vm13  ;;  %v10460_v20 = vsel %vm1457_vm4, 1.0, %v18823_v1 }
  0xe6   : > { %10478 = vmatpush.msk.msra.mxu3 %vm19171_vm0, %v1491_v37  ;;  %vm1458_vm9 = vmand %vm12301_vm5, %vm19172_vm8 }
  0xe7   : > { %10465 = vmatmul.msk.f32.vlgmr.msrb.gmra.mxu0 %vm19173_vm15, %v10463_v56  ;;  %vm19174_vm13 = vmmov %vm19173_vm15  ;;  %v10461_v44 = vsel %vm1458_vm9, 1.0, %v18823_v1 }
  0xe8   : > { %10467 = vmatmul.msk.f32.vlgmr.msra.gmra.mxu1 %vm19174_vm13, %v10463_v56  ;;  %vm19175_vm3 = vmmov %vm19174_vm13  ;;  %v1412_v30 = vpop.permute.xlu1 %1411 }
  0xe9   : > { %10471 = vmatmul.msk.f32.vlgmr.msrb.gmra.mxu3 %vm19175_vm3, %v10463_v56  ;;  %v1423_v9 = vsel %vm19176_vm1, %v1410_v29, %v1412_v30  ;;  %vm19177_vm6 = vmmov %vm19171_vm0 }
  0xea   : > { %10487 = vmatpush.msk.msrb.mxu3 %vm19177_vm6, %v11601_v33  ;;  %v1488_v26 = vmul.f32 %v10459_v50, %v1423_v9  ;;  %v1414_v34 = vpop.permute.xlu0 %1413  ;;  %v1929_v36 = vpop.permute.xlu2 %1928  ;;  %vm19178_vm0 = vmmov %vm19176_vm1  ;;  %vm19185_vm1 = vcmp.lt.s32.totalorder %v11997_v31, 32  ;;  %v2228_v50 = vadd.s32 1, %v11671_v7 }
  0xeb   : > { %v1421_v22 = vsel %vm19178_vm0, %v1414_v34, %v1416_v13  ;;  %vm19179_vm14 = vmmov %vm19178_vm0 }
  0xec   : > { %v1422_v46 = vsel %vm19179_vm14, %v1412_v30, %v1414_v34  ;;  %v1490_v37 = vmul.f32 %v10461_v44, %v1421_v22  ;;  %vm19180_vm3 = vmmov %vm19177_vm6 }
  0xed   : > { %v1489_v3 = vmul.f32 %v10460_v20, %v1422_v46  ;;  %10472 = vmatpush.msk.msra.mxu0 %vm19180_vm3, %v1488_v26  ;;  %vm19181_vm4 = vmmov %vm19180_vm3 }
  0xee   : > { %vm19182_vm8 = vmmov %vm19180_vm3 }
  0xef   : > { %10481 = vmatpush.msk.msrb.mxu0 %vm19181_vm4, %v11622_v42  ;;  %10474 = vmatpush.msk.msrb.mxu1 %vm19182_vm8, %v1489_v3  ;;  %vm19183_vm9 = vmmov %vm19180_vm3  ;;  %vm18810_vm3 = vcmp.lt.s32.totalorder %v11653_v61, 127  ;;  %vm19188_vm4 = vcmp.lt.s32.totalorder %v12044_v11, 32 }
  0xf0   : > { %10476 = vmatpush.msk.msrb.mxu2 %vm19183_vm9, %v1490_v37  ;;  %vm19184_vm15 = vmmov %vm19174_vm13  ;;  %10475 = vmatmul.msk.f32.vlgmr.msrb.gmra.mxu1 %vm19174_vm13, %v10463_v56  ;;  %v1917_v33 = vpop.permute.xlu1 %1916  ;;  %v19218_v37 = vmov 0 }
  0xf1   : > { %10473 = vmatmul.msk.f32.vlgmr.msra.gmra.mxu0 %vm19184_vm15, %v10463_v56  ;;  %vm1952_vm6 = vmand %vm12201_vm7, %vm19185_vm1 }
  0xf2   : > { %vm19186_vm0 = vmmov %vm19174_vm13  ;;  %10485 = vmatpush.msk.msra.mxu2 %vm19183_vm9, %v11599_v32  ;;  %v10500_v42 = vsel %vm1952_vm6, 1.0, %v18823_v1  ;;  %v1925_v47 = vpop.permute.xlu0 %1924  ;;  %v1927_v29 = vpop.permute.xlu2 %1926 }
  0xf3   : > { %10477 = vmatmul.msk.f32.vlgmr.msrb.gmra.mxu2 %vm19186_vm0, %v10463_v56  ;;  %vm19187_vm14 = vmmov %vm19186_vm0  ;;  %v1936_v54 = vsel %vm18810_vm3, %v12248_v25, %v1925_v47  ;;  %v1935_v3 = vsel %vm18810_vm3, %v1925_v47, %v1927_v29 }
  0xf4   : > { %10479 = vmatmul.msk.f32.vlgmr.msra.gmra.mxu3 %vm19187_vm14, %v10463_v56  ;;  %vm1951_vm8 = vmand %vm12093_vm2, %vm19188_vm4  ;;  %vm19192_vm2 = vcmp.lt.s32.totalorder %v12079_v21, 32  ;;  %vm19195_vm14 = vcmp.lt.s32.totalorder %v12087_v10, 32 }
  0xf5   : > { %vm19189_vm15 = vmmov %vm19183_vm9  ;;  %v10499_v32 = vsel %vm1951_vm8, 1.0, %v18823_v1 }
  0xf6   : > { %10483 = vmatpush.msk.msra.mxu1 %vm19189_vm15, %v11624_v43  ;;  %vm19190_vm7 = vmmov %vm19183_vm9  ;;  %v1976_v43 = vmul.f32 %v10500_v42, %v1936_v54  ;;  %vm19197_vm9 = vcmp.lt.s32.totalorder %v12151_v27, 32  ;;  %vm19200_vm15 = vcmask 23552  }
  0xf7   : > { %10493 = vmatpush.msk.msrb.mxu2 %vm19190_vm7, %v11612_v38  ;;  %vm19191_vm13 = vmmov %vm19190_vm7  ;;  %v1937_v38 = vsel %vm18810_vm3, %v12293_v2, %v12248_v25 }
  0xf8   : > { %10495 = vmatpush.msk.msra.mxu3 %vm19191_vm13, %v11614_v39  ;;  %vm1949_vm1 = vmand %vm12244_vm10, %vm19192_vm2  ;;  %v10480_v39 = vld [vmem:[%s19082_s1 + $0x20] sm:$0xff]  ;;  %vm19196_vm10 = vnez %v19137_v53  ;;  %v1975_v62 = vmul.f32 %v10499_v32, %v1937_v38  ;;  %vm19202_vm13 = vcmp.lt.s32.totalorder %v12071_v45, 32  ;;  %v1919_v13 = vpop.permute.xlu1 %1918 }
  0xf9   : > { %vm19193_vm0 = vmmov %vm19190_vm7  ;;  %10482 = vmatmul.msk.f32.vlgmr.msrb.gmra.mxu0 %vm19200_vm15, %v10480_v39  ;;  %v10497_v53 = vsel %vm1949_vm1, 1.0, %v18823_v1  ;;  %v1939_v58 = vsel %vm18810_vm3, %v1917_v33, %v1919_v13 }
  0xfa   : > { %10489 = vmatpush.msk.msra.mxu0 %vm19193_vm0, %v11617_v40  ;;  %vm19194_vm6 = vmmov %vm19193_vm0  ;;  %v2229_v40 = vadd.s32 1, %v11696_v17  ;;  %v1931_v9 = vpop.permute.xlu0 %1930  ;;  %v1973_v20 = vmul.f32 %v10497_v53, %v1939_v58  ;;  %v12436_v26 = vpop.permute.xlu2 %2215  ;;  %v2230_v53 = vadd.s32 1, %v11780_v55 }
  0xfb   : > { %10491 = vmatpush.msk.msrb.mxu1 %vm19194_vm6, %v11619_v41  ;;  %vm1950_vm4 = vmand %vm19196_vm10, %vm19195_vm14  ;;  %vm19207_vm6 = vcmp.lt.s32.totalorder %v12036_v52, 32  ;;  %vm19208_vm14 = vnez %v19154_v0  ;;  %v1938_v0 = vsel %vm18810_vm3, %v1919_v13, %v12293_v2  ;;  %v1934_v2 = vsel %vm18810_vm3, %v1927_v29, %v1929_v36  ;;  %v10505_v41 = vld [vmem:[%s19082_s1 + $0x28] sm:$0xff] }
  0xfc   : > { %vm12388_vm8 = vmand %vm12295_vm11, %vm19197_vm9  ;;  %v10498_v25 = vsel %vm1950_vm4, 1.0, %v18823_v1  ;;  %vm19211_vm9 = vcmp.lt.s32.totalorder %v12130_v51, 32  ;;  %vm19214_vm4 = vcmask 1042432   ;;  %v1933_v34 = vsel %vm18810_vm3, %v1929_v36, %v1931_v9 }
  0xfd   : > { %vm19201_vm7 = vmmov %vm19200_vm15  ;;  %v10502_v49 = vsel %vm12388_vm8, 1.0, %v18823_v1  ;;  %v1974_v44 = vmul.f32 %v10498_v25, %v1938_v0  ;;  %v1940_v22 = vsel %vm18810_vm3, %v1931_v9, %v1917_v33  ;;  %v2233_v33 = vadd.s32 1, %v11706_v19 }
  0xfe   : > { %10484 = vmatmul.msk.f32.vlgmr.msra.gmra.mxu1 %vm19201_vm7, %v10480_v39  ;;  %vm12398_vm2 = vmand %vm12301_vm5, %vm19202_vm13  ;;  %vm2237_vm5 = vcmp.ge.s32.totalorder %v2229_v40, 0  ;;  %v1978_v42 = vmul.f32 %v10502_v49, %v1934_v2  ;;  %v19224_v19 = vmov 0  ;;  %v2231_v0 = vadd.s32 1, %v11783_v57 }
  0xff   : > { %vm19205_vm11 = vmmov %vm19201_vm7  ;;  %v10503_v30 = vsel %vm12398_vm2, 1.0, %v18823_v1  ;;  %vm2236_vm2 = vcmp.ge.s32.totalorder %v2228_v50, 0  ;;  %v19245_v49 = vmov 0 }
 0x100   : > { %10486 = vmatmul.msk.f32.vlgmr.msra.gmra.mxu2 %vm19205_vm11, %v10480_v39  ;;  %vm19206_vm0 = vmmov %vm19201_vm7  ;;  %vm2245_vm7 = vcmp.lt.s32.totalorder %v2229_v40, 32  ;;  %v1979_v36 = vmul.f32 %v10503_v30, %v1933_v34  ;;  %vm2244_vm11 = vcmp.lt.s32.totalorder %v2228_v50, 32  ;;  %v12470_v47 = vpop.permute.xlu1 %2209 }
 0x101   : > { %10488 = vmatmul.msk.f32.vlgmr.msrb.gmra.mxu3 %vm19206_vm0, %v10480_v39  ;;  %vm12410_vm10 = vmand %vm19208_vm14, %vm19207_vm6  ;;  %10510 = vmatpush.msk.msra.mxu2 %vm19214_vm4, %v1975_v62  ;;  %vm19221_vm14 = vcmp.ge.s32.totalorder %v11790_v59, 0  ;;  %v19231_v62 = vmov 0 }
 0x102   : > { %vm12418_vm1 = vmand %vm12289_vm12, %vm19211_vm9  ;;  %v10504_v7 = vsel %vm12410_vm10, 1.0, %v18823_v1  ;;  %10490 = vmatmul.msk.f32.vlgmr.msra.gmra.mxu0 %vm19206_vm0, %v10480_v39  ;;  %v2208_v59 = vpop.permute.xlu0 %2207  ;;  %v12481_v38 = vpop.permute.xlu2 %2524 }
 0x103   : > { %vm19215_vm15 = vmmov %vm19214_vm4  ;;  %v10501_v46 = vsel %vm12418_vm1, 1.0, %v18823_v1  ;;  %v1980_v54 = vmul.f32 %v10504_v7, %v1940_v22  ;;  %vm18811_vm1 = vcmp.lt.s32.totalorder %v11653_v61, 97 }
 0x104   : > { %10512 = vmatpush.msk.msrb.mxu3 %vm19215_vm15, %v1976_v43  ;;  %vm19216_vm12 = vmmov %vm19214_vm4  ;;  %v1977_v32 = vmul.f32 %v10501_v46, %v1935_v3  ;;  %v2221_v40 = vsel %vm18811_vm1, %v2208_v59, %v12470_v47  ;;  %v2226_v43 = vadd.s32 1, %v11717_v24  ;;  %vm19237_vm1 = vcmask 1042432   ;;  %v10530_v46 = vld [vmem:[%s19082_s1 + $0x30] sm:$0xff] }
 0x105   : > { %10506 = vmatpush.msk.msrb.mxu0 %vm19216_vm12, %v1973_v20  ;;  %vm19217_vm8 = vmmov %vm19214_vm4  ;;  %vm2241_vm12 = vcmp.ge.s32.totalorder %v2233_v33, 0 }
 0x106   : > { %10508 = vmatpush.msk.msra.mxu1 %vm19217_vm8, %v1974_v44  ;;  %vm12456_vm13 = vmand %vm2237_vm5, %vm2245_vm7 }
 0x107   : > { %v19219_v37 = vsel %vm12456_vm13, 4294967295, %v19218_v37  ;;  %vm19220_vm6 = vmmov %vm19206_vm0 }
 0x108   : > { %10492 = vmatmul.msk.f32.vlgmr.msrb.gmra.mxu1 %vm19220_vm6, %v10480_v39  ;;  %vm2261_vm10 = vmand %vm12456_vm13, %vm19221_vm14  ;;  %vm19257_vm13 = vcmask 1042432  }
 0x109   : > { %vm19222_vm5 = vmmov %vm19206_vm0  ;;  %v10525_v29 = vsel %vm2261_vm10, 1.0, %v18823_v1 }
 0x10a   : > { %10494 = vmatmul.msk.f32.vlgmr.msrb.gmra.mxu2 %vm19222_vm5, %v10480_v39  ;;  %vm19223_vm9 = vmmov %vm19206_vm0  ;;  %v2293_v17 = vmul.f32 %v10525_v29, %v2221_v40  ;;  %v2202_v13 = vpop.permute.xlu0 %2201 }
 0x10b   : > { %10496 = vmatmul.msk.f32.vlgmr.msra.gmra.mxu3 %vm19223_vm9, %v10480_v39  ;;  %vm12472_vm4 = vmand %vm2236_vm2, %vm2244_vm11  ;;  %v2232_v39 = vadd.s32 1, %v11674_v8  ;;  %vm19230_vm2 = vcmp.ge.s32.totalorder %v11810_v15, 0  ;;  %v2227_v8 = vadd.s32 1, %v11668_v6  ;;  %10507 = vmatmul.msk.f32.vlgmr.msrb.gmra.mxu0 %vm19223_vm9, %v10505_v41  ;;  %v2206_v6 = vpop.permute.xlu1 %2205  ;;  %v12527_v50 = vpop.permute.xlu2 %2518 }
 0x10c   : > { %v19225_v19 = vsel %vm12472_vm4, 4294967295, %v19224_v19  ;;  %vm19226_vm15 = vmmov %vm19217_vm8 }
 0x10d   : > { %10514 = vmatpush.msk.msra.mxu0 %vm19226_vm15, %v1977_v32  ;;  %vm19227_vm7 = vmmov %vm19217_vm8  ;;  %vm2249_vm8 = vcmp.lt.s32.totalorder %v2233_v33, 32  ;;  %vm2248_vm5 = vcmp.lt.s32.totalorder %v2232_v39, 32  ;;  %vm2235_vm3 = vcmp.ge.s32.totalorder %v2227_v8, 0  ;;  %vm2243_vm10 = vcmp.lt.s32.totalorder %v2227_v8, 32 }
 0x10e   : > { %10518 = vmatpush.msk.msrb.mxu2 %vm19227_vm7, %v1979_v36  ;;  %vm19228_vm0 = vmmov %vm19227_vm7  ;;  %vm19234_vm7 = vcmp.ge.s32.totalorder %v11926_v28, 0  ;;  %v19240_v28 = vmov 0 }
 0x10f   : > { %10520 = vmatpush.msk.msra.mxu3 %vm19228_vm0, %v1980_v54  ;;  %vm19229_vm6 = vmmov %vm19228_vm0 }
 0x110   : > { %10516 = vmatpush.msk.msrb.mxu1 %vm19229_vm6, %v1978_v42  ;;  %vm2260_vm11 = vmand %vm12472_vm4, %vm19230_vm2  ;;  %vm19251_vm4 = vcmask 23552  }
 0x111   : > { %vm12495_vm14 = vmand %vm2241_vm12, %vm2249_vm8  ;;  %v10524_v15 = vsel %vm2260_vm11, 1.0, %v18823_v1  ;;  %vm2234_vm12 = vcmp.ge.s32.totalorder %v2226_v43, 0  ;;  %vm2242_vm8 = vcmp.lt.s32.totalorder %v2226_v43, 32  ;;  %vm19239_vm11 = vcmp.ge.s32.totalorder %v2232_v39, 0 }
 0x112   : > { %v19232_v62 = vsel %vm12495_vm14, 4294967295, %v19231_v62  ;;  %vm19233_vm15 = vmmov %vm19223_vm9  ;;  %v2204_v2 = vpop.permute.xlu0 %2203 }
 0x113   : > { %10509 = vmatmul.msk.f32.vlgmr.msra.gmra.mxu1 %vm19233_vm15, %v10505_v41  ;;  %vm2265_vm0 = vmand %vm12495_vm14, %vm19234_vm7  ;;  %10515 = vmatmul.msk.f32.vlgmr.msra.gmra.mxu0 %vm19251_vm4, %v10505_v41 }
 0x114   : > { %vm19235_vm6 = vmmov %vm19223_vm9  ;;  %vm19238_vm9 = vcmp.lt.s32.totalorder %v11653_v61, 97  ;;  %v10529_v56 = vsel %vm2265_vm0, 1.0, %v18823_v1  ;;  %vm19248_vm0 = vcmp.ge.s32.totalorder %v11800_v14, 0  ;;  %v2214_v14 = vpop.permute.xlu1 %2213 }
 0x115   : > { %10511 = vmatmul.msk.f32.vlgmr.msra.gmra.mxu2 %vm19235_vm6, %v10505_v41  ;;  %vm19236_vm2 = vmmov %vm19235_vm6  ;;  %v2222_v24 = vsel %vm19238_vm9, %v2206_v6, %v2208_v59  ;;  %vm19247_vm6 = vcmask 1042432   ;;  %v2521_v3 = vpop.permute.xlu2 %2520 }
 0x116   : > { %10513 = vmatmul.msk.f32.vlgmr.msrb.gmra.mxu3 %vm19236_vm2, %v10505_v41  ;;  %vm12513_vm15 = vmand %vm19239_vm11, %vm2248_vm5  ;;  %v2292_v25 = vmul.f32 %v10524_v15, %v2222_v24  ;;  %vm2246_vm11 = vcmp.lt.s32.totalorder %v2230_v53, 32 }
 0x117   : > { %10537 = vmatpush.msk.msrb.mxu3 %vm19237_vm1, %v2293_v17  ;;  %v19241_v28 = vsel %vm12513_vm15, 4294967295, %v19240_v28  ;;  %vm12519_vm7 = vmand %vm2234_vm12, %vm2242_vm8  ;;  %vm19249_vm8 = vcmp.ge.s32.totalorder %v11915_v35, 0 }
 0x118   : > { %vm19244_vm1 = vmmov %vm19238_vm9  ;;  %10535 = vmatpush.msk.msra.mxu2 %vm19247_vm6, %v2292_v25  ;;  %vm2238_vm9 = vcmp.ge.s32.totalorder %v2230_v53, 0  ;;  %vm2247_vm6 = vcmp.lt.s32.totalorder %v2231_v0, 32 }
 0x119   : > { %v2225_v58 = vsel %vm19244_vm1, %v12436_v26, %v2202_v13  ;;  %vm12529_vm5 = vmand %vm2235_vm3, %vm2243_vm10  ;;  %vm19250_vm3 = vcmp.ge.s32.totalorder %v11880_v48, 0  ;;  %vm2239_vm1 = vcmp.ge.s32.totalorder %v2231_v0, 0 }
 0x11a   : > { %v19246_v49 = vsel %vm12529_vm5, 4294967295, %v19245_v49  ;;  %vm2264_vm12 = vmand %vm12513_vm15, %vm19248_vm0  ;;  %v2297_v55 = vmul.f32 %v10529_v56, %v2225_v58  ;;  %v12604_v43 = vpop.permute.xlu0 %2526  ;;  %v10548_v24 = vsel %vm12529_vm5, 1.0, %v18823_v1 }
 0x11b   : > { %vm2258_vm2 = vmand %vm12519_vm7, %vm19249_vm8  ;;  %v10528_v57 = vsel %vm2264_vm12, 1.0, %v18823_v1 }
 0x11c   : > { %vm2259_vm10 = vmand %vm12529_vm5, %vm19250_vm3  ;;  %vm19258_vm3 = vcmp.lt.s32.totalorder %v11653_v61, 97  ;;  %v10522_v30 = vsel %vm2258_vm2, 1.0, %v18823_v1  ;;  %vm19264_vm2 = vcmask 1042432   ;;  %v2212_v42 = vpop.permute.xlu1 %2211 }
 0x11d   : > { %vm19252_vm14 = vmmov %vm19251_vm4  ;;  %v2218_v48 = vsel %vm19258_vm3, %v2214_v14, %v12436_v26  ;;  %v10523_v9 = vsel %vm2259_vm10, 1.0, %v18823_v1  ;;  %vm18820_vm10 = vcmp.lt.s32.totalorder %v11653_v61, 96  ;;  %v12619_v17 = vpop.permute.xlu2 %2811 }
 0x11e   : > { %10517 = vmatmul.msk.f32.vlgmr.msrb.gmra.mxu1 %vm19252_vm14, %v10505_v41  ;;  %vm19253_vm0 = vmmov %vm19251_vm4  ;;  %v2296_v44 = vmul.f32 %v10528_v57, %v2218_v48  ;;  %v2541_v36 = vsel %vm18820_vm10, %v12527_v50, %v2521_v3  ;;  %v3065_v48 = vld [vmem:[%s18767_s2] sm:$0xff] }
 0x11f   : > { %10519 = vmatmul.msk.f32.vlgmr.msrb.gmra.mxu2 %vm19253_vm0, %v10505_v41  ;;  %vm19254_vm15 = vmmov %vm19253_vm0 }
 0x120   : > { %10521 = vmatmul.msk.f32.vlgmr.msra.gmra.mxu3 %vm19254_vm15, %v10505_v41  ;;  %vm12551_vm8 = vmand %vm2238_vm9, %vm2246_vm11  ;;  %10543 = vmatpush.msk.msrb.mxu2 %vm19264_vm2, %v2296_v44  ;;  %vm19265_vm9 = vcmp.ge.s32.totalorder %v11862_v60, 0  ;;  %v2538_v41 = vsel %vm18820_vm10, %v12481_v38, %v12604_v43 }
 0x121   : > { %10545 = vmatpush.msk.msra.mxu3 %vm19257_vm13, %v2297_v55  ;;  %vm12561_vm4 = vmand %vm2239_vm1, %vm2247_vm6  ;;  %vm19263_vm13 = vcmp.ge.s32.totalorder %v11898_v23, 0  ;;  %v10547_v23 = vsel %vm12519_vm7, 1.0, %v18823_v1 }
 0x122   : > { %vm19261_vm14 = vmmov %vm19258_vm3  ;;  %v2575_v54 = vmul.f32 %v10547_v23, %v2541_v36  ;;  %v10552_v23 = vsel %vm12561_vm4, 1.0, %v18823_v1 }
 0x123   : > { %v2223_v7 = vsel %vm19261_vm14, %v2204_v2, %v2206_v6  ;;  %vm19262_vm15 = vmmov %vm19258_vm3  ;;  %v2523_v56 = vpop.permute.xlu0 %2522 }
 0x124   : > { %v2224_v34 = vsel %vm19262_vm15, %v2202_v13, %v2204_v2  ;;  %vm2262_vm12 = vmand %vm12551_vm8, %vm19263_vm13  ;;  %v2291_v22 = vmul.f32 %v10523_v9, %v2223_v7  ;;  %vm19271_vm13 = vcmp.lt.s32.totalorder %v11653_v61, 97  ;;  %v2533_v15 = vpop.permute.xlu1 %2532  ;;  %v2539_v13 = vsel %vm18820_vm10, %v2523_v56, %v12481_v38 }
 0x125   : > { %v2290_v26 = vmul.f32 %v10522_v30, %v2224_v34  ;;  %vm2263_vm11 = vmand %vm12561_vm4, %vm19265_vm9  ;;  %v10526_v60 = vsel %vm2262_vm12, 1.0, %v18823_v1  ;;  %v2219_v32 = vsel %vm19271_vm13, %v2212_v42, %v2214_v14  ;;  %vm19273_vm9 = vnez %v19219_v37  ;;  %v2808_v38 = vpop.permute.xlu2 %2807 }
 0x126   : > { %vm19266_vm1 = vmmov %vm19264_vm2  ;;  %v10527_v33 = vsel %vm2263_vm11, 1.0, %v18823_v1  ;;  %v10550_v29 = vsel %vm19273_vm9, 1.0, %v18823_v1  ;;  %v2542_v6 = vsel %vm18820_vm10, %v2533_v15, %v12527_v50  ;;  %v2540_v0 = vsel %vm18820_vm10, %v2521_v3, %v2523_v56  ;;  %v10555_v50 = vld [vmem:[%s19082_s1 + $0x38] sm:$0xff] }
 0x127   : > { %10531 = vmatpush.msk.msrb.mxu0 %vm19266_vm1, %v2290_v26  ;;  %vm19267_vm6 = vmmov %vm19266_vm1  ;;  %v2295_v40 = vmul.f32 %v10527_v33, %v2219_v32  ;;  %v2578_v8 = vmul.f32 %v10550_v29, %v2538_v41  ;;  %v2576_v58 = vmul.f32 %v10548_v24, %v2540_v0  ;;  %v11441_v14 = vmov 0   ;;  %v12671_v26 = vpop.f32.mrf.mxu1 }
 0x128   : > { %10533 = vmatpush.msk.msra.mxu1 %vm19267_vm6, %v2291_v22  ;;  %10532 = vmatmul.msk.f32.vlgmr.msrb.gmra.mxu0 %vm19253_vm0, %v10530_v46  ;;  %vm19268_vm3 = vmmov %vm19253_vm0  ;;  %v12677_v22 = vpop.f32.mrf.mxu2  ;;  %v10551_v3 = vsel %vm12551_vm8, 1.0, %v18823_v1 }
 0x129   : > { %10534 = vmatmul.msk.f32.vlgmr.msra.gmra.mxu1 %vm19268_vm3, %v10530_v46  ;;  %vm19269_vm14 = vmmov %vm19253_vm0  ;;  %11301 = vset.pattern.permute.xlu1 %v11441_v14 }
 0x12a   : > { %10536 = vmatmul.msk.f32.vlgmr.msra.gmra.mxu2 %vm19269_vm14, %v10530_v46  ;;  %vm19270_vm15 = vmmov %vm19253_vm0  ;;  %vm19278_vm14 = vnez %v19232_v62  ;;  %11302 = vset.pattern.permute.xlu2 %v11441_v14 }
 0x12b   : > { %10538 = vmatmul.msk.f32.vlgmr.msrb.gmra.mxu3 %vm19270_vm15, %v10530_v46  ;;  %vm19272_vm2 = vmmov %vm19271_vm13  ;;  %11303 = vset.pattern.permute.xlu0 %v11441_v14 }
 0x12c   : > { %v2220_v59 = vsel %vm19272_vm2, %v12470_v47, %v2212_v42  ;;  %vm19274_vm12 = vmmov %vm19266_vm1  ;;  %v10554_v47 = vsel %vm19278_vm14, 1.0, %v18823_v1  ;;  %vm19281_vm2 = vnez %v19225_v19  ;;  %v2531_v37 = vpop.permute.xlu0 %2530  ;;  %3068 = vperm.xlu1 %11301, %v3065_v48  }
 0x12d   : > { %v2294_v39 = vmul.f32 %v10526_v60, %v2220_v59  ;;  %vm19275_vm11 = vmmov %vm19266_vm1  ;;  %v10549_v53 = vsel %vm19281_vm2, 1.0, %v18823_v1  ;;  %v2582_v25 = vmul.f32 %v10554_v47, %v2542_v6  ;;  %v10580_v59 = vld [vmem:[%s19082_s1 + $0x40] sm:$0xff] }
 0x12e   : > { %10541 = vmatpush.msk.msrb.mxu1 %vm19275_vm11, %v2295_v40  ;;  %vm19276_vm6 = vmmov %vm19266_vm1  ;;  %v2577_v55 = vmul.f32 %v10549_v53, %v2539_v13 }
 0x12f   : > { %10539 = vmatpush.msk.msra.mxu0 %vm19274_vm12, %v2294_v39  ;;  %10562 = vmatpush.msk.msrb.mxu3 %vm19276_vm6, %v2578_v8  ;;  %vm19277_vm3 = vmmov %vm19253_vm0  ;;  %vm19284_vm6 = vcmp.lt.s32.totalorder %v12044_v11, 32 }
 0x130   : > { %10540 = vmatmul.msk.f32.vlgmr.msra.gmra.mxu0 %vm19253_vm0, %v10530_v46  ;;  %vm19279_vm15 = vmmov %vm19253_vm0  ;;  %10560 = vmatpush.msk.msra.mxu2 %vm19266_vm1, %v2577_v55 }
 0x131   : > { %10556 = vmatpush.msk.msrb.mxu0 %vm19266_vm1, %v2575_v54  ;;  %10542 = vmatmul.msk.f32.vlgmr.msrb.gmra.mxu1 %vm19277_vm3, %v10530_v46  ;;  %vm19280_vm13 = vmmov %vm19253_vm0 }
 0x132   : > { %10544 = vmatmul.msk.f32.vlgmr.msrb.gmra.mxu2 %vm19279_vm15, %v10530_v46  ;;  %vm19282_vm12 = vmmov %vm19266_vm1 }
 0x133   : > { %10546 = vmatmul.msk.f32.vlgmr.msra.gmra.mxu3 %vm19280_vm13, %v10530_v46  ;;  %vm19283_vm11 = vmmov %vm19266_vm1  ;;  %vm19286_vm13 = vcmp.lt.s32.totalorder %v11997_v31, 32  ;;  %v2810_v31 = vpop.permute.xlu1 %2809  ;;  %v12680_v46 = vpop.f32.mrf.mxu3 }
 0x134   : > { %10570 = vmatpush.msk.msra.mxu3 %vm19282_vm12, %v2582_v25  ;;  %10558 = vmatpush.msk.msra.mxu1 %vm19283_vm11, %v2576_v58  ;;  %vm2838_vm0 = vmand %vm19281_vm2, %vm19284_vm6  ;;  %vm18822_vm11 = vcmp.lt.s32.totalorder %v11653_v61, 95  ;;  %vm19289_vm2 = vnez %v19241_v28  ;;  %v2529_v36 = vpop.permute.xlu0 %2528  ;;  %v12725_v18 = vpop.f32.mrf.mxu2 }
 0x135   : > { %vm19285_vm15 = vmmov %vm19277_vm3  ;;  %v10574_v11 = vsel %vm2838_vm0, 1.0, %v18823_v1  ;;  %v10553_v57 = vsel %vm19289_vm2, 1.0, %v18823_v1  ;;  %v2823_v30 = vsel %vm18822_vm11, %v2810_v31, %v12619_v17  ;;  %v2824_v9 = vsel %vm18822_vm11, %v2808_v38, %v2810_v31  ;;  %v12700_v29 = vpop.f32.mrf.mxu0  ;;  %v12708_v39 = vpop.f32.mrf.mxu1 }
 0x136   : > { %vm2839_vm12 = vmand %vm19273_vm9, %vm19286_vm13  ;;  %v2862_v2 = vmul.f32 %v10574_v11, %v2824_v9  ;;  %vm19298_vm13 = vcmp.lt.s32.totalorder %v12036_v52, 32  ;;  %v2814_v52 = vpop.permute.xlu2 %2813 }
 0x137   : > { %vm19287_vm10 = vmmov %vm19277_vm3  ;;  %v10575_v19 = vsel %vm2839_vm12, 1.0, %v18823_v1 }
 0x138   : > { %10557 = vmatmul.msk.f32.vlgmr.msrb.gmra.mxu0 %vm19277_vm3, %v10555_v50  ;;  %vm19288_vm5 = vmmov %vm19277_vm3  ;;  %v2863_v7 = vmul.f32 %v10575_v19, %v2823_v30 }
 0x139   : > { %10559 = vmatmul.msk.f32.vlgmr.msra.gmra.mxu1 %vm19285_vm15, %v10555_v50  ;;  %vm19292_vm9 = vmmov %vm19266_vm1 }
 0x13a   : > { %10561 = vmatmul.msk.f32.vlgmr.msra.gmra.mxu2 %vm19287_vm10, %v10555_v50  ;;  %vm19291_vm10 = vmmov %vm19266_vm1 }
 0x13b   : > { %10563 = vmatmul.msk.f32.vlgmr.msrb.gmra.mxu3 %vm19288_vm5, %v10555_v50  ;;  %vm19290_vm5 = vcmp.lt.s32.totalorder %v11653_v61, 96  ;;  %vm19293_vm1 = vmmov %vm19277_vm3  ;;  %v2804_v42 = vpop.permute.xlu1 %2803 }
 0x13c   : > { %v2535_v44 = vsel %vm19290_vm5, %v2531_v37, %v2533_v15  ;;  %10587 = vmatpush.msk.msrb.mxu3 %vm19292_vm9, %v2863_v7  ;;  %vm19294_vm6 = vmmov %vm19293_vm1 }
 0x13d   : > { %v2581_v34 = vmul.f32 %v10553_v57, %v2535_v44  ;;  %vm19295_vm0 = vmmov %vm19292_vm9  ;;  %vm19301_vm9 = vcmp.lt.s32.totalorder %v12079_v21, 32  ;;  %v12722_v21 = vpop.f32.mrf.mxu3  ;;  %v12750_v53 = vpop.f32.mrf.mxu0 }
 0x13e   : > { %vm19296_vm3 = vmmov %vm19290_vm5  ;;  %v968_v0 = vpop.f32.mrf.mxu2  ;;  %v929_v16 = vadd.f32 %v12750_v53, %v12680_v46 }
 0x13f   : > { %10568 = vmatpush.msk.msrb.mxu2 %vm19291_vm10, %v2581_v34  ;;  %v2536_v60 = vsel %vm19296_vm3, %v2529_v36, %v2531_v37  ;;  %vm19297_vm15 = vmmov %vm19296_vm3  ;;  %vm19303_vm3 = vcmp.lt.s32.totalorder %v12087_v10, 32  ;;  %v2818_v10 = vpop.permute.xlu0 %2817  ;;  %v969_v4 = vadd.f32 %v968_v0, %v12677_v22 }
 0x140   : > { %v2537_v33 = vsel %vm19297_vm15, %v12604_v43, %v2529_v36  ;;  %v2580_v32 = vmul.f32 %v10552_v23, %v2536_v60  ;;  %vm2843_vm12 = vmand %vm19278_vm14, %vm19298_vm13  ;;  %vm19304_vm14 = vnez %v19246_v49  ;;  %vm19305_vm13 = vcmp.lt.s32.totalorder %v12130_v51, 32 }
 0x141   : > { %10585 = vmatpush.msk.msra.mxu2 %vm19295_vm0, %v2862_v2  ;;  %v2579_v54 = vmul.f32 %v10551_v3, %v2537_v33  ;;  %vm19299_vm5 = vmmov %vm19295_vm0  ;;  %v10579_v62 = vsel %vm2843_vm12, 1.0, %v18823_v1 }
 0x142   : > { %10569 = vmatmul.msk.f32.vlgmr.msrb.gmra.mxu2 %vm19293_vm1, %v10555_v50  ;;  %vm19300_vm10 = vmmov %vm19295_vm0 }
 0x143   : > { %10571 = vmatmul.msk.f32.vlgmr.msra.gmra.mxu3 %vm19294_vm6, %v10555_v50  ;;  %10564 = vmatpush.msk.msra.mxu0 %vm19299_vm5, %v2579_v54  ;;  %vm2836_vm1 = vmand %vm12519_vm7, %vm19301_vm9  ;;  %vm19308_vm7 = vcmp.lt.s32.totalorder %v11653_v61, 95  ;;  %v2806_v43 = vpop.permute.xlu1 %2805  ;;  %vm19312_vm9 = vcmp.lt.s32.totalorder %v12151_v27, 32  ;;  %v12754_v27 = vpop.f32.mrf.mxu1 }
 0x144   : > { %10566 = vmatpush.msk.msrb.mxu1 %vm19300_vm10, %v2580_v32  ;;  %10565 = vmatmul.msk.f32.vlgmr.msra.gmra.mxu0 %vm19294_vm6, %v10555_v50  ;;  %vm19302_vm0 = vmmov %vm19294_vm6  ;;  %v10572_v49 = vsel %vm2836_vm1, 1.0, %v18823_v1  ;;  %v2827_v35 = vsel %vm19308_vm7, %v2818_v10, %v2804_v42  ;;  %vm19313_vm6 = vcmask 1042432   ;;  %v949_v5 = vadd.f32 %v12754_v27, %v12671_v26 }
 0x145   : > { %10567 = vmatmul.msk.f32.vlgmr.msrb.gmra.mxu1 %vm19302_vm0, %v10555_v50  ;;  %vm2837_vm15 = vmand %vm19304_vm14, %vm19303_vm3  ;;  %v2867_v8 = vmul.f32 %v10579_v62, %v2827_v35 }
 0x146   : > { %vm2840_vm5 = vmand %vm12551_vm8, %vm19305_vm13  ;;  %v10573_v40 = vsel %vm2837_vm15, 1.0, %v18823_v1  ;;  %v12777_v19 = vpop.f32.mrf.mxu2 }
 0x147   : > { %vm19306_vm10 = vmmov %vm19302_vm0  ;;  %v10576_v51 = vsel %vm2840_vm5, 1.0, %v18823_v1  ;;  %10595 = vmatpush.msk.msra.mxu3 %vm19313_vm6, %v2867_v8  ;;  %v2816_v25 = vpop.permute.xlu0 %2815 }
 0x148   : > { %vm19307_vm11 = vmmov %vm19302_vm0  ;;  %vm19314_vm0 = vcmp.lt.s32.totalorder %v12071_v45, 32  ;;  %v12758_v45 = vpop.f32.mrf.mxu3 }
 0x149   : > { %vm19309_vm8 = vmmov %vm19308_vm7 }
 0x14a   : > { %10586 = vmatmul.msk.f32.vlgmr.msra.gmra.mxu2 %vm19306_vm10, %v10580_v59  ;;  %v2822_v41 = vsel %vm19309_vm8, %v12619_v17, %v2814_v52  ;;  %vm19311_vm12 = vmmov %vm19308_vm7 }
 0x14b   : > { %10588 = vmatmul.msk.f32.vlgmr.msrb.gmra.mxu3 %vm19307_vm11, %v10580_v59  ;;  %vm19310_vm11 = vmmov %vm19308_vm7  ;;  %v2826_v15 = vsel %vm19311_vm12, %v2804_v42, %v2806_v43  ;;  %v2864_v17 = vmul.f32 %v10576_v51, %v2822_v41  ;;  %v12775_v11 = vpop.f32.mrf.mxu1 }
 0x14c   : > { %v2825_v47 = vsel %vm19310_vm11, %v2806_v43, %v2808_v38  ;;  %v2860_v6 = vmul.f32 %v10572_v49, %v2826_v15  ;;  %vm2841_vm1 = vmand %vm12561_vm4, %vm19312_vm9  ;;  %v12773_v38 = vpop.f32.mrf.mxu0 }
 0x14d   : > { %v2861_v24 = vmul.f32 %v10573_v40, %v2825_v47  ;;  %vm2842_vm3 = vmand %vm19289_vm2, %vm19314_vm0  ;;  %v10577_v28 = vsel %vm2841_vm1, 1.0, %v18823_v1 }
 0x14e   : > { %vm19315_vm14 = vmmov %vm19313_vm6  ;;  %v10578_v20 = vsel %vm2842_vm3, 1.0, %v18823_v1 }
 0x14f   : > { %10581 = vmatpush.msk.msrb.mxu0 %vm19315_vm14, %v2860_v6  ;;  %vm19316_vm15 = vmmov %vm19313_vm6 }
 0x150   : > { %10583 = vmatpush.msk.msra.mxu1 %vm19316_vm15, %v2861_v24  ;;  %vm19317_vm13 = vmmov %vm19306_vm10  ;;  %v12771_v50 = vpop.f32.mrf.mxu3 }
 0x151   : > { %10582 = vmatmul.msk.f32.vlgmr.msrb.gmra.mxu0 %vm19317_vm13, %v10580_v59  ;;  %vm19318_vm5 = vmmov %vm19306_vm10  ;;  %v989_v22 = vadd.f32 %v12771_v50, %v12722_v21 }
 0x152   : > { %10584 = vmatmul.msk.f32.vlgmr.msra.gmra.mxu1 %vm19318_vm5, %v10580_v59  ;;  %vm19319_vm4 = vmmov %vm19313_vm6  ;;  %v1269_v37 = vpop.f32.mrf.mxu2 }
 0x153   : > { %10589 = vmatpush.msk.msra.mxu0 %vm19319_vm4, %v2864_v17  ;;  %vm19320_vm10 = vmmov %vm19318_vm5  ;;  %v1374_v61 = vadd.f32 %v1269_v37, %v969_v4  ;;  %v1009_v4 = vadd.f32 %v12773_v38, %v12700_v29 }
 0x154   : > { %10596 = vmatmul.msk.f32.vlgmr.msra.gmra.mxu3 %vm19320_vm10, %v10580_v59  ;;  %vm19321_vm2 = vmmov %vm19308_vm7  ;;  %v1229_v14 = vpop.f32.mrf.mxu0 }
 0x155   : > { %v2820_v56 = vsel %vm19321_vm2, %v2816_v25, %v2818_v10  ;;  %vm19322_vm7 = vmmov %vm19321_vm2  ;;  %v1249_v31 = vpop.f32.mrf.mxu1 }
 0x156   : > { %v2821_v13 = vsel %vm19322_vm7, %v2814_v52, %v2816_v25  ;;  %v2866_v55 = vmul.f32 %v10578_v20, %v2820_v56  ;;  %vm19323_vm8 = vmmov %vm19319_vm4 }
 0x157   : > { %v2865_v58 = vmul.f32 %v10577_v28, %v2821_v13  ;;  %vm19324_vm11 = vmmov %vm19319_vm4 }
 0x158   : > { %10593 = vmatpush.msk.msrb.mxu2 %vm19324_vm11, %v2866_v55  ;;  %vm19325_vm12 = vmmov %vm19318_vm5  ;;  %v12779_v57 = vpop.f32.mrf.mxu3 }
 0x159   : > { %10591 = vmatpush.msk.msrb.mxu1 %vm19323_vm8, %v2865_v58  ;;  %10594 = vmatmul.msk.f32.vlgmr.msrb.gmra.mxu2 %vm19325_vm12, %v10580_v59  ;;  %vm19326_vm9 = vmmov %vm19318_vm5 }
 0x15a   : > { %10590 = vmatmul.msk.f32.vlgmr.msra.gmra.mxu0 %vm19326_vm9, %v10580_v59  ;;  %vm19327_vm1 = vmmov %vm19318_vm5 }
 0x15b   : > { %10592 = vmatmul.msk.f32.vlgmr.msrb.gmra.mxu1 %vm19327_vm1, %v10580_v59 }
 0x15c   : > { %v12781_v30 = vpop.f32.mrf.mxu0  ;;  %v12785_v44 = vpop.f32.mrf.mxu2 }
 0x15d   : > { %v12783_v9 = vpop.f32.mrf.mxu1 }
 0x160   : > { %v1289_v48 = vpop.f32.mrf.mxu3 }
 0x164   : > { %v1538_v7 = vpop.f32.mrf.mxu0  ;;  %v1578_v3 = vpop.f32.mrf.mxu2 }
 0x165   : > { %v1558_v34 = vpop.f32.mrf.mxu1 }
 0x168   : > { %v1369_v2 = vpop.f32.mrf.mxu3 }
 0x16d   : > { %v12789_v60 = vpop.f32.mrf.mxu1 }
 0x16e   : > { %v12787_v36 = vpop.f32.mrf.mxu0 }
 0x170   : > { %v1598_v23 = vpop.f32.mrf.mxu3 }
 0x176   : > { %v12791_v33 = vpop.f32.mrf.mxu2  ;;  %v1742_v54 = vpop.f32.mrf.mxu0 }
 0x177   : > { %19328 = vst [vmem:[#allocation13_spill] sm:$0xff] %v12791_v33 }
 0x178   : > { %v1678_v42 = vpop.f32.mrf.mxu3 }
 0x17b   : > { %v1762_v32 = vpop.f32.mrf.mxu1 }
 0x17f   : > { %v12793_v62 = vpop.f32.mrf.mxu0 }
 0x183   : > { %v1782_v59 = vpop.f32.mrf.mxu2 }
 0x184   : > { %v1802_v52 = vpop.f32.mrf.mxu3 }
 0x185   : > { %v12795_v10 = vpop.f32.mrf.mxu1 }
 0x186   : > { %19329 = vst [vmem:[#allocation14_spill] sm:$0xff] %v12795_v10 }
 0x188   : > { %v2027_v51 = vpop.f32.mrf.mxu0 }
 0x18d   : > { %v12797_v49 = vpop.f32.mrf.mxu2 }
 0x18e   : > { %19330 = vst [vmem:[#allocation15_spill] sm:$0xff] %v12797_v49  ;;  %v12799_v40 = vpop.f32.mrf.mxu3 }
 0x190   : > { %v2047_v35 = vpop.f32.mrf.mxu1  ;;  %v12801_v8 = vpop.f32.mrf.mxu0 }
 0x198   : > { %v2067_v43 = vpop.f32.mrf.mxu2 }
 0x199   : > { %v2087_v41 = vpop.f32.mrf.mxu3 }
 0x19b   : > { %v12803_v47 = vpop.f32.mrf.mxu1 }
 0x19c   : > { %19331 = vst [vmem:[#allocation16_spill] sm:$0xff] %v12803_v47  ;;  %v1683_v47 = vadd.f32 %v1578_v3, %v1374_v61  ;;  %v1069_v61 = vadd.f32 %v12779_v57, %v12758_v45 }
 0x19e   : > { %v3069_v50 = vpop.permute.xlu1 %3068 }
 0x1a2   : > { %v12805_v15 = vpop.f32.mrf.mxu2 }
 0x1a3   : > { %19332 = vst [vmem:[#allocation17_spill] sm:$0xff] %v12805_v15  ;;  %v12807_v6 = vpop.f32.mrf.mxu3  ;;  %v1372_v15 = vadd.f32 %v1229_v14, %v929_v16  ;;  %v1376_v14 = vadd.f32 %v12781_v30, %v1009_v4  ;;  %v1049_v30 = vadd.f32 %v12777_v19, %v12725_v18 }
 0x1a5   : > { %v2344_v24 = vpop.f32.mrf.mxu0  ;;  %v1681_v10 = vadd.f32 %v1538_v7, %v1372_v15 }
 0x1a6   : > { %v2364_v17 = vpop.f32.mrf.mxu1 }
 0x1a7   : > { %v1885_v46 = vadd.f32 %v1742_v54, %v1681_v10 }
 0x1a9   : > { %v2170_v16 = vadd.f32 %v2027_v51, %v1885_v46 }
 0x1ab   : > { %v2487_v7 = vadd.f32 %v2344_v24, %v2170_v16 }
 0x1ad   : > { %v2384_v28 = vpop.f32.mrf.mxu2  ;;  %v12809_v25 = vpop.f32.mrf.mxu0 }
 0x1ae   : > { %v2404_v20 = vpop.f32.mrf.mxu3  ;;  %19333 = vst [vmem:[#allocation18_spill] sm:$0xff] %v12809_v25  ;;  %v12811_v56 = vpop.f32.mrf.mxu1 }
 0x1af   : > { %19334 = vst [vmem:[#allocation19_spill] sm:$0xff] %v12811_v56  ;;  %v1373_v56 = vadd.f32 %v1249_v31, %v949_v5  ;;  %v1375_v5 = vadd.f32 %v1289_v48, %v989_v22  ;;  %v1379_v31 = vadd.f32 %v1369_v2, %v1069_v61  ;;  %v1029_v48 = vadd.f32 %v12775_v11, %v12708_v39 }
 0x1b1   : > { %v1682_v25 = vadd.f32 %v1558_v34, %v1373_v56  ;;  %v1684_v37 = vadd.f32 %v1598_v23, %v1375_v5  ;;  %v1688_v3 = vadd.f32 %v1678_v42, %v1379_v31 }
 0x1b3   : > { %v1886_v53 = vadd.f32 %v1762_v32, %v1682_v25  ;;  %v1888_v38 = vadd.f32 %v1802_v52, %v1684_v37  ;;  %v1892_v23 = vadd.f32 %v12799_v40, %v1688_v3 }
 0x1b5   : > { %v12813_v13 = vpop.f32.mrf.mxu2  ;;  %v2629_v63 = vpop.f32.mrf.mxu0  ;;  %v2171_v26 = vadd.f32 %v2047_v35, %v1886_v53  ;;  %v2177_v52 = vadd.f32 %v12807_v6, %v1892_v23  ;;  %v19340_v15 = vld [vmem:[#allocation18_spill] sm:$0xff] }
 0x1b6   : > { %19335 = vst [vmem:[#allocation20_spill] sm:$0xff] %v12813_v13  ;;  %v12815_v58 = vpop.f32.mrf.mxu3  ;;  %v2649_v12 = vpop.f32.mrf.mxu1  ;;  %v2772_v32 = vadd.f32 %v2629_v63, %v2487_v7  ;;  %v1378_v63 = vadd.f32 %v12785_v44, %v1049_v30  ;;  %v19346_v5 = vld [vmem:[#allocation19_spill] sm:$0xff] }
 0x1b7   : > { %19336 = vst [vmem:[#allocation21_spill] sm:$0xff] %v12815_v58  ;;  %v2488_v34 = vadd.f32 %v2364_v17, %v2171_v26 }
 0x1b9   : > { %v2773_v45 = vadd.f32 %v2649_v12, %v2488_v34  ;;  %v1377_v12 = vadd.f32 %v12783_v9, %v1029_v48  ;;  %v19342_v9 = vld [vmem:[#allocation14_spill] sm:$0xff] }
 0x1bd   : > { %v2669_v55 = vpop.f32.mrf.mxu2  ;;  %v19347_v26 = vld [vmem:[#allocation20_spill] sm:$0xff] }
 0x1be   : > { %v12817_v1 = vpop.f32.mrf.mxu3  ;;  %v19338_v40 = vld [vmem:[#allocation21_spill] sm:$0xff] }
 0x1bf   : > { %19337 = vst [vmem:[#allocation22_spill] sm:$0xff] %v12817_v1  ;;  %v1887_v1 = vadd.f32 %v1782_v59, %v1683_v47 }
 0x1c1   : > { %v2709_v33 = vpop.f32.mrf.mxu0  ;;  %v2172_v0 = vadd.f32 %v2067_v43, %v1887_v1  ;;  %v1685_v1 = vadd.f32 %v12787_v36, %v1376_v14  ;;  %v2173_v36 = vadd.f32 %v2087_v41, %v1888_v38  ;;  %v2494_v43 = vadd.f32 %v19338_v40, %v2177_v52  ;;  %v19339_v41 = vld [vmem:[#allocation13_spill] sm:$0xff] }
 0x1c2   : > { %v12826_v58 = vpop.f32.mrf.mxu1  ;;  %v1687_v47 = vadd.f32 %v19339_v41, %v1378_v63 }
 0x1c3   : > { %v2489_v27 = vadd.f32 %v2384_v28, %v2172_v0  ;;  %v1889_v2 = vadd.f32 %v12793_v62, %v1685_v1  ;;  %v2490_v11 = vadd.f32 %v2404_v20, %v2173_v36  ;;  %v1686_v62 = vadd.f32 %v12789_v60, %v1377_v12  ;;  %v19343_v28 = vld [vmem:[#allocation15_spill] sm:$0xff]  ;;  %v19345_v0 = vld [vmem:[#allocation17_spill] sm:$0xff] }
 0x1c4   : > { %v1891_v20 = vadd.f32 %v19343_v28, %v1687_v47 }
 0x1c5   : > { %v12824_v13 = vpop.f32.mrf.mxu2  ;;  %v2774_v21 = vadd.f32 %v2669_v55, %v2489_v27  ;;  %v2174_v39 = vadd.f32 %v12801_v8, %v1889_v2  ;;  %v1890_v8 = vadd.f32 %v19342_v9, %v1686_v62  ;;  %v19344_v55 = vld [vmem:[#allocation16_spill] sm:$0xff] }
 0x1c6   : > { %v2769_v49 = vpop.f32.mrf.mxu3  ;;  %v19341_v44 = vld [vmem:[#allocation22_spill] sm:$0xff]  ;;  %v2176_v4 = vadd.f32 %v19345_v0, %v1891_v20 }
 0x1c7   : > { %v2491_v24 = vadd.f32 %v19340_v15, %v2174_v39  ;;  %v2775_v17 = vadd.f32 %v19341_v44, %v2490_v11  ;;  %v2779_v6 = vadd.f32 %v2769_v49, %v2494_v43  ;;  %v2175_v22 = vadd.f32 %v19344_v55, %v1890_v8 }
 0x1c8   : > { %v2493_v27 = vadd.f32 %v19347_v26, %v2176_v4 }
 0x1c9   : > { %v2776_v25 = vadd.f32 %v2709_v33, %v2491_v24  ;;  %v2492_v16 = vadd.f32 %v19346_v5, %v2175_v22 }
 0x1ca   : > { %v2778_v7 = vadd.f32 %v12824_v13, %v2493_v27  ;;  %v19348_v13 = vld [vmem:[#allocation5_spill] sm:$0xff] }
 0x1cb   : > { %v2777_v33 = vadd.f32 %v12826_v58, %v2492_v16  ;;  %vm19349_vm6 = vcmp.lt.s32.totalorder %v19348_v13, 127  ;;  %vm19357_vm10 = vcmp.lt.s32.totalorder %v19348_v13, 96 }
 0x1cc   : > { %vm19350_vm0 = vmmov %vm19349_vm6 }
 0x1cd   : > { %v2954_v54 = vpop.f32.mrf.mxu2  ;;  %vm19351_vm3 = vmmov %vm19350_vm0 }
 0x1ce   : > { %v2974_v29 = vpop.f32.mrf.mxu3  ;;  %v3059_v57 = vadd.f32 %v2954_v54, %v2774_v21  ;;  %v2914_v10 = vpop.f32.mrf.mxu0  ;;  %vm19352_vm14 = vmmov %vm19350_vm0 }
 0x1cf   : > { %v2934_v59 = vpop.f32.mrf.mxu1  ;;  %v3057_v51 = vadd.f32 %v2914_v10, %v2772_v32  ;;  %v3060_v56 = vadd.f32 %v2974_v29, %v2775_v17  ;;  %vm19353_vm15 = vmmov %vm19350_vm0 }
 0x1d0   : > { %v3058_v42 = vadd.f32 %v2934_v59, %v2773_v45  ;;  %v3073_v35 = vadd.f32 %v3069_v50, %v3059_v57  ;;  %vm19354_vm13 = vmmov %vm19350_vm0 }
 0x1d1   : > { %v3071_v18 = vadd.f32 %v3069_v50, %v3057_v51  ;;  %v3074_v37 = vadd.f32 %v3069_v50, %v3060_v56  ;;  %vm19355_vm5 = vmmov %vm19350_vm0 }
 0x1d2   : > { %3083 = vrot.lane.b32.xlu1 %v3073_v35, %s11436_s15  ;;  %v3072_v19 = vadd.f32 %v3069_v50, %v3058_v42  ;;  %vm19356_vm4 = vmmov %vm19350_vm0 }
 0x1d3   : > { %3079 = vrot.lane.b32.xlu2 %v3071_v18, %s11436_s15  ;;  %vm19358_vm2 = vmmov %vm19357_vm10 }
 0x1d4   : > { %3081 = vrot.lane.b32.xlu0 %v3072_v19, %s11436_s15  ;;  %vm19361_vm7 = vmmov %vm19358_vm2 }
 0x1d5   : > { %vm19362_vm8 = vmmov %vm19358_vm2 }
 0x1d6   : > { %vm19363_vm11 = vmmov %vm19358_vm2 }
 0x1d7   : > { %v3054_v60 = vpop.f32.mrf.mxu3  ;;  %v2994_v53 = vpop.f32.mrf.mxu0  ;;  %vm19366_vm12 = vmmov %vm19358_vm2 }
 0x1d8   : > { %v3064_v46 = vadd.f32 %v3054_v60, %v2779_v6  ;;  %v3061_v61 = vadd.f32 %v2994_v53, %v2776_v25  ;;  %v3014_v49 = vpop.f32.mrf.mxu1  ;;  %vm19367_vm9 = vmmov %vm19358_vm2 }
 0x1d9   : > { %v3062_v21 = vadd.f32 %v3014_v49, %v2777_v33  ;;  %vm19370_vm1 = vmmov %vm19358_vm2  ;;  %v19372_v33 = vld [vmem:[#allocation8_spill] sm:$0xff] }
 0x1da   : > { %v3078_v14 = vadd.f32 %v3069_v50, %v3064_v46  ;;  %v3075_v31 = vadd.f32 %v3069_v50, %v3061_v61 }
 0x1db   : > { %v3076_v3 = vadd.f32 %v3069_v50, %v3062_v21  ;;  %v19373_v21 = vld [vmem:[#allocation10_spill] sm:$0xff] }
 0x1dc   : > { %3085 = vrot.lane.b32.xlu0 %v3074_v37, %s11436_s15  ;;  %3093 = vrot.lane.b32.xlu2 %v3078_v14, %s11436_s15  ;;  %v3034_v34 = vpop.f32.mrf.mxu2 }
 0x1dd   : > { %3087 = vrot.lane.b32.xlu1 %v3075_v31, %s11436_s15  ;;  %v3063_v1 = vadd.f32 %v3034_v34, %v2778_v7  ;;  %v12961_v7 = vshra.s32 %v19348_v13, 6  ;;  %v12964_v34 = vshra.s32 %v19372_v33, 6 }
 0x1df   : > { %v3077_v54 = vadd.f32 %v3069_v50, %v3063_v1  ;;  %v12967_v1 = vshra.s32 %v19373_v21, 6 }
 0x1e4   : > { %3091 = vrot.lane.b32.xlu0 %v3077_v54, %s11436_s15  ;;  %3089 = vrot.lane.b32.xlu2 %v3076_v3, %s11436_s15  ;;  %s11442_s15 = smov 64  }
 0x22d   : > { %v3080_v29 = vpop.permute.xlu2 %3079 }
 0x236   : > { %v3094_v38 = vpop.permute.xlu2 %3093 }
 0x237   : > { %v3102_v58 = vsel %vm19349_vm6, %v3094_v38, %v3080_v29 }
 0x238   : > { %v3110_v32 = vmax.f32 %v3078_v14, %v3102_v58  ;;  %v4849_v58 = vadd.s32 1, %v12967_v1 }
 0x23a   : > { %3125 = vrot.lane.b32.xlu0 %v3110_v32, %s11439_s19 }
 0x23e   : > { %v3090_v59 = vpop.permute.xlu2 %3089 }
 0x244   : > { %v3084_v45 = vpop.permute.xlu1 %3083 }
 0x246   : > { %v3082_v57 = vpop.permute.xlu0 %3081 }
 0x247   : > { %v3100_v48 = vsel %vm19350_vm0, %v3082_v57, %v3084_v45  ;;  %v3101_v50 = vsel %vm19351_vm3, %v3080_v29, %v3082_v57  ;;  %v3200_v29 = vadd.s32 4294967295, %v12961_v7  ;;  %v3159_v57 = vshra.s32 %v19348_v13, 1 }
 0x248   : > { %v3103_v30 = vmax.f32 %v3071_v18, %v3101_v50  ;;  %v3104_v2 = vmax.f32 %v3072_v19, %v3100_v48  ;;  %v19374_v48 = vld [vmem:[#allocation7_spill] sm:$0xff] }
 0x249   : > { %vm3208_vm6 = vcmp.ge.s32.totalorder %v3200_v29, 0  ;;  %vm3216_vm0 = vcmp.lt.s32.totalorder %v3200_v29, 16  ;;  %v12983_v50 = vshra.s32 %v19374_v48, 6 }
 0x24a   : > { %3113 = vrot.lane.b32.xlu2 %v3104_v2, %s11439_s19  ;;  %3111 = vrot.lane.b32.xlu1 %v3103_v30, %s11439_s19 }
 0x24e   : > { %v3086_v23 = vpop.permute.xlu0 %3085 }
 0x24f   : > { %v3099_v10 = vsel %vm19352_vm14, %v3084_v45, %v3086_v23  ;;  %v3088_v36 = vpop.permute.xlu1 %3087 }
 0x250   : > { %v3105_v42 = vmax.f32 %v3073_v35, %v3099_v10  ;;  %v3097_v51 = vsel %vm19353_vm15, %v3088_v36, %v3090_v59  ;;  %v3098_v63 = vsel %vm19354_vm13, %v3086_v23, %v3088_v36  ;;  %vm4857_vm15 = vcmp.ge.s32.totalorder %v4849_v58, 0 }
 0x251   : > { %v3106_v12 = vmax.f32 %v3074_v37, %v3098_v63  ;;  %v3107_v52 = vmax.f32 %v3075_v31, %v3097_v51  ;;  %vm4865_vm13 = vcmp.lt.s32.totalorder %v4849_v58, 16  ;;  %v3207_v23 = vadd.s32 4294967295, %v12967_v1 }
 0x252   : > { %3115 = vrot.lane.b32.xlu1 %v3105_v42, %s11439_s19  ;;  %v13001_v10 = vand.u32 31, %v3159_v57  ;;  %v19379_v36 = vmov 0  ;;  %v4844_v63 = vadd.s32 1, %v12983_v50  ;;  %v19425_v57 = vmov 0 }
 0x253   : > { %3117 = vrot.lane.b32.xlu2 %v3106_v12, %s11439_s19  ;;  %3119 = vrot.lane.b32.xlu0 %v3107_v52, %s11439_s19 }
 0x256   : > { %v3092_v39 = vpop.permute.xlu0 %3091 }
 0x257   : > { %v3095_v11 = vsel %vm19355_vm5, %v3092_v39, %v3094_v38  ;;  %v3096_v35 = vsel %vm19356_vm4, %v3090_v59, %v3092_v39  ;;  %v4848_v38 = vadd.s32 1, %v12964_v34  ;;  %vm12985_vm5 = vmand %vm3208_vm6, %vm3216_vm0  ;;  %v19377_v59 = vmov 0 }
 0x258   : > { %v3108_v18 = vmax.f32 %v3076_v3, %v3096_v35  ;;  %v3109_v19 = vmax.f32 %v3077_v54, %v3095_v11  ;;  %v3165_v3 = vshra.s32 %v19372_v33, 1  ;;  %v3166_v54 = vshra.s32 %v19373_v21, 1  ;;  %v13265_v21 = vld [vmem:[%s18768_s3 + $0x10] sm:$0xff] }
 0x259   : > { %vm4856_vm3 = vcmp.ge.s32.totalorder %v4848_v38, 0  ;;  %vm4864_vm14 = vcmp.lt.s32.totalorder %v4848_v38, 16  ;;  %vm3223_vm6 = vcmp.lt.s32.totalorder %v3207_v23, 16 }
 0x25a   : > { %3123 = vrot.lane.b32.xlu1 %v3109_v19, %s11439_s19  ;;  %v12979_v45 = vand.u32 31, %v3166_v54  ;;  %v3206_v54 = vadd.s32 4294967295, %v12964_v34 }
 0x25b   : > { %3121 = vrot.lane.b32.xlu2 %v3108_v18, %s11439_s19  ;;  %s11443_s19 = smov 66  }
 0x2a4   : > { %v3114_v62 = vpop.permute.xlu2 %3113 }
 0x2ac   : > { %v3126_v40 = vpop.permute.xlu0 %3125 }
 0x2ad   : > { %v3118_v9 = vpop.permute.xlu2 %3117 }
 0x2b5   : > { %v3122_v0 = vpop.permute.xlu2 %3121 }
 0x2bc   : > { %v3112_v43 = vpop.permute.xlu1 %3111 }
 0x2bd   : > { %v3133_v41 = vsel %vm19357_vm10, %v3112_v43, %v3114_v62  ;;  %v3134_v47 = vsel %vm19358_vm2, %v3126_v40, %v3112_v43  ;;  %vm18841_vm10 = vcmp.ge.s32.totalorder %v12979_v45, 0  ;;  %vm12993_vm2 = vmand %vm4856_vm3, %vm4864_vm14  ;;  %vm18840_vm3 = vcmp.ge.s32.totalorder %v13001_v10, 0 }
 0x2be   : > { %v3135_v15 = vmax.f32 %v3103_v30, %v3133_v41  ;;  %v3142_v24 = vmax.f32 %v3110_v32, %v3134_v47  ;;  %v12977_v32 = vand.u32 31, %v3165_v3  ;;  %v19375_v30 = vmov 0 }
 0x2bf   : > { %v19376_v30 = vsel %vm12985_vm5, 4294967295, %v19375_v30  ;;  %v19378_v59 = vsel %vm12993_vm2, 4294967295, %v19377_v59  ;;  %v19437_v41 = vmov 0 }
 0x2c0   : > { %v12895_v44 = vmax.f32 %v3135_v15, 0.0  ;;  %v12897_v17 = vmax.f32 %v3142_v24, 0.0  ;;  %vm18838_vm4 = vcmp.ge.s32.totalorder %v12977_v32, 0  ;;  %v19391_v15 = vmov 0 }
 0x2c1   : > { %v3202_v24 = vadd.s32 4294967295, %v12983_v50 }
 0x2c2   : > { %19359 = vst [vmem:[#allocation21_spill] sm:$0xff] %v12895_v44  ;;  %3312 = vrot.lane.b32.xlu1 %v12897_v17, %s11442_s15  ;;  %3298 = vrot.lane.b32.xlu0 %v12895_v44, %s11442_s15 }
 0x2c3   : > { %19360 = vst [vmem:[#allocation13_spill] sm:$0xff] %v12897_v17 }
 0x2c4   : > { %v3116_v8 = vpop.permute.xlu1 %3115 }
 0x2c5   : > { %v3120_v6 = vpop.permute.xlu0 %3119  ;;  %v3131_v28 = vsel %vm19361_vm7, %v3116_v8, %v3118_v9  ;;  %v3132_v20 = vsel %vm19362_vm8, %v3114_v62, %v3116_v8  ;;  %vm18837_vm7 = vcmp.lt.s32.totalorder %v12977_v32, 16  ;;  %vm13004_vm8 = vmand %vm4857_vm15, %vm4865_vm13  ;;  %vm4852_vm15 = vcmp.ge.s32.totalorder %v4844_v63, 0 }
 0x2c6   : > { %v3130_v25 = vsel %vm19363_vm11, %v3118_v9, %v3120_v6  ;;  %v3136_v56 = vmax.f32 %v3104_v2, %v3132_v20  ;;  %v3137_v60 = vmax.f32 %v3105_v42, %v3131_v28  ;;  %v3129_v31 = vsel %vm19370_vm1, %v3120_v6, %v3122_v0  ;;  %v19381_v42 = vld [vmem:[#allocation9_spill] sm:$0xff] }
 0x2c7   : > { %v3138_v55 = vmax.f32 %v3106_v12, %v3130_v25  ;;  %v3139_v37 = vmax.f32 %v3107_v52, %v3129_v31  ;;  %v3161_v2 = vshra.s32 %v19374_v48, 1  ;;  %v19380_v36 = vsel %vm13004_vm8, 4294967295, %v19379_v36  ;;  %v19382_v52 = vld [vmem:[#allocation6_spill] sm:$0xff] }
 0x2c8   : > { %v12909_v22 = vmax.f32 %v3136_v56, 0.0  ;;  %v12911_v46 = vmax.f32 %v3137_v60, 0.0  ;;  %v13009_v51 = vshra.s32 %v19381_v42, 6  ;;  %vm18839_vm11 = vcmp.lt.s32.totalorder %v12979_v45, 16  ;;  %v5622_v56 = vld [vmem:[%s18769_s4 + $0x8] sm:$0xff] }
 0x2c9   : > { %v12913_v53 = vmax.f32 %v3138_v55, 0.0  ;;  %v12936_v49 = vmax.f32 %v3139_v37, 0.0  ;;  %v13023_v12 = vand.u32 31, %v3161_v2  ;;  %v13026_v39 = vshra.s32 %v19382_v52, 6 }
 0x2ca   : > { %19364 = vst [vmem:[#allocation18_spill] sm:$0xff] %v12911_v46  ;;  %3300 = vrot.lane.b32.xlu1 %v12909_v22, %s11442_s15  ;;  %3302 = vrot.lane.b32.xlu2 %v12911_v46, %s11442_s15  ;;  %vm3215_vm1 = vcmp.ge.s32.totalorder %v3207_v23, 0  ;;  %v3162_v35 = vshra.s32 %v19381_v42, 1  ;;  %vm4860_vm13 = vcmp.lt.s32.totalorder %v4844_v63, 16  ;;  %v3160_v62 = vshra.s32 %v19382_v52, 1 }
 0x2cb   : > { %19365 = vst [vmem:[#allocation22_spill] sm:$0xff] %v12913_v53  ;;  %3304 = vrot.lane.b32.xlu0 %v12913_v53, %s11442_s15  ;;  %v3201_v43 = vadd.s32 4294967295, %v13026_v39  ;;  %v19393_v8 = vmov 0  ;;  %v4842_v6 = vadd.s32 1, %v12961_v7  ;;  %v19395_v28 = vmov 0 }
 0x2cc   : > { %v3124_v4 = vpop.permute.xlu1 %3123  ;;  %19371 = vst [vmem:[#allocation16_spill] sm:$0xff] %v12936_v49  ;;  %v13058_v47 = vand.u32 31, %v3162_v35  ;;  %v13076_v9 = vand.u32 31, %v3160_v62  ;;  %v4843_v20 = vadd.s32 1, %v13026_v39  ;;  %v19400_v60 = vmov 0 }
 0x2cd   : > { %v3127_v61 = vsel %vm19366_vm12, %v3124_v4, %v3126_v40  ;;  %v3128_v5 = vsel %vm19367_vm9, %v3122_v0, %v3124_v4  ;;  %vm5129_vm12 = vmand %vm12993_vm2, %vm18838_vm4  ;;  %v19387_v40 = vmov 0  ;;  %vm18849_vm4 = vcmp.lt.s32.totalorder %v13023_v12, 16  ;;  %v19442_v0 = vld [vmem:[#allocation11_spill] sm:$0xff] }
 0x2ce   : > { %v3140_v16 = vmax.f32 %v3108_v18, %v3128_v5  ;;  %v3141_v26 = vmax.f32 %v3109_v19, %v3127_v61  ;;  %vm5130_vm9 = vmand %vm13004_vm8, %vm18841_vm10  ;;  %v19385_v18 = vmov 0  ;;  %v3203_v19 = vadd.s32 4294967295, %v13009_v51  ;;  %v19408_v5 = vld [vmem:[#allocation12_spill] sm:$0xff] }
 0x2cf   : > { %vm13030_vm0 = vmand %vm5129_vm12, %vm18837_vm7  ;;  %vm18846_vm7 = vcmp.ge.s32.totalorder %v13023_v12, 0  ;;  %vm18855_vm2 = vcmp.lt.s32.totalorder %v13001_v10, 16  ;;  %v19406_v61 = vmov 0  ;;  %v19412_v31 = vmov 0 }
 0x2d0   : > { %v12925_v27 = vmax.f32 %v3140_v16, 0.0  ;;  %v12927_v14 = vmax.f32 %v3141_v26, 0.0  ;;  %vm13038_vm14 = vmand %vm5130_vm9, %vm18839_vm11  ;;  %v13131_v16 = vshra.s32 %v19408_v5, 6  ;;  %v19414_v37 = vmov 0 }
 0x2d1   : > { %v19386_v18 = vsel %vm13038_vm14, 4294967295, %v19385_v18  ;;  %vm13044_vm12 = vmand %vm3215_vm1, %vm3223_vm6  ;;  %vm3211_vm1 = vcmp.ge.s32.totalorder %v3203_v19, 0  ;;  %vm3219_vm6 = vcmp.lt.s32.totalorder %v3203_v19, 16  ;;  %vm4859_vm14 = vcmp.lt.s32.totalorder %v4843_v20, 16 }
 0x2d2   : > { %19368 = vst [vmem:[#allocation14_spill] sm:$0xff] %v12925_v27  ;;  %3179 = vrot.lane.b32.xlu1 %v12911_v46, %s11443_s19  ;;  %3310 = vrot.lane.b32.xlu2 %v12927_v14, %s11442_s15  ;;  %v19388_v40 = vsel %vm13044_vm12, 4294967295, %v19387_v40  ;;  %vm13054_vm9 = vmand %vm12985_vm5, %vm18840_vm3  ;;  %vm19397_vm5 = vcmp.ge.s32.totalorder %v12979_v45, 0  ;;  %v3164_v3 = vshra.s32 %v19408_v5, 1  ;;  %v4847_v29 = vadd.s32 1, %v13131_v16 }
 0x2d3   : > { %19369 = vst [vmem:[#allocation15_spill] sm:$0xff] %v12927_v14  ;;  %3308 = vrot.lane.b32.xlu0 %v12925_v27, %s11442_s15  ;;  %vm13065_vm11 = vmand %vm4852_vm15, %vm4860_vm13  ;;  %vm3209_vm15 = vcmp.ge.s32.totalorder %v3201_v43, 0  ;;  %vm3217_vm13 = vcmp.lt.s32.totalorder %v3201_v43, 16  ;;  %v19428_v2 = vmov 0  ;;  %v19436_v62 = vmov 0.0  }
 0x2d4   : > { %v19392_v15 = vsel %vm13065_vm11, 4294967295, %v19391_v15  ;;  %vm5125_vm3 = vmand %vm13065_vm11, %vm18846_vm7  ;;  %vm18854_vm7 = vcmp.ge.s32.totalorder %v13058_v47, 0  ;;  %vm3218_vm11 = vcmp.lt.s32.totalorder %v3202_v24, 16  ;;  %v13194_v23 = vand.u32 31, %v3164_v3 }
 0x2d5   : > { %vm13080_vm10 = vmand %vm5125_vm3, %vm18849_vm4  ;;  %vm3210_vm4 = vcmp.ge.s32.totalorder %v3202_v24, 0  ;;  %v19440_v25 = vmov 0  ;;  %v13238_v4 = vshra.s32 %v19442_v0, 6  ;;  %v4845_v19 = vadd.s32 1, %v13009_v51 }
 0x2d6   : > { %v19394_v8 = vsel %vm13080_vm10, 4294967295, %v19393_v8  ;;  %vm13086_vm8 = vmand %vm3211_vm1, %vm3219_vm6  ;;  %vm4858_vm6 = vcmp.lt.s32.totalorder %v4842_v6, 16  ;;  %vm4851_vm10 = vcmp.ge.s32.totalorder %v4843_v20, 0  ;;  %v19479_v3 = vmov 0 }
 0x2d7   : > { %v19396_v28 = vsel %vm13086_vm8, 4294967295, %v19395_v28  ;;  %vm13096_vm3 = vmand %vm13044_vm12, %vm19397_vm5  ;;  %v4846_v5 = vadd.s32 1, %v13238_v4 }
 0x2d8   : > { %vm13103_vm1 = vmand %vm3209_vm15, %vm3217_vm13  ;;  %vm4850_vm13 = vcmp.ge.s32.totalorder %v4842_v6, 0  ;;  %v10775_v6 = vsel %vm13030_vm0, 1.0, %v19436_v62  ;;  %vm18877_vm0 = vcmask 64512  }
 0x2d9   : > { %v19401_v60 = vsel %vm13103_vm1, 4294967295, %v19400_v60  ;;  %vm13114_vm5 = vmand %vm13054_vm9, %vm18855_vm2  ;;  %vm19409_vm9 = vcmp.ge.s32.totalorder %v13076_v9, 0 }
 0x2da   : > { %3177 = vrot.lane.b32.xlu1 %v12909_v22, %s11443_s19  ;;  %3181 = vrot.lane.b32.xlu2 %v12913_v53, %s11443_s19  ;;  %vm13122_vm15 = vmand %vm13086_vm8, %vm18854_vm7  ;;  %v10605_v43 = vsel %vm13114_vm5, 1.0, %v19436_v62 }
 0x2db   : > { %3306 = vrot.lane.b32.xlu0 %v12936_v49, %s11442_s15  ;;  %vm13126_vm12 = vmand %vm3210_vm4, %vm3218_vm11 }
 0x2dc   : > { %v19407_v61 = vsel %vm13126_vm12, 4294967295, %v19406_v61  ;;  %vm13139_vm7 = vmand %vm13103_vm1, %vm19409_vm9  ;;  %vm19416_vm1 = vcmp.ge.s32.totalorder %v13001_v10, 0 }
 0x2dd   : > { %vm13145_vm4 = vmand %vm4850_vm13, %vm4858_vm6 }
 0x2de   : > { %v19413_v31 = vsel %vm13145_vm4, 4294967295, %v19412_v31  ;;  %vm13150_vm2 = vmand %vm4851_vm10, %vm4859_vm14  ;;  %vm19418_vm14 = vcmp.lt.s32.totalorder %v12979_v45, 16 }
 0x2df   : > { %v19415_v37 = vsel %vm13150_vm2, 4294967295, %v19414_v37  ;;  %vm5123_vm6 = vmand %vm13145_vm4, %vm19416_vm1  ;;  %vm19424_vm4 = vcmp.lt.s32.totalorder %v13001_v10, 16 }
 0x2e0   : > { %vm19417_vm13 = vmmov %vm19409_vm9  ;;  %vm19421_vm9 = vcmp.lt.s32.totalorder %v13058_v47, 16 }
 0x2e1   : > { %vm5124_vm10 = vmand %vm13150_vm2, %vm19417_vm13  ;;  %vm19427_vm13 = vcmp.lt.s32.totalorder %v13076_v9, 16  ;;  %vm3222_vm2 = vcmp.lt.s32.totalorder %v3206_v54, 16 }
 0x2e2   : > { %3175 = vrot.lane.b32.xlu1 %v12895_v44, %s11443_s19  ;;  %3187 = vrot.lane.b32.xlu2 %v12927_v14, %s11443_s19  ;;  %vm13170_vm11 = vmand %vm13096_vm3, %vm19418_vm14  ;;  %vm3214_vm14 = vcmp.ge.s32.totalorder %v3206_v54, 0  ;;  %v13256_v54 = vadd.s32 4294967295, %v13023_v12 }
 0x2e3   : > { %3189 = vrot.lane.b32.xlu0 %v12897_v17, %s11443_s19  ;;  %vm13178_vm1 = vmand %vm13122_vm15, %vm19421_vm9  ;;  %vm19430_vm15 = vcmp.ge.s32.totalorder %v13023_v12, 0 }
 0x2e4   : > { %vm13184_vm8 = vmand %vm5123_vm6, %vm19424_vm4  ;;  %vm4855_vm4 = vcmp.ge.s32.totalorder %v4847_v29, 0  ;;  %vm4863_vm6 = vcmp.lt.s32.totalorder %v4847_v29, 16  ;;  %v10608_v63 = vsel %vm13178_vm1, 1.0, %v19436_v62 }
 0x2e5   : > { %v19426_v57 = vsel %vm13184_vm8, 4294967295, %v19425_v57  ;;  %vm13190_vm3 = vmand %vm5124_vm10, %vm19427_vm13  ;;  %vm18885_vm8 = vcmp.lt.s32.totalorder %v19348_v13, 64 }
 0x2e6   : > { %v19429_v2 = vsel %vm13190_vm3, 4294967295, %v19428_v2  ;;  %vm13200_vm9 = vmand %vm13126_vm12, %vm19430_vm15  ;;  %vm18870_vm3 = vcmp.ge.s32.totalorder %v13194_v23, 0  ;;  %vm18869_vm12 = vcmp.lt.s32.totalorder %v13194_v23, 16 }
 0x2e7   : > { %vm19433_vm10 = vmmov %vm19427_vm13 }
 0x2e8   : > { %vm13210_vm13 = vmand %vm13139_vm7, %vm19433_vm10  ;;  %vm19439_vm7 = vnez %v19386_v18 }
 0x2e9   : > { %vm13219_vm15 = vmand %vm3214_vm14, %vm3222_vm2  ;;  %v10776_v20 = vsel %vm19439_vm7, 1.0, %v19436_v62  ;;  %vm19447_vm14 = vcmp.ge.s32.totalorder %v12977_v32, 0  ;;  %v10606_v38 = vsel %vm13210_vm13, 1.0, %v19436_v62 }
 0x2ea   : > { %3769 = vrot.lane.b32.xlu1 %v12913_v53, %s11444_s17  ;;  %3185 = vrot.lane.b32.xlu2 %v12925_v27, %s11443_s19  ;;  %v19438_v41 = vsel %vm13219_vm15, 4294967295, %v19437_v41  ;;  %vm13230_vm10 = vmand %vm4855_vm4, %vm4863_vm6  ;;  %vm19448_vm6 = vcmp.lt.s32.totalorder %v13023_v12, 16 }
 0x2eb   : > { %3767 = vrot.lane.b32.xlu0 %v12911_v46, %s11444_s17  ;;  %v19441_v25 = vsel %vm13230_vm10, 4294967295, %v19440_v25  ;;  %vm5128_vm2 = vmand %vm13230_vm10, %vm18870_vm3  ;;  %vm18884_vm3 = vcmp.ge.s32.totalorder %v13256_v54, 0  ;;  %vm19469_vm10 = vcmp.ge.s32.totalorder %v13194_v23, 0 }
 0x2ec   : > { %vm13251_vm5 = vmand %vm5128_vm2, %vm18869_vm12 }
 0x2ed   : > { %vm3337_vm4 = vmand %vm13219_vm15, %vm19447_vm14  ;;  %vm19450_vm14 = vcmp.lt.s32.totalorder %v12977_v32, 16 }
 0x2ee   : > { %vm3349_vm7 = vmand %vm13200_vm9, %vm19448_vm6  ;;  %vm19449_vm9 = vnez %v19394_v8 }
 0x2ef   : > { %vm13293_vm6 = vmand %vm3337_vm4, %vm19450_vm14 }
 0x2f2   : > { %3775 = vrot.lane.b32.xlu1 %v12927_v14, %s11444_s17  ;;  %3183 = vrot.lane.b32.xlu2 %v12936_v49, %s11443_s19  ;;  %s404_s19 = sand.u32 1, %s11422_s22  }
 0x2f3   : > { %3765 = vrot.lane.b32.xlu0 %v12909_v22, %s11444_s17  ;;  %s405_s0 = scalar_lea.vmem [#allocation2], %s404_s19  ;;  %s10308_s28 = scalar_lea.sflag [#allocation3], %s404_s19 }
 0x2fa   : > { %3773 = vrot.lane.b32.xlu1 %v12925_v27, %s11444_s17  ;;  %3777 = vrot.lane.b32.xlu2 %v12897_v17, %s11444_s17 }
 0x2fb   : > { %3763 = vrot.lane.b32.xlu0 %v12895_v44, %s11444_s17 }
 0x302   : > { %3771 = vrot.lane.b32.xlu1 %v12936_v49, %s11444_s17  ;;  %4065 = vrot.lane.b32.xlu2 %v12911_v46, %s11445_s18  ;;  %s11388_s17 = scalar_lea.hbm %s18777_s12, 2 }
 0x303   : > { %4067 = vrot.lane.b32.xlu0 %v12913_v53, %s11445_s18 }
 0x30a   : > { %4075 = vrot.lane.b32.xlu1 %v12897_v17, %s11445_s18  ;;  %4063 = vrot.lane.b32.xlu2 %v12909_v22, %s11445_s18 }
 0x30b   : > { %4073 = vrot.lane.b32.xlu0 %v12927_v14, %s11445_s18 }
 0x312   : > { %4069 = vrot.lane.b32.xlu1 %v12936_v49, %s11445_s18  ;;  %4061 = vrot.lane.b32.xlu2 %v12895_v44, %s11445_s18 }
 0x313   : > { %4071 = vrot.lane.b32.xlu0 %v12925_v27, %s11445_s18  ;;  %s10316_s18 = scalar_lea.hbm %s18777_s12, %s11535_s25 }
 0x314   : > { %s10320_s26 = sshll.u32 %s10316_s18, 4  ;;  %s10321_s26 = int_to_ptr.hbm [resolvable:$true] %s10320_s26 }
 0x315   : > { %s11382_s29 = sshra.s32 %s10321_s26, 4  ;;  %s11383_s29 = int_to_ptr.hbm [resolvable:$true] %s11382_s29 }
 0x316   : > { %s11384_s25 = scalar_lea.hbm %s11383_s29, 1  ;;  %p11389_p0 = scmp.lt.s32.totalorder %s11383_s29, %s18777_s12 }
 0x317   : > { %p11385_p11 = scmp.ne.s32.totalorder %s11383_s29, %s11384_s25  ;;  %p11390_p1 = scmp.lt.s32.totalorder %s11388_s17, %s11384_s25 }
 0x319   : > { %p11386_p12 = pnand %p11385_p11, %p11552_p5  ;;  %p11391_p2 = por %p11390_p1, %p11389_p0 }
 0x31a   : > { %4572 = vrot.lane.b32.xlu1 %v12911_v46, %s11446_s20  ;;  %4574 = vrot.lane.b32.xlu2 %v12913_v53, %s11446_s20 }
 0x31b   : > { %4576 = vrot.lane.b32.xlu0 %v12936_v49, %s11446_s20  ;;  %p11387_p13 = pneg %p11386_p12 }
 0x31d   : > { %p11392_p3 = pnand %p11391_p2, %p11387_p13 }
 0x322   : > { %4570 = vrot.lane.b32.xlu1 %v12909_v22, %s11446_s20  ;;  %4568 = vrot.lane.b32.xlu2 %v12895_v44, %s11446_s20 }
 0x323   : > { %4582 = vrot.lane.b32.xlu0 %v12897_v17, %s11446_s20  ;;  %v19459_v17 = vmov 0 }
 0x324   : > { %v13108_v55 = vpop.permute.xlu2 %3302 }
 0x32a   : > { %5630 = vperm.xlu1 %11301, %v5622_v56   ;;  %4580 = vrot.lane.b32.xlu2 %v12927_v14, %s11446_s20  ;;  %v13235_v56 = vadd.s32 4294967295, %v13058_v47 }
 0x32b   : > { %4578 = vrot.lane.b32.xlu0 %v12925_v27, %s11446_s20 }
 0x32c   : > { %v13204_v35 = vpop.permute.xlu2 %3310  ;;  %vm18875_vm2 = vcmp.ge.s32.totalorder %v13235_v56, 0  ;;  %vm18876_vm12 = vcmp.lt.s32.totalorder %v13235_v56, 16 }
 0x334   : > { %v3299_v24 = vpop.permute.xlu0 %3298  ;;  %v3313_v26 = vpop.permute.xlu1 %3312 }
 0x335   : > { %v3315_v11 = vsel %vm18885_vm8, %v13204_v35, %v3313_v26  ;;  %v3322_v18 = vsel %vm18885_vm8, %v3313_v26, %v3299_v24  ;;  %v3163_v26 = vshra.s32 %v19442_v0, 1  ;;  %v10607_v0 = vsel %vm3349_vm7, 1.0, %v19436_v62  ;;  %v13309_v58 = vpop.permute.xlu2 %3181 }
 0x336   : > { %v3371_v29 = vmul.f32 %v10605_v43, %v3322_v18  ;;  %v13258_v42 = vmul.f32 %v10775_v6, %v3315_v11  ;;  %v13260_v48 = vmul.f32 %v10776_v20, %v3322_v18  ;;  %v3204_v43 = vadd.s32 4294967295, %v13238_v4 }
 0x337   : > { %v3205_v6 = vadd.s32 4294967295, %v13131_v16  ;;  %v10612_v20 = vsel %vm13170_vm11, 1.0, %v19436_v62  ;;  %v10771_v18 = vsel %vm19449_vm9, 1.0, %v19436_v62  ;;  %vm19453_vm11 = vnez %v19396_v28 }
 0x338   : > { %19445 = vst [vmem:[#allocation17_spill] sm:$0xff] %v13258_v42  ;;  %3404 = vmatpush.msra.mxu2 %v3371_v29  ;;  %vm3251_vm1 = vmand %vm19453_vm11, %vm18875_vm2  ;;  %vm18887_vm9 = vcmp.lt.s32.totalorder %v13256_v54, 16  ;;  %v13307_v8 = vand.u32 31, %v3163_v26  ;;  %vm3220_vm14 = vcmp.lt.s32.totalorder %v3204_v43, 16  ;;  %vm19456_vm7 = vnez %v19426_v57 }
 0x339   : > { %19446 = vst [vmem:[#allocation19_spill] sm:$0xff] %v13260_v48  ;;  %10615 = vmatmul.msk.f32.vlgmr.msra.gmra.mxu2 %vm18877_vm0, %v13265_v21  ;;  %vm13313_vm4 = vmand %vm3251_vm1, %vm18876_vm12  ;;  %v10769_v26 = vsel %vm19456_vm7, 1.0, %v19436_v62  ;;  %vm19457_vm2 = vnez %v19429_v2  ;;  %vm19458_vm1 = vnez %v19392_v15  ;;  %vm3213_vm0 = vcmp.ge.s32.totalorder %v3205_v6, 0 }
 0x33a   : > { %v10770_v42 = vsel %vm19457_vm2, 1.0, %v19436_v62  ;;  %vm4876_vm12 = vmand %vm19458_vm1, %vm18884_vm3  ;;  %vm3221_vm13 = vcmp.lt.s32.totalorder %v3205_v6, 16  ;;  %vm18890_vm7 = vcmp.ge.s32.totalorder %v13307_v8, 0  ;;  %vm19462_vm3 = vcmp.ge.s32.totalorder %v3204_v43, 0 }
 0x33b   : > { %vm13342_vm2 = vmand %vm4876_vm12, %vm18887_vm9  ;;  %vm4861_vm1 = vcmp.lt.s32.totalorder %v4845_v19, 16  ;;  %v19482_v29 = vmov 0 }
 0x33c   : > { %v3301_v48 = vpop.permute.xlu1 %3300  ;;  %v19460_v17 = vsel %vm13342_vm2, 4294967295, %v19459_v17  ;;  %vm13365_vm12 = vmand %vm3213_vm0, %vm3221_vm13  ;;  %vm4853_vm13 = vcmp.ge.s32.totalorder %v4845_v19, 0  ;;  %vm4862_vm2 = vcmp.lt.s32.totalorder %v4846_v5, 16 }
 0x33d   : > { %v13319_v33 = vpop.permute.xlu0 %3304  ;;  %v3320_v57 = vsel %vm18885_vm8, %v3301_v48, %v13108_v55  ;;  %v3321_v2 = vsel %vm18885_vm8, %v3299_v24, %v3301_v48  ;;  %v19463_v48 = vmov 0  ;;  %vm3336_vm0 = vmand %vm13365_vm12, %vm19469_vm10  ;;  %vm19476_vm10 = vcmp.lt.s32.totalorder %v13194_v23, 16  ;;  %v13415_v52 = vpop.permute.xlu2 %3187 }
 0x33e   : > { %v3319_v14 = vsel %vm18885_vm8, %v13108_v55, %v13319_v33  ;;  %v3372_v46 = vmul.f32 %v10606_v38, %v3321_v2  ;;  %v3373_v53 = vmul.f32 %v10607_v0, %v3320_v57  ;;  %v13352_v55 = vld [vmem:[%s18768_s3 + $0x18] sm:$0xff]  ;;  %vm13356_vm8 = vmand %vm19462_vm3, %vm3220_vm14  ;;  %v13360_v24 = vmul.f32 %v10769_v26, %v3321_v2 }
 0x33f   : > { %v3374_v49 = vmul.f32 %v10608_v63, %v3319_v14  ;;  %v13347_v27 = vmul.f32 %v10771_v18, %v3319_v14  ;;  %v19464_v48 = vsel %vm13356_vm8, 4294967295, %v19463_v48  ;;  %v13362_v44 = vmul.f32 %v10770_v42, %v3320_v57  ;;  %vm3335_vm3 = vmand %vm13356_vm8, %vm18890_vm7 }
 0x340   : > { %19465 = vst [vmem:[#allocation23_spill] sm:$0xff] %v13360_v24  ;;  %v19466_v14 = vmov 0  ;;  %3427 = vmatpush.msra.mxu1 %v3372_v46  ;;  %3450 = vmatpush.msrb.mxu2 %v3373_v53  ;;  %v3378_v0 = vmul.f32 %v10612_v20, %v3315_v11  ;;  %vm19468_vm14 = vcmask 64512   ;;  %vm18898_vm7 = vcmp.lt.s32.totalorder %v19348_v13, 66 }
 0x341   : > { %19461 = vst [vmem:[#allocation20_spill] sm:$0xff] %v13347_v27  ;;  %v19467_v14 = vsel %vm13365_vm12, 4294967295, %v19466_v14  ;;  %3473 = vmatpush.msrb.mxu3 %v3374_v49  ;;  %10616 = vmatmul.msk.f32.gmra.mxu2 %vm19468_vm14, %v13352_v55  ;;  %vm19470_vm9 = vmmov %vm19468_vm14  ;;  %vm19472_vm8 = vcmp.lt.s32.totalorder %v13307_v8, 16  ;;  %vm4854_vm14 = vcmp.ge.s32.totalorder %v4846_v5, 0  ;;  %v10611_v53 = vsel %vm13293_vm6, 1.0, %v19436_v62 }
 0x342   : > { %10617 = vmatmul.msk.f32.vlgmr.msra.gmra.mxu1 %vm19470_vm9, %v13265_v21  ;;  %vm19471_vm11 = vmmov %vm19470_vm9  ;;  %v10774_v49 = vsel %vm13251_vm5, 1.0, %v19436_v62  ;;  %v10600_v42 = vsel %vm13313_vm4, 1.0, %v19436_v62  ;;  %vm19481_vm5 = vcmp.lt.s32.totalorder %v19348_v13, 64  ;;  %v13421_v63 = vadd.s32 4294967295, %v12977_v32 }
 0x343   : > { %10621 = vmatmul.msk.f32.vlgmr.msrb.gmra.mxu3 %vm19471_vm11, %v13265_v21  ;;  %vm13387_vm15 = vmand %vm3335_vm3, %vm19472_vm8  ;;  %vm19475_vm8 = vnez %v19460_v17  ;;  %vm19485_vm4 = vcmp.ge.s32.totalorder %v13058_v47, 0  ;;  %vm19486_vm3 = vcmp.ge.s32.totalorder %v13307_v8, 0  ;;  %v13451_v5 = vadd.s32 4294967295, %v13307_v8 }
 0x344   : > { %3565 = vmatpush.msra.mxu3 %v3378_v0  ;;  %v10745_v11 = vsel %vm19475_vm8, 1.0, %v19436_v62  ;;  %vm13405_vm11 = vmand %vm3336_vm0, %vm19476_vm10  ;;  %v3180_v20 = vpop.permute.xlu1 %3179  ;;  %vm19488_vm8 = vcmask 64512   ;;  %vm19489_vm10 = vcmp.lt.s32.totalorder %v13307_v8, 16 }
 0x345   : > { %v3309_v6 = vpop.permute.xlu0 %3308  ;;  %vm13411_vm6 = vmand %vm4853_vm13, %vm4861_vm1  ;;  %v3196_v18 = vsel %vm18898_vm7, %v3180_v20, %v13309_v58  ;;  %v10610_v2 = vsel %vm13405_vm11, 1.0, %v19436_v62 }
 0x346   : > { %v19480_v3 = vsel %vm13411_vm6, 4294967295, %v19479_v3  ;;  %v3316_v17 = vsel %vm19481_vm5, %v3309_v6, %v13204_v35  ;;  %vm13427_vm9 = vmand %vm4854_vm14, %vm4862_vm2  ;;  %v3291_v26 = vmul.f32 %v10600_v42, %v3196_v18  ;;  %v13433_v57 = vmul.f32 %v10745_v11, %v3196_v18 }
 0x347   : > { %v19483_v29 = vsel %vm13427_vm9, 4294967295, %v19482_v29  ;;  %v3377_v38 = vmul.f32 %v10611_v53, %v3316_v17  ;;  %v13431_v19 = vmul.f32 %v10774_v49, %v3316_v17  ;;  %vm5126_vm1 = vmand %vm13411_vm6, %vm19485_vm4  ;;  %vm19487_vm2 = vcmp.lt.s32.totalorder %v13058_v47, 16 }
 0x348   : > { %vm5127_vm0 = vmand %vm13427_vm9, %vm19486_vm3  ;;  %3663 = vmatpush.msrb.mxu3 %v3291_v26  ;;  %vm18897_vm14 = vcmp.ge.s32.totalorder %v13421_v63, 0  ;;  %v10609_v35 = vsel %vm13387_vm15, 1.0, %v19436_v62  ;;  %v13466_v49 = vadd.s32 4294967295, %v13194_v23  ;;  %vm19493_vm15 = vcmp.lt.s32.totalorder %v19348_v13, 64 }
 0x349   : > { %19484 = vst [vmem:[#allocation24_spill] sm:$0xff] %v13431_v19  ;;  %3542 = vmatpush.msra.mxu2 %v3377_v38  ;;  %vm5134_vm13 = vmand %vm5126_vm1, %vm19487_vm2  ;;  %vm19492_vm1 = vnez %v19438_v41  ;;  %vm18896_vm2 = vcmp.lt.s32.totalorder %v13421_v63, 16  ;;  %v13482_v17 = vadd.s32 4294967295, %v13076_v9 }
 0x34a   : > { %10619 = vmatmul.msk.f32.vlgmr.msrb.gmra.mxu2 %vm19488_vm8, %v13265_v21  ;;  %vm5135_vm5 = vmand %vm5127_vm0, %vm19489_vm10  ;;  %v10772_v0 = vsel %vm5134_vm13, 1.0, %v19436_v62  ;;  %vm18895_vm13 = vcmp.ge.s32.totalorder %v13451_v5, 0  ;;  %vm18899_vm10 = vcmp.ge.s32.totalorder %v13466_v49, 0 }
 0x34b   : > { %vm19490_vm4 = vmmov %vm19488_vm8  ;;  %v10773_v53 = vsel %vm5135_vm5, 1.0, %v19436_v62  ;;  %vm19499_vm5 = vnez %v19464_v48 }
 0x34c   : > { %10618 = vmatmul.msk.f32.gmra.mxu1 %vm19490_vm4, %v13352_v55  ;;  %vm19491_vm3 = vmmov %vm19490_vm4  ;;  %v13473_v42 = vpop.permute.xlu1 %3177 }
 0x34d   : > { %10622 = vmatmul.msk.f32.gmra.mxu3 %vm19491_vm3, %v13352_v55  ;;  %vm3254_vm0 = vmand %vm19492_vm1, %vm18897_vm14  ;;  %v3307_v46 = vpop.permute.xlu0 %3306 }
 0x34e   : > { %v3317_v11 = vsel %vm19493_vm15, %v3307_v46, %v3309_v6  ;;  %vm19494_vm11 = vmmov %vm19493_vm15  ;;  %v3186_v6 = vpop.permute.xlu2 %3185  ;;  %vm19504_vm15 = vcmask 64512  }
 0x34f   : > { %v3318_v43 = vsel %vm19494_vm11, %v13319_v33, %v3307_v46  ;;  %v3376_v38 = vmul.f32 %v10610_v2, %v3317_v11  ;;  %v13486_v19 = vmul.f32 %v10773_v53, %v3317_v11  ;;  %vm13490_vm8 = vmand %vm3254_vm0, %vm18896_vm2  ;;  %v13495_v33 = vadd.s32 4294967295, %v12979_v45 }
 0x350   : > { %v3375_v18 = vmul.f32 %v10609_v35, %v3318_v43  ;;  %v13484_v26 = vmul.f32 %v10772_v0, %v3318_v43  ;;  %vm13502_vm4 = vmand %vm19499_vm5, %vm18895_vm13  ;;  %vm19506_vm13 = vcmp.ge.s32.totalorder %v13256_v54, 0  ;;  %vm19507_vm2 = vnez %v19407_v61 }
 0x351   : > { %19496 = vst [vmem:[#allocation26_spill] sm:$0xff] %v13486_v19  ;;  %3519 = vmatpush.msrb.mxu1 %v3376_v38  ;;  %vm13510_vm3 = vmand %vm13365_vm12, %vm18899_vm10  ;;  %vm19508_vm10 = vcmp.lt.s32.totalorder %v19348_v13, 66  ;;  %vm18908_vm6 = vcmp.ge.s32.totalorder %v13495_v33, 0  ;;  %v13535_v53 = vadd.s32 4294967295, %v13001_v10  ;;  %vm19514_vm12 = vcmp.lt.s32.totalorder %v13482_v17, 16 }
 0x352   : > { %19495 = vst [vmem:[#allocation25_spill] sm:$0xff] %v13484_v26  ;;  %3496 = vmatpush.msrb.mxu0 %v3375_v18  ;;  %10620 = vmatmul.msk.f32.gmra.mxu2 %vm19504_vm15, %v13352_v55  ;;  %vm19505_vm11 = vmmov %vm19504_vm15  ;;  %v3197_v0 = vsel %vm19508_vm10, %v13473_v42, %v3180_v20  ;;  %vm19511_vm15 = vcmp.lt.s32.totalorder %v13256_v54, 16  ;;  %vm19513_vm10 = vnez %v19415_v37  ;;  %v10603_v18 = vsel %vm13490_vm8, 1.0, %v19436_v62 }
 0x353   : > { %10623 = vmatmul.msk.f32.vlgmr.msrb.gmra.mxu0 %vm19505_vm11, %v13265_v21  ;;  %vm3250_vm14 = vmand %vm19507_vm2, %vm19506_vm13  ;;  %vm19512_vm13 = vcmp.ge.s32.totalorder %v13482_v17, 0  ;;  %vm18909_vm8 = vcmp.ge.s32.totalorder %v13535_v53, 0  ;;  %v13719_v61 = vadd.s32 1, %v12977_v32  ;;  %v13735_v32 = vadd.s32 1, %v13001_v10 }
 0x354   : > { %vm19509_vm9 = vmmov %vm19505_vm11  ;;  %v3176_v43 = vpop.permute.xlu1 %3175 }
 0x355   : > { %10625 = vmatmul.msk.f32.vlgmr.msrb.gmra.mxu1 %vm19509_vm9, %v13265_v21  ;;  %vm19510_vm0 = vmmov %vm19509_vm9  ;;  %vm18906_vm9 = vcmp.lt.s32.totalorder %v13495_v33, 16  ;;  %v3190_v20 = vpop.permute.xlu0 %3189 }
 0x356   : > { %10629 = vmatmul.msk.f32.vlgmr.msra.gmra.mxu3 %vm19510_vm0, %v13265_v21  ;;  %vm3266_vm11 = vmand %vm3250_vm14, %vm19511_vm15  ;;  %vm18905_vm0 = vcmp.lt.s32.totalorder %v13451_v5, 16  ;;  %vm19515_vm15 = vcmp.lt.s32.totalorder %v19348_v13, 66 }
 0x357   : > { %v10599_v46 = vsel %vm3266_vm11, 1.0, %v19436_v62  ;;  %vm4875_vm7 = vmand %vm19513_vm10, %vm19512_vm13  ;;  %v13552_v38 = vsel %vm19515_vm15, %v3186_v6, %v13415_v52  ;;  %vm19516_vm11 = vnez %v19388_v40 }
 0x358   : > { %vm4883_vm14 = vmand %vm4875_vm7, %vm19514_vm12  ;;  %v3290_v11 = vmul.f32 %v10599_v46, %v3197_v0 }
 0x359   : > { %v10744_v19 = vsel %vm4883_vm14, 1.0, %v19436_v62  ;;  %vm3255_vm13 = vmand %vm19516_vm11, %vm18908_vm6  ;;  %vm18907_vm14 = vcmp.lt.s32.totalorder %v13466_v49, 16  ;;  %vm19527_vm6 = vcmp.ge.s32.totalorder %v13482_v17, 0 }
 0x35a   : > { %vm19517_vm7 = vmmov %vm19515_vm15  ;;  %v13564_v26 = vmul.f32 %v10744_v19, %v3197_v0  ;;  %3640 = vmatpush.msrb.mxu2 %v3290_v11  ;;  %v3294_v19 = vmul.f32 %v10603_v18, %v13552_v38  ;;  %v3184_v11 = vpop.permute.xlu2 %3183 }
 0x35b   : > { %v13562_v46 = vsel %vm19517_vm7, %v13415_v52, %v3190_v20  ;;  %vm3271_vm12 = vmand %vm3255_vm13, %vm18906_vm9  ;;  %vm19522_vm7 = vcmask 64512  }
 0x35c   : > { %vm13574_vm15 = vmand %vm13502_vm4, %vm18905_vm0  ;;  %v10604_v52 = vsel %vm3271_vm12, 1.0, %v19436_v62  ;;  %10624 = vmatmul.msk.f32.gmra.mxu0 %vm19522_vm7, %v13352_v55  ;;  %vm19524_vm0 = vnez %v19376_v30  ;;  %vm19528_vm4 = vnez %v19401_v60 }
 0x35d   : > { %vm13584_vm13 = vmand %vm13510_vm3, %vm18907_vm14  ;;  %v3295_v24 = vmul.f32 %v10604_v52, %v13562_v46  ;;  %v10601_v2 = vsel %vm13574_vm15, 1.0, %v19436_v62  ;;  %vm19534_vm15 = vcmp.lt.s32.totalorder %v13482_v17, 16  ;;  %v13635_v52 = vadd.s32 1, %v13023_v12  ;;  %v13649_v12 = vpop.permute.xlu1 %3769 }
 0x35e   : > { %vm19523_vm12 = vmmov %vm19522_vm7 }
 0x35f   : > { %10627 = vmatmul.msk.f32.vlgmr.msra.gmra.mxu2 %vm19523_vm12, %v13265_v21  ;;  %vm3248_vm9 = vmand %vm19524_vm0, %vm18909_vm8  ;;  %3755 = vmatpush.msra.mxu3 %v3295_v24  ;;  %v13609_v21 = vadd.s32 1, %v13058_v47  ;;  %vm19531_vm12 = vcmp.lt.s32.totalorder %v13535_v53, 16  ;;  %v10602_v47 = vsel %vm13584_vm13, 1.0, %v19436_v62  ;;  %vm19536_vm13 = vcmp.ge.s32.totalorder %v13495_v33, 0 }
 0x360   : > { %vm19525_vm3 = vmmov %vm19522_vm7  ;;  %vm19529_vm7 = vcmp.lt.s32.totalorder %v19348_v13, 66  ;;  %3732 = vmatpush.msra.mxu2 %v3294_v19 }
 0x361   : > { %10626 = vmatmul.msk.f32.gmra.mxu1 %vm19525_vm3, %v13352_v55  ;;  %vm19526_vm14 = vmmov %vm19525_vm3  ;;  %v3199_v35 = vsel %vm19529_vm7, %v3190_v20, %v3176_v43  ;;  %v3768_v20 = vpop.permute.xlu0 %3767 }
 0x362   : > { %10630 = vmatmul.msk.f32.gmra.mxu3 %vm19526_vm14, %v13352_v55  ;;  %vm3249_vm5 = vmand %vm19528_vm4, %vm19527_vm6 }
 0x363   : > { %vm19530_vm14 = vmmov %vm19529_vm7 }
 0x364   : > { %v13617_v18 = vsel %vm19530_vm14, %v13309_v58, %v3184_v11  ;;  %vm3264_vm6 = vmand %vm3248_vm9, %vm19531_vm12  ;;  %vm19535_vm9 = vnez %v19413_v31 }
 0x365   : > { %vm19532_vm3 = vmmov %vm19529_vm7  ;;  %v10597_v58 = vsel %vm3264_vm6, 1.0, %v19436_v62 }
 0x366   : > { %v3198_v24 = vsel %vm19532_vm3, %v3176_v43, %v13473_v42  ;;  %vm19533_vm7 = vmmov %vm19532_vm3  ;;  %v3288_v42 = vmul.f32 %v10597_v58, %v3199_v35  ;;  %v3292_v43 = vmul.f32 %v10601_v2, %v13617_v18  ;;  %vm19537_vm3 = vnez %v19380_v36 }
 0x367   : > { %v13629_v27 = vsel %vm19533_vm7, %v3184_v11, %v3186_v6  ;;  %vm3265_vm14 = vmand %vm3249_vm5, %vm19534_vm15  ;;  %vm19538_vm15 = vcmp.lt.s32.totalorder %v13535_v53, 16  ;;  %v13658_v11 = vld [vmem:[%s18768_s3] sm:$0xff] }
 0x368   : > { %v10598_v19 = vsel %vm3265_vm14, 1.0, %v19436_v62  ;;  %vm4874_vm12 = vmand %vm19535_vm9, %vm18909_vm8  ;;  %v3293_v0 = vmul.f32 %v10602_v47, %v13629_v27  ;;  %3594 = vmatpush.msra.mxu0 %v3288_v42  ;;  %v13665_v47 = vadd.s32 1, %v13076_v9 }
 0x369   : > { %vm4881_vm5 = vmand %vm19537_vm3, %vm19536_vm13  ;;  %v3289_v6 = vmul.f32 %v10598_v19, %v3198_v24  ;;  %vm19539_vm13 = vcmp.lt.s32.totalorder %v13495_v33, 16 }
 0x36a   : > { %vm4882_vm14 = vmand %vm4874_vm12, %vm19538_vm15  ;;  %3686 = vmatpush.msrb.mxu0 %v3292_v43  ;;  %vm19540_vm12 = vcmp.ge.s32.totalorder %v13609_v21, 0  ;;  %vm19541_vm15 = vnez %v19396_v28 }
 0x36b   : > { %vm4889_vm6 = vmand %vm4881_vm5, %vm19539_vm13  ;;  %v10743_v2 = vsel %vm4882_vm14, 1.0, %v19436_v62  ;;  %3617 = vmatpush.msra.mxu1 %v3289_v6  ;;  %vm18910_vm5 = vcmp.lt.s32.totalorder %v13635_v52, 16  ;;  %vm19542_vm14 = vcmp.lt.s32.totalorder %v19348_v13, 62  ;;  %vm19543_vm13 = vcmask 64512  }
 0x36c   : > { %v10750_v58 = vsel %vm4889_vm6, 1.0, %v19436_v62  ;;  %v13668_v19 = vmul.f32 %v10743_v2, %v3198_v24  ;;  %vm3807_vm8 = vmand %vm19541_vm15, %vm19540_vm12  ;;  %v3784_v42 = vsel %vm19542_vm14, %v3768_v20, %v13649_v12  ;;  %10628 = vmatmul.msk.f32.gmra.mxu2 %vm19543_vm13, %v13352_v55  ;;  %vm19544_vm6 = vcmp.lt.s32.totalorder %v13609_v21, 16  ;;  %v3766_v55 = vpop.permute.xlu0 %3765 }
 0x36d   : > { %3709 = vmatpush.msrb.mxu1 %v3293_v0  ;;  %v13680_v9 = vmul.f32 %v10750_v58, %v3199_v35  ;;  %vm3823_vm7 = vmand %vm3807_vm8, %vm19544_vm6  ;;  %vm19547_vm12 = vcmp.ge.s32.totalorder %v13635_v52, 0  ;;  %vm19548_vm15 = vnez %v19392_v15  ;;  %v3778_v35 = vpop.permute.xlu2 %3777  ;;  %vm18911_vm6 = vcmp.lt.s32.totalorder %v13665_v47, 16 }
 0x36e   : > { %vm19545_vm1 = vmmov %vm19543_vm13  ;;  %v10650_v28 = vsel %vm3823_vm7, 1.0, %v19436_v62  ;;  %v13707_v6 = vadd.s32 1, %v12979_v45  ;;  %v13724_v45 = vld [vmem:[%s18768_s3 + $0x8] sm:$0xff] }
 0x36f   : > { %10631 = vmatmul.msk.f32.vlgmr.msra.gmra.mxu0 %vm19545_vm1, %v13658_v11  ;;  %vm19546_vm3 = vmmov %vm19545_vm1  ;;  %v3847_v24 = vmul.f32 %v10650_v28, %v3784_v42 }
 0x370   : > { %10633 = vmatmul.msk.f32.vlgmr.msra.gmra.mxu1 %vm19546_vm3, %v13658_v11  ;;  %vm5374_vm14 = vmand %vm19548_vm15, %vm19547_vm12 }
 0x371   : > { %vm19549_vm13 = vmmov %vm19545_vm1  ;;  %vm18916_vm1 = vcmp.ge.s32.totalorder %v13665_v47, 0 }
 0x372   : > { %10637 = vmatmul.msk.f32.vlgmr.msrb.gmra.mxu3 %vm19549_vm13, %v13658_v11  ;;  %vm5382_vm8 = vmand %vm5374_vm14, %vm18910_vm5  ;;  %vm4088_vm13 = vcmp.ge.s32.totalorder %v12983_v50, 0 }
 0x373   : > { %v10797_v43 = vsel %vm5382_vm8, 1.0, %v19436_v62  ;;  %vm19550_vm3 = vmmov %vm19547_vm12  ;;  %vm19551_vm12 = vcmp.lt.s32.totalorder %v19348_v13, 62  ;;  %3945 = vmatpush.msrb.mxu3 %v3847_v24  ;;  %vm4096_vm8 = vcmp.lt.s32.totalorder %v12983_v50, 16  ;;  %v10681_v50 = vld [vmem:[%s18768_s3 + $0x30] sm:$0xff] }
 0x374   : > { %vm3806_vm7 = vmand %vm19507_vm2, %vm19550_vm3  ;;  %v3785_v15 = vsel %vm19551_vm12, %v3766_v55, %v3768_v20  ;;  %v13709_v0 = vmul.f32 %v10797_v43, %v3784_v42  ;;  %vm19552_vm3 = vcmask 64512   ;;  %v3776_v42 = vpop.permute.xlu1 %3775  ;;  %v3764_v24 = vpop.permute.xlu0 %3763 }
 0x375   : > { %vm3822_vm15 = vmand %vm3806_vm7, %vm18910_vm5  ;;  %10635 = vmatmul.msk.f32.vlgmr.msrb.gmra.mxu2 %vm19552_vm3, %v13658_v11  ;;  %vm18912_vm7 = vcmp.lt.s32.totalorder %v13707_v6, 16  ;;  %v13759_v10 = vpop.permute.xlu2 %4065 }
 0x376   : > { %v10649_v2 = vsel %vm3822_vm15, 1.0, %v19436_v62  ;;  %vm5373_vm2 = vmand %vm19513_vm10, %vm18916_vm1  ;;  %vm18915_vm10 = vcmp.ge.s32.totalorder %v13707_v6, 0 }
 0x377   : > { %vm5381_vm14 = vmand %vm5373_vm2, %vm18911_vm6  ;;  %v3846_v20 = vmul.f32 %v10649_v2, %v3785_v15  ;;  %vm19558_vm6 = vcmp.lt.s32.totalorder %v19348_v13, 62 }
 0x378   : > { %v10796_v58 = vsel %vm5381_vm14, 1.0, %v19436_v62  ;;  %vm19553_vm12 = vmmov %vm19552_vm3  ;;  %vm18913_vm14 = vcmp.ge.s32.totalorder %v13719_v61, 0  ;;  %v3780_v28 = vsel %vm19558_vm6, %v3776_v42, %v3778_v35 }
 0x379   : > { %v13737_v37 = vmul.f32 %v10796_v58, %v3785_v15  ;;  %10632 = vmatmul.msk.f32.gmra.mxu0 %vm19553_vm12, %v13724_v45  ;;  %vm19554_vm15 = vmmov %vm19552_vm3  ;;  %3922 = vmatpush.msrb.mxu2 %v3846_v20  ;;  %vm18914_vm12 = vcmp.lt.s32.totalorder %v13719_v61, 16 }
 0x37a   : > { %10634 = vmatmul.msk.f32.gmra.mxu1 %vm19554_vm15, %v13724_v45  ;;  %vm13744_vm2 = vmand %vm4088_vm13, %vm4096_vm8  ;;  %10638 = vmatmul.msk.f32.gmra.mxu3 %vm19552_vm3, %v13724_v45  ;;  %vm18918_vm8 = vcmp.ge.s32.totalorder %v13735_v32, 0  ;;  %vm19557_vm15 = vnez %v19378_v59 }
 0x37b   : > { %vm3811_vm5 = vmand %vm19516_vm11, %vm18915_vm10 }
 0x37c   : > { %vm3827_vm13 = vmand %vm3811_vm5, %vm18912_vm7  ;;  %vm18917_vm5 = vcmp.lt.s32.totalorder %v13735_v32, 16 }
 0x37d   : > { %vm5378_vm3 = vmand %vm19557_vm15, %vm18913_vm14  ;;  %v10654_v40 = vsel %vm3827_vm13, 1.0, %v19436_v62  ;;  %vm19559_vm14 = vcmp.ge.s32.totalorder %v13256_v54, 0 }
 0x37e   : > { %vm5386_vm11 = vmand %vm5378_vm3, %vm18914_vm12  ;;  %vm19562_vm3 = vcmp.lt.s32.totalorder %v19348_v13, 62  ;;  %v3851_v30 = vmul.f32 %v10654_v40, %v3780_v28  ;;  %v13821_v40 = vadd.s32 1, %v13194_v23 }
 0x37f   : > { %v10801_v43 = vsel %vm5386_vm11, 1.0, %v19436_v62  ;;  %vm3804_vm7 = vmand %vm19524_vm0, %vm18918_vm8  ;;  %v3787_v20 = vsel %vm19562_vm3, %v3778_v35, %v3764_v24  ;;  %vm19563_vm0 = vcmask 64512  }
 0x380   : > { %vm13780_vm6 = vmand %vm13744_vm2, %vm19559_vm14  ;;  %v13784_v2 = vmul.f32 %v10801_v43, %v3780_v28  ;;  %10636 = vmatmul.msk.f32.gmra.mxu2 %vm19563_vm0, %v13724_v45 }
 0x381   : > { %vm3805_vm13 = vmand %vm19528_vm4, %vm18916_vm1  ;;  %vm19567_vm4 = vcmp.lt.s32.totalorder %v13665_v47, 16 }
 0x382   : > { %vm3820_vm14 = vmand %vm3804_vm7, %vm18917_vm5 }
 0x383   : > { %vm19564_vm11 = vmmov %vm19562_vm3  ;;  %v10647_v60 = vsel %vm3820_vm14, 1.0, %v19436_v62  ;;  %vm4095_vm14 = vcmp.lt.s32.totalorder %v13026_v39, 16 }
 0x384   : > { %v3786_v58 = vsel %vm19564_vm11, %v3764_v24, %v3766_v55  ;;  %vm19565_vm12 = vmmov %vm19563_vm0  ;;  %v3844_v55 = vmul.f32 %v10647_v60, %v3787_v20  ;;  %v3774_v24 = vpop.permute.xlu1 %3773 }
 0x385   : > { %10639 = vmatmul.msk.f32.vlgmr.msrb.gmra.mxu0 %vm19565_vm12, %v13658_v11  ;;  %vm19566_vm10 = vmmov %vm19563_vm0  ;;  %vm19569_vm12 = vcmp.ge.s32.totalorder %v13707_v6, 0 }
 0x386   : > { %10641 = vmatmul.msk.f32.vlgmr.msrb.gmra.mxu1 %vm19566_vm10, %v13658_v11  ;;  %vm3821_vm1 = vmand %vm3805_vm13, %vm19567_vm4  ;;  %vm19570_vm10 = vnez %v19380_v36  ;;  %vm4087_vm13 = vcmp.ge.s32.totalorder %v13026_v39, 0  ;;  %3876 = vmatpush.msra.mxu0 %v3844_v55  ;;  %v4064_v36 = vpop.permute.xlu2 %4063  ;;  %v19572_v39 = vmov 0 }
 0x387   : > { %vm19568_vm3 = vmmov %vm19563_vm0  ;;  %v10648_v35 = vsel %vm3821_vm1, 1.0, %v19436_v62 }
 0x388   : > { %10645 = vmatmul.msk.f32.vlgmr.msra.gmra.mxu3 %vm19568_vm3, %v13658_v11  ;;  %vm5372_vm7 = vmand %vm19535_vm9, %vm18918_vm8  ;;  %v3845_v28 = vmul.f32 %v10648_v35, %v3786_v58  ;;  %vm19571_vm9 = vcmp.lt.s32.totalorder %v13707_v6, 16  ;;  %vm19574_vm3 = vcmp.ge.s32.totalorder %v13482_v17, 0 }
 0x389   : > { %4037 = vmatpush.msra.mxu3 %v3851_v30  ;;  %vm5379_vm0 = vmand %vm19570_vm10, %vm19569_vm12  ;;  %vm19575_vm12 = vcmask 64512   ;;  %vm19576_vm10 = vcmp.lt.s32.totalorder %v13482_v17, 16 }
 0x38a   : > { %vm5380_vm1 = vmand %vm5372_vm7, %vm18917_vm5  ;;  %3899 = vmatpush.msra.mxu1 %v3845_v28  ;;  %10643 = vmatmul.msk.f32.vlgmr.msra.gmra.mxu2 %vm19575_vm12, %v13658_v11  ;;  %v13860_v11 = vadd.s32 1, %v13307_v8  ;;  %vm4089_vm5 = vcmp.ge.s32.totalorder %v13009_v51, 0 }
 0x38b   : > { %vm5387_vm11 = vmand %vm5379_vm0, %vm19571_vm9  ;;  %v10795_v31 = vsel %vm5380_vm1, 1.0, %v19436_v62  ;;  %vm19581_vm9 = vcmp.ge.s32.totalorder %v13719_v61, 0 }
 0x38c   : > { %v10802_v43 = vsel %vm5387_vm11, 1.0, %v19436_v62  ;;  %v13827_v30 = vmul.f32 %v10795_v31, %v3786_v58  ;;  %vm13829_vm4 = vmand %vm4087_vm13, %vm4095_vm14  ;;  %vm18920_vm13 = vcmp.ge.s32.totalorder %v13821_v40, 0  ;;  %vm19582_vm11 = vnez %v19438_v41  ;;  %v13895_v58 = vld [vmem:[%s18768_s3 + $0x20] sm:$0xff] }
 0x38d   : > { %v19573_v39 = vsel %vm13829_vm4, 4294967295, %v19572_v39  ;;  %v13833_v60 = vmul.f32 %v10802_v43, %v3787_v20  ;;  %vm4111_vm7 = vmand %vm13829_vm4, %vm19574_vm3  ;;  %vm4098_vm4 = vcmp.lt.s32.totalorder %v13238_v4, 16 }
 0x38e   : > { %vm13843_vm0 = vmand %vm4111_vm7, %vm19576_vm10  ;;  %vm19583_vm7 = vcmp.lt.s32.totalorder %v19348_v13, 62  ;;  %v4062_v28 = vpop.permute.xlu2 %4061 }
 0x38f   : > { %vm19579_vm14 = vmmov %vm19575_vm12  ;;  %v3781_v17 = vsel %vm19583_vm7, %v3774_v24, %v3776_v42  ;;  %vm4097_vm7 = vcmp.lt.s32.totalorder %v13009_v51, 16  ;;  %v3772_v51 = vpop.permute.xlu1 %3771 }
 0x390   : > { %10640 = vmatmul.msk.f32.gmra.mxu0 %vm19579_vm14, %v13724_v45  ;;  %vm19580_vm1 = vmmov %vm19575_vm12  ;;  %vm18919_vm12 = vcmp.lt.s32.totalorder %v13821_v40, 16  ;;  %vm19585_vm14 = vcmp.lt.s32.totalorder %v13256_v54, 16  ;;  %v13881_v54 = vpop.permute.xlu0 %4067 }
 0x391   : > { %10642 = vmatmul.msk.f32.gmra.mxu1 %vm19580_vm1, %v13724_v45  ;;  %vm3810_vm3 = vmand %vm19582_vm11, %vm19581_vm9  ;;  %vm19588_vm9 = vcmp.lt.s32.totalorder %v13719_v61, 16 }
 0x392   : > { %vm19584_vm10 = vmmov %vm19580_vm1 }
 0x393   : > { %10646 = vmatmul.msk.f32.gmra.mxu3 %vm19584_vm10, %v13724_v45  ;;  %vm13868_vm1 = vmand %vm13780_vm6, %vm19585_vm14  ;;  %vm19589_vm10 = vnez %v19441_v25  ;;  %vm18921_vm14 = vcmp.lt.s32.totalorder %v19348_v13, 2 }
 0x394   : > { %vm3826_vm11 = vmand %vm3810_vm3, %vm19588_vm9  ;;  %vm18922_vm9 = vcmp.ge.s32.totalorder %v13860_v11, 0  ;;  %v4082_v55 = vsel %vm18921_vm14, %v13759_v10, %v13881_v54  ;;  %v10675_v23 = vsel %vm13868_vm1, 1.0, %v19436_v62  ;;  %vm4093_vm1 = vcmp.ge.s32.totalorder %v12967_v1, 0 }
 0x395   : > { %v10653_v41 = vsel %vm3826_vm11, 1.0, %v19436_v62  ;;  %vm5377_vm8 = vmand %vm19589_vm10, %vm18920_vm13  ;;  %vm19626_vm10 = vcmp.lt.s32.totalorder %v13495_v33, 16 }
 0x396   : > { %vm5385_vm6 = vmand %vm5377_vm8, %vm18919_vm12  ;;  %v3850_v8 = vmul.f32 %v10653_v41, %v3781_v17  ;;  %vm19592_vm8 = vcmp.ge.s32.totalorder %v13235_v56, 0  ;;  %vm19594_vm12 = vcmask 64512  }
 0x397   : > { %v10800_v42 = vsel %vm5385_vm6, 1.0, %v19436_v62  ;;  %vm13887_vm3 = vmand %vm4089_vm5, %vm4097_vm7  ;;  %vm19593_vm5 = vcmp.lt.s32.totalorder %v13235_v56, 16  ;;  %10644 = vmatmul.msk.f32.gmra.mxu2 %vm19594_vm12, %v13724_v45 }
 0x398   : > { %v13897_v35 = vmul.f32 %v10800_v42, %v3781_v17  ;;  %vm4113_vm11 = vmand %vm13887_vm3, %vm19592_vm8  ;;  %4014 = vmatpush.msra.mxu2 %v3850_v8  ;;  %vm19595_vm8 = vnez %v19464_v48  ;;  %v10674_v17 = vsel %vm13843_vm0, 1.0, %v19436_v62  ;;  %v4074_v20 = vpop.permute.xlu0 %4073 }
 0x399   : > { %vm4121_vm7 = vmand %vm4113_vm11, %vm19593_vm5  ;;  %vm19598_vm11 = vcmp.ge.s32.totalorder %v13821_v40, 0  ;;  %vm19599_vm5 = vnez %v19467_v14 }
 0x39a   : > { %v10676_v31 = vsel %vm4121_vm7, 1.0, %v19436_v62  ;;  %vm3808_vm13 = vmand %vm19595_vm8, %vm18922_vm9  ;;  %vm19600_vm7 = vcmp.lt.s32.totalorder %v19348_v13, 62  ;;  %vm19602_vm8 = vcmp.lt.s32.totalorder %v13860_v11, 16 }
 0x39b   : > { %vm19596_vm15 = vmmov %vm19594_vm12  ;;  %v4145_v43 = vmul.f32 %v10676_v31, %v4082_v55  ;;  %v3783_v45 = vsel %vm19600_vm7, %v13649_v12, %v3772_v51  ;;  %v4076_v55 = vpop.permute.xlu1 %4075 }
 0x39c   : > { %10657 = vmatmul.msk.f32.vlgmr.msra.gmra.mxu0 %vm19596_vm15, %v13895_v58  ;;  %vm19597_vm14 = vmmov %vm19594_vm12 }
 0x39d   : > { %10659 = vmatmul.msk.f32.vlgmr.msra.gmra.mxu1 %vm19597_vm14, %v13895_v58  ;;  %vm3809_vm12 = vmand %vm19599_vm5, %vm19598_vm11  ;;  %vm19605_vm11 = vcmp.lt.s32.totalorder %v13821_v40, 16 }
 0x39e   : > { %vm19601_vm6 = vmmov %vm19597_vm14  ;;  %vm19604_vm14 = vcmp.lt.s32.totalorder %v19348_v13, 2 }
 0x39f   : > { %10663 = vmatmul.msk.f32.vlgmr.msrb.gmra.mxu3 %vm19601_vm6, %v13895_v58  ;;  %vm3824_vm9 = vmand %vm3808_vm13, %vm19602_vm8  ;;  %v4084_v14 = vsel %vm19604_vm14, %v4062_v28, %v4064_v36  ;;  %vm19607_vm13 = vcmp.ge.s32.totalorder %v13609_v21, 0 }
 0x3a0   : > { %vm19603_vm15 = vmmov %vm19600_vm7  ;;  %v10651_v12 = vsel %vm3824_vm9, 1.0, %v19436_v62  ;;  %4243 = vmatpush.msrb.mxu3 %v4145_v43  ;;  %vm19608_vm7 = vnez %v19480_v3  ;;  %vm19610_vm9 = vnez %v19483_v29 }
 0x3a1   : > { %v3782_v48 = vsel %vm19603_vm15, %v3772_v51, %v3774_v24  ;;  %vm3825_vm5 = vmand %vm3809_vm12, %vm19605_vm11  ;;  %v3848_v24 = vmul.f32 %v10651_v12, %v3783_v45  ;;  %vm19609_vm12 = vcmp.ge.s32.totalorder %v13860_v11, 0  ;;  %vm19611_vm11 = vcmp.lt.s32.totalorder %v13609_v21, 16  ;;  %v19700_v12 = vld [vmem:[#allocation16_spill] sm:$0xff] }
 0x3a2   : > { %vm19606_vm6 = vmmov %vm19604_vm14  ;;  %v10652_v8 = vsel %vm3825_vm5, 1.0, %v19436_v62  ;;  %vm4094_vm14 = vcmp.lt.s32.totalorder %v12961_v7, 16  ;;  %vm19613_vm15 = vcmask 64512  }
 0x3a3   : > { %v4083_v41 = vsel %vm19606_vm6, %v4064_v36, %v13759_v10  ;;  %vm5375_vm0 = vmand %vm19608_vm7, %vm19607_vm13  ;;  %v3849_v42 = vmul.f32 %v10652_v8, %v3782_v48  ;;  %v13962_v10 = vld [vmem:[%s18768_s3 + $0x28] sm:$0xff]  ;;  %v4143_v36 = vmul.f32 %v10674_v17, %v4084_v14  ;;  %3968 = vmatpush.msrb.mxu0 %v3848_v24  ;;  %vm4101_vm6 = vcmp.lt.s32.totalorder %v12967_v1, 16  ;;  %10661 = vmatmul.msk.f32.vlgmr.msrb.gmra.mxu2 %vm19613_vm15, %v13895_v58 }
 0x3a4   : > { %vm5376_vm8 = vmand %vm19610_vm9, %vm19609_vm12  ;;  %vm19612_vm13 = vcmp.lt.s32.totalorder %v13860_v11, 16  ;;  %v4144_v31 = vmul.f32 %v10675_v23, %v4083_v41  ;;  %v19615_v1 = vmov 0 }
 0x3a5   : > { %vm5383_vm5 = vmand %vm5375_vm0, %vm19611_vm11  ;;  %3991 = vmatpush.msrb.mxu1 %v3849_v42  ;;  %vm19614_vm0 = vcmp.ge.s32.totalorder %v12961_v7, 0 }
 0x3a6   : > { %vm5384_vm12 = vmand %vm5376_vm8, %vm19612_vm13  ;;  %v10798_v51 = vsel %vm5383_vm5, 1.0, %v19436_v62  ;;  %4220 = vmatpush.msrb.mxu2 %v4144_v31 }
 0x3a7   : > { %v10799_v43 = vsel %vm5384_vm12, 1.0, %v19436_v62  ;;  %v13974_v17 = vmul.f32 %v10798_v51, %v3783_v45  ;;  %vm13980_vm11 = vmand %vm19614_vm0, %vm4094_vm14  ;;  %4197 = vmatpush.msra.mxu1 %v4143_v36  ;;  %vm19622_vm14 = vcmp.ge.s32.totalorder %v13535_v53, 0  ;;  %vm19623_vm0 = vcmp.ge.s32.totalorder %v13495_v33, 0 }
 0x3a8   : > { %v19616_v1 = vsel %vm13980_vm11, 4294967295, %v19615_v1  ;;  %vm19617_vm8 = vmmov %vm19613_vm15  ;;  %v13986_v14 = vmul.f32 %v10799_v43, %v3782_v48 }
 0x3a9   : > { %10658 = vmatmul.msk.f32.gmra.mxu0 %vm19617_vm8, %v13962_v10  ;;  %vm13988_vm15 = vmand %vm4093_vm1, %vm4101_vm6  ;;  %vm19624_vm6 = vcmp.lt.s32.totalorder %v19348_v13, 2 }
 0x3aa   : > { %vm19620_vm5 = vmmov %vm19617_vm8  ;;  %v4085_v7 = vsel %vm19624_vm6, %v4076_v55, %v4062_v28  ;;  %vm4092_vm8 = vcmp.ge.s32.totalorder %v12964_v34, 0 }
 0x3ab   : > { %10660 = vmatmul.msk.f32.gmra.mxu1 %vm19620_vm5, %v13962_v10  ;;  %vm19621_vm13 = vmmov %vm19620_vm5  ;;  %vm4100_vm5 = vcmp.lt.s32.totalorder %v12964_v34, 16  ;;  %v4072_v34 = vpop.permute.xlu0 %4071 }
 0x3ac   : > { %10664 = vmatmul.msk.f32.gmra.mxu3 %vm19621_vm13, %v13962_v10  ;;  %vm4110_vm12 = vmand %vm13980_vm11, %vm19622_vm14  ;;  %vm19625_vm13 = vcmp.lt.s32.totalorder %v13535_v53, 16  ;;  %vm4090_vm14 = vcmp.ge.s32.totalorder %v13238_v4, 0  ;;  %v4070_v53 = vpop.permute.xlu1 %4069 }
 0x3ad   : > { %vm4117_vm1 = vmand %vm13988_vm15, %vm19623_vm0 }
 0x3ae   : > { %vm4118_vm9 = vmand %vm4110_vm12, %vm19625_vm13  ;;  %vm19630_vm12 = vcmp.ge.s32.totalorder %v13421_v63, 0 }
 0x3af   : > { %vm4125_vm7 = vmand %vm4117_vm1, %vm19626_vm10  ;;  %v10673_v45 = vsel %vm4118_vm9, 1.0, %v19436_v62  ;;  %vm4091_vm9 = vcmp.ge.s32.totalorder %v13131_v16, 0  ;;  %vm4099_vm1 = vcmp.lt.s32.totalorder %v13131_v16, 16 }
 0x3b0   : > { %v10680_v48 = vsel %vm4125_vm7, 1.0, %v19436_v62  ;;  %vm19627_vm0 = vmmov %vm19624_vm6  ;;  %v4142_v28 = vmul.f32 %v10673_v45, %v4085_v7  ;;  %vm19631_vm7 = vcmask 64512   ;;  %v19701_v7 = vld [vmem:[#allocation13_spill] sm:$0xff] }
 0x3b1   : > { %v4078_v41 = vsel %vm19627_vm0, %v4074_v20, %v4076_v55  ;;  %vm14017_vm6 = vmand %vm4092_vm8, %vm4100_vm5  ;;  %10662 = vmatmul.msk.f32.gmra.mxu2 %vm19631_vm7, %v13962_v10  ;;  %vm19632_vm8 = vcmp.lt.s32.totalorder %v13421_v63, 16 }
 0x3b2   : > { %vm4116_vm10 = vmand %vm14017_vm6, %vm19630_vm12  ;;  %4174 = vmatpush.msra.mxu0 %v4142_v28  ;;  %v4149_v33 = vmul.f32 %v10680_v48, %v4078_v41  ;;  %v19703_v48 = vld [vmem:[#allocation15_spill] sm:$0xff] }
 0x3b3   : > { %vm4124_vm5 = vmand %vm4116_vm10, %vm19632_vm8  ;;  %vm19642_vm8 = vcmp.ge.s32.totalorder %v13466_v49, 0  ;;  %v4577_v45 = vpop.permute.xlu0 %4576 }
 0x3b4   : > { %vm14032_vm13 = vmand %vm4090_vm14, %vm4098_vm4  ;;  %v10679_v24 = vsel %vm4124_vm5, 1.0, %v19436_v62  ;;  %vm19640_vm4 = vcmp.lt.s32.totalorder %v19348_v13, 2  ;;  %vm19641_vm14 = vcmp.ge.s32.totalorder %v13451_v5, 0  ;;  %vm19644_vm5 = vcmp.lt.s32.totalorder %v13451_v5, 16 }
 0x3b5   : > { %vm19635_vm0 = vmmov %vm19631_vm7  ;;  %v4079_v23 = vsel %vm19640_vm4, %v4072_v34, %v4074_v20 }
 0x3b6   : > { %10665 = vmatmul.msk.f32.vlgmr.msrb.gmra.mxu0 %vm19635_vm0, %v13895_v58  ;;  %vm19636_vm12 = vmmov %vm19635_vm0  ;;  %v4148_v20 = vmul.f32 %v10679_v24, %v4079_v23  ;;  %v10699_v24 = vld [vmem:[%s18768_s3 + $0x40] sm:$0xff] }
 0x3b7   : > { %10667 = vmatmul.msk.f32.vlgmr.msrb.gmra.mxu1 %vm19636_vm12, %v13895_v58  ;;  %vm14040_vm11 = vmand %vm4091_vm9, %vm4099_vm1 }
 0x3b8   : > { %vm19639_vm7 = vmmov %vm19635_vm0 }
 0x3b9   : > { %10671 = vmatmul.msk.f32.vlgmr.msra.gmra.mxu3 %vm19639_vm7, %v13895_v58  ;;  %vm4114_vm10 = vmand %vm14032_vm13, %vm19641_vm14  ;;  %vm19646_vm7 = vcmp.lt.s32.totalorder %v13466_v49, 16  ;;  %vm19647_vm14 = vcmp.ge.s32.totalorder %v13609_v21, 0 }
 0x3ba   : > { %4335 = vmatpush.msra.mxu3 %v4149_v33  ;;  %vm4115_vm9 = vmand %vm14040_vm11, %vm19642_vm8 }
 0x3bb   : > { %vm19643_vm1 = vmmov %vm19640_vm4 }
 0x3bc   : > { %v4081_v42 = vsel %vm19643_vm1, %v13881_v54, %v4070_v53  ;;  %vm4122_vm0 = vmand %vm4114_vm10, %vm19644_vm5  ;;  %vm19649_vm10 = vcmp.lt.s32.totalorder %v13609_v21, 16  ;;  %v19662_v21 = vmov 0  ;;  %v14185_v41 = vpop.f32.mrf.mxu2 }
 0x3bd   : > { %vm19645_vm12 = vmmov %vm19643_vm1  ;;  %v10677_v51 = vsel %vm4122_vm0, 1.0, %v19436_v62  ;;  %vm19648_vm1 = vcmask 64512  }
 0x3be   : > { %v4080_v36 = vsel %vm19645_vm12, %v4070_v53, %v4072_v34  ;;  %vm4123_vm4 = vmand %vm4115_vm9, %vm19646_vm7  ;;  %v4146_v31 = vmul.f32 %v10677_v51, %v4081_v42  ;;  %10669 = vmatmul.msk.f32.vlgmr.msra.gmra.mxu2 %vm19648_vm1, %v13895_v58  ;;  %vm19652_vm9 = vcmp.ge.s32.totalorder %v13635_v52, 0  ;;  %v10682_v58 = vld [vmem:[%s18768_s3 + $0x38] sm:$0xff] }
 0x3bf   : > { %v10678_v55 = vsel %vm4123_vm4, 1.0, %v19436_v62  ;;  %vm4596_vm8 = vmand %vm13887_vm3, %vm19647_vm14  ;;  %4312 = vmatpush.msra.mxu2 %v4148_v20  ;;  %vm19654_vm3 = vcmp.lt.s32.totalorder %v13635_v52, 16  ;;  %vm19658_vm14 = vcmp.ge.s32.totalorder %v13719_v61, 0  ;;  %v19665_v52 = vmov 0  ;;  %v14190_v8 = vpop.f32.mrf.mxu1 }
 0x3c0   : > { %v4147_v54 = vmul.f32 %v10678_v55, %v4080_v36  ;;  %vm14076_vm5 = vmand %vm4596_vm8, %vm19649_vm10  ;;  %4266 = vmatpush.msrb.mxu0 %v4146_v31  ;;  %v4583_v36 = vpop.permute.xlu0 %4582 }
 0x3c1   : > { %vm4595_vm0 = vmand %vm13744_vm2, %vm19652_vm9  ;;  %vm19661_vm9 = vcmp.lt.s32.totalorder %v13719_v61, 16  ;;  %v10720_v23 = vsel %vm14076_vm5, 1.0, %v19436_v62 }
 0x3c2   : > { %vm19653_vm12 = vmmov %vm19648_vm1  ;;  %4289 = vmatpush.msrb.mxu1 %v4147_v54 }
 0x3c3   : > { %10668 = vmatmul.msk.f32.gmra.mxu1 %vm19653_vm12, %v13962_v10  ;;  %vm14088_vm7 = vmand %vm4595_vm0, %vm19654_vm3  ;;  %vm19664_vm12 = vcmp.lt.s32.totalorder %v13707_v6, 16 }
 0x3c4   : > { %vm19657_vm4 = vmmov %vm19648_vm1  ;;  %v14212_v55 = vpop.f32.mrf.mxu2  ;;  %v10719_v43 = vsel %vm14088_vm7, 1.0, %v19436_v62 }
 0x3c5   : > { %10666 = vmatmul.msk.f32.gmra.mxu0 %vm19657_vm4, %v13962_v10  ;;  %vm4599_vm8 = vmand %vm14017_vm6, %vm19658_vm14  ;;  %vm19667_vm6 = vcmp.ge.s32.totalorder %v13735_v32, 0 }
 0x3c6   : > { %vm19659_vm2 = vmmov %vm19648_vm1  ;;  %vm19660_vm1 = vcmp.ge.s32.totalorder %v13707_v6, 0  ;;  %v14215_v54 = vpop.f32.mrf.mxu3 }
 0x3c7   : > { %10672 = vmatmul.msk.f32.gmra.mxu3 %vm19659_vm2, %v13962_v10  ;;  %vm4600_vm10 = vmand %vm13988_vm15, %vm19660_vm1  ;;  %vm19668_vm15 = vnez %v19616_v1  ;;  %v4575_v1 = vpop.permute.xlu2 %4574 }
 0x3c8   : > { %vm14106_vm0 = vmand %vm4599_vm8, %vm19661_vm9  ;;  %vm19670_vm8 = vcmp.ge.s32.totalorder %v13665_v47, 0 }
 0x3c9   : > { %v19663_v21 = vsel %vm14106_vm0, 4294967295, %v19662_v21  ;;  %vm14112_vm3 = vmand %vm4600_vm10, %vm19664_vm12  ;;  %vm19672_vm10 = vcmp.lt.s32.totalorder %v13735_v32, 16  ;;  %vm19676_vm0 = vcmp.lt.s32.totalorder %v13665_v47, 16  ;;  %v19682_v32 = vld [vmem:[#allocation21_spill] sm:$0xff]  ;;  %v19684_v47 = vld [vmem:[#allocation22_spill] sm:$0xff]  ;;  %v14223_v6 = vpop.f32.mrf.mxu1 }
 0x3ca   : > { %v19666_v52 = vsel %vm14112_vm3, 4294967295, %v19665_v52  ;;  %vm4593_vm4 = vmand %vm19668_vm15, %vm19667_vm6  ;;  %vm19680_vm15 = vcmp.ge.s32.totalorder %v13860_v11, 0 }
 0x3cb   : > { %vm19669_vm14 = vmmov %vm19659_vm2  ;;  %vm19671_vm2 = vnez %v19573_v39 }
 0x3cc   : > { %10670 = vmatmul.msk.f32.gmra.mxu2 %vm19669_vm14, %v13962_v10  ;;  %vm4594_vm1 = vmand %vm19671_vm2, %vm19670_vm8  ;;  %vm19683_vm8 = vcmp.ge.s32.totalorder %v13821_v40, 0  ;;  %vm19685_vm2 = vcmp.lt.s32.totalorder %v13860_v11, 16  ;;  %v19692_v10 = vld [vmem:[#allocation18_spill] sm:$0xff] }
 0x3cd   : > { %vm14131_vm9 = vmand %vm4593_vm4, %vm19672_vm10  ;;  %vm19688_vm10 = vcmp.lt.s32.totalorder %v13821_v40, 16  ;;  %v4573_v40 = vpop.permute.xlu1 %4572  ;;  %v19698_v11 = vld [vmem:[#allocation14_spill] sm:$0xff]  ;;  %v14230_v15 = vpop.f32.mrf.mxu2 }
 0x3ce   : > { %vm19675_vm12 = vmmov %vm19669_vm14  ;;  %v10717_v53 = vsel %vm14131_vm9, 1.0, %v19436_v62 }
 0x3cf   : > { %10685 = vmatmul.msk.f32.vlgmr.msra.gmra.mxu1 %vm19675_vm12, %v10681_v50  ;;  %vm14138_vm3 = vmand %vm4594_vm1, %vm19676_vm0  ;;  %v4569_v34 = vpop.permute.xlu2 %4568 }
 0x3d0   : > { %vm19679_vm6 = vmmov %vm19675_vm12  ;;  %4406 = vmatpush.msra.mxu1 %v12909_v22  ;;  %v10718_v33 = vsel %vm14138_vm3, 1.0, %v19436_v62 }
 0x3d1   : > { %10683 = vmatmul.msk.f32.vlgmr.msra.gmra.mxu0 %vm19679_vm6, %v10681_v50  ;;  %vm4597_vm4 = vmand %vm14032_vm13, %vm19680_vm15 }
 0x3d2   : > { %vm19681_vm14 = vmmov %vm19679_vm6  ;;  %4383 = vmatpush.msra.mxu0 %v19682_v32  ;;  %v10700_v32 = vld [vmem:[%s18768_s3 + $0x48] sm:$0xff] }
 0x3d3   : > { %10689 = vmatmul.msk.f32.vlgmr.msrb.gmra.mxu3 %vm19681_vm14, %v10681_v50  ;;  %vm4598_vm0 = vmand %vm14040_vm11, %vm19683_vm8 }
 0x3d4   : > { %4452 = vmatpush.msrb.mxu3 %v19684_v47  ;;  %vm14157_vm1 = vmand %vm4597_vm4, %vm19685_vm2  ;;  %v4579_v47 = vpop.permute.xlu0 %4578 }
 0x3d5   : > { %vm14163_vm13 = vmand %vm4598_vm0, %vm19688_vm10  ;;  %v4571_v28 = vpop.permute.xlu1 %4570 }
 0x3d6   : > { %vm19691_vm12 = vmmov %vm19679_vm6 }
 0x3d7   : > { %10687 = vmatmul.msk.f32.vlgmr.msrb.gmra.mxu2 %vm19691_vm12, %v10681_v50  ;;  %vm19693_vm11 = vmmov %vm19679_vm6 }
 0x3d8   : > { %4429 = vmatpush.msrb.mxu2 %v19692_v10  ;;  %10686 = vmatmul.msk.f32.gmra.mxu1 %vm19693_vm11, %v10682_v58  ;;  %vm19694_vm15 = vmmov %vm19679_vm6  ;;  %v14236_v10 = vpop.f32.mrf.mxu0 }
 0x3d9   : > { %10684 = vmatmul.msk.f32.gmra.mxu0 %vm19679_vm6, %v10682_v58  ;;  %vm19695_vm4 = vmmov %vm19679_vm6  ;;  %vm4584_vm6 = vcmp.lt.s32.totalorder %v19348_v13, 126 }
 0x3da   : > { %vm19696_vm14 = vmmov %vm19695_vm4  ;;  %v4590_v4 = vsel %vm4584_vm6, %v4571_v28, %v4573_v40  ;;  %v4591_v16 = vsel %vm4584_vm6, %v4569_v34, %v4571_v28  ;;  %v4588_v42 = vsel %vm4584_vm6, %v4575_v1, %v4577_v45 }
 0x3db   : > { %10690 = vmatmul.msk.f32.gmra.mxu3 %vm19694_vm15, %v10682_v58  ;;  %vm19697_vm8 = vmmov %vm19695_vm4  ;;  %v4626_v20 = vmul.f32 %v10718_v33, %v4590_v4  ;;  %v4625_v51 = vmul.f32 %v10717_v53, %v4591_v16  ;;  %v4628_v31 = vmul.f32 %v10720_v23, %v4588_v42  ;;  %v4592_v33 = vsel %vm4584_vm6, %v4583_v36, %v4569_v34  ;;  %v14257_v53 = vpop.f32.mrf.mxu2 }
 0x3dc   : > { %vm19699_vm0 = vmmov %vm19695_vm4 }
 0x3dd   : > { %vm19702_vm2 = vmmov %vm19699_vm0 }
 0x3de   : > { %vm19704_vm10 = vmmov %vm19699_vm0 }
 0x3df   : > { %10688 = vmatmul.msk.f32.gmra.mxu2 %vm19695_vm4, %v10682_v58  ;;  %vm19705_vm12 = vmmov %vm19699_vm0 }
 0x3e0   : > { %10693 = vmatmul.msk.f32.vlgmr.msrb.gmra.mxu1 %vm19696_vm14, %v10681_v50  ;;  %vm19706_vm11 = vmmov %vm19699_vm0  ;;  %v14268_v16 = vpop.f32.mrf.mxu0 }
 0x3e1   : > { %10691 = vmatmul.msk.f32.vlgmr.msrb.gmra.mxu0 %vm19697_vm8, %v10681_v50  ;;  %4498 = vmatpush.msrb.mxu1 %v19698_v11  ;;  %vm19707_vm3 = vmmov %vm19699_vm0  ;;  %v14238_v11 = vpop.f32.mrf.mxu1  ;;  %19721 = vst [vmem:[#allocation22_spill] sm:$0xff] %v14268_v16 }
 0x3e2   : > { %4475 = vmatpush.msrb.mxu0 %v19700_v12  ;;  %vm19708_vm9 = vmmov %vm19699_vm0  ;;  %19715 = vst [vmem:[#allocation21_spill] sm:$0xff] %v14238_v11 }
 0x3e3   : > { %10697 = vmatmul.msk.f32.vlgmr.msra.gmra.mxu3 %vm19699_vm0, %v10681_v50  ;;  %vm19709_vm15 = vmmov %vm19699_vm0 }
 0x3e4   : > { %4544 = vmatpush.msra.mxu3 %v19701_v7  ;;  %vm19710_vm5 = vmmov %vm19699_vm0  ;;  %v10721_v7 = vsel %vm14157_vm1, 1.0, %v19436_v62 }
 0x3e5   : > { %vm19711_vm4 = vmmov %vm19699_vm0 }
 0x3e6   : > { %vm19712_vm14 = vmmov %vm19699_vm0 }
 0x3e7   : > { %10695 = vmatmul.msk.f32.vlgmr.msra.gmra.mxu2 %vm19702_vm2, %v10681_v50  ;;  %v4589_v50 = vsel %vm4584_vm6, %v4573_v40, %v4575_v1  ;;  %vm19713_vm7 = vmmov %vm19699_vm0  ;;  %v4581_v40 = vpop.permute.xlu2 %4580  ;;  %v10722_v1 = vsel %vm14163_vm13, 1.0, %v19436_v62 }
 0x3e8   : > { %4521 = vmatpush.msra.mxu2 %v19703_v48  ;;  %10694 = vmatmul.msk.f32.gmra.mxu1 %vm19704_vm10, %v10682_v58  ;;  %v4627_v61 = vmul.f32 %v10719_v43, %v4589_v50  ;;  %vm19714_vm8 = vmmov %vm19699_vm0  ;;  %v4586_v12 = vsel %vm4584_vm6, %v4579_v47, %v4581_v40  ;;  %v4587_v48 = vsel %vm4584_vm6, %v4577_v45, %v4579_v47 }
 0x3e9   : > { %10692 = vmatmul.msk.f32.gmra.mxu0 %vm19705_vm12, %v10682_v58  ;;  %vm19716_vm0 = vnez %v19666_v52  ;;  %v4630_v39 = vmul.f32 %v10722_v1, %v4586_v12  ;;  %v4629_v4 = vmul.f32 %v10721_v7, %v4587_v48  ;;  %vm19717_vm13 = vmmov %vm19702_vm2  ;;  %vm19719_vm10 = vnez %v19663_v21  ;;  %v14270_v23 = vpop.f32.mrf.mxu1  ;;  %v14278_v21 = vpop.f32.mrf.mxu2 }
 0x3ea   : > { %v10724_v28 = vsel %vm19716_vm0, 1.0, %v19436_v62  ;;  %vm19718_vm1 = vmmov %vm19702_vm2  ;;  %v10723_v52 = vsel %vm19719_vm10, 1.0, %v19436_v62  ;;  %v4585_v34 = vsel %vm4584_vm6, %v4581_v40, %v4583_v36  ;;  %19722 = vst [vmem:[#allocation18_spill] sm:$0xff] %v14270_v23  ;;  %vm19734_vm10 = vcmp.ge.s32.totalorder %v13466_v49, 0 }
 0x3eb   : > { %10698 = vmatmul.msk.f32.gmra.mxu3 %vm19706_vm11, %v10682_v58  ;;  %v4632_v22 = vmul.f32 %v10724_v28, %v4592_v33  ;;  %vm19720_vm12 = vmmov %vm19718_vm1  ;;  %v4631_v42 = vmul.f32 %v10723_v52, %v4585_v34 }
 0x3ec   : > { %vm19723_vm11 = vmmov %vm19718_vm1 }
 0x3ed   : > { %vm19730_vm0 = vmmov %vm19718_vm1 }
 0x3ef   : > { %10696 = vmatmul.msk.f32.gmra.mxu2 %vm19707_vm3, %v10682_v58  ;;  %v14233_v58 = vpop.f32.mrf.mxu3  ;;  %vm19724_vm3 = vcmp.ge.s32.totalorder %v13235_v56, 0 }
 0x3f0   : > { %10703 = vmatmul.msk.f32.vlgmr.msra.gmra.mxu1 %vm19708_vm9, %v10699_v24  ;;  %vm19725_vm9 = vnez %v19480_v3  ;;  %v10725_v3 = vld [vmem:[%s18768_s3 + $0x50] sm:$0xff] }
 0x3f1   : > { %10701 = vmatmul.msk.f32.vlgmr.msra.gmra.mxu0 %vm19709_vm15, %v10699_v24  ;;  %4680 = vmatpush.msra.mxu1 %v4626_v20  ;;  %vm4877_vm15 = vmand %vm19725_vm9, %vm19724_vm3  ;;  %v14288_v20 = vpop.f32.mrf.mxu1  ;;  %vm19737_vm9 = vcmp.ge.s32.totalorder %v13451_v5, 0 }
 0x3f2   : > { %4657 = vmatpush.msra.mxu0 %v4625_v51  ;;  %vm19736_vm3 = vmmov %vm19730_vm0 }
 0x3f3   : > { %10707 = vmatmul.msk.f32.vlgmr.msrb.gmra.mxu3 %vm19710_vm5, %v10699_v24  ;;  %vm19726_vm5 = vmmov %vm19718_vm1 }
 0x3f4   : > { %4726 = vmatpush.msrb.mxu3 %v4628_v31 }
 0x3f7   : > { %10705 = vmatmul.msk.f32.vlgmr.msrb.gmra.mxu2 %vm19711_vm4, %v10699_v24  ;;  %v14260_v45 = vpop.f32.mrf.mxu3  ;;  %vm19727_vm4 = vmmov %vm19718_vm1 }
 0x3f8   : > { %4703 = vmatpush.msrb.mxu2 %v4627_v61  ;;  %10704 = vmatmul.msk.f32.gmra.mxu1 %vm19712_vm14, %v10700_v32  ;;  %vm19728_vm14 = vmmov %vm19718_vm1 }
 0x3f9   : > { %10702 = vmatmul.msk.f32.gmra.mxu0 %vm19713_vm7, %v10700_v32  ;;  %vm19729_vm7 = vcmp.lt.s32.totalorder %v13235_v56, 16  ;;  %v14299_v56 = vpop.f32.mrf.mxu2 }
 0x3fb   : > { %10708 = vmatmul.msk.f32.gmra.mxu3 %vm19714_vm8, %v10700_v32  ;;  %vm4885_vm8 = vmand %vm4877_vm15, %vm19729_vm7  ;;  %vm19738_vm15 = vnez %v19483_v29 }
 0x3fc   : > { %v10746_v51 = vsel %vm4885_vm8, 1.0, %v19436_v62  ;;  %vm19741_vm8 = vmmov %vm19730_vm0 }
 0x3fd   : > { %v4909_v31 = vmul.f32 %v10746_v51, %v13617_v18  ;;  %v10726_v18 = vld [vmem:[%s18768_s3 + $0x58] sm:$0xff] }
 0x3ff   : > { %10706 = vmatmul.msk.f32.gmra.mxu2 %vm19702_vm2, %v10700_v32  ;;  %v14281_v36 = vpop.f32.mrf.mxu3  ;;  %vm19731_vm2 = vmmov %vm19730_vm0 }
 0x400   : > { %10711 = vmatmul.msk.f32.vlgmr.msrb.gmra.mxu1 %vm19717_vm13, %v10699_v24  ;;  %vm19732_vm13 = vmmov %vm19730_vm0 }
 0x401   : > { %10709 = vmatmul.msk.f32.vlgmr.msrb.gmra.mxu0 %vm19718_vm1, %v10699_v24  ;;  %4772 = vmatpush.msrb.mxu1 %v4630_v39  ;;  %vm19733_vm1 = vmmov %vm19730_vm0 }
 0x402   : > { %4749 = vmatpush.msrb.mxu0 %v4629_v4 }
 0x403   : > { %10715 = vmatmul.msk.f32.vlgmr.msra.gmra.mxu3 %vm19720_vm12, %v10699_v24  ;;  %vm19735_vm12 = vnez %v19441_v25 }
 0x404   : > { %4818 = vmatpush.msra.mxu3 %v4632_v22 }
 0x407   : > { %10713 = vmatmul.msk.f32.vlgmr.msra.gmra.mxu2 %vm19723_vm11, %v10699_v24  ;;  %v14286_v24 = vpop.f32.mrf.mxu0  ;;  %v3665_v43 = vpop.f32.mrf.mxu3  ;;  %vm4879_vm11 = vmand %vm19735_vm12, %vm19734_vm10  ;;  %vm19745_vm10 = vnez %v19378_v59 }
 0x408   : > { %4795 = vmatpush.msra.mxu2 %v4631_v42  ;;  %10712 = vmatmul.msk.f32.gmra.mxu1 %vm19726_vm5, %v10700_v32  ;;  %v3666_v50 = vadd.f32 %v3665_v43, %v14215_v54  ;;  %vm4878_vm5 = vmand %vm19738_vm15, %vm19737_vm9 }
 0x409   : > { %10710 = vmatmul.msk.f32.gmra.mxu0 %vm19727_vm4, %v10700_v32  ;;  %vm19739_vm4 = vmmov %vm19730_vm0 }
 0x40a   : > { %vm19749_vm15 = vmmov %vm19739_vm4 }
 0x40b   : > { %10716 = vmatmul.msk.f32.gmra.mxu3 %vm19728_vm14, %v10700_v32  ;;  %vm19740_vm14 = vcmp.lt.s32.totalorder %v13466_v49, 16 }
 0x40c   : > { %vm4887_vm7 = vmand %vm4879_vm11, %vm19740_vm14 }
 0x40d   : > { %v10748_v29 = vsel %vm4887_vm7, 1.0, %v19436_v62  ;;  %vm19747_vm11 = vmmov %vm19736_vm3 }
 0x40e   : > { %vm19753_vm14 = vmmov %vm19739_vm4 }
 0x40f   : > { %10714 = vmatmul.msk.f32.gmra.mxu2 %vm19730_vm0, %v10700_v32  ;;  %v14304_v61 = vpop.f32.mrf.mxu0  ;;  %v14306_v32 = vpop.f32.mrf.mxu1  ;;  %vm19742_vm0 = vcmp.lt.s32.totalorder %v13451_v5, 16  ;;  %vm19754_vm7 = vmmov %vm19739_vm4 }
 0x410   : > { %10729 = vmatmul.msk.f32.vlgmr.msra.gmra.mxu1 %vm19731_vm2, %v10725_v3  ;;  %vm4886_vm2 = vmand %vm4878_vm5, %vm19742_vm0 }
 0x411   : > { %10727 = vmatmul.msk.f32.vlgmr.msra.gmra.mxu0 %vm19732_vm13, %v10725_v3  ;;  %4961 = vmatpush.msra.mxu1 %v13564_v26  ;;  %v3642_v26 = vpop.f32.mrf.mxu2  ;;  %vm19743_vm13 = vmmov %vm19733_vm1  ;;  %v10747_v5 = vsel %vm4886_vm2, 1.0, %v19436_v62 }
 0x412   : > { %4938 = vmatpush.msra.mxu0 %v13668_v19  ;;  %v3643_v25 = vadd.f32 %v3642_v26, %v14230_v15  ;;  %v3668_v19 = vpop.f32.mrf.mxu3  ;;  %v4911_v15 = vmul.f32 %v10748_v29, %v13552_v38  ;;  %v4910_v47 = vmul.f32 %v10747_v5, %v13629_v27  ;;  %vm19750_vm5 = vmmov %vm19739_vm4  ;;  %v19777_v29 = vld [vmem:[#allocation19_spill] sm:$0xff] }
 0x413   : > { %10733 = vmatmul.msk.f32.vlgmr.msrb.gmra.mxu3 %vm19733_vm1, %v10725_v3  ;;  %vm19744_vm1 = vcmp.ge.s32.totalorder %v13421_v63, 0  ;;  %vm19756_vm0 = vmmov %vm19739_vm4 }
 0x414   : > { %5007 = vmatpush.msrb.mxu3 %v4909_v31  ;;  %vm4880_vm12 = vmand %vm19745_vm10, %vm19744_vm1 }
 0x415   : > { %vm19757_vm2 = vmmov %vm19756_vm0 }
 0x416   : > { %vm19759_vm1 = vmmov %vm19756_vm0 }
 0x417   : > { %10731 = vmatmul.msk.f32.vlgmr.msrb.gmra.mxu2 %vm19736_vm3, %v10725_v3  ;;  %v14335_v49 = vpop.f32.mrf.mxu0  ;;  %v14337_v54 = vpop.f32.mrf.mxu1  ;;  %vm19748_vm3 = vcmp.lt.s32.totalorder %v13421_v63, 16  ;;  %vm19760_vm10 = vmmov %vm19756_vm0 }
 0x418   : > { %4984 = vmatpush.msrb.mxu2 %v13433_v57  ;;  %10730 = vmatmul.msk.f32.gmra.mxu1 %vm19739_vm4, %v10726_v18  ;;  %v3669_v57 = vadd.f32 %v3668_v19, %v14233_v58  ;;  %19746 = vst [vmem:[#allocation14_spill] sm:$0xff] %v14337_v54  ;;  %vm4888_vm9 = vmand %vm4880_vm12, %vm19748_vm3 }
 0x419   : > { %10728 = vmatmul.msk.f32.gmra.mxu0 %vm19741_vm8, %v10726_v18  ;;  %v3645_v59 = vpop.f32.mrf.mxu2  ;;  %v10749_v58 = vsel %vm4888_vm9, 1.0, %v19436_v62  ;;  %vm19755_vm8 = vmmov %vm19739_vm4 }
 0x41a   : > { %v3646_v40 = vadd.f32 %v3645_v59, %v14257_v53  ;;  %v3757_v38 = vpop.f32.mrf.mxu3  ;;  %v4912_v12 = vmul.f32 %v10749_v58, %v13562_v46  ;;  %v10751_v46 = vld [vmem:[%s18768_s3 + $0x60] sm:$0xff]  ;;  %vm19764_vm12 = vmmov %vm19756_vm0  ;;  %v19781_v59 = vld [vmem:[#allocation17_spill] sm:$0xff] }
 0x41b   : > { %10734 = vmatmul.msk.f32.gmra.mxu3 %vm19743_vm13, %v10726_v18  ;;  %v3758_v63 = vadd.f32 %v3757_v38, %v14260_v45  ;;  %vm19758_vm13 = vmmov %vm19756_vm0  ;;  %v19761_v53 = vld [vmem:[#allocation23_spill] sm:$0xff]  ;;  %v19762_v45 = vld [vmem:[#allocation25_spill] sm:$0xff] }
 0x41c   : > { %vm19767_vm3 = vmmov %vm19756_vm0 }
 0x41d   : > { %vm19768_vm9 = vmmov %vm19756_vm0 }
 0x41f   : > { %10732 = vmatmul.msk.f32.gmra.mxu2 %vm19747_vm11, %v10726_v18  ;;  %v14352_v1 = vpop.f32.mrf.mxu0  ;;  %v14354_v27 = vpop.f32.mrf.mxu1  ;;  %vm19766_vm11 = vmmov %vm19756_vm0 }
 0x420   : > { %10737 = vmatmul.msk.f32.vlgmr.msrb.gmra.mxu1 %vm19749_vm15, %v10725_v3  ;;  %19751 = vst [vmem:[#allocation16_spill] sm:$0xff] %v14352_v1  ;;  %vm19770_vm15 = vmmov %vm19756_vm0 }
 0x421   : > { %10735 = vmatmul.msk.f32.vlgmr.msrb.gmra.mxu0 %vm19750_vm5, %v10725_v3  ;;  %5053 = vmatpush.msrb.mxu1 %v4911_v15  ;;  %19752 = vst [vmem:[#allocation13_spill] sm:$0xff] %v14354_v27  ;;  %v3734_v7 = vpop.f32.mrf.mxu2  ;;  %vm19771_vm5 = vmmov %vm19756_vm0 }
 0x422   : > { %5030 = vmatpush.msrb.mxu0 %v4910_v47  ;;  %v3760_v48 = vpop.f32.mrf.mxu3 }
 0x423   : > { %10741 = vmatmul.msk.f32.vlgmr.msra.gmra.mxu3 %vm19739_vm4, %v10725_v3  ;;  %v3761_v28 = vadd.f32 %v3760_v48, %v14281_v36  ;;  %v19765_v36 = vld [vmem:[#allocation20_spill] sm:$0xff]  ;;  %vm19772_vm4 = vmmov %vm19756_vm0 }
 0x424   : > { %5099 = vmatpush.msra.mxu3 %v13680_v9  ;;  %v3735_v9 = vadd.f32 %v3734_v7, %v14278_v21 }
 0x427   : > { %10739 = vmatmul.msk.f32.vlgmr.msra.gmra.mxu2 %vm19753_vm14, %v10725_v3  ;;  %v14363_v33 = vpop.f32.mrf.mxu0  ;;  %v14365_v39 = vpop.f32.mrf.mxu1  ;;  %vm19774_vm14 = vmmov %vm19756_vm0 }
 0x428   : > { %5076 = vmatpush.msra.mxu2 %v4912_v12  ;;  %10738 = vmatmul.msk.f32.gmra.mxu1 %vm19754_vm7, %v10726_v18  ;;  %vm19780_vm7 = vmmov %vm19756_vm0  ;;  %v10777_v12 = vld [vmem:[%s18768_s3 + $0x70] sm:$0xff] }
 0x429   : > { %10736 = vmatmul.msk.f32.gmra.mxu0 %vm19755_vm8, %v10726_v18  ;;  %v3737_v4 = vpop.f32.mrf.mxu2  ;;  %vm19782_vm8 = vmmov %vm19756_vm0 }
 0x42a   : > { %v3738_v22 = vadd.f32 %v3737_v4, %v14299_v56  ;;  %v3947_v52 = vpop.f32.mrf.mxu3 }
 0x42b   : > { %10742 = vmatmul.msk.f32.gmra.mxu3 %vm19756_vm0, %v10726_v18  ;;  %v14378_v34 = vadd.f32 %v3947_v52, %v3666_v50 }
 0x42d   : > { %19763 = vst [vmem:[#allocation15_spill] sm:$0xff] %v14378_v34 }
 0x42f   : > { %10740 = vmatmul.msk.f32.gmra.mxu2 %vm19757_vm2, %v10726_v18  ;;  %v14380_v42 = vpop.f32.mrf.mxu0  ;;  %v14382_v21 = vpop.f32.mrf.mxu1  ;;  %v19773_v18 = vld [vmem:[#allocation24_spill] sm:$0xff]  ;;  %vm19783_vm2 = vmmov %vm19756_vm0 }
 0x430   : > { %10755 = vmatmul.msk.f32.vlgmr.msra.gmra.mxu1 %vm19758_vm13, %v10751_v46  ;;  %vm19785_vm13 = vmmov %vm19756_vm0 }
 0x431   : > { %10753 = vmatmul.msk.f32.vlgmr.msra.gmra.mxu0 %vm19759_vm1, %v10751_v46  ;;  %5210 = vmatpush.msra.mxu1 %v13362_v44  ;;  %v10752_v44 = vld [vmem:[%s18768_s3 + $0x68] sm:$0xff]  ;;  %v3924_v3 = vpop.f32.mrf.mxu2  ;;  %vm19786_vm1 = vmmov %vm19756_vm0 }
 0x432   : > { %5187 = vmatpush.msra.mxu0 %v19761_v53  ;;  %v14392_v51 = vadd.f32 %v3924_v3, %v3643_v25  ;;  %v3950_v31 = vpop.f32.mrf.mxu3  ;;  %v19775_v25 = vld [vmem:[#allocation26_spill] sm:$0xff]  ;;  %v10803_v3 = vld [vmem:[%s18768_s3 + $0x80] sm:$0xff] }
 0x433   : > { %10759 = vmatmul.msk.f32.vlgmr.msrb.gmra.mxu3 %vm19760_vm10, %v10751_v46  ;;  %v14394_v56 = vadd.f32 %v3950_v31, %v3669_v57  ;;  %vm19787_vm10 = vmmov %vm19756_vm0  ;;  %v10778_v53 = vld [vmem:[%s18768_s3 + $0x78] sm:$0xff] }
 0x434   : > { %5256 = vmatpush.msrb.mxu3 %v19762_v45 }
 0x437   : > { %10757 = vmatmul.msk.f32.vlgmr.msrb.gmra.mxu2 %vm19764_vm12, %v10751_v46  ;;  %v14396_v43 = vpop.f32.mrf.mxu0  ;;  %v14398_v50 = vpop.f32.mrf.mxu1  ;;  %vm19788_vm12 = vmmov %vm19756_vm0 }
 0x438   : > { %5233 = vmatpush.msrb.mxu2 %v19765_v36  ;;  %10756 = vmatmul.msk.f32.gmra.mxu1 %vm19766_vm11, %v10752_v44  ;;  %19769 = vst [vmem:[#allocation23_spill] sm:$0xff] %v14398_v50  ;;  %vm19791_vm11 = vmmov %vm19756_vm0 }
 0x439   : > { %10754 = vmatmul.msk.f32.gmra.mxu0 %vm19767_vm3, %v10752_v44  ;;  %v3927_v26 = vpop.f32.mrf.mxu2  ;;  %vm19792_vm3 = vmmov %vm19756_vm0 }
 0x43a   : > { %v14406_v19 = vadd.f32 %v3927_v26, %v3646_v40 }
 0x43b   : > { %10760 = vmatmul.msk.f32.gmra.mxu3 %vm19768_vm9, %v10752_v44  ;;  %vm19793_vm9 = vmmov %vm19756_vm0 }
 0x43c   : > { %19776 = vst [vmem:[#allocation25_spill] sm:$0xff] %v14406_v19  ;;  %v4039_v57 = vpop.f32.mrf.mxu3 }
 0x43d   : > { %v14409_v5 = vadd.f32 %v4039_v57, %v3758_v63  ;;  %v5621_v57 = vld [vmem:[%s18769_s4] sm:$0xff] }
 0x43e   : > { %5625 = vperm.xlu2 %11302, %v5621_v57  }
 0x43f   : > { %10758 = vmatmul.msk.f32.gmra.mxu2 %vm19770_vm15, %v10752_v44  ;;  %vm19794_vm15 = vmmov %vm19756_vm0 }
 0x440   : > { %10763 = vmatmul.msk.f32.vlgmr.msrb.gmra.mxu1 %vm19771_vm5, %v10751_v46  ;;  %v14411_v15 = vpop.f32.mrf.mxu1  ;;  %vm19797_vm5 = vmmov %vm19756_vm0 }
 0x441   : > { %10761 = vmatmul.msk.f32.vlgmr.msrb.gmra.mxu0 %vm19772_vm4, %v10751_v46  ;;  %5302 = vmatpush.msrb.mxu1 %v19773_v18  ;;  %19778 = vst [vmem:[#allocation20_spill] sm:$0xff] %v14411_v15  ;;  %v4016_v58 = vpop.f32.mrf.mxu2  ;;  %vm19798_vm4 = vmmov %vm19756_vm0 }
 0x442   : > { %5279 = vmatpush.msrb.mxu0 %v19775_v25  ;;  %v14413_v47 = vpop.f32.mrf.mxu0  ;;  %v14420_v40 = vadd.f32 %v4016_v58, %v3735_v9  ;;  %v10804_v25 = vld [vmem:[%s18768_s3 + $0x88] sm:$0xff] }
 0x443   : > { %10767 = vmatmul.msk.f32.vlgmr.msra.gmra.mxu3 %vm19774_vm14, %v10751_v46  ;;  %19779 = vst [vmem:[#allocation24_spill] sm:$0xff] %v14413_v47  ;;  %vm19799_vm14 = vmmov %vm19756_vm0 }
 0x444   : > { %5348 = vmatpush.msra.mxu3 %v19777_v29 }
 0x447   : > { %10765 = vmatmul.msk.f32.vlgmr.msra.gmra.mxu2 %vm19780_vm7, %v10751_v46  ;;  %vm19801_vm7 = vmmov %vm19756_vm0 }
 0x448   : > { %5325 = vmatpush.msra.mxu2 %v19781_v59  ;;  %10764 = vmatmul.msk.f32.gmra.mxu1 %vm19782_vm8, %v10752_v44  ;;  %vm19804_vm8 = vmmov %vm19756_vm0 }
 0x449   : > { %10762 = vmatmul.msk.f32.gmra.mxu0 %vm19756_vm0, %v10752_v44 }
 0x44a   : > { %v4042_v38 = vpop.f32.mrf.mxu3 }
 0x44b   : > { %10768 = vmatmul.msk.f32.gmra.mxu3 %vm19783_vm2, %v10752_v44  ;;  %v14427_v7 = vadd.f32 %v4042_v38, %v3761_v28  ;;  %vm19805_vm2 = vmmov %vm19756_vm0 }
 0x44c   : > { %v14422_v63 = vpop.f32.mrf.mxu1 }
 0x44d   : > { %19784 = vst [vmem:[#allocation26_spill] sm:$0xff] %v14427_v7 }
 0x44e   : > { %v14429_v48 = vpop.f32.mrf.mxu0 }
 0x44f   : > { %10766 = vmatmul.msk.f32.gmra.mxu2 %vm19785_vm13, %v10752_v44  ;;  %v4019_v9 = vpop.f32.mrf.mxu2  ;;  %vm19806_vm13 = vmmov %vm19756_vm0 }
 0x450   : > { %10781 = vmatmul.msk.f32.vlgmr.msra.gmra.mxu1 %vm19786_vm1, %v10777_v12  ;;  %v14437_v46 = vadd.f32 %v4019_v9, %v3738_v22  ;;  %vm19808_vm1 = vmmov %vm19756_vm0 }
 0x451   : > { %10779 = vmatmul.msk.f32.vlgmr.msra.gmra.mxu0 %vm19787_vm10, %v10777_v12  ;;  %5459 = vmatpush.msra.mxu1 %v13737_v37  ;;  %vm19809_vm10 = vmmov %vm19756_vm0 }
 0x452   : > { %5436 = vmatpush.msra.mxu0 %v13827_v30  ;;  %19789 = vst [vmem:[#allocation19_spill] sm:$0xff] %v14437_v46 }
 0x453   : > { %10785 = vmatmul.msk.f32.vlgmr.msrb.gmra.mxu3 %vm19788_vm12, %v10777_v12  ;;  %vm19810_vm12 = vmmov %vm19756_vm0 }
 0x454   : > { %5505 = vmatpush.msrb.mxu3 %v13974_v17 }
 0x455   : > { %v14442_v4 = vpop.f32.mrf.mxu1 }
 0x456   : > { %v14440_v28 = vpop.f32.mrf.mxu3  ;;  %v14447_v45 = vpop.f32.mrf.mxu0 }
 0x457   : > { %19790 = vst [vmem:[#allocation17_spill] sm:$0xff] %v14440_v28  ;;  %10783 = vmatmul.msk.f32.vlgmr.msrb.gmra.mxu2 %vm19791_vm11, %v10777_v12  ;;  %vm19812_vm11 = vmmov %vm19756_vm0 }
 0x458   : > { %5482 = vmatpush.msrb.mxu2 %v13709_v0  ;;  %10782 = vmatmul.msk.f32.gmra.mxu1 %vm19792_vm3, %v10778_v53  ;;  %vm19814_vm3 = vmmov %vm19756_vm0 }
 0x459   : > { %10780 = vmatmul.msk.f32.gmra.mxu0 %vm19793_vm9, %v10778_v53  ;;  %vm19815_vm9 = vmmov %vm19756_vm0 }
 0x45a   : > { %v14453_v37 = vpop.f32.mrf.mxu2 }
 0x45b   : > { %10786 = vmatmul.msk.f32.gmra.mxu3 %vm19794_vm15, %v10778_v53  ;;  %vm19816_vm15 = vmmov %vm19756_vm0 }
 0x45d   : > { %v14458_v17 = vpop.f32.mrf.mxu1 }
 0x45e   : > { %v14456_v30 = vpop.f32.mrf.mxu3  ;;  %19795 = vst [vmem:[#allocation27_spill] sm:$0xff] %v14458_v17  ;;  %v14460_v22 = vpop.f32.mrf.mxu0 }
 0x45f   : > { %19796 = vst [vmem:[#allocation28_spill] sm:$0xff] %v14460_v22  ;;  %10784 = vmatmul.msk.f32.gmra.mxu2 %vm19797_vm5, %v10778_v53  ;;  %vm19817_vm5 = vmmov %vm19756_vm0 }
 0x460   : > { %10789 = vmatmul.msk.f32.vlgmr.msrb.gmra.mxu1 %vm19798_vm4, %v10777_v12  ;;  %vm19820_vm4 = vmmov %vm19756_vm0 }
 0x461   : > { %10787 = vmatmul.msk.f32.vlgmr.msrb.gmra.mxu0 %vm19799_vm14, %v10777_v12  ;;  %5551 = vmatpush.msrb.mxu1 %v13897_v35  ;;  %vm19821_vm14 = vmmov %vm19756_vm0 }
 0x462   : > { %v14466_v0 = vpop.f32.mrf.mxu2  ;;  %5528 = vmatpush.msrb.mxu0 %v13986_v14 }
 0x463   : > { %19800 = vst [vmem:[#allocation29_spill] sm:$0xff] %v14466_v0  ;;  %10793 = vmatmul.msk.f32.vlgmr.msra.gmra.mxu3 %vm19801_vm7, %v10777_v12  ;;  %vm19822_vm7 = vmmov %vm19756_vm0 }
 0x464   : > { %5597 = vmatpush.msra.mxu3 %v13833_v60 }
 0x465   : > { %v14473_v44 = vpop.f32.mrf.mxu1 }
 0x466   : > { %v14471_v52 = vpop.f32.mrf.mxu3  ;;  %19802 = vst [vmem:[#allocation30_spill] sm:$0xff] %v14473_v44  ;;  %v14475_v36 = vpop.f32.mrf.mxu0 }
 0x467   : > { %19803 = vst [vmem:[#allocation31_spill] sm:$0xff] %v14475_v36  ;;  %10791 = vmatmul.msk.f32.vlgmr.msra.gmra.mxu2 %vm19804_vm8, %v10777_v12  ;;  %vm19824_vm8 = vmmov %vm19756_vm0 }
 0x468   : > { %5574 = vmatpush.msra.mxu2 %v13784_v2  ;;  %10790 = vmatmul.msk.f32.gmra.mxu1 %vm19756_vm0, %v10778_v53 }
 0x469   : > { %10788 = vmatmul.msk.f32.gmra.mxu0 %vm19805_vm2, %v10778_v53  ;;  %vm19827_vm2 = vmmov %vm19756_vm0 }
 0x46a   : > { %v14481_v35 = vpop.f32.mrf.mxu2 }
 0x46b   : > { %10794 = vmatmul.msk.f32.gmra.mxu3 %vm19806_vm13, %v10778_v53  ;;  %vm19828_vm13 = vmmov %vm19756_vm0 }
 0x46d   : > { %v14486_v60 = vpop.f32.mrf.mxu1 }
 0x46e   : > { %v14484_v14 = vpop.f32.mrf.mxu3  ;;  %v14491_v31 = vpop.f32.mrf.mxu0 }
 0x46f   : > { %19807 = vst [vmem:[#allocation32_spill] sm:$0xff] %v14484_v14  ;;  %10792 = vmatmul.msk.f32.gmra.mxu2 %vm19808_vm1, %v10778_v53  ;;  %vm19829_vm1 = vmmov %vm19756_vm0 }
 0x470   : > { %10807 = vmatmul.msk.f32.vlgmr.msra.gmra.mxu1 %vm19809_vm10, %v10803_v3  ;;  %vm19831_vm10 = vmmov %vm19756_vm0 }
 0x471   : > { %10805 = vmatmul.msk.f32.vlgmr.msra.gmra.mxu0 %vm19810_vm12, %v10803_v3 }
 0x472   : > { %v14496_v2 = vpop.f32.mrf.mxu2 }
 0x473   : > { %19811 = vst [vmem:[#allocation33_spill] sm:$0xff] %v14496_v2  ;;  %10811 = vmatmul.msk.f32.vlgmr.msrb.gmra.mxu3 %vm19812_vm11, %v10803_v3 }
 0x475   : > { %v14501_v26 = vpop.f32.mrf.mxu1 }
 0x476   : > { %v14499_v18 = vpop.f32.mrf.mxu3  ;;  %v14506_v29 = vpop.f32.mrf.mxu0 }
 0x477   : > { %19813 = vst [vmem:[#allocation34_spill] sm:$0xff] %v14499_v18  ;;  %10809 = vmatmul.msk.f32.vlgmr.msrb.gmra.mxu2 %vm19814_vm3, %v10803_v3 }
 0x478   : > { %10808 = vmatmul.msk.f32.gmra.mxu1 %vm19815_vm9, %v10804_v25 }
 0x479   : > { %10806 = vmatmul.msk.f32.gmra.mxu0 %vm19816_vm15, %v10804_v25 }
 0x47a   : > { %v14514_v59 = vpop.f32.mrf.mxu2 }
 0x47b   : > { %10812 = vmatmul.msk.f32.gmra.mxu3 %vm19817_vm5, %v10804_v25 }
 0x47d   : > { %v14519_v38 = vpop.f32.mrf.mxu1 }
 0x47e   : > { %v14517_v58 = vpop.f32.mrf.mxu3  ;;  %19818 = vst [vmem:[#allocation35_spill] sm:$0xff] %v14519_v38  ;;  %v14521_v12 = vpop.f32.mrf.mxu0 }
 0x47f   : > { %19819 = vst [vmem:[#allocation36_spill] sm:$0xff] %v14521_v12  ;;  %10810 = vmatmul.msk.f32.gmra.mxu2 %vm19820_vm4, %v10804_v25 }
 0x480   : > { %10815 = vmatmul.msk.f32.vlgmr.msrb.gmra.mxu1 %vm19821_vm14, %v10803_v3 }
 0x481   : > { %10813 = vmatmul.msk.f32.vlgmr.msrb.gmra.mxu0 %vm19822_vm7, %v10803_v3 }
 0x482   : > { %v14526_v9 = vpop.f32.mrf.mxu2 }
 0x483   : > { %19823 = vst [vmem:[#allocation37_spill] sm:$0xff] %v14526_v9  ;;  %10819 = vmatmul.msk.f32.vlgmr.msra.gmra.mxu3 %vm19824_vm8, %v10803_v3 }
 0x485   : > { %v14531_v57 = vpop.f32.mrf.mxu1 }
 0x486   : > { %v14529_v53 = vpop.f32.mrf.mxu3  ;;  %19825 = vst [vmem:[#allocation38_spill] sm:$0xff] %v14531_v57  ;;  %v14533_v62 = vpop.f32.mrf.mxu0 }
 0x487   : > { %19826 = vst [vmem:[#allocation39_spill] sm:$0xff] %v14533_v62  ;;  %10817 = vmatmul.msk.f32.vlgmr.msra.gmra.mxu2 %vm19756_vm0, %v10803_v3 }
 0x488   : > { %10816 = vmatmul.msk.f32.gmra.mxu1 %vm19827_vm2, %v10804_v25 }
 0x489   : > { %10814 = vmatmul.msk.f32.gmra.mxu0 %vm19828_vm13, %v10804_v25 }
 0x48a   : > { %v14538_v13 = vpop.f32.mrf.mxu2 }
 0x48b   : > { %10820 = vmatmul.msk.f32.gmra.mxu3 %vm19829_vm1, %v10804_v25 }
 0x48d   : > { %v4682_v15 = vpop.f32.mrf.mxu1 }
 0x48e   : > { %v14541_v44 = vpop.f32.mrf.mxu3  ;;  %v4659_v27 = vpop.f32.mrf.mxu0 }
 0x48f   : > { %19830 = vst [vmem:[#allocation40_spill] sm:$0xff] %v14541_v44  ;;  %10818 = vmatmul.msk.f32.gmra.mxu2 %vm19831_vm10, %v10804_v25 }
 0x492   : > { %v14544_v23 = vpop.f32.mrf.mxu2 }
 0x493   : > { %19832 = vst [vmem:[#allocation41_spill] sm:$0xff] %v14544_v23 }
 0x495   : > { %v14548_v62 = vpop.f32.mrf.mxu1 }
 0x496   : > { %v14546_v57 = vpop.f32.mrf.mxu3  ;;  %v14550_v3 = vpop.f32.mrf.mxu0 }
 0x497   : > { %19833 = vst [vmem:[#allocation42_spill] sm:$0xff] %v14546_v57 }
 0x49a   : > { %v14552_v36 = vpop.f32.mrf.mxu2 }
 0x49d   : > { %v14556_v1 = vpop.f32.mrf.mxu1 }
 0x49e   : > { %v14554_v47 = vpop.f32.mrf.mxu3  ;;  %19834 = vst [vmem:[#allocation43_spill] sm:$0xff] %v14556_v1  ;;  %v14558_v16 = vpop.f32.mrf.mxu0 }
 0x49f   : > { %19835 = vst [vmem:[#allocation44_spill] sm:$0xff] %v14558_v16 }
 0x4a2   : > { %v14560_v38 = vpop.f32.mrf.mxu2 }
 0x4a3   : > { %19836 = vst [vmem:[#allocation45_spill] sm:$0xff] %v14560_v38 }
 0x4a5   : > { %v14564_v25 = vpop.f32.mrf.mxu1 }
 0x4a6   : > { %v14562_v2 = vpop.f32.mrf.mxu3  ;;  %19837 = vst [vmem:[#allocation46_spill] sm:$0xff] %v14564_v25  ;;  %v14566_v23 = vpop.f32.mrf.mxu0 }
 0x4a7   : > { %19838 = vst [vmem:[#allocation47_spill] sm:$0xff] %v14566_v23 }
 0x4aa   : > { %v14568_v46 = vpop.f32.mrf.mxu2 }
 0x4ab   : > { %19839 = vst [vmem:[#allocation48_spill] sm:$0xff] %v14568_v46 }
 0x4ad   : > { %v4963_v50 = vpop.f32.mrf.mxu1 }
 0x4ae   : > { %v14570_v17 = vpop.f32.mrf.mxu3  ;;  %v4940_v57 = vpop.f32.mrf.mxu0 }
 0x4af   : > { %19840 = vst [vmem:[#allocation49_spill] sm:$0xff] %v14570_v17 }
 0x4b2   : > { %v14572_v54 = vpop.f32.mrf.mxu2 }
 0x4b3   : > { %19841 = vst [vmem:[#allocation50_spill] sm:$0xff] %v14572_v54 }
 0x4b5   : > { %v4966_v1 = vpop.f32.mrf.mxu1 }
 0x4b6   : > { %v14574_v11 = vpop.f32.mrf.mxu3  ;;  %v4943_v9 = vpop.f32.mrf.mxu0 }
 0x4b7   : > { %19842 = vst [vmem:[#allocation51_spill] sm:$0xff] %v14574_v11 }
 0x4ba   : > { %v14576_v18 = vpop.f32.mrf.mxu2 }
 0x4bd   : > { %v14580_v0 = vpop.f32.mrf.mxu1 }
 0x4be   : > { %v14578_v38 = vpop.f32.mrf.mxu3  ;;  %19843 = vst [vmem:[#allocation52_spill] sm:$0xff] %v14580_v0  ;;  %v14582_v25 = vpop.f32.mrf.mxu0 }
 0x4bf   : > { %19844 = vst [vmem:[#allocation53_spill] sm:$0xff] %v14582_v25 }
 0x4c2   : > { %v14584_v23 = vpop.f32.mrf.mxu2 }
 0x4c3   : > { %19845 = vst [vmem:[#allocation54_spill] sm:$0xff] %v14584_v23 }
 0x4c5   : > { %v14588_v28 = vpop.f32.mrf.mxu1 }
 0x4c6   : > { %v14586_v19 = vpop.f32.mrf.mxu3  ;;  %19846 = vst [vmem:[#allocation55_spill] sm:$0xff] %v14588_v28  ;;  %v14590_v34 = vpop.f32.mrf.mxu0 }
 0x4c7   : > { %19847 = vst [vmem:[#allocation56_spill] sm:$0xff] %v14590_v34  ;;  %v3620_v34 = vadd.f32 %v14288_v20, %v14190_v8 }
 0x4ca   : > { %v14592_v54 = vpop.f32.mrf.mxu2 }
 0x4cb   : > { %19848 = vst [vmem:[#allocation57_spill] sm:$0xff] %v14592_v54 }
 0x4cd   : > { %v5212_v17 = vpop.f32.mrf.mxu1 }
 0x4ce   : > { %v14594_v11 = vpop.f32.mrf.mxu3  ;;  %v5189_v16 = vpop.f32.mrf.mxu0 }
 0x4cf   : > { %19849 = vst [vmem:[#allocation58_spill] sm:$0xff] %v14594_v11  ;;  %v3597_v11 = vadd.f32 %v14286_v24, %v14185_v41  ;;  %v3623_v24 = vadd.f32 %v14306_v32, %v14223_v6 }
 0x4d2   : > { %v14596_v44 = vpop.f32.mrf.mxu2 }
 0x4d3   : > { %19850 = vst [vmem:[#allocation59_spill] sm:$0xff] %v14596_v44  ;;  %v4046_v44 = vadd.f32 %v14365_v39, %v3620_v34  ;;  %v4054_v34 = vadd.f32 %v14382_v21, %v3623_v24 }
 0x4d5   : > { %v5215_v0 = vpop.f32.mrf.mxu1  ;;  %v4344_v7 = vadd.f32 %v14422_v63, %v4046_v44  ;;  %v4352_v44 = vadd.f32 %v14442_v4, %v4054_v34 }
 0x4d6   : > { %v14598_v12 = vpop.f32.mrf.mxu3  ;;  %v5192_v25 = vpop.f32.mrf.mxu0 }
 0x4d7   : > { %19851 = vst [vmem:[#allocation60_spill] sm:$0xff] %v14598_v12  ;;  %v4045_v12 = vadd.f32 %v14363_v33, %v3597_v11  ;;  %v3600_v11 = vadd.f32 %v14304_v61, %v14212_v55  ;;  %v4561_v61 = vadd.f32 %v14501_v26, %v4352_v44 }
 0x4d9   : > { %v4343_v22 = vadd.f32 %v14429_v48, %v4045_v12  ;;  %v4053_v48 = vadd.f32 %v14380_v42, %v3600_v11  ;;  %v4835_v42 = vadd.f32 %v14548_v62, %v4561_v61  ;;  %v19860_v61 = vld [vmem:[#allocation36_spill] sm:$0xff] }
 0x4da   : > { %v5235_v46 = vpop.f32.mrf.mxu2 }
 0x4db   : > { %v4552_v41 = vadd.f32 %v14491_v31, %v4343_v22  ;;  %v14633_v22 = vpop.permute.xlu2 %5625  ;;  %v4351_v6 = vadd.f32 %v14447_v45, %v4053_v48  ;;  %v4345_v31 = vadd.f32 %v14453_v37, %v14392_v51  ;;  %v5116_v26 = vadd.f32 %v4966_v1, %v4835_v42  ;;  %v14660_v51 = vpop.permute.xlu1 %5630 }
 0x4dd   : > { %v14602_v14 = vpop.f32.mrf.mxu1  ;;  %v4826_v33 = vadd.f32 %v4659_v27, %v4552_v41  ;;  %v4560_v21 = vadd.f32 %v14506_v29, %v4351_v6  ;;  %v4554_v62 = vadd.f32 %v14514_v59, %v4345_v31  ;;  %v5365_v12 = vadd.f32 %v5215_v0, %v5116_v26  ;;  %v19864_v26 = vld [vmem:[#allocation49_spill] sm:$0xff] }
 0x4de   : > { %v14600_v23 = vpop.f32.mrf.mxu3  ;;  %19853 = vst [vmem:[#allocation62_spill] sm:$0xff] %v14602_v14  ;;  %v14604_v28 = vpop.f32.mrf.mxu0  ;;  %v4354_v59 = vadd.f32 %v14456_v30, %v14394_v56  ;;  %v3689_v56 = vadd.f32 %v14335_v49, %v14236_v10  ;;  %v19856_v10 = vld [vmem:[#allocation28_spill] sm:$0xff] }
 0x4df   : > { %19852 = vst [vmem:[#allocation61_spill] sm:$0xff] %v14600_v23  ;;  %v4828_v24 = vadd.f32 %v14552_v36, %v4554_v62  ;;  %v4350_v36 = vadd.f32 %v14471_v52, %v14409_v5 }
 0x4e0   : > { %19854 = vst [vmem:[#allocation63_spill] sm:$0xff] %v14604_v28  ;;  %v4553_v28 = vadd.f32 %v14486_v60, %v4344_v7  ;;  %v5107_v7 = vadd.f32 %v4940_v57, %v4826_v33  ;;  %v4049_v52 = vadd.f32 %v14396_v43, %v3689_v56  ;;  %v19873_v56 = vld [vmem:[#allocation37_spill] sm:$0xff] }
 0x4e1   : > { %v5109_v37 = vadd.f32 %v14576_v18, %v4828_v24  ;;  %v4563_v18 = vadd.f32 %v14517_v58, %v4354_v59  ;;  %v4559_v48 = vadd.f32 %v14529_v53, %v4350_v36 }
 0x4e2   : > { %v14610_v54 = vpop.f32.mrf.mxu2  ;;  %v4827_v20 = vadd.f32 %v4682_v15, %v4553_v28  ;;  %v5356_v32 = vadd.f32 %v5189_v16, %v5107_v7  ;;  %v4347_v49 = vadd.f32 %v19856_v10, %v4049_v52  ;;  %v19875_v52 = vld [vmem:[#allocation14_spill] sm:$0xff] }
 0x4e3   : > { %v4837_v7 = vadd.f32 %v14554_v47, %v4563_v18  ;;  %v4833_v30 = vadd.f32 %v14562_v2, %v4559_v48  ;;  %v19872_v48 = vld [vmem:[#allocation34_spill] sm:$0xff] }
 0x4e4   : > { %v5108_v63 = vadd.f32 %v4963_v50, %v4827_v20 }
 0x4e5   : > { %v14618_v14 = vpop.f32.mrf.mxu1  ;;  %v5118_v44 = vadd.f32 %v14578_v38, %v4837_v7  ;;  %v5114_v47 = vadd.f32 %v14586_v19, %v4833_v30  ;;  %v19859_v38 = vld [vmem:[#allocation48_spill] sm:$0xff] }
 0x4e6   : > { %v14616_v23 = vpop.f32.mrf.mxu3  ;;  %v14621_v8 = vpop.f32.mrf.mxu0  ;;  %v5357_v60 = vadd.f32 %v5212_v17, %v5108_v63  ;;  %v4834_v17 = vadd.f32 %v14550_v3, %v4560_v21  ;;  %v19862_v21 = vld [vmem:[#allocation57_spill] sm:$0xff] }
 0x4e8   : > { %v5115_v29 = vadd.f32 %v4943_v9, %v4834_v17  ;;  %v19863_v17 = vld [vmem:[#allocation44_spill] sm:$0xff] }
 0x4ea   : > { %v14628_v39 = vpop.f32.mrf.mxu2  ;;  %v5364_v57 = vadd.f32 %v5192_v25, %v5115_v29  ;;  %v5358_v25 = vadd.f32 %v5235_v46, %v5109_v37  ;;  %v4349_v46 = vadd.f32 %v14481_v35, %v14420_v40  ;;  %v19857_v40 = vld [vmem:[#allocation26_spill] sm:$0xff]  ;;  %v19858_v35 = vld [vmem:[#allocation32_spill] sm:$0xff]  ;;  %v19868_v37 = vld [vmem:[#allocation25_spill] sm:$0xff] }
 0x4eb   : > { %v4358_v2 = vadd.f32 %v19858_v35, %v19857_v40 }
 0x4ec   : > { %v4558_v53 = vadd.f32 %v14538_v13, %v4349_v46 }
 0x4ed   : > { %v5461_v55 = vpop.f32.mrf.mxu1 }
 0x4ee   : > { %v14636_v15 = vpop.f32.mrf.mxu3  ;;  %v5438_v27 = vpop.f32.mrf.mxu0  ;;  %v5606_v28 = vadd.f32 %v5461_v55, %v5357_v60  ;;  %v19855_v60 = vld [vmem:[#allocation61_spill] sm:$0xff]  ;;  %v5363_v55 = vadd.f32 %v14616_v23, %v5114_v47 }
 0x4ef   : > { %v5605_v50 = vadd.f32 %v5438_v27, %v5356_v32  ;;  %v5367_v6 = vadd.f32 %v19855_v60, %v5118_v44  ;;  %v4832_v32 = vadd.f32 %v19859_v38, %v4558_v53  ;;  %v4556_v27 = vadd.f32 %v19860_v61, %v4347_v49  ;;  %v19874_v44 = vld [vmem:[#allocation21_spill] sm:$0xff]  ;;  %v19878_v38 = vld [vmem:[#allocation23_spill] sm:$0xff]  ;;  %v19880_v61 = vld [vmem:[#allocation54_spill] sm:$0xff] }
 0x4f0   : > { %v14642_v4 = vadd.f32 %v14633_v22, %v5606_v28  ;;  %v19861_v28 = vld [vmem:[#allocation40_spill] sm:$0xff]  ;;  %v3712_v53 = vadd.f32 %v19875_v52, %v19874_v44  ;;  %v19877_v49 = vld [vmem:[#allocation45_spill] sm:$0xff]  ;;  %v19895_v44 = vld [vmem:[#allocation62_spill] sm:$0xff] }
 0x4f1   : > { %v14646_v45 = vadd.f32 %v14633_v22, %v5605_v50  ;;  %v4567_v19 = vadd.f32 %v19861_v28, %v4358_v2  ;;  %v5113_v50 = vadd.f32 %v19862_v21, %v4832_v32  ;;  %v4830_v31 = vadd.f32 %v19863_v17, %v4556_v27  ;;  %v19882_v21 = vld [vmem:[#allocation19_spill] sm:$0xff]  ;;  %v19884_v17 = vld [vmem:[#allocation60_spill] sm:$0xff] }
 0x4f2   : > { %v14648_v16 = vpop.f32.mrf.mxu2  ;;  %5653 = vrot.lane.b32.xlu1 %v14642_v4, %s11446_s20  ;;  %v4050_v32 = vadd.f32 %v19878_v38, %v3712_v53  ;;  %v19899_v38 = vld [vmem:[#allocation47_spill] sm:$0xff] }
 0x4f3   : > { %5649 = vrot.lane.b32.xlu0 %v14646_v45, %s11446_s20  ;;  %v4841_v29 = vadd.f32 %v19864_v26, %v4567_v19  ;;  %v5362_v62 = vadd.f32 %v14628_v39, %v5113_v50  ;;  %v19883_v50 = vld [vmem:[#allocation33_spill] sm:$0xff] }
 0x4f5   : > { %v5464_v41 = vpop.f32.mrf.mxu1 }
 0x4f6   : > { %v14657_v3 = vpop.f32.mrf.mxu3  ;;  %v5441_v20 = vpop.f32.mrf.mxu0  ;;  %v5614_v11 = vadd.f32 %v5464_v41, %v5365_v12  ;;  %v19866_v41 = vld [vmem:[#allocation17_spill] sm:$0xff] }
 0x4f7   : > { %v5613_v1 = vadd.f32 %v5441_v20, %v5364_v57  ;;  %v19865_v57 = vld [vmem:[#allocation15_spill] sm:$0xff]  ;;  %v19867_v20 = vld [vmem:[#allocation53_spill] sm:$0xff] }
 0x4f8   : > { %v14664_v9 = vadd.f32 %v14660_v51, %v5614_v11  ;;  %v4346_v24 = vadd.f32 %v19866_v41, %v19865_v57  ;;  %v5111_v11 = vadd.f32 %v19867_v20, %v4830_v31  ;;  %v19886_v57 = vld [vmem:[#allocation41_spill] sm:$0xff] }
 0x4f9   : > { %v14667_v33 = vadd.f32 %v14660_v51, %v5613_v1 }
 0x4fa   : > { %v5484_v0 = vpop.f32.mrf.mxu2  ;;  %5655 = vrot.lane.b32.xlu1 %v14664_v9, %s11446_s20  ;;  %v4555_v7 = vadd.f32 %v19872_v48, %v4346_v24 }
 0x4fb   : > { %5651 = vrot.lane.b32.xlu0 %v14667_v33, %s11446_s20  ;;  %v5607_v34 = vadd.f32 %v5484_v0, %v5358_v25  ;;  %v19869_v0 = vld [vmem:[#allocation29_spill] sm:$0xff]  ;;  %v19870_v25 = vld [vmem:[#allocation58_spill] sm:$0xff] }
 0x4fc   : > { %v4353_v59 = vadd.f32 %v19869_v0, %v19868_v37  ;;  %v5122_v36 = vadd.f32 %v19870_v25, %v4841_v29  ;;  %v19885_v29 = vld [vmem:[#allocation35_spill] sm:$0xff] }
 0x4fd   : > { %v14687_v5 = vadd.f32 %v14633_v22, %v5607_v34  ;;  %v19871_v34 = vld [vmem:[#allocation63_spill] sm:$0xff] }
 0x4fe   : > { %v5510_v63 = vpop.f32.mrf.mxu3  ;;  %v5530_v18 = vpop.f32.mrf.mxu0  ;;  %v4562_v46 = vadd.f32 %v19873_v56, %v4353_v59  ;;  %v5371_v30 = vadd.f32 %v14636_v15, %v5122_v36  ;;  %v19890_v59 = vld [vmem:[#allocation50_spill] sm:$0xff]  ;;  %v19891_v36 = vld [vmem:[#allocation24_spill] sm:$0xff] }
 0x4ff   : > { %v5616_v43 = vadd.f32 %v5510_v63, %v5367_v6  ;;  %v5360_v63 = vadd.f32 %v19871_v34, %v5111_v11  ;;  %v19876_v6 = vld [vmem:[#allocation42_spill] sm:$0xff] }
 0x500   : > { %v4829_v10 = vadd.f32 %v19876_v6, %v4555_v7  ;;  %v4836_v40 = vadd.f32 %v19877_v49, %v4562_v46  ;;  %v19887_v11 = vld [vmem:[#allocation22_spill] sm:$0xff]  ;;  %v19894_v46 = vld [vmem:[#allocation31_spill] sm:$0xff] }
 0x501   : > { %v14707_v12 = vadd.f32 %v14660_v51, %v5616_v43  ;;  %v5609_v47 = vadd.f32 %v5530_v18, %v5360_v63  ;;  %v19893_v63 = vld [vmem:[#allocation59_spill] sm:$0xff]  ;;  %v19897_v49 = vld [vmem:[#allocation18_spill] sm:$0xff] }
 0x502   : > { %v5487_v58 = vpop.f32.mrf.mxu2  ;;  %5657 = vrot.lane.b32.xlu1 %v14687_v5, %s11446_s20  ;;  %v5117_v27 = vadd.f32 %v19880_v61, %v4836_v40  ;;  %v19898_v40 = vld [vmem:[#allocation13_spill] sm:$0xff]  ;;  %v19901_v61 = vld [vmem:[#allocation56_spill] sm:$0xff] }
 0x503   : > { %v14741_v19 = vadd.f32 %v14633_v22, %v5609_v47  ;;  %v19896_v47 = vld [vmem:[#allocation39_spill] sm:$0xff] }
 0x504   : > { %v5366_v26 = vadd.f32 %v14610_v54, %v5117_v27  ;;  %v19889_v54 = vld [vmem:[#allocation43_spill] sm:$0xff] }
 0x506   : > { %v5599_v13 = vpop.f32.mrf.mxu3  ;;  %v5615_v20 = vadd.f32 %v5487_v58, %v5366_v26 }
 0x507   : > { %v5612_v42 = vadd.f32 %v5599_v13, %v5363_v55  ;;  %v19879_v55 = vld [vmem:[#allocation51_spill] sm:$0xff] }
 0x508   : > { %v5110_v43 = vadd.f32 %v19879_v55, %v4829_v10  ;;  %v19881_v13 = vld [vmem:[#allocation27_spill] sm:$0xff]  ;;  %v14767_v56 = vadd.f32 %v14660_v51, %v5615_v20  ;;  %v19900_v55 = vld [vmem:[#allocation20_spill] sm:$0xff] }
 0x509   : > { %v14710_v23 = vadd.f32 %v14633_v22, %v5612_v42  ;;  %v4348_v28 = vadd.f32 %v19881_v13, %v4050_v32  ;;  %v4357_v42 = vadd.f32 %v19883_v50, %v19882_v21  ;;  %v19902_v21 = vld [vmem:[#allocation30_spill] sm:$0xff] }
 0x50a   : > { %v5576_v1 = vpop.f32.mrf.mxu2  ;;  %5663 = vrot.lane.b32.xlu1 %v14707_v12, %s11446_s20  ;;  %v5359_v31 = vadd.f32 %v19884_v17, %v5110_v43  ;;  %v19903_v17 = vld [vmem:[#allocation38_spill] sm:$0xff] }
 0x50b   : > { %5677 = vrot.lane.b32.xlu0 %v14710_v23, %s11446_s20  ;;  %v5611_v39 = vadd.f32 %v5576_v1, %v5362_v62  ;;  %v4557_v62 = vadd.f32 %v19885_v29, %v4348_v28  ;;  %v4566_v41 = vadd.f32 %v19886_v57, %v4357_v42  ;;  %v19888_v1 = vld [vmem:[#allocation16_spill] sm:$0xff]  ;;  %v5533_v28 = vpop.f32.mrf.mxu0  ;;  %v19904_v29 = vld [vmem:[#allocation46_spill] sm:$0xff]  ;;  %v19905_v57 = vld [vmem:[#allocation55_spill] sm:$0xff] }
 0x50c   : > { %v5608_v24 = vadd.f32 %v14657_v3, %v5359_v31  ;;  %v3692_v37 = vadd.f32 %v19888_v1, %v19887_v11  ;;  %v5553_v3 = vpop.f32.mrf.mxu1 }
 0x50d   : > { %v14731_v35 = vadd.f32 %v14633_v22, %v5611_v39  ;;  %v4831_v0 = vadd.f32 %v19889_v54, %v4557_v62  ;;  %v4840_v25 = vadd.f32 %v19890_v59, %v4566_v41  ;;  %v19892_v39 = vld [vmem:[#allocation52_spill] sm:$0xff]  ;;  %v19906_v54 = vld [vmem:[#allocation5_spill] sm:$0xff] }
 0x50e   : > { %v5602_v60 = vpop.f32.mrf.mxu3  ;;  %v4057_v18 = vadd.f32 %v19891_v36, %v3692_v37  ;;  %v14764_v7 = vadd.f32 %v14633_v22, %v5608_v24 }
 0x50f   : > { %v5620_v2 = vadd.f32 %v5602_v60, %v5371_v30  ;;  %v5112_v34 = vadd.f32 %v19892_v39, %v4831_v0  ;;  %v5121_v48 = vadd.f32 %v19893_v63, %v4840_v25 }
 0x510   : > { %v4355_v30 = vadd.f32 %v19894_v46, %v4057_v18 }
 0x511   : > { %v14737_v15 = vadd.f32 %v14660_v51, %v5620_v2  ;;  %v5361_v52 = vadd.f32 %v19895_v44, %v5112_v34  ;;  %v5370_v53 = vadd.f32 %v14648_v16, %v5121_v48  ;;  %v3715_v2 = vadd.f32 %v19898_v40, %v19897_v49 }
 0x512   : > { %5665 = vrot.lane.b32.xlu1 %v14741_v19, %s11446_s20  ;;  %v5579_v58 = vpop.f32.mrf.mxu2  ;;  %v4564_v60 = vadd.f32 %v19896_v47, %v4355_v30 }
 0x513   : > { %5679 = vrot.lane.b32.xlu2 %v14737_v15, %s11446_s20  ;;  %5673 = vrot.lane.b32.xlu0 %v14731_v35, %s11446_s20  ;;  %v5610_v6 = vadd.f32 %v5553_v3, %v5361_v52  ;;  %v5619_v10 = vadd.f32 %v5579_v58, %v5370_v53  ;;  %v4058_v43 = vadd.f32 %v19900_v55, %v3715_v2 }
 0x514   : > { %v4838_v32 = vadd.f32 %v19899_v38, %v4564_v60  ;;  %v5556_v24 = vpop.f32.mrf.mxu1 }
 0x515   : > { %v14783_v16 = vadd.f32 %v14633_v22, %v5610_v6  ;;  %v5647_v13 = vadd.f32 %v14660_v51, %v5619_v10  ;;  %v4356_v50 = vadd.f32 %v19902_v21, %v4058_v43 }
 0x516   : > { %v5119_v27 = vadd.f32 %v19901_v61, %v4838_v32 }
 0x517   : > { %v4565_v31 = vadd.f32 %v19903_v17, %v4356_v50 }
 0x518   : > { %v5368_v42 = vadd.f32 %v14621_v8, %v5119_v27 }
 0x519   : > { %v4839_v62 = vadd.f32 %v19904_v29, %v4565_v31 }
 0x51a   : > { %v5617_v26 = vadd.f32 %v5533_v28, %v5368_v42  ;;  %v19907_v42 = vld [vmem:[#allocation8_spill] sm:$0xff] }
 0x51b   : > { %5659 = vrot.lane.b32.xlu2 %v14767_v56, %s11446_s20  ;;  %5661 = vrot.lane.b32.xlu0 %v14764_v7, %s11446_s20  ;;  %v5120_v22 = vadd.f32 %v19905_v57, %v4839_v62  ;;  %v14909_v17 = vshra.s32 %v19907_v42, 7  ;;  %v5807_v31 = vshra.s32 %v19907_v42, 2  ;;  %v19909_v62 = vld [vmem:[#allocation12_spill] sm:$0xff] }
 0x51c   : > { %v5645_v41 = vadd.f32 %v14660_v51, %v5617_v26  ;;  %v14921_v57 = vshra.s32 %v19909_v62, 7 }
 0x51d   : > { %v5369_v20 = vadd.f32 %v14618_v14, %v5120_v22  ;;  %19908 = vst [vmem:[#allocation61_spill] sm:$0xff] %v14909_v17  ;;  %v14916_v26 = vand.u32 31, %v5807_v31  ;;  %v5806_v22 = vshra.s32 %v19909_v62, 2  ;;  %v19949_v62 = vmov 0.0  }
 0x51e   : > { %19910 = vst [vmem:[#allocation28_spill] sm:$0xff] %v14921_v57 }
 0x51f   : > { %v5618_v8 = vadd.f32 %v5556_v24, %v5369_v20  ;;  %vm18930_vm11 = vcmp.ge.s32.totalorder %v14916_v26, 0  ;;  %vm18928_vm3 = vcmp.lt.s32.totalorder %v14916_v26, 8  ;;  %v5801_v24 = vshra.s32 %v19906_v54, 2 }
 0x520   : > { %v19911_v20 = vmov 0 }
 0x521   : > { %v5646_v11 = vadd.f32 %v14660_v51, %v5618_v8  ;;  %v7702_v8 = vadd.s32 1, %v14921_v57 }
 0x523   : > { %5675 = vrot.lane.b32.xlu2 %v5647_v13, %s11446_s20  ;;  %5669 = vrot.lane.b32.xlu0 %v14783_v16, %s11446_s20  ;;  %vm7710_vm7 = vcmp.ge.s32.totalorder %v7702_v8, 0  ;;  %vm7718_vm8 = vcmp.lt.s32.totalorder %v7702_v8, 8 }
 0x524   : > { %vm14957_vm1 = vmand %vm7710_vm7, %vm7718_vm8 }
 0x52b   : > { %5667 = vrot.lane.b32.xlu2 %v5645_v41, %s11446_s20 }
 0x533   : > { %5671 = vrot.lane.b32.xlu2 %v5646_v11, %s11446_s20  ;;  %s11448_s20 = smov 124  }
 0x564   : > { %v5654_v1 = vpop.permute.xlu1 %5653 }
 0x565   : > { %v5650_v37 = vpop.permute.xlu0 %5649 }
 0x566   : > { %v5693_v0 = vsel %vm4584_vm6, %v5650_v37, %v5654_v1 }
 0x567   : > { %v14802_v59 = vmax.f32 %v14646_v45, %v5693_v0  ;;  %v19916_v0 = vmov 0 }
 0x569   : > { %5713 = vrot.lane.b32.xlu0 %v14802_v59, %s11442_s15 }
 0x56c   : > { %v5656_v14 = vpop.permute.xlu1 %5655 }
 0x56d   : > { %v5680_v25 = vpop.permute.xlu2 %5679  ;;  %v5652_v36 = vpop.permute.xlu0 %5651 }
 0x56e   : > { %v5696_v18 = vsel %vm4584_vm6, %v5680_v25, %v5652_v36  ;;  %v5694_v51 = vsel %vm4584_vm6, %v5652_v36, %v5656_v14 }
 0x56f   : > { %v14811_v39 = vmax.f32 %v14737_v15, %v5696_v18  ;;  %v14814_v34 = vmax.f32 %v14667_v33, %v5694_v51  ;;  %v19919_v18 = vmov 0 }
 0x570   : > { %v19920_v18 = vsel %vm14957_vm1, 4294967295, %v19919_v18 }
 0x571   : > { %5743 = vrot.lane.b32.xlu2 %v14811_v39, %s11442_s15  ;;  %5715 = vrot.lane.b32.xlu1 %v14814_v34, %s11442_s15  ;;  %19921 = vst [vmem:[#allocation32_spill] sm:$0xff] %v19920_v18 }
 0x574   : > { %v5658_v63 = vpop.permute.xlu1 %5657 }
 0x575   : > { %v5660_v45 = vpop.permute.xlu2 %5659  ;;  %v5691_v3 = vsel %vm4584_vm6, %v5654_v1, %v5658_v63  ;;  %v19913_v1 = vmov 0 }
 0x576   : > { %v5692_v48 = vsel %vm4584_vm6, %v5656_v14, %v5660_v45  ;;  %v14825_v15 = vmax.f32 %v14642_v4, %v5691_v3  ;;  %v19925_v3 = vld [vmem:[#allocation10_spill] sm:$0xff] }
 0x577   : > { %v14828_v33 = vmax.f32 %v14664_v9, %v5692_v48  ;;  %v19922_v48 = vmov 0 }
 0x578   : > { %5717 = vrot.lane.b32.xlu0 %v14825_v15, %s11442_s15 }
 0x579   : > { %5719 = vrot.lane.b32.xlu1 %v14828_v33, %s11442_s15 }
 0x57c   : > { %v5664_v52 = vpop.permute.xlu1 %5663 }
 0x57d   : > { %v5676_v58 = vpop.permute.xlu2 %5675  ;;  %v5678_v46 = vpop.permute.xlu0 %5677  ;;  %v5690_v9 = vsel %vm4584_vm6, %v5660_v45, %v5664_v52 }
 0x57e   : > { %v5682_v30 = vsel %vm4584_vm6, %v5676_v58, %v5680_v25  ;;  %v5695_v44 = vsel %vm4584_vm6, %v5678_v46, %v5650_v37  ;;  %v14846_v47 = vmax.f32 %v14767_v56, %v5690_v9  ;;  %v14945_v37 = vand.u32 31, %v5801_v24  ;;  %v19918_v25 = vld [vmem:[#allocation6_spill] sm:$0xff]  ;;  %v19950_v24 = vld [vmem:[#allocation9_spill] sm:$0xff] }
 0x57f   : > { %v14839_v4 = vmax.f32 %v14710_v23, %v5695_v44  ;;  %v14843_v53 = vmax.f32 %v5647_v13, %v5682_v30  ;;  %v14953_v14 = vshra.s32 %v19918_v25, 7  ;;  %v5802_v36 = vshra.s32 %v19918_v25, 2 }
 0x580   : > { %5723 = vrot.lane.b32.xlu0 %v14846_v47, %s11442_s15  ;;  %vm18933_vm7 = vcmp.lt.s32.totalorder %v14945_v37, 8  ;;  %v5808_v44 = vshra.s32 %v19925_v3, 2  ;;  %v19926_v9 = vmov 0  ;;  %v15065_v8 = vshra.s32 %v19950_v24, 7 }
 0x581   : > { %5741 = vrot.lane.b32.xlu2 %v14839_v4, %s11442_s15  ;;  %5739 = vrot.lane.b32.xlu1 %v14843_v53, %s11442_s15  ;;  %v5867_v51 = vadd.s32 4294967295, %v14953_v14 }
 0x584   : > { %v5666_v40 = vpop.permute.xlu1 %5665 }
 0x585   : > { %v5668_v60 = vpop.permute.xlu2 %5667  ;;  %v5674_v23 = vpop.permute.xlu0 %5673 }
 0x586   : > { %v5688_v6 = vsel %vm4584_vm6, %v5664_v52, %v5668_v60  ;;  %v5681_v10 = vsel %vm4584_vm6, %v5674_v23, %v5678_v46 }
 0x587   : > { %v14859_v56 = vmax.f32 %v14731_v35, %v5681_v10  ;;  %v14862_v49 = vmax.f32 %v14707_v12, %v5688_v6  ;;  %v5869_v10 = vadd.s32 4294967295, %v15065_v8 }
 0x589   : > { %5737 = vrot.lane.b32.xlu2 %v14859_v56, %s11442_s15  ;;  %5727 = vrot.lane.b32.xlu1 %v14862_v49, %s11442_s15 }
 0x58d   : > { %v5672_v2 = vpop.permute.xlu2 %5671  ;;  %v5662_v38 = vpop.permute.xlu0 %5661 }
 0x58e   : > { %v5686_v32 = vsel %vm4584_vm6, %v5668_v60, %v5672_v2  ;;  %v5687_v55 = vsel %vm4584_vm6, %v5662_v38, %v5666_v40  ;;  %v5689_v35 = vsel %vm4584_vm6, %v5658_v63, %v5662_v38  ;;  %v5684_v27 = vsel %vm4584_vm6, %v5672_v2, %v5676_v58  ;;  %v19928_v60 = vld [vmem:[#allocation7_spill] sm:$0xff] }
 0x58f   : > { %v14875_v12 = vmax.f32 %v14687_v5, %v5689_v35  ;;  %v14878_v43 = vmax.f32 %v14764_v7, %v5687_v55  ;;  %v14880_v61 = vmax.f32 %v5645_v41, %v5686_v32  ;;  %v14894_v28 = vmax.f32 %v5646_v11, %v5684_v27 }
 0x590   : > { %v14933_v11 = vand.u32 31, %v5806_v22  ;;  %v14969_v63 = vand.u32 31, %v5802_v36  ;;  %v14978_v58 = vshra.s32 %v19925_v3, 7  ;;  %v5803_v2 = vshra.s32 %v19928_v60, 2 }
 0x591   : > { %5721 = vrot.lane.b32.xlu2 %v14875_v12, %s11442_s15  ;;  %5725 = vrot.lane.b32.xlu0 %v14878_v43, %s11442_s15  ;;  %v15014_v38 = vand.u32 31, %v5808_v44  ;;  %v19934_v55 = vmov 0  ;;  %v19951_v36 = vmov 0  ;;  %v5804_v3 = vshra.s32 %v19950_v24, 2 }
 0x592   : > { %5731 = vrot.lane.b32.xlu1 %v14880_v61, %s11442_s15  ;;  %vm18929_vm0 = vcmp.ge.s32.totalorder %v14933_v11, 0  ;;  %vm18927_vm13 = vcmp.lt.s32.totalorder %v14933_v11, 8  ;;  %v7704_v52 = vadd.s32 1, %v14978_v58  ;;  %v15036_v31 = vand.u32 31, %v5803_v2 }
 0x593   : > { %vm8027_vm10 = vmand %vm14957_vm1, %vm18929_vm0  ;;  %vm18939_vm1 = vcmp.lt.s32.totalorder %v14969_v63, 8 }
 0x595   : > { %v5670_v13 = vpop.permute.xlu0 %5669 }
 0x596   : > { %v5683_v5 = vsel %vm4584_vm6, %v5670_v13, %v5674_v23  ;;  %v5685_v7 = vsel %vm4584_vm6, %v5666_v40, %v5670_v13  ;;  %v14994_v23 = vshra.s32 %v19928_v60, 7 }
 0x597   : > { %v14897_v21 = vmax.f32 %v14741_v19, %v5685_v7  ;;  %v14900_v50 = vmax.f32 %v14783_v16, %v5683_v5  ;;  %v14913_v19 = vshra.s32 %v19906_v54, 7  ;;  %v7703_v16 = vadd.s32 1, %v14909_v17 }
 0x598   : > { %v5868_v32 = vadd.s32 4294967295, %v14994_v23  ;;  %v19936_v5 = vmov 0 }
 0x599   : > { %5735 = vrot.lane.b32.xlu0 %v14894_v28, %s11442_s15  ;;  %5729 = vrot.lane.b32.xlu2 %v14897_v21, %s11442_s15  ;;  %vm7711_vm6 = vcmp.ge.s32.totalorder %v7703_v16, 0  ;;  %vm7719_vm12 = vcmp.lt.s32.totalorder %v7703_v16, 8  ;;  %v5866_v29 = vadd.s32 4294967295, %v14913_v19  ;;  %v7697_v46 = vadd.s32 1, %v14913_v19 }
 0x59a   : > { %5733 = vrot.lane.b32.xlu1 %v14900_v50, %s11442_s15  ;;  %vm14928_vm9 = vmand %vm7711_vm6, %vm7719_vm12  ;;  %vm18931_vm6 = vcmp.ge.s32.totalorder %v14945_v37, 0  ;;  %s11447_s15 = smov 4  }
 0x59b   : > { %v19912_v20 = vsel %vm14928_vm9, 4294967295, %v19911_v20  ;;  %vm8028_vm15 = vmand %vm14928_vm9, %vm18930_vm11  ;;  %vm5874_vm5 = vcmp.ge.s32.totalorder %v5866_v29, 0  ;;  %vm5882_vm4 = vcmp.lt.s32.totalorder %v5866_v29, 8  ;;  %vm7720_vm11 = vcmp.lt.s32.totalorder %v7704_v52, 8 }
 0x59c   : > { %vm14941_vm14 = vmand %vm8028_vm15, %vm18928_vm3  ;;  %vm5875_vm15 = vcmp.ge.s32.totalorder %v5867_v51, 0  ;;  %vm19929_vm3 = vcmp.lt.s32.totalorder %v19906_v54, 64  ;;  %v19946_v29 = vmov 0 }
 0x59d   : > { %v19914_v1 = vsel %vm14941_vm14, 4294967295, %v19913_v1  ;;  %vm14948_vm2 = vmand %vm5874_vm5, %vm5882_vm4  ;;  %vm5883_vm5 = vcmp.lt.s32.totalorder %v5867_v51, 8  ;;  %vm5876_vm14 = vcmp.ge.s32.totalorder %v5868_v32, 0 }
 0x59e   : > { %19915 = vst [vmem:[#allocation26_spill] sm:$0xff] %v19914_v1  ;;  %v19917_v0 = vsel %vm14948_vm2, 4294967295, %v19916_v0  ;;  %vm14973_vm12 = vmand %vm8027_vm10, %vm18927_vm13  ;;  %vm18932_vm10 = vcmp.ge.s32.totalorder %v14969_v63, 0  ;;  %vm7705_vm13 = vcmp.ge.s32.totalorder %v7697_v46, 0 }
 0x59f   : > { %v19923_v48 = vsel %vm14973_vm12, 4294967295, %v19922_v48  ;;  %vm5981_vm4 = vmand %vm14948_vm2, %vm18931_vm6  ;;  %vm5884_vm12 = vcmp.lt.s32.totalorder %v5868_v32, 8 }
 0x5a0   : > { %19924 = vst [vmem:[#allocation48_spill] sm:$0xff] %v19923_v48  ;;  %vm14988_vm8 = vmand %vm5875_vm15, %vm5883_vm5  ;;  %vm7712_vm15 = vcmp.ge.s32.totalorder %v7704_v52, 0  ;;  %vm7713_vm5 = vcmp.lt.s32.totalorder %v7697_v46, 8 }
 0x5a1   : > { %v19927_v9 = vsel %vm14988_vm8, 4294967295, %v19926_v9  ;;  %vm15001_vm0 = vmand %vm5981_vm4, %vm18933_vm7  ;;  %vm19939_vm7 = vcmp.ge.s32.totalorder %v14945_v37, 0 }
 0x5a2   : > { %vm15009_vm6 = vmand %vm14988_vm8, %vm18932_vm10  ;;  %vm19938_vm10 = vcmp.lt.s32.totalorder %v19906_v54, 64  ;;  %v10829_v22 = vsel %vm15001_vm0, 1.0, %v19949_v62 }
 0x5a3   : > { %vm15024_vm4 = vmand %vm7712_vm15, %vm7720_vm11  ;;  %vm19940_vm11 = vcmp.lt.s32.totalorder %v14945_v37, 8 }
 0x5a4   : > { %v19937_v5 = vsel %vm15024_vm4, 4294967295, %v19936_v5  ;;  %vm5998_vm0 = vmand %vm15009_vm6, %vm18939_vm1 }
 0x5a5   : > { %v10830_v32 = vsel %vm5998_vm0, 1.0, %v19949_v62 }
 0x5cb   : > { %v14925_v41 = vpop.permute.xlu2 %5743 }
 0x5db   : > { %v14966_v45 = vpop.permute.xlu2 %5741  ;;  %v5714_v30 = vpop.permute.xlu0 %5713 }
 0x5dc   : > { %v5759_v6 = vsel %vm19929_vm3, %v14966_v45, %v5714_v30  ;;  %vm15017_vm3 = vmand %vm7705_vm13, %vm7713_vm5  ;;  %vm18938_vm5 = vcmp.ge.s32.totalorder %v15014_v38, 0 }
 0x5dd   : > { %v19935_v55 = vsel %vm15017_vm3, 4294967295, %v19934_v55  ;;  %v5768_v35 = vmax.f32 %v14839_v4, %v5759_v6  ;;  %vm8022_vm13 = vmand %vm15017_vm3, %vm19939_vm7  ;;  %v19941_v4 = vmov 0 }
 0x5de   : > { %vm15041_vm15 = vmand %vm8022_vm13, %vm19940_vm11 }
 0x5df   : > { %v19942_v4 = vsel %vm15041_vm15, 4294967295, %v19941_v4  ;;  %vm8029_vm7 = vmand %vm15024_vm4, %vm18938_vm5  ;;  %vm19964_vm5 = vcmp.lt.s32.totalorder %v14969_v63, 8  ;;  %vm19968_vm15 = vcmp.lt.s32.totalorder %v5869_v10, 8 }
 0x5e0   : > { %19943 = vst [vmem:[#allocation36_spill] sm:$0xff] %v19942_v4  ;;  %vm15070_vm11 = vmand %vm5876_vm14, %vm5884_vm12  ;;  %vm18940_vm14 = vcmp.lt.s32.totalorder %v15036_v31, 8  ;;  %v19998_v4 = vmov 0 }
 0x5e1   : > { %v19952_v36 = vsel %vm15070_vm11, 4294967295, %v19951_v36 }
 0x5e3   : > { %v15022_v27 = vpop.permute.xlu2 %5737  ;;  %v5716_v13 = vpop.permute.xlu1 %5715 }
 0x5e4   : > { %v5760_v7 = vsel %vm19938_vm10, %v14925_v41, %v5716_v13  ;;  %vm18936_vm10 = vcmp.lt.s32.totalorder %v15014_v38, 8 }
 0x5e5   : > { %v5776_v42 = vmax.f32 %v14811_v39, %v5760_v7  ;;  %v15050_v39 = vmax.f32 %v5768_v35, 0.0  ;;  %vm15057_vm13 = vmand %vm8029_vm7, %vm18936_vm10  ;;  %vm18937_vm7 = vcmp.ge.s32.totalorder %v15036_v31, 0  ;;  %vm19953_vm10 = vcmp.lt.s32.totalorder %v19906_v54, 64 }
 0x5e6   : > { %v19947_v29 = vsel %vm15057_vm13, 4294967295, %v19946_v29  ;;  %vm19954_vm12 = vmmov %vm19953_vm10  ;;  %v15103_v7 = vand.u32 31, %v5804_v3  ;;  %v19961_v3 = vmov 0 }
 0x5e7   : > { %19944 = vst [vmem:[#allocation40_spill] sm:$0xff] %v15050_v39  ;;  %v15052_v16 = vmax.f32 %v5776_v42, 0.0  ;;  %v6021_v52 = vmul.f32 %v10829_v22, %v15050_v39  ;;  %vm5983_vm6 = vmand %vm15070_vm11, %vm18937_vm7  ;;  %v19956_v42 = vld [vmem:[#allocation11_spill] sm:$0xff] }
 0x5e8   : > { %19948 = vst [vmem:[#allocation44_spill] sm:$0xff] %v19947_v29 }
 0x5e9   : > { %19945 = vst [vmem:[#allocation57_spill] sm:$0xff] %v15052_v16  ;;  %5847 = vrot.lane.b32.xlu0 %v15052_v16, %s11447_s15  ;;  %v6029_v25 = vmul.f32 %v10829_v22, %v15052_v16  ;;  %v15106_v22 = vshra.s32 %v19956_v42, 7 }
 0x5ea   : > { %v5718_v51 = vpop.permute.xlu0 %5717 }
 0x5eb   : > { %v5757_v46 = vsel %vm19953_vm10, %v5714_v30, %v5718_v51  ;;  %6065 = vmatpush.msra.mxu0 %v6029_v25  ;;  %v5720_v44 = vpop.permute.xlu1 %5719  ;;  %v7698_v30 = vadd.s32 1, %v14953_v14  ;;  %v15093_v40 = vpop.permute.xlu2 %5721  ;;  %19957 = vst [vmem:[#allocation15_spill] sm:$0xff] %v15106_v22  ;;  %v5805_v25 = vshra.s32 %v19956_v42, 2  ;;  %v5872_v42 = vadd.s32 4294967295, %v14909_v17 }
 0x5ec   : > { %v5761_v60 = vmax.f32 %v14802_v59, %v5757_v46  ;;  %v5758_v6 = vsel %vm19954_vm12, %v5716_v13, %v5720_v44  ;;  %v5873_v59 = vadd.s32 4294967295, %v14978_v58  ;;  %v5755_v35 = vsel %vm19953_vm10, %v5718_v51, %v15093_v40  ;;  %vm15112_vm12 = vmand %vm5983_vm6, %vm18940_vm14 }
 0x5ed   : > { %v5769_v2 = vmax.f32 %v14814_v34, %v5758_v6  ;;  %6066 = vmatpush.msra.mxu0 %v6021_v52  ;;  %vm7706_vm0 = vcmp.ge.s32.totalorder %v7698_v30, 0  ;;  %vm7714_vm7 = vcmp.lt.s32.totalorder %v7698_v30, 8  ;;  %v5870_v51 = vadd.s32 4294967295, %v15106_v22 }
 0x5ee   : > { %v15101_v13 = vmax.f32 %v5761_v60, 0.0  ;;  %vm15118_vm1 = vmand %vm7706_vm0, %vm7714_vm7  ;;  %vm19963_vm6 = vcmp.ge.s32.totalorder %v14969_v63, 0  ;;  %v5762_v52 = vmax.f32 %v14825_v15, %v5755_v35  ;;  %vm5889_vm10 = vcmp.lt.s32.totalorder %v5873_v59, 8 }
 0x5ef   : > { %v15108_v24 = vmax.f32 %v5769_v2, 0.0  ;;  %v19962_v3 = vsel %vm15118_vm1, 4294967295, %v19961_v3  ;;  %vm8023_vm14 = vmand %vm15118_vm1, %vm19963_vm6  ;;  %v19965_v60 = vmov 0  ;;  %vm19969_vm6 = vcmp.ge.s32.totalorder %v5869_v10, 0 }
 0x5f0   : > { %19955 = vst [vmem:[#allocation49_spill] sm:$0xff] %v15101_v13  ;;  %vm15135_vm13 = vmand %vm8023_vm14, %vm19964_vm5  ;;  %v6022_v2 = vmul.f32 %v10830_v32, %v15101_v13  ;;  %v19970_v15 = vmov 0  ;;  %v15148_v35 = vand.u32 31, %v5805_v25  ;;  %vm19972_vm5 = vcmp.lt.s32.totalorder %v19906_v54, 64 }
 0x5f1   : > { %19958 = vst [vmem:[#allocation17_spill] sm:$0xff] %v15108_v24  ;;  %5845 = vrot.lane.b32.xlu0 %v15050_v39, %s11447_s15  ;;  %5819 = vrot.lane.b32.xlu1 %v15108_v24, %s11447_s15  ;;  %v6030_v46 = vmul.f32 %v10830_v32, %v15108_v24  ;;  %v19966_v60 = vsel %vm15135_vm13, 4294967295, %v19965_v60  ;;  %vm15144_vm11 = vmand %vm19969_vm6, %vm19968_vm15  ;;  %vm5886_vm0 = vcmp.lt.s32.totalorder %v5870_v51, 8  ;;  %v5871_v10 = vadd.s32 4294967295, %v14921_v57 }
 0x5f2   : > { %19967 = vst [vmem:[#allocation53_spill] sm:$0xff] %v19966_v60  ;;  %v5724_v6 = vpop.permute.xlu0 %5723  ;;  %v19971_v15 = vsel %vm15144_vm11, 4294967295, %v19970_v15  ;;  %vm19973_vm14 = vmmov %vm19972_vm5  ;;  %vm19974_vm15 = vcmp.ge.s32.totalorder %v5873_v59, 0  ;;  %v19975_v25 = vmov 0  ;;  %v19984_v34 = vmov 0 }
 0x5f3   : > { %6091 = vmatpush.msra.mxu1 %v6030_v46  ;;  %v15139_v30 = vpop.permute.xlu1 %5739  ;;  %v5756_v1 = vsel %vm19972_vm5, %v5720_v44, %v5724_v6  ;;  %vm15162_vm6 = vmand %vm19974_vm15, %vm5889_vm10  ;;  %v7699_v44 = vadd.s32 1, %v14994_v23  ;;  %vm19977_vm5 = vcmp.ge.s32.totalorder %v15103_v7, 0  ;;  %vm19983_vm10 = vcmp.ge.s32.totalorder %v5870_v51, 0 }
 0x5f4   : > { %v5746_v46 = vsel %vm19973_vm14, %v15139_v30, %v14925_v41  ;;  %v5770_v32 = vmax.f32 %v14828_v33, %v5756_v1  ;;  %v19976_v25 = vsel %vm15162_vm6, 4294967295, %v19975_v25  ;;  %v10831_v41 = vsel %vm15112_vm12, 1.0, %v19949_v62  ;;  %vm15174_vm14 = vmand %vm15144_vm11, %vm19977_vm5 }
 0x5f5   : > { %v5775_v29 = vmax.f32 %v14843_v53, %v5746_v46  ;;  %6092 = vmatpush.msra.mxu1 %v6022_v2  ;;  %v15179_v53 = vmax.f32 %v5762_v52, 0.0  ;;  %vm15186_vm15 = vmand %vm19983_vm10, %vm5886_vm0  ;;  %vm19986_vm5 = vcmp.lt.s32.totalorder %v19906_v54, 64  ;;  %vm19987_vm7 = vcmp.ge.s32.totalorder %v15014_v38, 0 }
 0x5f6   : > { %v15181_v1 = vmax.f32 %v5770_v32, 0.0  ;;  %v19985_v34 = vsel %vm15186_vm15, 4294967295, %v19984_v34  ;;  %v5745_v2 = vsel %vm19986_vm5, %v15022_v27, %v14966_v45  ;;  %vm15199_vm13 = vmand %vm15162_vm6, %vm19987_vm7  ;;  %vm19990_vm5 = vcmp.lt.s32.totalorder %v15103_v7, 8 }
 0x5f7   : > { %19980 = vst [vmem:[#allocation25_spill] sm:$0xff] %v15179_v53  ;;  %v15183_v59 = vmax.f32 %v5775_v29, 0.0  ;;  %vm15212_vm12 = vmand %vm15174_vm14, %vm19990_vm5  ;;  %vm5887_vm7 = vcmp.lt.s32.totalorder %v5871_v10, 8  ;;  %vm7715_vm0 = vcmp.lt.s32.totalorder %v7699_v44, 8  ;;  %vm19993_vm10 = vcmp.ge.s32.totalorder %v15148_v35, 0 }
 0x5f8   : > { %19981 = vst [vmem:[#allocation29_spill] sm:$0xff] %v15181_v1  ;;  %v6031_v29 = vmul.f32 %v10831_v41, %v15181_v1  ;;  %vm15220_vm6 = vmand %vm15186_vm15, %vm19993_vm10  ;;  %v7700_v46 = vadd.s32 1, %v15065_v8  ;;  %v7701_v32 = vadd.s32 1, %v15106_v22  ;;  %v5767_v33 = vmax.f32 %v14859_v56, %v5745_v2 }
 0x5f9   : > { %19982 = vst [vmem:[#allocation58_spill] sm:$0xff] %v15183_v59  ;;  %5817 = vrot.lane.b32.xlu1 %v15101_v13, %s11447_s15  ;;  %5843 = vrot.lane.b32.xlu2 %v15183_v59, %s11447_s15  ;;  %v6023_v60 = vmul.f32 %v10831_v41, %v15179_v53  ;;  %vm19996_vm14 = vcmp.lt.s32.totalorder %v5872_v42, 8  ;;  %vm19997_vm5 = vcmp.ge.s32.totalorder %v5872_v42, 0  ;;  %vm20001_vm10 = vcmp.lt.s32.totalorder %v19906_v54, 64 }
 0x5fa   : > { %6117 = vmatpush.msrb.mxu2 %v6031_v29  ;;  %vm15230_vm11 = vmand %vm19997_vm5, %vm19996_vm14  ;;  %vm20002_vm15 = vcmp.lt.s32.totalorder %v15014_v38, 8  ;;  %vm20005_vm1 = vcmp.ge.s32.totalorder %v5871_v10, 0  ;;  %v20006_v56 = vmov 0  ;;  %vm7708_vm14 = vcmp.ge.s32.totalorder %v7700_v46, 0 }
 0x5fb   : > { %v5728_v48 = vpop.permute.xlu1 %5727  ;;  %v19999_v4 = vsel %vm15230_vm11, 4294967295, %v19998_v4  ;;  %vm15240_vm8 = vmand %vm15199_vm13, %vm20002_vm15  ;;  %vm7716_vm5 = vcmp.lt.s32.totalorder %v7700_v46, 8  ;;  %vm20008_vm2 = vcmp.ge.s32.totalorder %v7699_v44, 0  ;;  %v20009_v42 = vmov 0 }
 0x5fc   : > { %20000 = vst [vmem:[#allocation63_spill] sm:$0xff] %v19999_v4  ;;  %v5754_v57 = vsel %vm20001_vm10, %v5724_v6, %v5728_v48  ;;  %vm15245_vm4 = vmand %vm20005_vm1, %vm5887_vm7  ;;  %6118 = vmatpush.msrb.mxu2 %v6023_v60  ;;  %v20011_v41 = vmov 0  ;;  %vm7709_vm13 = vcmp.ge.s32.totalorder %v7701_v32, 0  ;;  %vm7717_vm15 = vcmp.lt.s32.totalorder %v7701_v32, 8  ;;  %v5730_v60 = vpop.permute.xlu2 %5729 }
 0x5fd   : > { %v20007_v56 = vsel %vm15245_vm4, 4294967295, %v20006_v56  ;;  %vm15250_vm3 = vmand %vm20008_vm2, %vm7715_vm0  ;;  %v5771_v6 = vmax.f32 %v14846_v47, %v5754_v57  ;;  %v10832_v10 = vsel %vm15212_vm12, 1.0, %v19949_v62  ;;  %v20013_v2 = vmov 0 }
 0x5fe   : > { %v20010_v42 = vsel %vm15250_vm3, 4294967295, %v20009_v42  ;;  %vm15255_vm10 = vmand %vm7708_vm14, %vm7716_vm5  ;;  %v15266_v44 = vmax.f32 %v5767_v33, 0.0  ;;  %vm20017_vm2 = vcmp.ge.s32.totalorder %v15036_v31, 0  ;;  %vm20018_vm7 = vcmp.lt.s32.totalorder %v15036_v31, 8 }
 0x5ff   : > { %v20012_v41 = vsel %vm15255_vm10, 4294967295, %v20011_v41  ;;  %vm15262_vm1 = vmand %vm7709_vm13, %vm7717_vm15  ;;  %v15268_v52 = vmax.f32 %v5771_v6, 0.0  ;;  %v20019_v47 = vmov 0  ;;  %vm20022_vm12 = vcmp.ge.s32.totalorder %v15103_v7, 0 }
 0x600   : > { %v20014_v2 = vsel %vm15262_vm1, 4294967295, %v20013_v2  ;;  %20015 = vst [vmem:[#allocation34_spill] sm:$0xff] %v15266_v44  ;;  %vm8024_vm0 = vmand %vm15250_vm3, %vm20017_vm2  ;;  %vm5993_vm13 = vcmp.lt.s32.totalorder %v15148_v35, 8  ;;  %vm20023_vm15 = vcmp.lt.s32.totalorder %v15103_v7, 8  ;;  %v20024_v45 = vmov 0 }
 0x601   : > { %20016 = vst [vmem:[#allocation37_spill] sm:$0xff] %v15268_v52  ;;  %vm15276_vm14 = vmand %vm8024_vm0, %vm20018_vm7  ;;  %5821 = vrot.lane.b32.xlu1 %v15179_v53, %s11447_s15  ;;  %5841 = vrot.lane.b32.xlu2 %v15266_v44, %s11447_s15  ;;  %v6032_v57 = vmul.f32 %v10832_v10, %v15268_v52  ;;  %vm20027_vm0 = vcmp.lt.s32.totalorder %v19906_v54, 64  ;;  %v20031_v17 = vmov 0 }
 0x602   : > { %v20020_v47 = vsel %vm15276_vm14, 4294967295, %v20019_v47  ;;  %vm8025_vm5 = vmand %vm15255_vm10, %vm20022_vm12  ;;  %5827 = vrot.lane.b32.xlu0 %v15268_v52, %s11447_s15  ;;  %vm20029_vm12 = vcmp.ge.s32.totalorder %v15148_v35, 0 }
 0x603   : > { %20021 = vst [vmem:[#allocation21_spill] sm:$0xff] %v20020_v47  ;;  %v5726_v29 = vpop.permute.xlu0 %5725  ;;  %vm15294_vm2 = vmand %vm8025_vm5, %vm20023_vm15  ;;  %6143 = vmatpush.msrb.mxu3 %v6032_v57 }
 0x604   : > { %v20025_v45 = vsel %vm15294_vm2, 4294967295, %v20024_v45  ;;  %v5751_v46 = vsel %vm20027_vm0, %v5726_v29, %v5730_v60  ;;  %vm20028_vm7 = vmmov %vm20027_vm0  ;;  %v5732_v33 = vpop.permute.xlu1 %5731 }
 0x605   : > { %20026 = vst [vmem:[#allocation14_spill] sm:$0xff] %v20025_v45  ;;  %v5753_v32 = vsel %vm20028_vm7, %v15093_v40, %v5726_v29  ;;  %vm8026_vm14 = vmand %vm15262_vm1, %vm20029_vm12  ;;  %v5764_v47 = vmax.f32 %v14878_v43, %v5751_v46  ;;  %vm20035_vm7 = vcmp.ge.s32.totalorder %v14916_v26, 0  ;;  %v10839_v29 = vld [vmem:[%s18770_s5 + $0x28] sm:$0xff]  ;;  %v8608_v46 = vld [vmem:[%s18771_s6] sm:$0xff] }
 0x606   : > { %v5763_v6 = vmax.f32 %v14875_v12, %v5753_v32  ;;  %vm20030_vm5 = vmmov %vm20027_vm0 }
 0x607   : > { %v5752_v45 = vsel %vm20030_vm5, %v5728_v48, %v5732_v33  ;;  %vm15311_vm15 = vmand %vm8026_vm14, %vm5993_vm13  ;;  %v15324_v12 = vmax.f32 %v5764_v47, 0.0  ;;  %v10836_v48 = vsel %vm15240_vm8, 1.0, %v19949_v62  ;;  %vm20038_vm14 = vcmp.ge.s32.totalorder %v14933_v11, 0 }
 0x608   : > { %v20032_v17 = vsel %vm15311_vm15, 4294967295, %v20031_v17  ;;  %v5772_v40 = vmax.f32 %v14862_v49, %v5752_v45  ;;  %vm6001_vm0 = vmand %vm15220_vm6, %vm5993_vm13  ;;  %v15318_v57 = vmax.f32 %v5763_v6, 0.0  ;;  %v6036_v47 = vmul.f32 %v10836_v48, %v15183_v59 }
 0x609   : > { %20033 = vst [vmem:[#allocation42_spill] sm:$0xff] %v20032_v17  ;;  %vm5987_vm12 = vmand %vm15230_vm11, %vm20035_vm7  ;;  %v10833_v51 = vsel %vm6001_vm0, 1.0, %v19949_v62  ;;  %5829 = vrot.lane.b32.xlu1 %v15324_v12, %s11447_s15  ;;  %5823 = vrot.lane.b32.xlu2 %v15181_v1, %s11447_s15  ;;  %vm20039_vm8 = vcmp.lt.s32.totalorder %v14916_v26, 8  ;;  %vm20042_vm5 = vcmp.lt.s32.totalorder %v14933_v11, 8  ;;  %vm20045_vm7 = vcmp.lt.s32.totalorder %v19906_v54, 64 }
 0x60a   : > { %20034 = vst [vmem:[#allocation45_spill] sm:$0xff] %v15318_v57  ;;  %v15326_v43 = vmax.f32 %v5772_v40, 0.0  ;;  %vm5986_vm6 = vmand %vm15245_vm4, %vm20038_vm14  ;;  %v6024_v49 = vmul.f32 %v10832_v10, %v15318_v57  ;;  %v6028_v10 = vmul.f32 %v10836_v48, %v15266_v44  ;;  %vm20062_vm11 = vnez %v19917_v0 }
 0x60b   : > { %20036 = vst [vmem:[#allocation23_spill] sm:$0xff] %v15324_v12  ;;  %vm15345_vm13 = vmand %vm5987_vm12, %vm20039_vm8  ;;  %v5736_v45 = vpop.permute.xlu0 %5735  ;;  %vm18979_vm8 = vcmask 130048  }
 0x60c   : > { %20037 = vst [vmem:[#allocation51_spill] sm:$0xff] %v15326_v43  ;;  %v6033_v22 = vmul.f32 %v10833_v51, %v15326_v43  ;;  %6144 = vmatpush.msrb.mxu3 %v6024_v49  ;;  %5831 = vrot.lane.b32.xlu0 %v15326_v43, %s11447_s15  ;;  %vm15354_vm0 = vmand %vm5986_vm6, %vm20042_vm5  ;;  %v5748_v32 = vsel %vm20045_vm7, %v5736_v45, %v15139_v30  ;;  %v5734_v40 = vpop.permute.xlu1 %5733 }
 0x60d   : > { %vm20046_vm12 = vmmov %vm20045_vm7  ;;  %v6025_v49 = vmul.f32 %v10833_v51, %v15324_v12  ;;  %v5774_v17 = vmax.f32 %v14894_v28, %v5748_v32  ;;  %v10835_v51 = vsel %vm15345_vm13, 1.0, %v19949_v62  ;;  %v5898_v32 = vadd.s32 4294967295, %v14945_v37 }
 0x60e   : > { %v5750_v6 = vsel %vm20046_vm12, %v5732_v33, %v5736_v45  ;;  %6247 = vmatpush.msra.mxu3 %v6036_v47  ;;  %6169 = vmatpush.msrb.mxu0 %v6033_v22  ;;  %vm20047_vm14 = vmmov %vm20045_vm7  ;;  %v10838_v22 = vld [vmem:[%s18770_s5 + $0x20] sm:$0xff]  ;;  %v15447_v45 = vadd.s32 4294967295, %v14916_v26  ;;  %vm6842_vm12 = vcmp.ge.s32.totalorder %v14913_v19, 0 }
 0x60f   : > { %v5773_v48 = vmax.f32 %v14880_v61, %v5750_v6  ;;  %v5747_v4 = vsel %vm20047_vm14, %v5734_v40, %v15022_v27  ;;  %vm20048_vm6 = vmmov %vm20045_vm7  ;;  %v10834_v61 = vsel %vm15354_vm0, 1.0, %v19949_v62  ;;  %v15381_v27 = vmax.f32 %v5774_v17, 0.0 }
 0x610   : > { %v5749_v18 = vsel %vm20048_vm6, %v5730_v60, %v5734_v40  ;;  %v5766_v33 = vmax.f32 %v14900_v50, %v5747_v4  ;;  %6248 = vmatpush.msra.mxu3 %v6028_v10  ;;  %6170 = vmatpush.msrb.mxu0 %v6025_v49  ;;  %v10837_v4 = vld [vmem:[%s18770_s5 + $0x18] sm:$0xff]  ;;  %20053 = vst [vmem:[#allocation60_spill] sm:$0xff] %v15447_v45  ;;  %vm18978_vm13 = vcmp.ge.s32.totalorder %v15447_v45, 0  ;;  %vm18977_vm5 = vcmp.lt.s32.totalorder %v15447_v45, 8 }
 0x611   : > { %v5765_v30 = vmax.f32 %v14897_v21, %v5749_v18  ;;  %v15379_v28 = vmax.f32 %v5773_v48, 0.0  ;;  %20050 = vst [vmem:[#allocation27_spill] sm:$0xff] %v15381_v27  ;;  %v6035_v21 = vmul.f32 %v10835_v51, %v15381_v27  ;;  %6506 = vrot.lane.b32.xlu1 %v15052_v16, %s11448_s20  ;;  %5825 = vrot.lane.b32.xlu2 %v15318_v57, %s11447_s15  ;;  %vm7735_vm0 = vmand %vm14928_vm9, %vm18978_vm13  ;;  %v15484_v6 = vadd.s32 4294967295, %v15014_v38 }
 0x612   : > { %v15385_v60 = vmax.f32 %v5766_v33, 0.0  ;;  %10840 = vmatmul.msk.f32.vlgmr.msra.gmra.mxu0 %vm18979_vm8, %v10837_v4  ;;  %10843 = vmatmul.msk.f32.vlgmr.msra.gmra.mxu1 %vm18979_vm8, %v10837_v4  ;;  %vm15467_vm7 = vmand %vm7735_vm0, %vm18977_vm5  ;;  %v5899_v40 = vadd.s32 4294967295, %v14969_v63  ;;  %vm6850_vm14 = vcmp.lt.s32.totalorder %v14913_v19, 8  ;;  %vm5906_vm6 = vcmp.ge.s32.totalorder %v5898_v32, 0 }
 0x613   : > { %20049 = vst [vmem:[#allocation54_spill] sm:$0xff] %v15379_v28  ;;  %v15383_v47 = vmax.f32 %v5765_v30, 0.0  ;;  %v6034_v50 = vmul.f32 %v10834_v61, %v15379_v28  ;;  %6221 = vmatpush.msra.mxu2 %v6035_v21  ;;  %10849 = vmatmul.msk.f32.vlgmr.msrb.gmra.mxu3 %vm18979_vm8, %v10837_v4  ;;  %vm6843_vm0 = vcmp.ge.s32.totalorder %v14953_v14, 0  ;;  %vm6851_vm5 = vcmp.lt.s32.totalorder %v14953_v14, 8  ;;  %vm15500_vm2 = vmand %vm6842_vm12, %vm6850_vm14  ;;  %v8609_v30 = vld [vmem:[%s18771_s6 + $0x8] sm:$0xff] }
 0x614   : > { %20052 = vst [vmem:[#allocation33_spill] sm:$0xff] %v15385_v60  ;;  %v6027_v17 = vmul.f32 %v10835_v51, %v15385_v60  ;;  %10846 = vmatmul.msk.f32.vlgmr.msrb.gmra.mxu2 %vm18979_vm8, %v10837_v4  ;;  %vm20057_vm13 = vnez %v19935_v55  ;;  %vm18991_vm15 = vcmp.ge.s32.totalorder %v15484_v6, 0  ;;  %v20060_v48 = vmov 0  ;;  %vm15506_vm1 = vmand %vm20062_vm11, %vm5906_vm6 }
 0x615   : > { %20051 = vst [vmem:[#allocation19_spill] sm:$0xff] %v15383_v47  ;;  %v6026_v18 = vmul.f32 %v10834_v61, %v15383_v47  ;;  %6195 = vmatpush.msrb.mxu1 %v6034_v50  ;;  %5833 = vrot.lane.b32.xlu0 %v15383_v47, %s11447_s15  ;;  %v20061_v48 = vsel %vm15500_vm2, 4294967295, %v20060_v48  ;;  %vm18993_vm4 = vcmp.ge.s32.totalorder %v5899_v40, 0  ;;  %vm15514_vm10 = vmand %vm6843_vm0, %vm6851_vm5  ;;  %v20066_v14 = vmov 0 }
 0x616   : > { %6222 = vmatpush.msra.mxu2 %v6027_v17  ;;  %20056 = vst [vmem:[#allocation35_spill] sm:$0xff] %v15484_v6  ;;  %v20067_v14 = vsel %vm15514_vm10, 4294967295, %v20066_v14  ;;  %vm18992_vm12 = vcmp.lt.s32.totalorder %v5899_v40, 8  ;;  %vm6866_vm14 = vmand %vm15500_vm2, %vm5906_vm6  ;;  %vm5922_vm3 = vcmp.lt.s32.totalorder %v5898_v32, 8  ;;  %v5900_v33 = vadd.s32 4294967295, %v15036_v31 }
 0x617   : > { %6196 = vmatpush.msrb.mxu1 %v6026_v18  ;;  %vm6867_vm11 = vmand %vm15514_vm10, %vm18993_vm4  ;;  %v20072_v21 = vmov 0  ;;  %v20074_v50 = vmov 0  ;;  %v20076_v18 = vmov 0 }
 0x618   : > { %vm15528_vm5 = vmand %vm6866_vm14, %vm5922_vm3  ;;  %vm18997_vm4 = vcmp.ge.s32.totalorder %v5900_v33, 0 }
 0x619   : > { %5839 = vrot.lane.b32.xlu1 %v15381_v27, %s11447_s15  ;;  %5835 = vrot.lane.b32.xlu2 %v15379_v28, %s11447_s15  ;;  %vm15533_vm0 = vmand %vm6867_vm11, %vm18992_vm12  ;;  %vm6844_vm11 = vcmp.ge.s32.totalorder %v14994_v23, 0  ;;  %vm6852_vm12 = vcmp.lt.s32.totalorder %v14994_v23, 8  ;;  %v20083_v23 = vmov 0  ;;  %v15625_v16 = vsel %vm15528_vm5, 1.0, %v19949_v62 }
 0x61a   : > { %10841 = vmatmul.msk.f32.gmra.mxu0 %vm18979_vm8, %v10838_v22  ;;  %10844 = vmatmul.msk.f32.gmra.mxu1 %vm18979_vm8, %v10838_v22  ;;  %vm15553_vm10 = vmand %vm6844_vm11, %vm6852_vm12  ;;  %vm20080_vm12 = vcmp.ge.s32.totalorder %v5899_v40, 0  ;;  %vm20081_vm11 = vnez %v19962_v3 }
 0x61b   : > { %10850 = vmatmul.msk.f32.gmra.mxu3 %vm18979_vm8, %v10838_v22  ;;  %v20077_v18 = vsel %vm15553_vm10, 4294967295, %v20076_v18  ;;  %vm7730_vm2 = vmand %vm20081_vm11, %vm20080_vm12 }
 0x61c   : > { %10847 = vmatmul.msk.f32.gmra.mxu2 %vm18979_vm8, %v10838_v22 }
 0x61d   : > { %6478 = vrot.lane.b32.xlu0 %v15108_v24, %s11448_s20 }
 0x621   : > { %6504 = vrot.lane.b32.xlu1 %v15050_v39, %s11448_s20  ;;  %5837 = vrot.lane.b32.xlu2 %v15385_v60, %s11447_s15  ;;  %v20093_v39 = vmov 0 }
 0x622   : > { %10842 = vmatmul.msk.f32.gmra.mxu0 %vm18979_vm8, %v10839_v29  ;;  %10845 = vmatmul.msk.f32.gmra.mxu1 %vm18979_vm8, %v10839_v29 }
 0x623   : > { %10851 = vmatmul.msk.f32.gmra.mxu3 %vm18979_vm8, %v10839_v29 }
 0x624   : > { %10848 = vmatmul.msk.f32.gmra.mxu2 %vm18979_vm8, %v10839_v29 }
 0x625   : > { %6482 = vrot.lane.b32.xlu0 %v15181_v1, %s11448_s20 }
 0x629   : > { %6490 = vrot.lane.b32.xlu1 %v15326_v43, %s11448_s20  ;;  %6476 = vrot.lane.b32.xlu2 %v15101_v13, %s11448_s20 }
 0x62a   : > { %10852 = vmatmul.msk.f32.vlgmr.msrb.gmra.mxu0 %vm18979_vm8, %v10837_v4  ;;  %10855 = vmatmul.msk.f32.vlgmr.msrb.gmra.mxu1 %vm18979_vm8, %v10837_v4 }
 0x62b   : > { %10861 = vmatmul.msk.f32.vlgmr.msra.gmra.mxu3 %vm18979_vm8, %v10837_v4 }
 0x62c   : > { %10858 = vmatmul.msk.f32.vlgmr.msra.gmra.mxu2 %vm18979_vm8, %v10837_v4 }
 0x62d   : > { %6486 = vrot.lane.b32.xlu0 %v15268_v52, %s11448_s20 }
 0x631   : > { %6494 = vrot.lane.b32.xlu1 %v15379_v28, %s11448_s20  ;;  %6480 = vrot.lane.b32.xlu2 %v15179_v53, %s11448_s20 }
 0x632   : > { %10853 = vmatmul.msk.f32.gmra.mxu0 %vm18979_vm8, %v10838_v22  ;;  %10856 = vmatmul.msk.f32.gmra.mxu1 %vm18979_vm8, %v10838_v22 }
 0x633   : > { %10862 = vmatmul.msk.f32.gmra.mxu3 %vm18979_vm8, %v10838_v22 }
 0x634   : > { %10859 = vmatmul.msk.f32.gmra.mxu2 %vm18979_vm8, %v10838_v22 }
 0x635   : > { %6488 = vrot.lane.b32.xlu0 %v15324_v12, %s11448_s20 }
 0x639   : > { %6496 = vrot.lane.b32.xlu1 %v15385_v60, %s11448_s20  ;;  %6484 = vrot.lane.b32.xlu2 %v15318_v57, %s11448_s20 }
 0x63a   : > { %10854 = vmatmul.msk.f32.gmra.mxu0 %vm18979_vm8, %v10839_v29  ;;  %10857 = vmatmul.msk.f32.gmra.mxu1 %vm18979_vm8, %v10839_v29 }
 0x63b   : > { %10863 = vmatmul.msk.f32.gmra.mxu3 %vm18979_vm8, %v10839_v29 }
 0x63c   : > { %10860 = vmatmul.msk.f32.gmra.mxu2 %vm18979_vm8, %v10839_v29  ;;  %vm15493_vm8 = vmand %vm20057_vm13, %vm5906_vm6  ;;  %vm20065_vm13 = vnez %v19937_v5  ;;  %vm18995_vm6 = vcmp.lt.s32.totalorder %v15484_v6, 8  ;;  %v11026_v29 = vsel %vm15467_vm7, 1.0, %v19949_v62  ;;  %vm6845_vm7 = vcmp.ge.s32.totalorder %v15065_v8, 0 }
 0x63d   : > { %6498 = vrot.lane.b32.xlu0 %v15381_v27, %s11448_s20  ;;  %vm7736_vm9 = vmand %vm20065_vm13, %vm18991_vm15 }
 0x63e   : > { %vm15541_vm15 = vmand %vm15493_vm8, %vm5922_vm3 }
 0x63f   : > { %v20073_v21 = vsel %vm15541_vm15, 4294967295, %v20072_v21  ;;  %vm15547_vm14 = vmand %vm7736_vm9, %vm18995_vm6  ;;  %vm18998_vm6 = vcmp.lt.s32.totalorder %v5900_v33, 8 }
 0x640   : > { %v20075_v50 = vsel %vm15547_vm14, 4294967295, %v20074_v50  ;;  %vm6868_vm8 = vmand %vm15553_vm10, %vm18997_vm4  ;;  %vm20082_vm14 = vcmp.lt.s32.totalorder %v5899_v40, 8  ;;  %vm18999_vm4 = vcmp.lt.s32.totalorder %v19906_v54, 4 }
 0x641   : > { %8613 = vperm.xlu1 %11301, %v8608_v46   ;;  %6492 = vrot.lane.b32.xlu2 %v15383_v47, %s11448_s20  ;;  %vm5930_vm9 = vmand %vm15506_vm1, %vm5922_vm3  ;;  %vm20086_vm1 = vnez %v19927_v9  ;;  %vm20103_vm5 = vnez %v20075_v50  ;;  %v20109_v50 = vmov 0 }
 0x642   : > { %vm15566_vm13 = vmand %vm6868_vm8, %vm18998_vm6  ;;  %v10821_v22 = vsel %vm5930_vm9, 1.0, %v19949_v62  ;;  %vm20091_vm6 = vcmp.lt.s32.totalorder %v5899_v40, 8  ;;  %v11027_v61 = vsel %vm20103_vm5, 1.0, %v19949_v62  ;;  %vm6857_vm5 = vcmp.lt.s32.totalorder %v14978_v58, 8 }
 0x643   : > { %vm15574_vm15 = vmand %vm7730_vm2, %vm20082_vm14  ;;  %vm20088_vm2 = vcmp.ge.s32.totalorder %v5900_v33, 0  ;;  %vm20089_vm14 = vnez %v19952_v36 }
 0x644   : > { %v20084_v23 = vsel %vm15574_vm15, 4294967295, %v20083_v23  ;;  %vm20085_vm3 = vmmov %vm20080_vm12  ;;  %vm6853_vm12 = vcmp.lt.s32.totalorder %v15065_v8, 8 }
 0x645   : > { %6500 = vrot.lane.b32.xlu0 %v15266_v44, %s11448_s20  ;;  %vm5915_vm8 = vmand %vm20086_vm1, %vm20085_vm3  ;;  %vm20096_vm1 = vnez %v20010_v42 }
 0x646   : > { %vm5916_vm9 = vmand %vm20089_vm14, %vm20088_vm2  ;;  %vm20095_vm14 = vcmp.ge.s32.totalorder %v5900_v33, 0 }
 0x647   : > { %vm5931_vm3 = vmand %vm5915_vm8, %vm20091_vm6  ;;  %vm20100_vm6 = vcmp.lt.s32.totalorder %v19906_v54, 4  ;;  %vm20104_vm8 = vnez %v20012_v41 }
 0x648   : > { %vm15605_vm10 = vmand %vm6845_vm7, %vm6853_vm12  ;;  %v10822_v44 = vsel %vm5931_vm3, 1.0, %v19949_v62  ;;  %vm20114_vm3 = vcmp.lt.s32.totalorder %v5900_v33, 8 }
 0x649   : > { %6502 = vrot.lane.b32.xlu2 %v15183_v59, %s11448_s20  ;;  %v20094_v39 = vsel %vm15605_vm10, 4294967295, %v20093_v39  ;;  %vm15612_vm15 = vmand %vm20096_vm1, %vm20095_vm14  ;;  %v15630_v59 = vsel %vm15533_vm0, 1.0, %v19949_v62 }
 0x64a   : > { %20099 = vst [vmem:[#allocation16_spill] sm:$0xff] %v15630_v59  ;;  %vm20108_vm7 = vmmov %vm20100_vm6 }
 0x651   : > { %8618 = vperm.xlu2 %11302, %v8609_v30   ;;  %v5901_v30 = vadd.s32 4294967295, %v15103_v7 }
 0x653   : > { %v15557_v17 = vpop.permute.xlu2 %5843  ;;  %vm5909_vm2 = vcmp.ge.s32.totalorder %v5901_v30, 0  ;;  %vm5925_vm0 = vcmp.lt.s32.totalorder %v5901_v30, 8 }
 0x654   : > { %vm15651_vm14 = vmand %vm20104_vm8, %vm5909_vm2  ;;  %vm20127_vm8 = vcmask 130048  }
 0x65b   : > { %v5848_v46 = vpop.permute.xlu0 %5847  ;;  %v15583_v32 = vpop.permute.xlu2 %5841 }
 0x65c   : > { %v15591_v49 = vsel %vm18999_vm4, %v15557_v17, %v5848_v46  ;;  %vm20092_vm4 = vcmp.lt.s32.totalorder %v5900_v33, 8 }
 0x65d   : > { %20087 = vst [vmem:[#allocation41_spill] sm:$0xff] %v15591_v49  ;;  %v5962_v19 = vmul.f32 %v10821_v22, %v15591_v49  ;;  %v15598_v10 = vmul.f32 %v11026_v29, %v15591_v49  ;;  %vm5932_vm11 = vmand %vm5916_vm9, %vm20092_vm4 }
 0x65e   : > { %vm6869_vm4 = vmand %vm15605_vm10, %vm5909_vm2 }
 0x65f   : > { %20090 = vst [vmem:[#allocation22_spill] sm:$0xff] %v15598_v10  ;;  %6282 = vmatpush.msra.mxu0 %v5962_v19  ;;  %v15620_v19 = vsel %vm5932_vm11, 1.0, %v19949_v62  ;;  %vm20102_vm11 = vnez %v20073_v21  ;;  %vm20107_vm9 = vmmov %vm20100_vm6  ;;  %v15734_v10 = vadd.s32 4294967295, %v14933_v11 }
 0x660   : > { %v15643_v51 = vsel %vm20102_vm11, 1.0, %v19949_v62  ;;  %vm15662_vm12 = vmand %vm6869_vm4, %vm5925_vm0  ;;  %vm20120_vm11 = vcmask 130048  }
 0x661   : > { %v20110_v50 = vsel %vm15662_vm12, 4294967295, %v20109_v50  ;;  %vm15686_vm4 = vmand %vm15612_vm15, %vm20114_vm3  ;;  %vm6849_vm15 = vcmp.ge.s32.totalorder %v14978_v58, 0 }
 0x662   : > { %20111 = vst [vmem:[#allocation50_spill] sm:$0xff] %v20110_v50 }
 0x663   : > { %v5846_v8 = vpop.permute.xlu0 %5845  ;;  %v15616_v40 = vpop.permute.xlu2 %5823 }
 0x664   : > { %v15638_v60 = vsel %vm20100_vm6, %v15583_v32, %v5846_v8  ;;  %v5820_v27 = vpop.permute.xlu1 %5819  ;;  %vm15693_vm6 = vmand %vm15651_vm14, %vm5925_vm0  ;;  %vm20121_vm14 = vnez %v19971_v15 }
 0x665   : > { %20101 = vst [vmem:[#allocation43_spill] sm:$0xff] %v15638_v60  ;;  %v5863_v28 = vsel %vm20107_vm9, %v5820_v27, %v15616_v40  ;;  %v5865_v21 = vsel %vm20108_vm7, %v5848_v46, %v5820_v27  ;;  %v5954_v12 = vmul.f32 %v10821_v22, %v15638_v60  ;;  %v15676_v27 = vld [vmem:[%s18770_s5] sm:$0xff]  ;;  %vm5917_vm9 = vmand %vm20121_vm14, %vm5909_vm2  ;;  %vm20218_vm14 = vnez %v19935_v55 }
 0x666   : > { %v5963_v57 = vmul.f32 %v10822_v44, %v5865_v21  ;;  %v5964_v43 = vmul.f32 %v15620_v19, %v5863_v28  ;;  %v15668_v52 = vmul.f32 %v15625_v16, %v5865_v21  ;;  %v15671_v53 = vmul.f32 %v15630_v59, %v5863_v28  ;;  %vm20128_vm2 = vmmov %vm20127_vm8 }
 0x667   : > { %v15679_v22 = vmul.f32 %v15643_v51, %v5863_v28  ;;  %v15681_v46 = vmul.f32 %v11027_v61, %v5865_v21  ;;  %6283 = vmatpush.msra.mxu0 %v5954_v12  ;;  %v15698_v28 = vmul.f32 %v11026_v29, %v15638_v60  ;;  %v15720_v29 = vadd.s32 4294967295, %v15148_v35 }
 0x668   : > { %6308 = vmatpush.msra.mxu1 %v5963_v57  ;;  %6334 = vmatpush.msrb.mxu2 %v5964_v43  ;;  %v15707_v57 = vadd.s32 1, %v14916_v26  ;;  %v15710_v43 = vadd.s32 1, %v15014_v38  ;;  %v20122_v26 = vmov 0  ;;  %v15731_v38 = vld [vmem:[%s18770_s5 + $0x8] sm:$0xff] }
 0x669   : > { %20112 = vst [vmem:[#allocation24_spill] sm:$0xff] %v15679_v22  ;;  %10864 = vmatmul.msk.f32.vlgmr.msra.gmra.mxu0 %vm20120_vm11, %v15676_v27  ;;  %vm15723_vm11 = vmand %vm6849_vm15, %vm6857_vm5  ;;  %vm19036_vm15 = vcmp.ge.s32.totalorder %v15734_v10, 0 }
 0x66a   : > { %20113 = vst [vmem:[#allocation52_spill] sm:$0xff] %v15681_v46  ;;  %v20123_v26 = vsel %vm15723_vm11, 4294967295, %v20122_v26  ;;  %vm20125_vm5 = vcmp.ge.s32.totalorder %v15710_v43, 0 }
 0x66b   : > { %20119 = vst [vmem:[#allocation59_spill] sm:$0xff] %v15698_v28  ;;  %v15704_v12 = vpop.permute.xlu2 %5825  ;;  %vm7411_vm12 = vmand %vm15723_vm11, %vm20125_vm5  ;;  %vm20132_vm5 = vcmp.ge.s32.totalorder %v15707_v57, 0  ;;  %vm20133_vm11 = vnez %v19912_v20 }
 0x66c   : > { %v5818_v47 = vpop.permute.xlu1 %5817  ;;  %20124 = vst [vmem:[#allocation31_spill] sm:$0xff] %v20123_v26  ;;  %vm8321_vm1 = vmand %vm20133_vm11, %vm20132_vm5 }
 0x66d   : > { %v15717_v33 = vsel %vm20108_vm7, %v5846_v8, %v5818_v47  ;;  %vm5933_vm7 = vmand %vm5917_vm9, %vm5925_vm0  ;;  %vm19032_vm0 = vcmp.ge.s32.totalorder %v15720_v29, 0  ;;  %vm20129_vm9 = vcmp.lt.s32.totalorder %v15710_v43, 8 }
 0x66e   : > { %v5955_v58 = vmul.f32 %v10822_v44, %v15717_v33  ;;  %v15745_v44 = vmul.f32 %v11027_v61, %v15717_v33  ;;  %vm15754_vm3 = vmand %vm7411_vm12, %vm20129_vm9  ;;  %v10824_v8 = vsel %vm5933_vm7, 1.0, %v19949_v62  ;;  %v10925_v61 = vsel %vm15566_vm13, 1.0, %v19949_v62 }
 0x66f   : > { %vm20135_vm12 = vcmp.lt.s32.totalorder %v15707_v57, 8  ;;  %vm20138_vm13 = vnez %v19985_v34  ;;  %vm19037_vm7 = vcmp.lt.s32.totalorder %v15720_v29, 8  ;;  %vm20139_vm9 = vcmp.lt.s32.totalorder %v19906_v54, 4 }
 0x670   : > { %6309 = vmatpush.msra.mxu1 %v5955_v58  ;;  %20126 = vst [vmem:[#allocation62_spill] sm:$0xff] %v15745_v44  ;;  %v15773_v44 = vadd.s32 1, %v14945_v37  ;;  %vm5918_vm11 = vmand %vm20138_vm13, %vm19032_vm0  ;;  %vm19038_vm0 = vcmp.lt.s32.totalorder %v15734_v10, 8 }
 0x671   : > { %10865 = vmatmul.msk.f32.gmra.mxu0 %vm20127_vm8, %v15731_v38  ;;  %10867 = vmatmul.msk.f32.vlgmr.msra.gmra.mxu1 %vm20128_vm2, %v15676_v27  ;;  %vm20134_vm8 = vnez %v20084_v23  ;;  %vm15777_vm2 = vmand %vm8321_vm1, %vm20135_vm12 }
 0x672   : > { %v11021_v21 = vsel %vm20134_vm8, 1.0, %v19949_v62  ;;  %vm20140_vm5 = vmmov %vm20139_vm9  ;;  %vm20142_vm8 = vnez %v20007_v56 }
 0x673   : > { %v15770_v58 = vpop.permute.xlu2 %5835  ;;  %vm20141_vm1 = vmmov %vm20140_vm5 }
 0x674   : > { %v5828_v28 = vpop.permute.xlu0 %5827  ;;  %v5822_v46 = vpop.permute.xlu1 %5821  ;;  %vm5919_vm12 = vmand %vm20142_vm8, %vm19036_vm15  ;;  %vm20149_vm15 = vcmask 130048  }
 0x675   : > { %v5861_v37 = vsel %vm20139_vm9, %v15616_v40, %v5828_v28  ;;  %v5860_v4 = vsel %vm20140_vm5, %v5822_v46, %v15704_v12  ;;  %v15794_v23 = vsel %vm20141_vm1, %v5818_v47, %v5822_v46  ;;  %v15810_v46 = vld [vmem:[%s18770_s5 + $0x10] sm:$0xff]  ;;  %vm15814_vm9 = vmand %vm5918_vm11, %vm19037_vm7  ;;  %vm20151_vm7 = vcmp.ge.s32.totalorder %v15484_v6, 0  ;;  %v20164_v47 = vld [vmem:[#allocation32_spill] sm:$0xff] }
 0x676   : > { %v5965_v22 = vmul.f32 %v10824_v8, %v5861_v37  ;;  %v15801_v24 = vmul.f32 %v10925_v61, %v5861_v37  ;;  %v15803_v60 = vmul.f32 %v11021_v21, %v5861_v37  ;;  %v5956_v40 = vmul.f32 %v15620_v19, %v15794_v23  ;;  %vm5935_vm1 = vmand %vm5919_vm12, %vm19038_vm0 }
 0x677   : > { %v5957_v37 = vmul.f32 %v10824_v8, %v5860_v4  ;;  %v15821_v19 = vmul.f32 %v10925_v61, %v5860_v4  ;;  %vm20150_vm11 = vmmov %vm20149_vm15  ;;  %vm20152_vm5 = vnez %v19976_v25  ;;  %v15839_v8 = vmul.f32 %v11021_v21, %v5860_v4 }
 0x678   : > { %20143 = vst [vmem:[#allocation39_spill] sm:$0xff] %v15801_v24  ;;  %6335 = vmatpush.msrb.mxu2 %v5956_v40  ;;  %6360 = vmatpush.msrb.mxu3 %v5965_v22  ;;  %vm15835_vm8 = vmand %vm20152_vm5, %vm20151_vm7  ;;  %vm20157_vm0 = vcmp.ge.s32.totalorder %v15773_v44, 0  ;;  %v10825_v61 = vsel %vm15814_vm9, 1.0, %v19949_v62  ;;  %v10826_v21 = vsel %vm5935_vm1, 1.0, %v19949_v62  ;;  %vm20161_vm7 = vcmp.ge.s32.totalorder %v15720_v29, 0 }
 0x679   : > { %20144 = vst [vmem:[#allocation18_spill] sm:$0xff] %v15803_v60  ;;  %v15825_v60 = vmul.f32 %v15643_v51, %v15794_v23  ;;  %10866 = vmatmul.msk.f32.gmra.mxu0 %vm20149_vm15, %v15810_v46  ;;  %10868 = vmatmul.msk.f32.gmra.mxu1 %vm20150_vm11, %v15731_v38  ;;  %vm20156_vm12 = vmmov %vm20150_vm11  ;;  %vm20158_vm15 = vnez %v19917_v0  ;;  %v11022_v0 = vsel %vm15686_vm4, 1.0, %v19949_v62  ;;  %v11023_v40 = vsel %vm15693_vm6, 1.0, %v19949_v62 }
 0x67a   : > { %20147 = vst [vmem:[#allocation13_spill] sm:$0xff] %v15821_v19  ;;  %10870 = vmatmul.msk.f32.vlgmr.msrb.gmra.mxu2 %vm20156_vm12, %v15676_v27  ;;  %6361 = vmatpush.msrb.mxu3 %v5957_v37  ;;  %vm15847_vm10 = vmand %vm20158_vm15, %vm20157_vm0  ;;  %vm20162_vm12 = vnez %v20014_v2  ;;  %vm20163_vm0 = vcmp.ge.s32.totalorder %v15734_v10, 0  ;;  %vm20165_vm9 = vnez %v20164_v47  ;;  %vm20166_vm15 = vcmp.lt.s32.totalorder %v19906_v54, 4 }
 0x67b   : > { %20148 = vst [vmem:[#allocation47_spill] sm:$0xff] %v15825_v60  ;;  %10873 = vmatmul.msk.f32.vlgmr.msrb.gmra.mxu3 %vm20150_vm11, %v15676_v27  ;;  %v5838_v4 = vpop.permute.xlu2 %5837  ;;  %vm7733_vm13 = vmand %vm20162_vm12, %vm20161_vm7  ;;  %vm19043_vm6 = vcmp.lt.s32.totalorder %v15773_v44, 8  ;;  %vm20171_vm7 = vcmp.lt.s32.totalorder %v15720_v29, 8  ;;  %v15908_v24 = vadd.s32 1, %v14969_v63  ;;  %v20194_v22 = vmov 0 }
 0x67c   : > { %20155 = vst [vmem:[#allocation20_spill] sm:$0xff] %v15839_v8  ;;  %v5830_v8 = vpop.permute.xlu1 %5829  ;;  %vm7734_vm1 = vmand %vm20165_vm9, %vm20163_vm0  ;;  %vm20174_vm0 = vcmp.lt.s32.totalorder %v15734_v10, 8 }
 0x67d   : > { %vm20167_vm11 = vmmov %vm20166_vm15 }
 0x67e   : > { %v5832_v37 = vpop.permute.xlu0 %5831  ;;  %vm20169_vm4 = vmmov %vm20167_vm11 }
 0x67f   : > { %v15874_v60 = vsel %vm20166_vm15, %v5832_v37, %v15770_v58  ;;  %v15878_v1 = vsel %vm20167_vm11, %v5828_v28, %v5832_v37  ;;  %v15883_v13 = vsel %vm20169_vm4, %v15704_v12, %v5830_v8  ;;  %vm15888_vm12 = vmand %vm7733_vm13, %vm20171_vm7 }
 0x680   : > { %20168 = vst [vmem:[#allocation56_spill] sm:$0xff] %v15878_v1  ;;  %v5966_v19 = vmul.f32 %v10825_v61, %v15878_v1  ;;  %v5967_v26 = vmul.f32 %v10826_v21, %v15874_v60  ;;  %vm7742_vm15 = vmand %vm7734_vm1, %vm20174_vm0  ;;  %v15897_v28 = vmul.f32 %v11022_v0, %v15878_v1  ;;  %v15900_v12 = vmul.f32 %v11023_v40, %v15874_v60 }
 0x681   : > { %20170 = vst [vmem:[#allocation30_spill] sm:$0xff] %v15883_v13  ;;  %vm20177_vm11 = vmmov %vm20169_vm4  ;;  %v5958_v50 = vmul.f32 %v10825_v61, %v15883_v13  ;;  %vm20180_vm1 = vcmp.ge.s32.totalorder %v15447_v45, 0  ;;  %vm20185_vm0 = vcmp.lt.s32.totalorder %v15484_v6, 8  ;;  %v20202_v61 = vmov 0 }
 0x682   : > { %20175 = vst [vmem:[#allocation38_spill] sm:$0xff] %v15897_v28  ;;  %v15905_v37 = vsel %vm20177_vm11, %v5838_v4, %v15583_v32  ;;  %6386 = vmatpush.msrb.mxu0 %v5966_v19  ;;  %6412 = vmatpush.msrb.mxu1 %v5967_v26  ;;  %vm15915_vm13 = vmand %vm15847_vm10, %vm19043_vm6  ;;  %v15936_v26 = vsel %vm7742_vm15, 1.0, %v19949_v62  ;;  %vm20188_vm10 = vcmask 130048   ;;  %vm20189_vm6 = vcmp.ge.s32.totalorder %v15773_v44, 0 }
 0x683   : > { %20176 = vst [vmem:[#allocation46_spill] sm:$0xff] %v15900_v12  ;;  %v20181_v12 = vld [vmem:[#allocation63_spill] sm:$0xff]  ;;  %vm15931_vm11 = vmand %vm15835_vm8, %vm20185_vm0  ;;  %10869 = vmatmul.msk.f32.gmra.mxu1 %vm20188_vm10, %v15810_v46  ;;  %v15945_v19 = vmul.f32 %v11022_v0, %v15883_v13  ;;  %vm20193_vm8 = vcmp.lt.s32.totalorder %v15773_v44, 8  ;;  %v15957_v51 = vmul.f32 %v15936_v26, %v15905_v37  ;;  %v15979_v0 = vadd.s32 1, %v15036_v31 }
 0x684   : > { %vm20182_vm4 = vnez %v20181_v12  ;;  %vm20192_vm5 = vmmov %vm20188_vm10  ;;  %6387 = vmatpush.msrb.mxu0 %v5958_v50  ;;  %vm20199_vm10 = vcmp.ge.s32.totalorder %v15710_v43, 0  ;;  %v15970_v50 = vpop.permute.xlu1 %6506  ;;  %v20211_v32 = vmov 0 }
 0x685   : > { %vm15923_vm7 = vmand %vm20182_vm4, %vm20180_vm1  ;;  %vm20190_vm1 = vnez %v20061_v48  ;;  %20191 = vst [vmem:[#allocation55_spill] sm:$0xff] %v15945_v19  ;;  %10871 = vmatmul.msk.f32.gmra.mxu2 %vm20192_vm5, %v15731_v38  ;;  %v15963_v48 = vpop.permute.xlu2 %6476  ;;  %v20205_v19 = vmov 0 }
 0x686   : > { %vm7404_vm4 = vmand %vm20190_vm1, %vm20189_vm6  ;;  %20196 = vst [vmem:[#allocation8_spill] sm:$0xff] %v15957_v51 }
 0x687   : > { %vm15951_vm0 = vmand %vm7404_vm4, %vm20193_vm8  ;;  %vm20200_vm4 = vnez %v19937_v5  ;;  %vm20201_vm8 = vcmp.lt.s32.totalorder %v15710_v43, 8  ;;  %v5834_v51 = vpop.permute.xlu0 %5833  ;;  %v15990_v5 = vadd.s32 1, %v15103_v7 }
 0x688   : > { %v20195_v22 = vsel %vm15951_vm0, 4294967295, %v20194_v22  ;;  %vm20197_vm15 = vmmov %vm20192_vm5 }
 0x689   : > { %10874 = vmatmul.msk.f32.gmra.mxu3 %vm20197_vm15, %v15731_v38  ;;  %vm20198_vm6 = vmmov %vm20192_vm5  ;;  %vm19048_vm5 = vcmp.ge.s32.totalorder %v15908_v24, 0  ;;  %vm20204_vm15 = vcmp.lt.s32.totalorder %v15447_v45, 8  ;;  %v11024_v45 = vsel %vm15888_vm12, 1.0, %v19949_v62  ;;  %vm20214_vm12 = vnez %v20067_v14 }
 0x68a   : > { %10876 = vmatmul.msk.f32.vlgmr.msrb.gmra.mxu0 %vm20198_vm6, %v15676_v27  ;;  %vm8322_vm1 = vmand %vm20200_vm4, %vm20199_vm10  ;;  %vm20207_vm10 = vcmp.lt.s32.totalorder %v19906_v54, 4 }
 0x68b   : > { %vm15974_vm9 = vmand %vm8322_vm1, %vm20201_vm8  ;;  %v15994_v13 = vsel %vm20207_vm10, %v5834_v51, %v5838_v4  ;;  %v20213_v4 = vld [vmem:[#allocation61_spill] sm:$0xff] }
 0x68c   : > { %v20203_v61 = vsel %vm15974_vm9, 4294967295, %v20202_v61  ;;  %vm15985_vm6 = vmand %vm15923_vm7, %vm20204_vm15  ;;  %vm20210_vm7 = vnez %v19927_v9  ;;  %vm6848_vm8 = vcmp.ge.s32.totalorder %v20213_v4, 0  ;;  %vm6856_vm15 = vcmp.lt.s32.totalorder %v20213_v4, 8  ;;  %v5840_v20 = vpop.permute.xlu1 %5839 }
 0x68d   : > { %v20206_v19 = vsel %vm15985_vm6, 4294967295, %v20205_v19  ;;  %vm20208_vm4 = vmmov %vm20207_vm10  ;;  %vm19047_vm10 = vcmp.lt.s32.totalorder %v15908_v24, 8  ;;  %vm19054_vm9 = vcmp.ge.s32.totalorder %v15979_v0, 0  ;;  %v16035_v14 = vmul.f32 %v11024_v45, %v15994_v13 }
 0x68e   : > { %v15998_v31 = vsel %vm20208_vm4, %v5830_v8, %v5834_v51  ;;  %vm16007_vm1 = vmand %vm20210_vm7, %vm19048_vm5  ;;  %v20223_v8 = vmov 0  ;;  %v6481_v51 = vpop.permute.xlu2 %6480 }
 0x68f   : > { %20209 = vst [vmem:[#allocation12_spill] sm:$0xff] %v15998_v31  ;;  %v20212_v32 = vsel %vm16007_vm1, 4294967295, %v20211_v32  ;;  %v5959_v7 = vmul.f32 %v10826_v21, %v15998_v31  ;;  %vm7405_vm4 = vmand %vm20214_vm12, %vm19048_vm5  ;;  %vm20217_vm1 = vcmp.ge.s32.totalorder %v15773_v44, 0  ;;  %v16032_v49 = vmul.f32 %v11023_v40, %v15998_v31  ;;  %v6479_v63 = vpop.permute.xlu0 %6478 }
 0x690   : > { %vm16022_vm7 = vmand %vm7405_vm4, %vm19047_vm10  ;;  %20220 = vst [vmem:[#allocation10_spill] sm:$0xff] %v16035_v14  ;;  %vm20221_vm12 = vcmask 130048   ;;  %vm19058_vm10 = vcmp.lt.s32.totalorder %v19906_v54, 124  ;;  %v16059_v21 = vsel %vm15915_vm13, 1.0, %v19949_v62  ;;  %v16064_v40 = vsel %vm15754_vm3, 1.0, %v19949_v62 }
 0x691   : > { %6413 = vmatpush.msrb.mxu1 %v5959_v7  ;;  %vm8315_vm0 = vmand %vm20218_vm14, %vm20217_vm1  ;;  %20219 = vst [vmem:[#allocation6_spill] sm:$0xff] %v16032_v49  ;;  %10872 = vmatmul.msk.f32.gmra.mxu2 %vm20221_vm12, %v15810_v46  ;;  %vm20225_vm14 = vcmp.lt.s32.totalorder %v15773_v44, 8  ;;  %v16069_v44 = vsel %vm15777_vm2, 1.0, %v19949_v62  ;;  %v10828_v7 = vsel %vm15931_vm11, 1.0, %v19949_v62  ;;  %vm20230_vm13 = vnez %v19952_v36  ;;  %v20266_v36 = vld [vmem:[#allocation28_spill] sm:$0xff] }
 0x692   : > { %vm20222_vm4 = vmmov %vm20221_vm12  ;;  %vm20233_vm3 = vnez %v20206_v19  ;;  %vm20234_vm2 = vnez %v20195_v22  ;;  %vm19056_vm11 = vcmp.lt.s32.totalorder %v15979_v0, 8  ;;  %v16103_v19 = vsel %vm19058_vm10, %v15963_v48, %v6481_v51 }
 0x693   : > { %10879 = vmatmul.msk.f32.vlgmr.msrb.gmra.mxu1 %vm20222_vm4, %v15676_v27  ;;  %vm16042_vm5 = vmand %vm6848_vm8, %vm6856_vm15  ;;  %v10827_v30 = vsel %vm20233_vm3, 1.0, %v19949_v62  ;;  %v16088_v4 = vsel %vm20234_vm2, 1.0, %v19949_v62  ;;  %vm20236_vm8 = vnez %v19971_v15  ;;  %vm20242_vm3 = vnez %v20077_v18 }
 0x694   : > { %v20224_v8 = vsel %vm16042_vm5, 4294967295, %v20223_v8  ;;  %vm16048_vm1 = vmand %vm8315_vm0, %vm20225_vm14  ;;  %vm20239_vm14 = vcmp.lt.s32.totalorder %v19906_v54, 4  ;;  %v6524_v49 = vsel %vm19058_vm10, %v15970_v50, %v6479_v63  ;;  %v5960_v31 = vmul.f32 %v10827_v30, %v15994_v13  ;;  %v16227_v28 = vpop.permute.xlu1 %6504 }
 0x695   : > { %vm20228_vm6 = vmmov %vm20222_vm4  ;;  %v16108_v22 = vsel %vm20239_vm14, %v5840_v20, %v15557_v17  ;;  %v6589_v18 = vmul.f32 %v16059_v21, %v6524_v49  ;;  %v16141_v1 = vmul.f32 %v16069_v44, %v6524_v49 }
 0x696   : > { %10875 = vmatmul.msk.f32.gmra.mxu3 %vm20228_vm6, %v15810_v46  ;;  %vm20229_vm12 = vmmov %vm20222_vm4  ;;  %vm20235_vm6 = vcmp.ge.s32.totalorder %v15990_v5, 0  ;;  %vm19055_vm4 = vcmp.lt.s32.totalorder %v15990_v5, 8  ;;  %v5969_v6 = vmul.f32 %v10828_v7, %v16108_v22 }
 0x697   : > { %10877 = vmatmul.msk.f32.gmra.mxu0 %vm20229_vm12, %v15731_v38  ;;  %vm16078_vm0 = vmand %vm20230_vm13, %vm19054_vm9  ;;  %vm20241_vm13 = vnez %v20203_v61  ;;  %v16134_v61 = vadd.s32 1, %v14933_v11  ;;  %20246 = vst [vmem:[#allocation9_spill] sm:$0xff] %v16141_v1  ;;  %v16153_v11 = vmul.f32 %v15936_v26, %v16108_v22  ;;  %v20274_v1 = vmov 0 }
 0x698   : > { %vm16095_vm15 = vmand %vm20236_vm8, %vm20235_vm6  ;;  %v11097_v14 = vsel %vm20241_vm13, 1.0, %v19949_v62  ;;  %vm20247_vm8 = vcmp.ge.s32.totalorder %v15908_v24, 0  ;;  %6464 = vmatpush.msra.mxu3 %v5969_v6  ;;  %vm20251_vm13 = vcmp.lt.s32.totalorder %v15908_v24, 8  ;;  %6624 = vmatpush.msra.mxu0 %v6589_v18  ;;  %v16175_v6 = vadd.s32 1, %v15148_v35  ;;  %v20262_v35 = vld [vmem:[#allocation15_spill] sm:$0xff] }
 0x699   : > { %vm20240_vm12 = vmmov %vm20239_vm14  ;;  %vm20248_vm14 = vnez %v19962_v3  ;;  %20250 = vst [vmem:[#allocation32_spill] sm:$0xff] %v16153_v11  ;;  %v5961_v3 = vmul.f32 %v10828_v7, %v15905_v37  ;;  %v16178_v26 = vmul.f32 %v11097_v14, %v16103_v19  ;;  %v16185_v24 = vsel %vm16022_vm7, 1.0, %v19949_v62 }
 0x69a   : > { %v16113_v15 = vsel %vm20240_vm12, %v15770_v58, %v5840_v20  ;;  %vm7406_vm2 = vmand %vm20242_vm3, %vm19054_vm9  ;;  %v16138_v20 = vmul.f32 %v16064_v40, %v6524_v49  ;;  %v11090_v7 = vsel %vm16048_vm1, 1.0, %v19949_v62  ;;  %vm20265_vm9 = vcmp.ge.s32.totalorder %v15707_v57, 0 }
 0x69b   : > { %v5968_v17 = vmul.f32 %v10827_v30, %v16113_v15  ;;  %vm16129_vm6 = vmand %vm7406_vm2, %vm19056_vm11  ;;  %v16149_v59 = vmul.f32 %v11024_v45, %v16113_v15  ;;  %v16163_v30 = vmul.f32 %v16088_v4, %v16103_v19  ;;  %20258 = vst [vmem:[#allocation63_spill] sm:$0xff] %v16178_v26  ;;  %6465 = vmatpush.msra.mxu3 %v5961_v3  ;;  %v6483_v3 = vpop.permute.xlu0 %6482 }
 0x69c   : > { %20245 = vst [vmem:[#allocation7_spill] sm:$0xff] %v16138_v20  ;;  %vm8316_vm12 = vmand %vm20248_vm14, %vm20247_vm8  ;;  %vm20255_vm8 = vnez %v20212_v32  ;;  %v6522_v45 = vsel %vm19058_vm10, %v6479_v63, %v6483_v3  ;;  %v20289_v63 = vmov 0 }
 0x69d   : > { %20249 = vst [vmem:[#allocation11_spill] sm:$0xff] %v16149_v59  ;;  %6438 = vmatpush.msra.mxu2 %v5968_v17  ;;  %vm16157_vm3 = vmand %vm8316_vm12, %vm20251_vm13  ;;  %vm20259_vm12 = vcmask 130048   ;;  %v20270_v17 = vmov 0  ;;  %v16265_v59 = vmul.f32 %v16088_v4, %v6522_v45  ;;  %v16267_v20 = vmul.f32 %v11097_v14, %v6522_v45  ;;  %v16288_v14 = vld [vmem:[%s18770_s5 + $0x30] sm:$0xff] }
 0x69e   : > { %vm20254_vm2 = vmmov %vm20251_vm13  ;;  %10880 = vmatmul.msk.f32.gmra.mxu1 %vm20259_vm12, %v15731_v38 }
 0x69f   : > { %vm16170_vm14 = vmand %vm20255_vm8, %vm20254_vm2  ;;  %6439 = vmatpush.msra.mxu2 %v5960_v31  ;;  %10878 = vmatmul.msk.f32.gmra.mxu0 %vm20259_vm12, %v15810_v46  ;;  %v16199_v31 = vpop.permute.xlu2 %6484  ;;  %20276 = vst [vmem:[#allocation61_spill] sm:$0xff] %v16267_v20  ;;  %v10959_v20 = vld [vmem:[%s18770_s5 + $0x68] sm:$0xff] }
 0x6a0   : > { %vm16191_vm13 = vmand %vm16095_vm15, %vm19055_vm4  ;;  %vm19057_vm15 = vcmp.lt.s32.totalorder %v16134_v61, 8  ;;  %vm6854_vm4 = vcmp.lt.s32.totalorder %v20262_v35, 8  ;;  %v6519_v55 = vsel %vm19058_vm10, %v6481_v51, %v16199_v31  ;;  %v10889_v18 = vsel %vm16170_vm14, 1.0, %v19949_v62 }
 0x6a1   : > { %vm16205_vm7 = vmand %vm16078_vm0, %vm19056_vm11  ;;  %vm6855_vm0 = vcmp.lt.s32.totalorder %v20266_v36, 8  ;;  %vm20267_vm11 = vcmask 130048   ;;  %v16248_v51 = vmul.f32 %v16185_v24, %v6519_v55  ;;  %v6590_v11 = vmul.f32 %v10889_v18, %v6522_v45 }
 0x6a2   : > { %vm7410_vm12 = vmand %vm16042_vm5, %vm20265_vm9  ;;  %10882 = vmatmul.msk.f32.vlgmr.msra.gmra.mxu2 %vm20267_vm11, %v15676_v27  ;;  %vm20269_vm9 = vcmp.lt.s32.totalorder %v15707_v57, 8  ;;  %vm20293_vm5 = vcmask 130048  }
 0x6a3   : > { %vm20268_vm2 = vmmov %vm20267_vm11  ;;  %vm20272_vm11 = vcmp.ge.s32.totalorder %v16134_v61, 0  ;;  %6650 = vmatpush.msra.mxu1 %v6590_v11 }
 0x6a4   : > { %10885 = vmatmul.msk.f32.vlgmr.msra.gmra.mxu3 %vm20268_vm2, %v15676_v27  ;;  %vm16231_vm1 = vmand %vm7410_vm12, %vm20269_vm9  ;;  %v6523_v27 = vsel %vm19058_vm10, %v16227_v28, %v15963_v48  ;;  %vm20273_vm2 = vnez %v20164_v47  ;;  %vm19059_vm12 = vcmp.ge.s32.totalorder %v16175_v6, 0  ;;  %v16262_v47 = vmul.f32 %v11090_v7, %v6519_v55 }
 0x6a5   : > { %v20271_v17 = vsel %vm16231_vm1, 4294967295, %v20270_v17  ;;  %vm8320_vm8 = vmand %vm20273_vm2, %vm20272_vm11  ;;  %v6581_v26 = vmul.f32 %v16059_v21, %v6523_v27  ;;  %v16260_v48 = vmul.f32 %v16064_v40, %v6523_v27  ;;  %vm20277_vm9 = vcmp.ge.s32.totalorder %v15710_v43, 0 }
 0x6a6   : > { %vm16255_vm14 = vmand %vm8320_vm8, %vm19057_vm15  ;;  %vm20278_vm11 = vnez %v19976_v25  ;;  %vm20281_vm8 = vcmp.ge.s32.totalorder %v20262_v35, 0  ;;  %v16299_v4 = vmul.f32 %v16069_v44, %v6523_v27  ;;  %vm20291_vm10 = vcmp.ge.s32.totalorder %v15990_v5, 0  ;;  %10881 = vmatmul.msk.f32.gmra.mxu1 %vm20293_vm5, %v15810_v46 }
 0x6a7   : > { %v20275_v1 = vsel %vm16255_vm14, 4294967295, %v20274_v1  ;;  %vm16273_vm2 = vmand %vm20278_vm11, %vm20277_vm9  ;;  %6625 = vmatpush.msra.mxu0 %v6581_v26  ;;  %vm20284_vm9 = vnez %v19985_v34  ;;  %v6582_v26 = vmul.f32 %v10889_v18, %v16103_v19  ;;  %vm20294_vm14 = vcmp.lt.s32.totalorder %v15990_v5, 8  ;;  %v16324_v44 = vpop.permute.xlu2 %6492  ;;  %v6491_v19 = vpop.permute.xlu1 %6490 }
 0x6a8   : > { %vm16281_vm15 = vmand %vm20281_vm8, %vm6854_vm4  ;;  %20287 = vst [vmem:[#allocation15_spill] sm:$0xff] %v16299_v4  ;;  %vm20288_vm4 = vcmp.ge.s32.totalorder %v20266_v36, 0  ;;  %v10987_v35 = vsel %vm16129_vm6, 1.0, %v19949_v62 }
 0x6a9   : > { %vm16294_vm11 = vmand %vm20284_vm9, %vm19059_vm12  ;;  %vm20292_vm9 = vnez %v20094_v39  ;;  %6651 = vmatpush.msra.mxu1 %v6582_v26  ;;  %v10891_v39 = vsel %vm16191_vm13, 1.0, %v19949_v62  ;;  %vm20305_vm13 = vcmp.lt.s32.totalorder %v15710_v43, 8 }
 0x6aa   : > { %vm16305_vm8 = vmand %vm20288_vm4, %vm6855_vm0  ;;  %vm20298_vm4 = vcmp.ge.s32.totalorder %v15979_v0, 0 }
 0x6ab   : > { %v20290_v63 = vsel %vm16305_vm8, 4294967295, %v20289_v63  ;;  %vm7407_vm12 = vmand %vm20292_vm9, %vm20291_vm10  ;;  %vm20299_vm8 = vnez %v20010_v42  ;;  %v6487_v42 = vpop.permute.xlu0 %6486 }
 0x6ac   : > { %vm16318_vm1 = vmand %vm7407_vm12, %vm20294_vm14  ;;  %vm6553_vm12 = vcmp.lt.s32.totalorder %v16175_v6, 8  ;;  %vm20302_vm14 = vcmp.lt.s32.totalorder %v15979_v0, 8  ;;  %v10890_v0 = vsel %vm16205_vm7, 1.0, %v19949_v62 }
 0x6ad   : > { %vm20297_vm0 = vmmov %vm20293_vm5 }
 0x6ae   : > { %10899 = vmatmul.msk.f32.vlgmr.msra.gmra.mxu0 %vm20297_vm0, %v16288_v14  ;;  %vm8317_vm10 = vmand %vm20299_vm8, %vm20298_vm4  ;;  %vm20308_vm4 = vcmp.lt.s32.totalorder %v19906_v54, 124 }
 0x6af   : > { %vm20300_vm9 = vmmov %vm20297_vm0  ;;  %v6520_v58 = vsel %vm20308_vm4, %v6483_v3, %v6487_v42  ;;  %v6503_v26 = vpop.permute.xlu2 %6502 }
 0x6b0   : > { %10883 = vmatmul.msk.f32.gmra.mxu2 %vm20300_vm9, %v15731_v38  ;;  %vm20301_vm5 = vmmov %vm20297_vm0  ;;  %v6591_v43 = vmul.f32 %v10890_v0, %v6520_v58  ;;  %v16370_v49 = vmul.f32 %v16185_v24, %v6520_v58  ;;  %v16372_v18 = vmul.f32 %v11090_v7, %v6520_v58  ;;  %v6583_v7 = vmul.f32 %v10890_v0, %v6519_v55  ;;  %v6495_v0 = vpop.permute.xlu1 %6494 }
 0x6b1   : > { %10886 = vmatmul.msk.f32.gmra.mxu3 %vm20301_vm5, %v15731_v38  ;;  %vm16340_vm0 = vmand %vm8317_vm10, %vm20302_vm14  ;;  %v11091_v38 = vsel %vm16157_vm3, 1.0, %v19949_v62  ;;  %vm20310_vm3 = vcmp.ge.s32.totalorder %v16134_v61, 0  ;;  %vm20311_vm10 = vnez %v20007_v56  ;;  %v16389_v56 = vld [vmem:[%s18770_s5 + $0x38] sm:$0xff]  ;;  %vm20315_vm5 = vnez %v20181_v12 }
 0x6b2   : > { %vm16354_vm8 = vmand %vm16273_vm2, %vm20305_vm13  ;;  %vm20314_vm2 = vcmp.ge.s32.totalorder %v15707_v57, 0  ;;  %6676 = vmatpush.msrb.mxu2 %v6591_v43  ;;  %v11092_v34 = vsel %vm16340_vm0, 1.0, %v19949_v62  ;;  %vm20336_vm0 = vcmp.ge.s32.totalorder %v15990_v5, 0 }
 0x6b3   : > { %vm20309_vm6 = vmmov %vm20308_vm4  ;;  %vm20321_vm4 = vcmp.ge.s32.totalorder %v16175_v6, 0  ;;  %v16414_v12 = vsel %vm16354_vm8, 1.0, %v19949_v62 }
 0x6b4   : > { %v6518_v36 = vsel %vm20309_vm6, %v6487_v42, %v6491_v19  ;;  %vm6546_vm9 = vmand %vm20311_vm10, %vm20310_vm3  ;;  %vm20322_vm3 = vcmask 130048   ;;  %vm20323_vm10 = vnez %v20271_v17  ;;  %6677 = vmatpush.msrb.mxu2 %v6583_v7 }
 0x6b5   : > { %v6592_v27 = vmul.f32 %v10891_v39, %v6518_v36  ;;  %vm16378_vm7 = vmand %vm16294_vm11, %vm6553_vm12  ;;  %v16382_v3 = vmul.f32 %v10987_v35, %v6518_v36  ;;  %v16384_v45 = vmul.f32 %v11091_v38, %v6518_v36  ;;  %vm20318_vm11 = vcmp.lt.s32.totalorder %v16134_v61, 8  ;;  %10902 = vmatmul.msk.f32.vlgmr.msra.gmra.mxu1 %vm20322_vm3, %v16288_v14  ;;  %v6489_v36 = vpop.permute.xlu0 %6488 }
 0x6b6   : > { %vm16395_vm14 = vmand %vm20315_vm5, %vm20314_vm2  ;;  %v16419_v55 = vsel %vm20323_vm10, 1.0, %v19949_v62  ;;  %vm20325_vm2 = vcmp.ge.s32.totalorder %v16134_v61, 0  ;;  %vm20326_vm5 = vnez %v20290_v63  ;;  %v10892_v17 = vsel %vm16378_vm7, 1.0, %v19949_v62 }
 0x6b7   : > { %6702 = vmatpush.msrb.mxu3 %v6592_v27  ;;  %vm16401_vm13 = vmand %vm6546_vm9, %vm20318_vm11  ;;  %vm20324_vm9 = vnez %v20275_v1  ;;  %v10988_v1 = vsel %vm16318_vm1, 1.0, %v19949_v62  ;;  %vm20332_vm1 = vcmp.lt.s32.totalorder %v16134_v61, 8 }
 0x6b8   : > { %vm7408_vm6 = vmand %vm16281_vm15, %vm20321_vm4  ;;  %v16424_v25 = vsel %vm20324_vm9, 1.0, %v19949_v62  ;;  %10884 = vmatmul.msk.f32.gmra.mxu2 %vm20322_vm3, %v15810_v46  ;;  %vm20331_vm9 = vcmp.lt.s32.totalorder %v19906_v54, 124  ;;  %v10893_v24 = vsel %vm16401_vm13, 1.0, %v19949_v62  ;;  %vm20356_vm13 = vcmp.lt.s32.totalorder %v19906_v54, 124  ;;  %v20430_v54 = vld [vmem:[#allocation19_spill] sm:$0xff] }
 0x6b9   : > { %vm7409_vm11 = vmand %vm20326_vm5, %vm20325_vm2  ;;  %v6510_v32 = vsel %vm20331_vm9, %v6503_v26, %v15970_v50  ;;  %vm20337_vm2 = vnez %v20012_v41 }
 0x6ba   : > { %vm20327_vm4 = vmmov %vm20322_vm3  ;;  %v6596_v43 = vmul.f32 %v16414_v12, %v6510_v32  ;;  %v16465_v27 = vmul.f32 %v16424_v25, %v6510_v32 }
 0x6bb   : > { %10900 = vmatmul.msk.f32.gmra.mxu0 %vm20327_vm4, %v16389_v56  ;;  %vm16440_vm8 = vmand %vm7408_vm6, %vm6553_vm12 }
 0x6bc   : > { %vm20330_vm10 = vmmov %vm20322_vm3 }
 0x6bd   : > { %10887 = vmatmul.msk.f32.gmra.mxu3 %vm20330_vm10, %v15810_v46  ;;  %vm16456_vm7 = vmand %vm7409_vm11, %vm20332_vm1  ;;  %v16462_v46 = vmul.f32 %v16419_v55, %v6510_v32  ;;  %vm20340_vm10 = vcmp.ge.s32.totalorder %v16175_v6, 0 }
 0x6be   : > { %vm20335_vm6 = vmmov %vm20331_vm9  ;;  %vm20341_vm9 = vnez %v20014_v2 }
 0x6bf   : > { %v6516_v50 = vsel %vm20335_vm6, %v6491_v19, %v6495_v0  ;;  %vm8318_vm11 = vmand %vm20337_vm2, %vm20336_vm0 }
 0x6c0   : > { %vm20338_vm4 = vmmov %vm20335_vm6  ;;  %v6593_v9 = vmul.f32 %v10892_v17, %v6516_v50  ;;  %v16479_v7 = vmul.f32 %v10988_v1, %v6516_v50  ;;  %v16485_v19 = vmul.f32 %v11092_v34, %v6516_v50  ;;  %vm20342_vm6 = vcmp.lt.s32.totalorder %v15990_v5, 8  ;;  %v16508_v5 = vld [vmem:[%s18770_s5 + $0x40] sm:$0xff] }
 0x6c1   : > { %v6515_v61 = vsel %vm20338_vm4, %v6489_v36, %v16324_v44  ;;  %vm20339_vm3 = vmmov %vm20338_vm4  ;;  %vm20348_vm4 = vcmask 130048  }
 0x6c2   : > { %v6517_v11 = vsel %vm20339_vm3, %v16199_v31, %v6489_v36  ;;  %vm8319_vm1 = vmand %vm20341_vm9, %vm20340_vm10  ;;  %6728 = vmatpush.msrb.mxu0 %v6593_v9  ;;  %v16501_v2 = vmul.f32 %v10988_v1, %v6515_v61  ;;  %v16514_v6 = vmul.f32 %v11092_v34, %v6515_v61  ;;  %10903 = vmatmul.msk.f32.gmra.mxu1 %vm20348_vm4, %v16389_v56  ;;  %vm20350_vm3 = vcmp.ge.s32.totalorder %v15720_v29, 0  ;;  %v6497_v1 = vpop.permute.xlu1 %6496  ;;  %v6499_v34 = vpop.permute.xlu0 %6498 }
 0x6c3   : > { %v6584_v41 = vmul.f32 %v10891_v39, %v6517_v11  ;;  %vm16489_vm0 = vmand %vm8318_vm11, %vm20342_vm6  ;;  %v16499_v36 = vmul.f32 %v10987_v35, %v6517_v11  ;;  %v16503_v50 = vmul.f32 %v11091_v38, %v6517_v11  ;;  %v6585_v39 = vmul.f32 %v10892_v17, %v6515_v61  ;;  %v16518_v35 = vpop.f32.mrf.mxu0  ;;  %v16583_v31 = vpop.f32.mrf.mxu1 }
 0x6c4   : > { %vm16495_vm2 = vmand %vm8319_vm1, %vm6553_vm12  ;;  %vm20347_vm11 = vcmp.lt.s32.totalorder %v15707_v57, 8  ;;  %20349 = vst [vmem:[#allocation28_spill] sm:$0xff] %v16518_v35  ;;  %v10989_v57 = vsel %vm16440_vm8, 1.0, %v19949_v62  ;;  %v10990_v17 = vsel %vm16456_vm7, 1.0, %v19949_v62  ;;  %v11093_v42 = vsel %vm16489_vm0, 1.0, %v19949_v62  ;;  %v10958_v35 = vld [vmem:[%s18770_s5 + $0x60] sm:$0xff] }
 0x6c5   : > { %6703 = vmatpush.msrb.mxu3 %v6584_v41  ;;  %vm6563_vm12 = vmand %vm16395_vm14, %vm20347_vm11  ;;  %6729 = vmatpush.msrb.mxu0 %v6585_v39  ;;  %v11094_v21 = vsel %vm16495_vm2, 1.0, %v19949_v62  ;;  %v6513_v58 = vsel %vm20356_vm13, %v16324_v44, %v6497_v1  ;;  %vm20357_vm8 = vcmp.lt.s32.totalorder %v15720_v29, 8  ;;  %vm20360_vm0 = vcmp.ge.s32.totalorder %v15734_v10, 0  ;;  %20362 = vst [vmem:[#allocation64_spill] sm:$0xff] %v16583_v31  ;;  %v20443_v31 = vld [vmem:[#allocation57_spill] sm:$0xff] }
 0x6c6   : > { %vm16524_vm10 = vmand %vm16281_vm15, %vm20350_vm3  ;;  %v10894_v40 = vsel %vm6563_vm12, 1.0, %v19949_v62  ;;  %v16564_v11 = vmul.f32 %v10989_v57, %v6513_v58  ;;  %v16574_v29 = vmul.f32 %v11093_v42, %v6513_v58  ;;  %vm20365_vm3 = vcmp.lt.s32.totalorder %v15734_v10, 8 }
 0x6c7   : > { %6806 = vmatpush.msra.mxu3 %v6596_v43  ;;  %vm20353_vm14 = vmmov %vm20348_vm4  ;;  %6941 = vmatpush.msra.mxu0 %v15668_v52  ;;  %v6898_v43 = vmul.f32 %v15625_v16, %v15717_v33 }
 0x6c8   : > { %10901 = vmatmul.msk.f32.gmra.mxu0 %vm20353_vm14, %v16508_v5  ;;  %vm20354_vm9 = vmmov %vm20348_vm4 }
 0x6c9   : > { %10905 = vmatmul.msk.f32.vlgmr.msrb.gmra.mxu2 %vm20354_vm9, %v16288_v14  ;;  %vm20355_vm15 = vmmov %vm20348_vm4  ;;  %6942 = vmatpush.msra.mxu0 %v6898_v43 }
 0x6ca   : > { %10908 = vmatmul.msk.f32.vlgmr.msrb.gmra.mxu3 %vm20355_vm15, %v16288_v14  ;;  %vm6878_vm7 = vmand %vm16524_vm10, %vm20357_vm8  ;;  %v6501_v63 = vpop.permute.xlu0 %6500 }
 0x6cb   : > { %vm20358_vm1 = vmmov %vm20356_vm13  ;;  %v16590_v38 = vpop.f32.mrf.mxu0 }
 0x6cc   : > { %v6512_v52 = vsel %vm20358_vm1, %v6499_v34, %v6503_v26  ;;  %vm20359_vm6 = vmmov %vm20358_vm1  ;;  %v10927_v26 = vsel %vm6878_vm7, 1.0, %v19949_v62  ;;  %20364 = vst [vmem:[#allocation65_spill] sm:$0xff] %v16590_v38 }
 0x6cd   : > { %v6514_v61 = vsel %vm20359_vm6, %v6495_v0, %v6499_v34  ;;  %v6595_v41 = vmul.f32 %v10894_v40, %v6512_v52  ;;  %v16568_v44 = vmul.f32 %v10990_v17, %v6512_v52  ;;  %v16572_v33 = vmul.f32 %v11094_v21, %v6512_v52  ;;  %vm6871_vm2 = vmand %vm20326_vm5, %vm20360_vm0 }
 0x6ce   : > { %v6594_v9 = vmul.f32 %v10893_v24, %v6514_v61  ;;  %v16566_v32 = vmul.f32 %v10989_v57, %v6514_v61  ;;  %v16570_v16 = vmul.f32 %v11093_v42, %v6514_v61  ;;  %v6586_v0 = vmul.f32 %v10893_v24, %v6513_v58  ;;  %vm20361_vm11 = vmmov %vm20348_vm4  ;;  %v20367_v57 = vld [vmem:[#allocation16_spill] sm:$0xff]  ;;  %v20368_v24 = vld [vmem:[#allocation50_spill] sm:$0xff] }
 0x6cf   : > { %6780 = vmatpush.msra.mxu2 %v6595_v41  ;;  %10904 = vmatmul.msk.f32.gmra.mxu1 %vm20361_vm11, %v16508_v5  ;;  %v6910_v39 = vmul.f32 %v10927_v26, %v15874_v60  ;;  %vm20363_vm12 = vmmov %vm20348_vm4  ;;  %v6899_v60 = vmul.f32 %v20367_v57, %v15794_v23  ;;  %vm20369_vm14 = vnez %v20368_v24  ;;  %v20372_v58 = vld [vmem:[#allocation12_spill] sm:$0xff]  ;;  %vm20382_vm0 = vnez %v20224_v8  ;;  %v16656_v24 = vpop.f32.mrf.mxu3 }
 0x6d0   : > { %6754 = vmatpush.msrb.mxu1 %v6594_v9  ;;  %10911 = vmatmul.msk.f32.vlgmr.msrb.gmra.mxu0 %vm20348_vm4, %v16288_v14  ;;  %vm6879_vm10 = vmand %vm6871_vm2, %vm20365_vm3  ;;  %v10926_v42 = vsel %vm20369_vm14, 1.0, %v19949_v62  ;;  %v6902_v43 = vmul.f32 %v10927_v26, %v20372_v58 }
 0x6d1   : > { %10906 = vmatmul.msk.f32.gmra.mxu2 %vm20363_vm12, %v16389_v56  ;;  %vm20366_vm5 = vmmov %vm20348_vm4  ;;  %7045 = vmatpush.msrb.mxu0 %v6910_v39  ;;  %v10928_v9 = vsel %vm6879_vm10, 1.0, %v19949_v62  ;;  %v16639_v39 = vpop.f32.mrf.mxu1 }
 0x6d2   : > { %6755 = vmatpush.msrb.mxu1 %v6586_v0  ;;  %10909 = vmatmul.msk.f32.gmra.mxu3 %vm20366_vm5, %v16389_v56  ;;  %vm20370_vm9 = vmmov %vm20358_vm1  ;;  %v6911_v26 = vmul.f32 %v10928_v9, %v16113_v15  ;;  %v20385_v15 = vld [vmem:[#allocation30_spill] sm:$0xff]  ;;  %20386 = vst [vmem:[#allocation16_spill] sm:$0xff] %v16639_v39 }
 0x6d3   : > { %v6509_v34 = vsel %vm20370_vm9, %v6501_v63, %v16227_v28  ;;  %vm20371_vm15 = vmmov %vm20358_vm1  ;;  %7046 = vmatpush.msrb.mxu0 %v6902_v43  ;;  %v16646_v8 = vpop.f32.mrf.mxu0  ;;  %v20396_v43 = vld [vmem:[#allocation43_spill] sm:$0xff] }
 0x6d4   : > { %6967 = vmatpush.msra.mxu1 %v15671_v53  ;;  %v6511_v10 = vsel %vm20371_vm15, %v6497_v1, %v6501_v63  ;;  %v6588_v52 = vmul.f32 %v16414_v12, %v6509_v34  ;;  %v16612_v23 = vmul.f32 %v16419_v55, %v6509_v34  ;;  %v16618_v28 = vmul.f32 %v16424_v25, %v6509_v34  ;;  %v20373_v1 = vld [vmem:[#allocation56_spill] sm:$0xff]  ;;  %vm20374_vm13 = vmmov %vm20348_vm4  ;;  %v20375_v12 = vld [vmem:[#allocation39_spill] sm:$0xff] }
 0x6d5   : > { %v6587_v53 = vmul.f32 %v10894_v40, %v6511_v10  ;;  %v16609_v61 = vmul.f32 %v10990_v17, %v6511_v10  ;;  %v16615_v41 = vmul.f32 %v11094_v21, %v6511_v10  ;;  %v6909_v0 = vmul.f32 %v10926_v42, %v20373_v1  ;;  %v20376_v55 = vld [vmem:[#allocation35_spill] sm:$0xff]  ;;  %v20380_v25 = vld [vmem:[#allocation60_spill] sm:$0xff]  ;;  %vm20383_vm11 = vmmov %vm20348_vm4  ;;  %20389 = vst [vmem:[#allocation50_spill] sm:$0xff] %v16646_v8 }
 0x6d6   : > { %6968 = vmatpush.msra.mxu1 %v6899_v60  ;;  %6807 = vmatpush.msra.mxu3 %v6588_v52  ;;  %vm20377_vm8 = vcmp.ge.s32.totalorder %v20376_v55, 0  ;;  %v20378_v40 = vld [vmem:[#allocation31_spill] sm:$0xff]  ;;  %vm20381_vm6 = vcmp.ge.s32.totalorder %v20380_v25, 0  ;;  %vm20384_vm12 = vmmov %vm20348_vm4  ;;  %v6901_v17 = vmul.f32 %v10926_v42, %v20385_v15  ;;  %v6903_v21 = vmul.f32 %v10928_v9, %v15994_v13  ;;  %v20387_v63 = vld [vmem:[#allocation13_spill] sm:$0xff]  ;;  %v16651_v13 = vpop.f32.mrf.mxu2 }
 0x6d7   : > { %6781 = vmatpush.msra.mxu2 %v6587_v53  ;;  %10914 = vmatmul.msk.f32.vlgmr.msrb.gmra.mxu1 %vm20374_vm13, %v16288_v14  ;;  %vm20379_vm7 = vnez %v20378_v40  ;;  %vm6872_vm2 = vmand %vm20382_vm0, %vm20381_vm6  ;;  %vm20388_vm3 = vcmp.lt.s32.totalorder %v20376_v55, 8  ;;  %vm20390_vm5 = vcmp.lt.s32.totalorder %v20380_v25, 8  ;;  %v20392_v34 = vld [vmem:[#allocation41_spill] sm:$0xff]  ;;  %v20442_v8 = vld [vmem:[#allocation58_spill] sm:$0xff] }
 0x6d8   : > { %vm6873_vm1 = vmand %vm20379_vm7, %vm20377_vm8  ;;  %7019 = vmatpush.msrb.mxu3 %v6909_v0  ;;  %7071 = vmatpush.msrb.mxu1 %v6911_v26  ;;  %v10931_v9 = vld [vmem:[%s18770_s5 + $0x48] sm:$0xff] }
 0x6d9   : > { %6993 = vmatpush.msrb.mxu2 %v20375_v12  ;;  %10912 = vmatmul.msk.f32.gmra.mxu0 %vm20384_vm12, %v16389_v56  ;;  %vm6881_vm10 = vmand %vm6873_vm1, %vm20388_vm3  ;;  %v16668_v52 = vpop.f32.mrf.mxu1  ;;  %v20403_v1 = vld [vmem:[#allocation17_spill] sm:$0xff] }
 0x6da   : > { %10907 = vmatmul.msk.f32.gmra.mxu2 %vm20383_vm11, %v16508_v5  ;;  %10910 = vmatmul.msk.f32.gmra.mxu3 %vm20348_vm4, %v16508_v5  ;;  %vm6880_vm14 = vmand %vm6872_vm2, %vm20390_vm5  ;;  %v10930_v57 = vsel %vm6881_vm10, 1.0, %v19949_v62  ;;  %20397 = vst [vmem:[#allocation12_spill] sm:$0xff] %v16668_v52  ;;  %v20404_v0 = vld [vmem:[#allocation49_spill] sm:$0xff] }
 0x6db   : > { %6994 = vmatpush.msrb.mxu2 %v20387_v63  ;;  %7020 = vmatpush.msrb.mxu3 %v6901_v17  ;;  %v10929_v60 = vsel %vm6880_vm14, 1.0, %v19949_v62  ;;  %vm20391_vm9 = vmmov %vm20348_vm4  ;;  %v6913_v10 = vmul.f32 %v10930_v57, %v20392_v34  ;;  %v6905_v53 = vmul.f32 %v10930_v57, %v20396_v43  ;;  %v10932_v12 = vld [vmem:[%s18770_s5 + $0x50] sm:$0xff]  ;;  %v10933_v17 = vld [vmem:[%s18770_s5 + $0x58] sm:$0xff] }
 0x6dc   : > { %7072 = vmatpush.msrb.mxu1 %v6903_v21  ;;  %v6912_v42 = vmul.f32 %v10929_v60, %v16108_v22  ;;  %vm20393_vm15 = vmmov %vm20348_vm4  ;;  %v6904_v58 = vmul.f32 %v10929_v60, %v15905_v37  ;;  %v16670_v22 = vpop.f32.mrf.mxu0  ;;  %v16682_v37 = vpop.f32.mrf.mxu3  ;;  %v20408_v40 = vld [vmem:[#allocation29_spill] sm:$0xff]  ;;  %v20420_v57 = vld [vmem:[#allocation51_spill] sm:$0xff] }
 0x6dd   : > { %vm20394_vm13 = vmmov %vm20348_vm4  ;;  %20398 = vst [vmem:[#allocation56_spill] sm:$0xff] %v16670_v22  ;;  %v20421_v60 = vld [vmem:[#allocation45_spill] sm:$0xff]  ;;  %v20422_v34 = vld [vmem:[#allocation23_spill] sm:$0xff] }
 0x6de   : > { %vm20395_vm8 = vmmov %vm20348_vm4  ;;  %v20428_v43 = vld [vmem:[#allocation54_spill] sm:$0xff] }
 0x6df   : > { %10915 = vmatmul.msk.f32.gmra.mxu1 %vm20391_vm9, %v16389_v56  ;;  %vm20399_vm7 = vmmov %vm20348_vm4 }
 0x6e0   : > { %vm20400_vm1 = vmmov %vm20348_vm4 }
 0x6e1   : > { %10913 = vmatmul.msk.f32.gmra.mxu0 %vm20393_vm15, %v16508_v5  ;;  %vm20401_vm6 = vmmov %vm20400_vm1  ;;  %v16688_v26 = vpop.f32.mrf.mxu1 }
 0x6e2   : > { %10917 = vmatmul.msk.f32.vlgmr.msra.gmra.mxu2 %vm20394_vm13, %v16288_v14  ;;  %10920 = vmatmul.msk.f32.vlgmr.msra.gmra.mxu3 %vm20395_vm8, %v16288_v14  ;;  %v16677_v14 = vpop.f32.mrf.mxu2  ;;  %vm20402_vm0 = vmmov %vm20400_vm1  ;;  %20405 = vst [vmem:[#allocation39_spill] sm:$0xff] %v16688_v26 }
 0x6e3   : > { %7097 = vmatpush.msra.mxu2 %v6912_v42  ;;  %7123 = vmatpush.msra.mxu3 %v6913_v10  ;;  %vm20406_vm2 = vmmov %vm20402_vm0 }
 0x6e4   : > { %v16694_v55 = vpop.f32.mrf.mxu0  ;;  %vm20409_vm11 = vmmov %vm20402_vm0  ;;  %v16705_v15 = vpop.f32.mrf.mxu3 }
 0x6e5   : > { %7098 = vmatpush.msra.mxu2 %v6904_v58  ;;  %7124 = vmatpush.msra.mxu3 %v6905_v53  ;;  %20407 = vst [vmem:[#allocation35_spill] sm:$0xff] %v16694_v55  ;;  %vm20410_vm12 = vmmov %vm20402_vm0  ;;  %v20432_v55 = vld [vmem:[#allocation27_spill] sm:$0xff] }
 0x6e6   : > { %vm20411_vm4 = vmmov %vm20402_vm0 }
 0x6e7   : > { %10916 = vmatmul.msk.f32.gmra.mxu1 %vm20399_vm7, %v16508_v5  ;;  %vm20413_vm3 = vmmov %vm20402_vm0 }
 0x6e8   : > { %vm20415_vm10 = vmmov %vm20402_vm0 }
 0x6e9   : > { %10934 = vmatmul.msk.f32.vlgmr.msra.gmra.mxu0 %vm20401_vm6, %v10931_v9  ;;  %v16711_v21 = vpop.f32.mrf.mxu1  ;;  %vm20416_vm5 = vmmov %vm20402_vm0 }
 0x6ea   : > { %10918 = vmatmul.msk.f32.gmra.mxu2 %vm20400_vm1, %v16389_v56  ;;  %10921 = vmatmul.msk.f32.gmra.mxu3 %vm20402_vm0, %v16389_v56  ;;  %v20412_v56 = vld [vmem:[#allocation25_spill] sm:$0xff]  ;;  %v16703_v25 = vpop.f32.mrf.mxu2  ;;  %20414 = vst [vmem:[#allocation31_spill] sm:$0xff] %v16711_v21  ;;  %vm20418_vm14 = vmmov %vm20402_vm0 }
 0x6eb   : > { %7186 = vmatpush.msra.mxu0 %v20403_v1  ;;  %vm20423_vm9 = vmmov %vm20402_vm0 }
 0x6ec   : > { %v16715_v63 = vpop.f32.mrf.mxu0  ;;  %v16724_v10 = vpop.f32.mrf.mxu3  ;;  %vm20424_vm15 = vmmov %vm20402_vm0 }
 0x6ed   : > { %7187 = vmatpush.msra.mxu0 %v20404_v0  ;;  %20417 = vst [vmem:[#allocation60_spill] sm:$0xff] %v16715_v63  ;;  %vm20425_vm13 = vmmov %vm20402_vm0 }
 0x6ee   : > { %vm20427_vm8 = vmmov %vm20402_vm0 }
 0x6ef   : > { %10937 = vmatmul.msk.f32.vlgmr.msra.gmra.mxu1 %vm20406_vm2, %v10931_v9  ;;  %vm20431_vm7 = vmmov %vm20402_vm0 }
 0x6f0   : > { %7212 = vmatpush.msra.mxu1 %v20408_v40  ;;  %vm20433_vm1 = vmmov %vm20402_vm0 }
 0x6f1   : > { %10935 = vmatmul.msk.f32.gmra.mxu0 %vm20410_vm12, %v10932_v12  ;;  %v16729_v58 = vpop.f32.mrf.mxu1  ;;  %vm20434_vm6 = vmmov %vm20402_vm0 }
 0x6f2   : > { %10919 = vmatmul.msk.f32.gmra.mxu2 %vm20409_vm11, %v16508_v5  ;;  %10922 = vmatmul.msk.f32.gmra.mxu3 %vm20411_vm4, %v16508_v5  ;;  %v20419_v5 = vld [vmem:[#allocation37_spill] sm:$0xff]  ;;  %v16721_v42 = vpop.f32.mrf.mxu2  ;;  %20426 = vst [vmem:[#allocation30_spill] sm:$0xff] %v16729_v58  ;;  %vm20438_vm2 = vmmov %vm20402_vm0 }
 0x6f3   : > { %7213 = vmatpush.msra.mxu1 %v20412_v56  ;;  %v20435_v58 = vld [vmem:[#allocation33_spill] sm:$0xff]  ;;  %vm20439_vm11 = vmmov %vm20402_vm0 }
 0x6f4   : > { %v16733_v53 = vpop.f32.mrf.mxu0  ;;  %v16739_v21 = vpop.f32.mrf.mxu3  ;;  %vm20440_vm12 = vmmov %vm20402_vm0 }
 0x6f5   : > { %20429 = vst [vmem:[#allocation13_spill] sm:$0xff] %v16733_v53  ;;  %vm20441_vm4 = vmmov %vm20402_vm0 }
 0x6f7   : > { %10938 = vmatmul.msk.f32.gmra.mxu1 %vm20413_vm3, %v10932_v12  ;;  %vm20448_vm3 = vmmov %vm20402_vm0 }
 0x6f9   : > { %10936 = vmatmul.msk.f32.gmra.mxu0 %vm20415_vm10, %v10933_v17  ;;  %v16748_v22 = vpop.f32.mrf.mxu1  ;;  %vm20449_vm10 = vmmov %vm20402_vm0 }
 0x6fa   : > { %10940 = vmatmul.msk.f32.vlgmr.msrb.gmra.mxu2 %vm20416_vm5, %v10931_v9  ;;  %10943 = vmatmul.msk.f32.vlgmr.msrb.gmra.mxu3 %vm20418_vm14, %v10931_v9  ;;  %v16736_v63 = vpop.f32.mrf.mxu2  ;;  %20437 = vst [vmem:[#allocation43_spill] sm:$0xff] %v16748_v22  ;;  %v20446_v22 = vld [vmem:[#allocation40_spill] sm:$0xff]  ;;  %vm20450_vm5 = vmmov %vm20402_vm0 }
 0x6fb   : > { %7238 = vmatpush.msrb.mxu2 %v20419_v5  ;;  %7264 = vmatpush.msrb.mxu3 %v20420_v57  ;;  %vm20451_vm14 = vmmov %vm20402_vm0 }
 0x6fc   : > { %v16746_v26 = vpop.f32.mrf.mxu0  ;;  %v16755_v39 = vpop.f32.mrf.mxu3 }
 0x6fd   : > { %7239 = vmatpush.msrb.mxu2 %v20421_v60  ;;  %7265 = vmatpush.msrb.mxu3 %v20422_v34  ;;  %20436 = vst [vmem:[#allocation41_spill] sm:$0xff] %v16746_v26  ;;  %v20445_v26 = vld [vmem:[#allocation34_spill] sm:$0xff] }
 0x6ff   : > { %10939 = vmatmul.msk.f32.gmra.mxu1 %vm20423_vm9, %v10933_v17  ;;  %vm20454_vm9 = vmmov %vm20402_vm0 }
 0x701   : > { %10946 = vmatmul.msk.f32.vlgmr.msrb.gmra.mxu0 %vm20425_vm13, %v10931_v9  ;;  %v16760_v38 = vpop.f32.mrf.mxu1  ;;  %vm20456_vm13 = vmmov %vm20402_vm0 }
 0x702   : > { %10941 = vmatmul.msk.f32.gmra.mxu2 %vm20424_vm15, %v10932_v12  ;;  %10944 = vmatmul.msk.f32.gmra.mxu3 %vm20427_vm8, %v10932_v12  ;;  %v16751_v52 = vpop.f32.mrf.mxu2  ;;  %20444 = vst [vmem:[#allocation17_spill] sm:$0xff] %v16760_v38  ;;  %vm20455_vm15 = vmmov %vm20402_vm0 }
 0x703   : > { %7290 = vmatpush.msrb.mxu0 %v20428_v43  ;;  %vm20457_vm8 = vmmov %vm20402_vm0 }
 0x704   : > { %v16764_v53 = vpop.f32.mrf.mxu0  ;;  %v16778_v4 = vpop.f32.mrf.mxu3 }
 0x705   : > { %7291 = vmatpush.msrb.mxu0 %v20430_v54  ;;  %20447 = vst [vmem:[#allocation49_spill] sm:$0xff] %v16764_v53 }
 0x707   : > { %10949 = vmatmul.msk.f32.vlgmr.msrb.gmra.mxu1 %vm20431_vm7, %v10931_v9  ;;  %vm20460_vm7 = vmmov %vm20402_vm0 }
 0x708   : > { %7316 = vmatpush.msrb.mxu1 %v20432_v55 }
 0x709   : > { %10947 = vmatmul.msk.f32.gmra.mxu0 %vm20434_vm6, %v10932_v12  ;;  %v16776_v38 = vpop.f32.mrf.mxu1  ;;  %vm20462_vm6 = vmmov %vm20402_vm0 }
 0x70a   : > { %10942 = vmatmul.msk.f32.gmra.mxu2 %vm20433_vm1, %v10933_v17  ;;  %10945 = vmatmul.msk.f32.gmra.mxu3 %vm20402_vm0, %v10933_v17  ;;  %20452 = vst [vmem:[#allocation29_spill] sm:$0xff] %v16776_v38  ;;  %vm20461_vm1 = vmmov %vm20402_vm0 }
 0x70b   : > { %7317 = vmatpush.msrb.mxu1 %v20435_v58 }
 0x70c   : > { %v16781_v53 = vpop.f32.mrf.mxu0 }
 0x70d   : > { %20453 = vst [vmem:[#allocation25_spill] sm:$0xff] %v16781_v53 }
 0x70f   : > { %10950 = vmatmul.msk.f32.gmra.mxu1 %vm20438_vm2, %v10932_v12  ;;  %vm20465_vm2 = vmmov %vm20402_vm0 }
 0x711   : > { %10948 = vmatmul.msk.f32.gmra.mxu0 %vm20439_vm11, %v10933_v17  ;;  %vm20466_vm11 = vmmov %vm20402_vm0 }
 0x712   : > { %10952 = vmatmul.msk.f32.vlgmr.msra.gmra.mxu2 %vm20440_vm12, %v10931_v9  ;;  %10955 = vmatmul.msk.f32.vlgmr.msra.gmra.mxu3 %vm20441_vm4, %v10931_v9  ;;  %v16774_v9 = vpop.f32.mrf.mxu2  ;;  %vm20467_vm12 = vmmov %vm20402_vm0 }
 0x713   : > { %7342 = vmatpush.msra.mxu2 %v20442_v8  ;;  %7368 = vmatpush.msra.mxu3 %v20443_v31  ;;  %vm20468_vm4 = vmmov %vm20402_vm0 }
 0x714   : > { %v16798_v53 = vpop.f32.mrf.mxu0 }
 0x715   : > { %7343 = vmatpush.msra.mxu2 %v20445_v26  ;;  %7369 = vmatpush.msra.mxu3 %v20446_v22  ;;  %20459 = vst [vmem:[#allocation51_spill] sm:$0xff] %v16798_v53 }
 0x717   : > { %10951 = vmatmul.msk.f32.gmra.mxu1 %vm20448_vm3, %v10933_v17  ;;  %vm20471_vm3 = vmmov %vm20402_vm0 }
 0x719   : > { %10961 = vmatmul.msk.f32.vlgmr.msra.gmra.mxu0 %vm20450_vm5, %v10958_v35  ;;  %vm20473_vm5 = vmmov %vm20402_vm0 }
 0x71a   : > { %10953 = vmatmul.msk.f32.gmra.mxu2 %vm20449_vm10, %v10932_v12  ;;  %10956 = vmatmul.msk.f32.gmra.mxu3 %vm20451_vm14, %v10932_v12  ;;  %v16796_v12 = vpop.f32.mrf.mxu1  ;;  %vm20472_vm10 = vmmov %vm20402_vm0 }
 0x71b   : > { %7479 = vmatpush.msra.mxu0 %v16265_v59  ;;  %v16792_v59 = vpop.f32.mrf.mxu2  ;;  %20458 = vst [vmem:[#allocation37_spill] sm:$0xff] %v16796_v12  ;;  %vm20474_vm14 = vmmov %vm20402_vm0 }
 0x71c   : > { %v16820_v12 = vpop.f32.mrf.mxu0 }
 0x71d   : > { %7480 = vmatpush.msra.mxu0 %v16163_v30  ;;  %v16794_v30 = vpop.f32.mrf.mxu3  ;;  %20464 = vst [vmem:[#allocation23_spill] sm:$0xff] %v16820_v12 }
 0x71f   : > { %10964 = vmatmul.msk.f32.vlgmr.msra.gmra.mxu1 %vm20454_vm9, %v10958_v35  ;;  %vm20477_vm9 = vmmov %vm20402_vm0 }
 0x720   : > { %7505 = vmatpush.msra.mxu1 %v16370_v49  ;;  %v16803_v49 = vld [vmem:[%s18770_s5 + $0x70] sm:$0xff] }
 0x721   : > { %10962 = vmatmul.msk.f32.gmra.mxu0 %vm20456_vm13, %v10959_v20  ;;  %vm20479_vm13 = vmmov %vm20402_vm0 }
 0x722   : > { %10954 = vmatmul.msk.f32.gmra.mxu2 %vm20455_vm15, %v10933_v17  ;;  %10957 = vmatmul.msk.f32.gmra.mxu3 %vm20457_vm8, %v10933_v17  ;;  %v16817_v53 = vpop.f32.mrf.mxu1  ;;  %vm20478_vm15 = vmmov %vm20402_vm0 }
 0x723   : > { %7506 = vmatpush.msra.mxu1 %v16248_v51  ;;  %v16814_v17 = vpop.f32.mrf.mxu2  ;;  %20463 = vst [vmem:[#allocation45_spill] sm:$0xff] %v16817_v53  ;;  %vm20480_vm8 = vmmov %vm20402_vm0 }
 0x725   : > { %v16812_v51 = vpop.f32.mrf.mxu3 }
 0x727   : > { %10965 = vmatmul.msk.f32.gmra.mxu1 %vm20460_vm7, %v10959_v20  ;;  %vm20484_vm7 = vmmov %vm20402_vm0 }
 0x729   : > { %10963 = vmatmul.msk.f32.gmra.mxu0 %vm20461_vm1, %v16803_v49  ;;  %vm20485_vm1 = vmmov %vm20402_vm0 }
 0x72a   : > { %10967 = vmatmul.msk.f32.vlgmr.msrb.gmra.mxu2 %vm20462_vm6, %v10958_v35  ;;  %10970 = vmatmul.msk.f32.vlgmr.msrb.gmra.mxu3 %vm20402_vm0, %v10958_v35  ;;  %vm20486_vm6 = vmmov %vm20402_vm0 }
 0x72b   : > { %7531 = vmatpush.msrb.mxu2 %v16382_v3  ;;  %7557 = vmatpush.msrb.mxu3 %v16479_v7  ;;  %v16829_v3 = vpop.f32.mrf.mxu1  ;;  %v16831_v7 = vpop.f32.mrf.mxu2 }
 0x72c   : > { %20469 = vst [vmem:[#allocation54_spill] sm:$0xff] %v16829_v3 }
 0x72d   : > { %7532 = vmatpush.msrb.mxu2 %v16499_v36  ;;  %7558 = vmatpush.msrb.mxu3 %v16501_v2  ;;  %v16833_v36 = vpop.f32.mrf.mxu3  ;;  %v16835_v2 = vpop.f32.mrf.mxu0 }
 0x72e   : > { %20470 = vst [vmem:[#allocation19_spill] sm:$0xff] %v16835_v2 }
 0x72f   : > { %10966 = vmatmul.msk.f32.gmra.mxu1 %vm20465_vm2, %v16803_v49  ;;  %vm20489_vm2 = vmmov %vm20402_vm0 }
 0x731   : > { %10973 = vmatmul.msk.f32.vlgmr.msrb.gmra.mxu0 %vm20467_vm12, %v10958_v35  ;;  %vm20492_vm12 = vmmov %vm20402_vm0 }
 0x732   : > { %10968 = vmatmul.msk.f32.gmra.mxu2 %vm20466_vm11, %v10959_v20  ;;  %10971 = vmatmul.msk.f32.gmra.mxu3 %vm20468_vm4, %v10959_v20  ;;  %vm20491_vm11 = vmmov %vm20402_vm0 }
 0x733   : > { %7583 = vmatpush.msrb.mxu0 %v16566_v32  ;;  %v16847_v32 = vpop.f32.mrf.mxu1  ;;  %vm20493_vm4 = vmmov %vm20402_vm0 }
 0x734   : > { %20475 = vst [vmem:[#allocation27_spill] sm:$0xff] %v16847_v32 }
 0x735   : > { %7584 = vmatpush.msrb.mxu0 %v16564_v11  ;;  %v16845_v11 = vpop.f32.mrf.mxu2  ;;  %v16849_v3 = vpop.f32.mrf.mxu3 }
 0x737   : > { %10976 = vmatmul.msk.f32.vlgmr.msrb.gmra.mxu1 %vm20471_vm3, %v10958_v35  ;;  %vm20496_vm3 = vmmov %vm20402_vm0 }
 0x738   : > { %7609 = vmatpush.msrb.mxu1 %v16568_v44  ;;  %v16851_v2 = vpop.f32.mrf.mxu0  ;;  %v20481_v44 = vld [vmem:[#allocation7_spill] sm:$0xff] }
 0x739   : > { %10974 = vmatmul.msk.f32.gmra.mxu0 %vm20473_vm5, %v10959_v20  ;;  %20476 = vst [vmem:[#allocation33_spill] sm:$0xff] %v16851_v2  ;;  %vm20498_vm5 = vmmov %vm20402_vm0 }
 0x73a   : > { %10969 = vmatmul.msk.f32.gmra.mxu2 %vm20472_vm10, %v16803_v49  ;;  %10972 = vmatmul.msk.f32.gmra.mxu3 %vm20474_vm14, %v16803_v49  ;;  %vm20497_vm10 = vmmov %vm20402_vm0 }
 0x73b   : > { %7610 = vmatpush.msrb.mxu1 %v16609_v61  ;;  %vm20499_vm14 = vmmov %vm20402_vm0 }
 0x73d   : > { %v6447_v61 = vpop.f32.mrf.mxu2 }
 0x73e   : > { %v16865_v2 = vadd.f32 %v6447_v61, %v16751_v52 }
 0x73f   : > { %10977 = vmatmul.msk.f32.gmra.mxu1 %vm20477_vm9, %v10959_v20  ;;  %v16861_v32 = vpop.f32.mrf.mxu1  ;;  %vm20504_vm9 = vmmov %vm20402_vm0 }
 0x740   : > { %20482 = vst [vmem:[#allocation58_spill] sm:$0xff] %v16861_v32  ;;  %v6473_v12 = vpop.f32.mrf.mxu3 }
 0x741   : > { %10975 = vmatmul.msk.f32.gmra.mxu0 %vm20478_vm15, %v16803_v49  ;;  %v16868_v53 = vadd.f32 %v6473_v12, %v16755_v39  ;;  %v20488_v39 = vld [vmem:[#allocation47_spill] sm:$0xff]  ;;  %vm20505_vm15 = vmmov %vm20402_vm0 }
 0x742   : > { %10979 = vmatmul.msk.f32.vlgmr.msra.gmra.mxu2 %vm20479_vm13, %v10958_v35  ;;  %10982 = vmatmul.msk.f32.vlgmr.msra.gmra.mxu3 %vm20480_vm8, %v10958_v35  ;;  %v6338_v35 = vadd.f32 %v16774_v9, %v16651_v13  ;;  %v20494_v13 = vld [vmem:[#allocation20_spill] sm:$0xff]  ;;  %v6367_v9 = vadd.f32 %v16794_v30, %v16682_v37  ;;  %v6344_v37 = vadd.f32 %v16814_v17, %v16703_v25  ;;  %vm20506_vm13 = vmmov %vm20402_vm0  ;;  %v20508_v25 = vld [vmem:[#allocation11_spill] sm:$0xff] }
 0x743   : > { %7635 = vmatpush.msra.mxu2 %v16462_v46  ;;  %7661 = vmatpush.msra.mxu3 %v20481_v44  ;;  %v16875_v46 = vld [vmem:[%s18770_s5 + $0x78] sm:$0xff]  ;;  %v6370_v30 = vadd.f32 %v16812_v51, %v16705_v15  ;;  %vm20507_vm8 = vmmov %vm20402_vm0  ;;  %v6442_v15 = vadd.f32 %v16831_v7, %v16721_v42  ;;  %v6468_v51 = vadd.f32 %v16833_v36, %v16724_v10  ;;  %v20514_v42 = vld [vmem:[#allocation8_spill] sm:$0xff] }
 0x744   : > { %v20509_v17 = vld [vmem:[#allocation10_spill] sm:$0xff]  ;;  %v6445_v10 = vadd.f32 %v16845_v11, %v16736_v63  ;;  %v6471_v7 = vadd.f32 %v16849_v3, %v16739_v21  ;;  %v20520_v63 = vld [vmem:[#allocation52_spill] sm:$0xff]  ;;  %v20521_v3 = vld [vmem:[#allocation59_spill] sm:$0xff] }
 0x745   : > { %7636 = vmatpush.msra.mxu2 %v16612_v23  ;;  %7662 = vmatpush.msra.mxu3 %v16260_v48  ;;  %v16870_v38 = vpop.f32.mrf.mxu0  ;;  %v20487_v48 = vld [vmem:[#allocation24_spill] sm:$0xff]  ;;  %v6364_v23 = vadd.f32 %v16778_v4, %v16656_v24  ;;  %v20490_v4 = vld [vmem:[#allocation18_spill] sm:$0xff]  ;;  %v6341_v24 = vadd.f32 %v16792_v59, %v16677_v14 }
 0x746   : > { %20483 = vst [vmem:[#allocation57_spill] sm:$0xff] %v16870_v38  ;;  %v20500_v14 = vld [vmem:[#allocation38_spill] sm:$0xff] }
 0x747   : > { %10978 = vmatmul.msk.f32.gmra.mxu1 %vm20484_vm7, %v16803_v49  ;;  %v20501_v59 = vld [vmem:[#allocation46_spill] sm:$0xff]  ;;  %vm20510_vm7 = vmmov %vm20402_vm0 }
 0x748   : > { %v20519_v21 = vld [vmem:[#allocation22_spill] sm:$0xff] }
 0x749   : > { %10996 = vmatmul.msk.f32.vlgmr.msra.gmra.mxu0 %vm20486_vm6, %v16875_v46  ;;  %vm20513_vm6 = vmmov %vm20402_vm0 }
 0x74a   : > { %10980 = vmatmul.msk.f32.gmra.mxu2 %vm20485_vm1, %v10959_v20  ;;  %10983 = vmatmul.msk.f32.gmra.mxu3 %vm20402_vm0, %v10959_v20  ;;  %v16900_v20 = vld [vmem:[%s18770_s5 + $0x80] sm:$0xff]  ;;  %vm20512_vm1 = vmmov %vm20402_vm0 }
 0x74b   : > { %7804 = vmatpush.msra.mxu0 %v20487_v48 }
 0x74c   : > { %v16889_v52 = vpop.f32.mrf.mxu1  ;;  %v6679_v12 = vpop.f32.mrf.mxu2 }
 0x74d   : > { %7805 = vmatpush.msra.mxu0 %v20488_v39  ;;  %v16891_v44 = vadd.f32 %v6679_v12, %v6338_v35  ;;  %v6705_v61 = vpop.f32.mrf.mxu3  ;;  %v16895_v32 = vpop.f32.mrf.mxu0 }
 0x74e   : > { %v16893_v38 = vadd.f32 %v6705_v61, %v6364_v23 }
 0x74f   : > { %10999 = vmatmul.msk.f32.vlgmr.msra.gmra.mxu1 %vm20489_vm2, %v16875_v46  ;;  %vm20515_vm2 = vmmov %vm20402_vm0 }
 0x750   : > { %7830 = vmatpush.msra.mxu1 %v20490_v4  ;;  %v20502_v4 = vld [vmem:[#allocation55_spill] sm:$0xff] }
 0x751   : > { %10997 = vmatmul.msk.f32.gmra.mxu0 %vm20492_vm12, %v16900_v20  ;;  %vm20517_vm12 = vmmov %vm20402_vm0 }
 0x752   : > { %10981 = vmatmul.msk.f32.gmra.mxu2 %vm20491_vm11, %v16803_v49  ;;  %10984 = vmatmul.msk.f32.gmra.mxu3 %vm20493_vm4, %v16803_v49  ;;  %v16927_v49 = vld [vmem:[%s18770_s5 + $0x88] sm:$0xff]  ;;  %vm20516_vm11 = vmmov %vm20402_vm0 }
 0x753   : > { %7831 = vmatpush.msra.mxu1 %v20494_v13  ;;  %vm20518_vm4 = vmmov %vm20402_vm0 }
 0x754   : > { %v6682_v48 = vpop.f32.mrf.mxu2  ;;  %v16916_v35 = vpop.f32.mrf.mxu1 }
 0x755   : > { %v16918_v23 = vadd.f32 %v6682_v48, %v6341_v24  ;;  %v6708_v39 = vpop.f32.mrf.mxu3 }
 0x756   : > { %v16920_v12 = vadd.f32 %v6708_v39, %v6367_v9  ;;  %v16922_v61 = vpop.f32.mrf.mxu0  ;;  %v20503_v9 = vld [vmem:[#allocation6_spill] sm:$0xff] }
 0x757   : > { %20495 = vst [vmem:[#allocation34_spill] sm:$0xff] %v16922_v61  ;;  %11000 = vmatmul.msk.f32.gmra.mxu1 %vm20496_vm3, %v16900_v20  ;;  %vm20524_vm3 = vmmov %vm20402_vm0 }
 0x759   : > { %10998 = vmatmul.msk.f32.gmra.mxu0 %vm20497_vm10, %v16927_v49 }
 0x75a   : > { %11002 = vmatmul.msk.f32.vlgmr.msrb.gmra.mxu2 %vm20498_vm5, %v16875_v46  ;;  %11005 = vmatmul.msk.f32.vlgmr.msrb.gmra.mxu3 %vm20499_vm14, %v16875_v46  ;;  %vm20527_vm5 = vmmov %vm20402_vm0 }
 0x75b   : > { %7856 = vmatpush.msrb.mxu2 %v20500_v14  ;;  %7882 = vmatpush.msrb.mxu3 %v20501_v59  ;;  %vm20528_vm14 = vmmov %vm20402_vm0 }
 0x75c   : > { %v16944_v24 = vpop.f32.mrf.mxu1 }
 0x75d   : > { %7857 = vmatpush.msrb.mxu2 %v20502_v4  ;;  %v6685_v13 = vpop.f32.mrf.mxu2  ;;  %7883 = vmatpush.msrb.mxu3 %v20503_v9  ;;  %v6711_v39 = vpop.f32.mrf.mxu3 }
 0x75e   : > { %v16947_v48 = vadd.f32 %v6685_v13, %v6344_v37  ;;  %v16949_v61 = vadd.f32 %v6711_v39, %v6370_v30  ;;  %v16951_v14 = vpop.f32.mrf.mxu0  ;;  %v20511_v39 = vld [vmem:[#allocation32_spill] sm:$0xff] }
 0x75f   : > { %11001 = vmatmul.msk.f32.gmra.mxu1 %vm20504_vm9, %v16927_v49  ;;  %vm20529_vm9 = vmmov %vm20402_vm0 }
 0x761   : > { %11008 = vmatmul.msk.f32.vlgmr.msrb.gmra.mxu0 %vm20506_vm13, %v16875_v46  ;;  %vm20532_vm13 = vmmov %vm20402_vm0 }
 0x762   : > { %11003 = vmatmul.msk.f32.gmra.mxu2 %vm20505_vm15, %v16900_v20  ;;  %11006 = vmatmul.msk.f32.gmra.mxu3 %vm20507_vm8, %v16900_v20  ;;  %vm20533_vm8 = vmmov %vm20402_vm0 }
 0x763   : > { %7908 = vmatpush.msrb.mxu0 %v20508_v25 }
 0x764   : > { %v16967_v37 = vpop.f32.mrf.mxu1 }
 0x765   : > { %7909 = vmatpush.msrb.mxu0 %v20509_v17  ;;  %v6783_v59 = vpop.f32.mrf.mxu2  ;;  %v6809_v4 = vpop.f32.mrf.mxu3 }
 0x766   : > { %v16969_v30 = vadd.f32 %v6783_v59, %v6442_v15  ;;  %v16971_v13 = vadd.f32 %v6809_v4, %v6468_v51  ;;  %v16973_v9 = vpop.f32.mrf.mxu0 }
 0x767   : > { %11011 = vmatmul.msk.f32.vlgmr.msrb.gmra.mxu1 %vm20510_vm7, %v16875_v46  ;;  %vm20534_vm7 = vmmov %vm20402_vm0 }
 0x768   : > { %7934 = vmatpush.msrb.mxu1 %v20511_v39  ;;  %v20522_v39 = vld [vmem:[#allocation62_spill] sm:$0xff] }
 0x769   : > { %11009 = vmatmul.msk.f32.gmra.mxu0 %vm20513_vm6, %v16900_v20 }
 0x76a   : > { %11004 = vmatmul.msk.f32.gmra.mxu2 %vm20512_vm1, %v16927_v49  ;;  %11007 = vmatmul.msk.f32.gmra.mxu3 %vm20402_vm0, %v16927_v49  ;;  %vm20535_vm1 = vmmov %vm20402_vm0 }
 0x76b   : > { %7935 = vmatpush.msrb.mxu1 %v20514_v42 }
 0x76c   : > { %v16989_v25 = vpop.f32.mrf.mxu1 }
 0x76d   : > { %v6786_v36 = vpop.f32.mrf.mxu2  ;;  %v6812_v51 = vpop.f32.mrf.mxu3 }
 0x76e   : > { %v16991_v15 = vadd.f32 %v6786_v36, %v6445_v10  ;;  %v16993_v17 = vadd.f32 %v6812_v51, %v6471_v7  ;;  %v16995_v59 = vpop.f32.mrf.mxu0  ;;  %v20525_v51 = vld [vmem:[#allocation36_spill] sm:$0xff] }
 0x76f   : > { %11012 = vmatmul.msk.f32.gmra.mxu1 %vm20515_vm2, %v16900_v20  ;;  %vm20526_vm10 = vnez %v20525_v51 }
 0x771   : > { %11010 = vmatmul.msk.f32.gmra.mxu0 %vm20516_vm11, %v16927_v49  ;;  %vm20540_vm11 = vmmov %vm20402_vm0 }
 0x772   : > { %11014 = vmatmul.msk.f32.vlgmr.msra.gmra.mxu2 %vm20517_vm12, %v16875_v46  ;;  %11017 = vmatmul.msk.f32.vlgmr.msra.gmra.mxu3 %vm20518_vm4, %v16875_v46  ;;  %v17022_v46 = vld [vmem:[%s18770_s5 + $0x90] sm:$0xff]  ;;  %vm20541_vm12 = vmmov %vm20402_vm0 }
 0x773   : > { %7960 = vmatpush.msra.mxu2 %v20519_v21  ;;  %7986 = vmatpush.msra.mxu3 %v20520_v63  ;;  %v11055_v21 = vsel %vm20526_vm10, 1.0, %v19949_v62  ;;  %v20530_v63 = vld [vmem:[#allocation53_spill] sm:$0xff]  ;;  %vm20542_vm4 = vmmov %vm20402_vm0 }
 0x774   : > { %v17008_v4 = vpop.f32.mrf.mxu1  ;;  %vm20531_vm15 = vnez %v20530_v63  ;;  %v17078_v63 = vld [vmem:[%s18770_s5 + $0xa0] sm:$0xff]  ;;  %vm20545_vm10 = vmmov %vm20402_vm0 }
 0x775   : > { %7961 = vmatpush.msra.mxu2 %v20521_v3  ;;  %v6789_v11 = vpop.f32.mrf.mxu2  ;;  %7987 = vmatpush.msra.mxu3 %v20522_v39  ;;  %v6815_v10 = vpop.f32.mrf.mxu3  ;;  %v11056_v3 = vsel %vm20531_vm15, 1.0, %v19949_v62 }
 0x776   : > { %v17012_v42 = vadd.f32 %v6789_v11, %v16865_v2  ;;  %v17015_v7 = vadd.f32 %v6815_v10, %v16868_v53  ;;  %v17017_v36 = vpop.f32.mrf.mxu0  ;;  %v8062_v2 = vmul.f32 %v11055_v21, %v20408_v40  ;;  %v8054_v53 = vmul.f32 %v11055_v21, %v20412_v56  ;;  %v17054_v56 = vld [vmem:[%s18770_s5 + $0x98] sm:$0xff] }
 0x777   : > { %20523 = vst [vmem:[#allocation40_spill] sm:$0xff] %v17017_v36  ;;  %11013 = vmatmul.msk.f32.gmra.mxu1 %vm20524_vm3, %v16927_v49 }
 0x779   : > { %11031 = vmatmul.msk.f32.vlgmr.msra.gmra.mxu0 %vm20528_vm14, %v17022_v46  ;;  %vm20547_vm14 = vmmov %vm20402_vm0 }
 0x77a   : > { %11015 = vmatmul.msk.f32.gmra.mxu2 %vm20527_vm5, %v16900_v20  ;;  %11018 = vmatmul.msk.f32.gmra.mxu3 %vm20529_vm9, %v16900_v20  ;;  %v8063_v20 = vmul.f32 %v11056_v3, %v20419_v5  ;;  %vm20546_vm5 = vmmov %vm20402_vm0 }
 0x77b   : > { %8097 = vmatpush.msra.mxu0 %v8062_v2  ;;  %vm20548_vm9 = vmmov %vm20402_vm0 }
 0x77c   : > { %v17040_v11 = vpop.f32.mrf.mxu1 }
 0x77d   : > { %8098 = vmatpush.msra.mxu0 %v8054_v53  ;;  %v6996_v40 = vpop.f32.mrf.mxu2  ;;  %v7022_v10 = vpop.f32.mrf.mxu3 }
 0x77e   : > { %v17043_v39 = vadd.f32 %v6996_v40, %v16891_v44  ;;  %v17046_v51 = vadd.f32 %v7022_v10, %v16893_v38  ;;  %v17048_v36 = vpop.f32.mrf.mxu0  ;;  %v8055_v44 = vmul.f32 %v11056_v3, %v20421_v60 }
 0x77f   : > { %11034 = vmatmul.msk.f32.vlgmr.msra.gmra.mxu1 %vm20532_vm13, %v17022_v46  ;;  %vm20551_vm13 = vmmov %vm20402_vm0 }
 0x780   : > { %8123 = vmatpush.msra.mxu1 %v8063_v20 }
 0x781   : > { %11032 = vmatmul.msk.f32.gmra.mxu0 %vm20534_vm7, %v17054_v56  ;;  %vm20553_vm7 = vmmov %vm20402_vm0 }
 0x782   : > { %11016 = vmatmul.msk.f32.gmra.mxu2 %vm20533_vm8, %v16927_v49  ;;  %11019 = vmatmul.msk.f32.gmra.mxu3 %vm20535_vm1, %v16927_v49  ;;  %v20536_v49 = vld [vmem:[#allocation14_spill] sm:$0xff]  ;;  %vm20552_vm8 = vmmov %vm20402_vm0 }
 0x783   : > { %8124 = vmatpush.msra.mxu1 %v8055_v44  ;;  %vm20537_vm6 = vnez %v20536_v49  ;;  %vm20554_vm1 = vmmov %vm20402_vm0 }
 0x784   : > { %v17065_v5 = vpop.f32.mrf.mxu1  ;;  %v11058_v3 = vsel %vm20537_vm6, 1.0, %v19949_v62 }
 0x785   : > { %v6999_v38 = vpop.f32.mrf.mxu2  ;;  %v7025_v2 = vpop.f32.mrf.mxu3  ;;  %v8065_v10 = vmul.f32 %v11058_v3, %v20428_v43  ;;  %v8057_v44 = vmul.f32 %v11058_v3, %v20430_v54  ;;  %v20543_v43 = vld [vmem:[#allocation42_spill] sm:$0xff] }
 0x786   : > { %v17068_v21 = vadd.f32 %v6999_v38, %v16918_v23  ;;  %v17071_v53 = vadd.f32 %v7025_v2, %v16920_v12  ;;  %v17073_v60 = vpop.f32.mrf.mxu0  ;;  %v20538_v23 = vld [vmem:[#allocation21_spill] sm:$0xff]  ;;  %vm20544_vm3 = vnez %v20543_v43 }
 0x787   : > { %11035 = vmatmul.msk.f32.gmra.mxu1 %vm20402_vm0, %v17054_v56  ;;  %vm20539_vm2 = vnez %v20538_v23  ;;  %v11059_v23 = vsel %vm20544_vm3, 1.0, %v19949_v62  ;;  %vm20562_vm3 = vmmov %vm20402_vm0 }
 0x788   : > { %v11057_v40 = vsel %vm20539_vm2, 1.0, %v19949_v62  ;;  %v8066_v54 = vmul.f32 %v11059_v23, %v20432_v55 }
 0x789   : > { %v8064_v12 = vmul.f32 %v11057_v40, %v20420_v57  ;;  %11033 = vmatmul.msk.f32.gmra.mxu0 %vm20540_vm11, %v17078_v63  ;;  %v8056_v20 = vmul.f32 %v11057_v40, %v20422_v34  ;;  %vm20559_vm11 = vmmov %vm20402_vm0 }
 0x78a   : > { %11037 = vmatmul.msk.f32.vlgmr.msrb.gmra.mxu2 %vm20541_vm12, %v17022_v46  ;;  %11040 = vmatmul.msk.f32.vlgmr.msrb.gmra.mxu3 %vm20542_vm4, %v17022_v46  ;;  %vm20560_vm12 = vmmov %vm20402_vm0 }
 0x78b   : > { %8149 = vmatpush.msrb.mxu2 %v8064_v12  ;;  %8175 = vmatpush.msrb.mxu3 %v8065_v10  ;;  %v20549_v10 = vld [vmem:[#allocation48_spill] sm:$0xff]  ;;  %vm20561_vm4 = vmmov %vm20402_vm0 }
 0x78c   : > { %v17098_v57 = vpop.f32.mrf.mxu1  ;;  %vm20550_vm15 = vnez %v20549_v10 }
 0x78d   : > { %8150 = vmatpush.msrb.mxu2 %v8056_v20  ;;  %v7002_v38 = vpop.f32.mrf.mxu2  ;;  %8176 = vmatpush.msrb.mxu3 %v8057_v44  ;;  %v7028_v49 = vpop.f32.mrf.mxu3  ;;  %v11060_v20 = vsel %vm20550_vm15, 1.0, %v19949_v62  ;;  %vm20567_vm15 = vmmov %vm20402_vm0 }
 0x78e   : > { %v17101_v2 = vadd.f32 %v7002_v38, %v16947_v48  ;;  %v17107_v12 = vadd.f32 %v7028_v49, %v16949_v61  ;;  %v17109_v34 = vpop.f32.mrf.mxu0  ;;  %v8058_v61 = vmul.f32 %v11059_v23, %v20435_v58  ;;  %v8067_v49 = vmul.f32 %v11060_v20, %v20442_v8 }
 0x78f   : > { %11036 = vmatmul.msk.f32.gmra.mxu1 %vm20545_vm10, %v17078_v63  ;;  %v8059_v58 = vmul.f32 %v11060_v20, %v20445_v26  ;;  %vm20563_vm10 = vmmov %vm20402_vm0 }
 0x791   : > { %11043 = vmatmul.msk.f32.vlgmr.msrb.gmra.mxu0 %vm20547_vm14, %v17022_v46  ;;  %vm20565_vm14 = vmmov %vm20402_vm0 }
 0x792   : > { %11038 = vmatmul.msk.f32.gmra.mxu2 %vm20546_vm5, %v17054_v56  ;;  %11041 = vmatmul.msk.f32.gmra.mxu3 %vm20548_vm9, %v17054_v56  ;;  %vm20564_vm5 = vmmov %vm20402_vm0 }
 0x793   : > { %8201 = vmatpush.msrb.mxu0 %v8066_v54  ;;  %v20555_v54 = vld [vmem:[#allocation44_spill] sm:$0xff]  ;;  %vm20566_vm9 = vmmov %vm20402_vm0 }
 0x794   : > { %v17121_v48 = vpop.f32.mrf.mxu1  ;;  %vm20556_vm6 = vnez %v20555_v54 }
 0x795   : > { %8202 = vmatpush.msrb.mxu0 %v8058_v61  ;;  %v7100_v3 = vpop.f32.mrf.mxu2  ;;  %v7126_v55 = vpop.f32.mrf.mxu3  ;;  %v11062_v61 = vsel %vm20556_vm6, 1.0, %v19949_v62  ;;  %vm20575_vm6 = vmmov %vm20402_vm0 }
 0x796   : > { %v17124_v40 = vadd.f32 %v7100_v3, %v16969_v30  ;;  %v17130_v44 = vadd.f32 %v7126_v55, %v16971_v13  ;;  %v17132_v38 = vpop.f32.mrf.mxu0  ;;  %v20557_v3 = vld [vmem:[#allocation26_spill] sm:$0xff]  ;;  %v8061_v20 = vmul.f32 %v11062_v61, %v20404_v0 }
 0x797   : > { %11046 = vmatmul.msk.f32.vlgmr.msrb.gmra.mxu1 %vm20551_vm13, %v17022_v46  ;;  %vm20558_vm2 = vnez %v20557_v3  ;;  %vm20568_vm13 = vmmov %vm20402_vm0  ;;  %v17235_v3 = vld [vmem:[%s18770_s5 + $0xb8] sm:$0xff] }
 0x798   : > { %8227 = vmatpush.msrb.mxu1 %v8067_v49  ;;  %v11061_v55 = vsel %vm20558_vm2, 1.0, %v19949_v62  ;;  %vm20580_vm2 = vmmov %vm20402_vm0 }
 0x799   : > { %11044 = vmatmul.msk.f32.gmra.mxu0 %vm20553_vm7, %v17054_v56  ;;  %v8060_v10 = vmul.f32 %v11061_v55, %v20446_v22  ;;  %v17185_v22 = vld [vmem:[%s18770_s5 + $0xa8] sm:$0xff]  ;;  %vm20573_vm7 = vmmov %vm20402_vm0 }
 0x79a   : > { %11039 = vmatmul.msk.f32.gmra.mxu2 %vm20552_vm8, %v17078_v63  ;;  %11042 = vmatmul.msk.f32.gmra.mxu3 %vm20554_vm1, %v17078_v63  ;;  %vm20569_vm8 = vmmov %vm20402_vm0 }
 0x79b   : > { %8228 = vmatpush.msrb.mxu1 %v8059_v58  ;;  %vm20574_vm1 = vmmov %vm20402_vm0 }
 0x79c   : > { %v17144_v13 = vpop.f32.mrf.mxu1 }
 0x79d   : > { %v7103_v30 = vpop.f32.mrf.mxu2  ;;  %v7129_v43 = vpop.f32.mrf.mxu3 }
 0x79e   : > { %v17147_v8 = vadd.f32 %v7103_v30, %v16991_v15  ;;  %v17150_v23 = vadd.f32 %v7129_v43, %v16993_v17  ;;  %v17152_v26 = vpop.f32.mrf.mxu0  ;;  %v8068_v15 = vmul.f32 %v11061_v55, %v20443_v31  ;;  %v8069_v17 = vmul.f32 %v11062_v61, %v20403_v1 }
 0x79f   : > { %11047 = vmatmul.msk.f32.gmra.mxu1 %vm20402_vm0, %v17054_v56 }
 0x7a1   : > { %11045 = vmatmul.msk.f32.gmra.mxu0 %vm20559_vm11, %v17078_v63  ;;  %vm20581_vm11 = vmmov %vm20402_vm0 }
 0x7a2   : > { %11049 = vmatmul.msk.f32.vlgmr.msra.gmra.mxu2 %vm20560_vm12, %v17022_v46  ;;  %11052 = vmatmul.msk.f32.vlgmr.msra.gmra.mxu3 %vm20561_vm4, %v17022_v46  ;;  %vm20582_vm12 = vmmov %vm20402_vm0 }
 0x7a3   : > { %8253 = vmatpush.msra.mxu2 %v8068_v15  ;;  %8279 = vmatpush.msra.mxu3 %v8069_v17  ;;  %vm20583_vm4 = vmmov %vm20402_vm0 }
 0x7a4   : > { %v17172_v31 = vpop.f32.mrf.mxu1 }
 0x7a5   : > { %8254 = vmatpush.msra.mxu2 %v8060_v10  ;;  %v7106_v62 = vpop.f32.mrf.mxu2  ;;  %8280 = vmatpush.msra.mxu3 %v8061_v20  ;;  %v7132_v58 = vpop.f32.mrf.mxu3 }
 0x7a6   : > { %v17175_v49 = vadd.f32 %v7106_v62, %v17012_v42  ;;  %v17178_v1 = vadd.f32 %v7132_v58, %v17015_v7  ;;  %v17180_v30 = vpop.f32.mrf.mxu0  ;;  %v20603_v62 = vld [vmem:[#allocation63_spill] sm:$0xff] }
 0x7a7   : > { %11048 = vmatmul.msk.f32.gmra.mxu1 %vm20562_vm3, %v17078_v63  ;;  %vm20587_vm3 = vmmov %vm20402_vm0 }
 0x7a9   : > { %11066 = vmatmul.msk.f32.vlgmr.msra.gmra.mxu0 %vm20564_vm5, %v17185_v22  ;;  %vm20589_vm5 = vmmov %vm20402_vm0 }
 0x7aa   : > { %11050 = vmatmul.msk.f32.gmra.mxu2 %vm20563_vm10, %v17054_v56  ;;  %11053 = vmatmul.msk.f32.gmra.mxu3 %vm20565_vm14, %v17054_v56  ;;  %v17210_v56 = vld [vmem:[%s18770_s5 + $0xb0] sm:$0xff]  ;;  %vm20588_vm10 = vmmov %vm20402_vm0 }
 0x7ab   : > { %8390 = vmatpush.msra.mxu0 %v16372_v18  ;;  %vm20590_vm14 = vmmov %vm20402_vm0 }
 0x7ac   : > { %v17197_v0 = vpop.f32.mrf.mxu1 }
 0x7ad   : > { %8391 = vmatpush.msra.mxu0 %v16262_v47  ;;  %v7241_v42 = vpop.f32.mrf.mxu2  ;;  %v7267_v46 = vpop.f32.mrf.mxu3 }
 0x7ae   : > { %v17200_v7 = vadd.f32 %v7241_v42, %v17043_v39  ;;  %v17203_v43 = vadd.f32 %v7267_v46, %v17046_v51  ;;  %v17205_v54 = vpop.f32.mrf.mxu0 }
 0x7af   : > { %11069 = vmatmul.msk.f32.vlgmr.msra.gmra.mxu1 %vm20566_vm9, %v17185_v22  ;;  %vm20595_vm9 = vmmov %vm20402_vm0 }
 0x7b0   : > { %8416 = vmatpush.msra.mxu1 %v16384_v45 }
 0x7b1   : > { %11067 = vmatmul.msk.f32.gmra.mxu0 %vm20568_vm13, %v17210_v56  ;;  %vm20597_vm13 = vmmov %vm20402_vm0 }
 0x7b2   : > { %11051 = vmatmul.msk.f32.gmra.mxu2 %vm20567_vm15, %v17078_v63  ;;  %11054 = vmatmul.msk.f32.gmra.mxu3 %vm20569_vm8, %v17078_v63  ;;  %vm20596_vm15 = vmmov %vm20402_vm0 }
 0x7b3   : > { %8417 = vmatpush.msra.mxu1 %v16503_v50  ;;  %vm20598_vm8 = vmmov %vm20402_vm0 }
 0x7b4   : > { %v17222_v18 = vpop.f32.mrf.mxu1 }
 0x7b5   : > { %v7244_v47 = vpop.f32.mrf.mxu2  ;;  %v7270_v51 = vpop.f32.mrf.mxu3 }
 0x7b6   : > { %v17225_v39 = vadd.f32 %v7244_v47, %v17068_v21  ;;  %v17228_v45 = vadd.f32 %v7270_v51, %v17071_v53  ;;  %v17230_v61 = vpop.f32.mrf.mxu0  ;;  %v8610_v51 = vld [vmem:[%s18771_s6 + $0x10] sm:$0xff] }
 0x7b7   : > { %20572 = vst [vmem:[#allocation47_spill] sm:$0xff] %v17230_v61  ;;  %11070 = vmatmul.msk.f32.gmra.mxu1 %vm20573_vm7, %v17210_v56  ;;  %vm20607_vm7 = vmmov %vm20402_vm0  ;;  %8623 = vperm.xlu0 %11303, %v8610_v51  }
 0x7b8   : > { %20570 = vst [vmem:[#allocation7_spill] sm:$0xff] %v17225_v39 }
 0x7b9   : > { %20571 = vst [vmem:[#allocation24_spill] sm:$0xff] %v17228_v45  ;;  %11068 = vmatmul.msk.f32.gmra.mxu0 %vm20574_vm1, %v17235_v3  ;;  %vm20608_vm1 = vmmov %vm20402_vm0  ;;  %v20703_v45 = vld [vmem:[#allocation49_spill] sm:$0xff] }
 0x7ba   : > { %11072 = vmatmul.msk.f32.vlgmr.msrb.gmra.mxu2 %vm20575_vm6, %v17185_v22  ;;  %11075 = vmatmul.msk.f32.vlgmr.msrb.gmra.mxu3 %vm20402_vm0, %v17185_v22  ;;  %vm20609_vm6 = vmmov %vm20402_vm0 }
 0x7bb   : > { %8442 = vmatpush.msrb.mxu2 %v16485_v19  ;;  %8468 = vmatpush.msrb.mxu3 %v16570_v16 }
 0x7bc   : > { %v17248_v21 = vpop.f32.mrf.mxu1 }
 0x7bd   : > { %8443 = vmatpush.msrb.mxu2 %v16514_v6  ;;  %v7247_v50 = vpop.f32.mrf.mxu2  ;;  %20576 = vst [vmem:[#allocation18_spill] sm:$0xff] %v17248_v21  ;;  %8469 = vmatpush.msrb.mxu3 %v16574_v29  ;;  %v7273_v63 = vpop.f32.mrf.mxu3  ;;  %v20718_v21 = vld [vmem:[#allocation30_spill] sm:$0xff] }
 0x7be   : > { %v17252_v53 = vadd.f32 %v7247_v50, %v17101_v2  ;;  %v17255_v55 = vadd.f32 %v7273_v63, %v17107_v12  ;;  %v17257_v15 = vpop.f32.mrf.mxu0 }
 0x7bf   : > { %20579 = vst [vmem:[#allocation46_spill] sm:$0xff] %v17257_v15  ;;  %11071 = vmatmul.msk.f32.gmra.mxu1 %vm20580_vm2, %v17235_v3  ;;  %vm20611_vm2 = vmmov %vm20402_vm0  ;;  %v20716_v15 = vld [vmem:[#allocation60_spill] sm:$0xff] }
 0x7c0   : > { %20577 = vst [vmem:[#allocation20_spill] sm:$0xff] %v17252_v53 }
 0x7c1   : > { %20578 = vst [vmem:[#allocation38_spill] sm:$0xff] %v17255_v55  ;;  %11078 = vmatmul.msk.f32.vlgmr.msrb.gmra.mxu0 %vm20582_vm12, %v17185_v22  ;;  %vm20613_vm12 = vmmov %vm20402_vm0 }
 0x7c2   : > { %11073 = vmatmul.msk.f32.gmra.mxu2 %vm20581_vm11, %v17210_v56  ;;  %11076 = vmatmul.msk.f32.gmra.mxu3 %vm20583_vm4, %v17210_v56  ;;  %vm20612_vm11 = vmmov %vm20402_vm0 }
 0x7c3   : > { %8494 = vmatpush.msrb.mxu0 %v16572_v33  ;;  %vm20614_vm4 = vmmov %vm20402_vm0 }
 0x7c4   : > { %v17269_v19 = vpop.f32.mrf.mxu1 }
 0x7c5   : > { %8495 = vmatpush.msrb.mxu0 %v16615_v41  ;;  %20584 = vst [vmem:[#allocation55_spill] sm:$0xff] %v17269_v19  ;;  %v7345_v6 = vpop.f32.mrf.mxu2  ;;  %v7371_v29 = vpop.f32.mrf.mxu3 }
 0x7c6   : > { %v17272_v16 = vadd.f32 %v7345_v6, %v17124_v40  ;;  %v17275_v2 = vadd.f32 %v7371_v29, %v17130_v44  ;;  %v17277_v12 = vpop.f32.mrf.mxu0  ;;  %v11099_v6 = vld [vmem:[%s18770_s5 + $0xc8] sm:$0xff] }
 0x7c7   : > { %11081 = vmatmul.msk.f32.vlgmr.msrb.gmra.mxu1 %vm20587_vm3, %v17185_v22  ;;  %vm20619_vm3 = vmmov %vm20402_vm0 }
 0x7c8   : > { %20585 = vst [vmem:[#allocation6_spill] sm:$0xff] %v17272_v16  ;;  %8520 = vmatpush.msrb.mxu1 %v16465_v27 }
 0x7c9   : > { %20586 = vst [vmem:[#allocation11_spill] sm:$0xff] %v17275_v2  ;;  %11079 = vmatmul.msk.f32.gmra.mxu0 %vm20589_vm5, %v17210_v56  ;;  %vm20621_vm5 = vmmov %vm20402_vm0 }
 0x7ca   : > { %11074 = vmatmul.msk.f32.gmra.mxu2 %vm20588_vm10, %v17235_v3  ;;  %11077 = vmatmul.msk.f32.gmra.mxu3 %vm20590_vm14, %v17235_v3  ;;  %vm20620_vm10 = vmmov %vm20402_vm0 }
 0x7cb   : > { %8521 = vmatpush.msrb.mxu1 %v16618_v28  ;;  %v20599_v28 = vld [vmem:[#allocation9_spill] sm:$0xff]  ;;  %vm20622_vm14 = vmmov %vm20402_vm0 }
 0x7cc   : > { %v17289_v41 = vpop.f32.mrf.mxu1 }
 0x7cd   : > { %v7348_v33 = vpop.f32.mrf.mxu2  ;;  %20591 = vst [vmem:[#allocation10_spill] sm:$0xff] %v17289_v41  ;;  %v7374_v44 = vpop.f32.mrf.mxu3 }
 0x7ce   : > { %v17292_v40 = vadd.f32 %v7348_v33, %v17147_v8  ;;  %v17295_v27 = vadd.f32 %v7374_v44, %v17150_v23  ;;  %v17297_v17 = vpop.f32.mrf.mxu0  ;;  %v20600_v8 = vld [vmem:[#allocation61_spill] sm:$0xff]  ;;  %v20601_v23 = vld [vmem:[#allocation15_spill] sm:$0xff] }
 0x7cf   : > { %20594 = vst [vmem:[#allocation22_spill] sm:$0xff] %v17297_v17  ;;  %11082 = vmatmul.msk.f32.gmra.mxu1 %vm20595_vm9, %v17210_v56  ;;  %vm20627_vm9 = vmmov %vm20402_vm0  ;;  %v20711_v17 = vld [vmem:[#allocation37_spill] sm:$0xff] }
 0x7d0   : > { %20592 = vst [vmem:[#allocation32_spill] sm:$0xff] %v17292_v40 }
 0x7d1   : > { %20593 = vst [vmem:[#allocation8_spill] sm:$0xff] %v17295_v27  ;;  %11080 = vmatmul.msk.f32.gmra.mxu0 %vm20596_vm15, %v17235_v3  ;;  %vm20628_vm15 = vmmov %vm20402_vm0 }
 0x7d2   : > { %11084 = vmatmul.msk.f32.vlgmr.msra.gmra.mxu2 %vm20597_vm13, %v17185_v22  ;;  %11087 = vmatmul.msk.f32.vlgmr.msra.gmra.mxu3 %vm20598_vm8, %v17185_v22  ;;  %v11098_v22 = vld [vmem:[%s18770_s5 + $0xc0] sm:$0xff]  ;;  %vm20629_vm13 = vmmov %vm20402_vm0 }
 0x7d3   : > { %8546 = vmatpush.msra.mxu2 %v20599_v28  ;;  %8572 = vmatpush.msra.mxu3 %v20600_v8  ;;  %v11100_v28 = vld [vmem:[%s18770_s5 + $0xd0] sm:$0xff]  ;;  %vm20630_vm8 = vmmov %vm20402_vm0 }
 0x7d4   : > { %v17310_v20 = vpop.f32.mrf.mxu1 }
 0x7d5   : > { %8547 = vmatpush.msra.mxu2 %v20601_v23  ;;  %v7351_v10 = vpop.f32.mrf.mxu2  ;;  %20602 = vst [vmem:[#allocation52_spill] sm:$0xff] %v17310_v20  ;;  %8573 = vmatpush.msra.mxu3 %v20603_v62  ;;  %v7377_v42 = vpop.f32.mrf.mxu3  ;;  %v20707_v20 = vld [vmem:[#allocation29_spill] sm:$0xff] }
 0x7d6   : > { %v17314_v58 = vadd.f32 %v7351_v10, %v17175_v49  ;;  %v17317_v46 = vadd.f32 %v7377_v42, %v17178_v1  ;;  %v17319_v47 = vpop.f32.mrf.mxu0 }
 0x7d7   : > { %20606 = vst [vmem:[#allocation36_spill] sm:$0xff] %v17319_v47  ;;  %11083 = vmatmul.msk.f32.gmra.mxu1 %vm20607_vm7, %v17235_v3  ;;  %vm20634_vm7 = vmmov %vm20402_vm0 }
 0x7d8   : > { %20604 = vst [vmem:[#allocation59_spill] sm:$0xff] %v17314_v58 }
 0x7d9   : > { %20605 = vst [vmem:[#allocation62_spill] sm:$0xff] %v17317_v46  ;;  %11101 = vmatmul.msk.f32.vlgmr.msra.gmra.mxu0 %vm20609_vm6, %v11098_v22  ;;  %vm20636_vm6 = vmmov %vm20402_vm0 }
 0x7da   : > { %11085 = vmatmul.msk.f32.gmra.mxu2 %vm20608_vm1, %v17210_v56  ;;  %11088 = vmatmul.msk.f32.gmra.mxu3 %vm20402_vm0, %v17210_v56  ;;  %vm20635_vm1 = vmmov %vm20402_vm0 }
 0x7dc   : > { %v17334_v49 = vpop.f32.mrf.mxu1 }
 0x7dd   : > { %20610 = vst [vmem:[#allocation53_spill] sm:$0xff] %v17334_v49  ;;  %v17336_v1 = vpop.f32.mrf.mxu2  ;;  %v17338_v50 = vpop.f32.mrf.mxu3 }
 0x7de   : > { %v17340_v63 = vpop.f32.mrf.mxu0 }
 0x7df   : > { %11104 = vmatmul.msk.f32.vlgmr.msra.gmra.mxu1 %vm20611_vm2, %v11098_v22  ;;  %vm20641_vm2 = vmmov %vm20402_vm0 }
 0x7e1   : > { %11102 = vmatmul.msk.f32.gmra.mxu0 %vm20613_vm12, %v11099_v6  ;;  %vm20643_vm12 = vmmov %vm20402_vm0 }
 0x7e2   : > { %11086 = vmatmul.msk.f32.gmra.mxu2 %vm20612_vm11, %v17235_v3  ;;  %11089 = vmatmul.msk.f32.gmra.mxu3 %vm20614_vm4, %v17235_v3  ;;  %vm20642_vm11 = vmmov %vm20402_vm0 }
 0x7e3   : > { %vm20644_vm4 = vmmov %vm20402_vm0 }
 0x7e4   : > { %v17353_v29 = vpop.f32.mrf.mxu1 }
 0x7e5   : > { %v17351_v56 = vpop.f32.mrf.mxu2  ;;  %20616 = vst [vmem:[#allocation21_spill] sm:$0xff] %v17353_v29  ;;  %v17355_v33 = vpop.f32.mrf.mxu3 }
 0x7e6   : > { %20615 = vst [vmem:[#allocation14_spill] sm:$0xff] %v17351_v56  ;;  %v17357_v44 = vpop.f32.mrf.mxu0  ;;  %v20704_v56 = vld [vmem:[#allocation16_spill] sm:$0xff] }
 0x7e7   : > { %20617 = vst [vmem:[#allocation42_spill] sm:$0xff] %v17355_v33  ;;  %11105 = vmatmul.msk.f32.gmra.mxu1 %vm20619_vm3, %v11099_v6  ;;  %vm20649_vm3 = vmmov %vm20402_vm0 }
 0x7e8   : > { %20618 = vst [vmem:[#allocation48_spill] sm:$0xff] %v17357_v44  ;;  %v20698_v44 = vld [vmem:[#allocation41_spill] sm:$0xff] }
 0x7e9   : > { %11103 = vmatmul.msk.f32.gmra.mxu0 %vm20620_vm10, %v11100_v28  ;;  %vm20650_vm10 = vmmov %vm20402_vm0 }
 0x7ea   : > { %11107 = vmatmul.msk.f32.vlgmr.msrb.gmra.mxu2 %vm20621_vm5, %v11098_v22  ;;  %11110 = vmatmul.msk.f32.vlgmr.msrb.gmra.mxu3 %vm20622_vm14, %v11098_v22  ;;  %vm20651_vm5 = vmmov %vm20402_vm0 }
 0x7eb   : > { %vm20654_vm14 = vmmov %vm20402_vm0 }
 0x7ec   : > { %v17368_v8 = vpop.f32.mrf.mxu1 }
 0x7ed   : > { %v17366_v3 = vpop.f32.mrf.mxu2  ;;  %20624 = vst [vmem:[#allocation26_spill] sm:$0xff] %v17368_v8  ;;  %v17370_v23 = vpop.f32.mrf.mxu3 }
 0x7ee   : > { %20623 = vst [vmem:[#allocation44_spill] sm:$0xff] %v17366_v3  ;;  %v17372_v10 = vpop.f32.mrf.mxu0 }
 0x7ef   : > { %20625 = vst [vmem:[#allocation9_spill] sm:$0xff] %v17370_v23  ;;  %11106 = vmatmul.msk.f32.gmra.mxu1 %vm20627_vm9, %v11100_v28  ;;  %vm20655_vm9 = vmmov %vm20402_vm0 }
 0x7f0   : > { %20626 = vst [vmem:[#allocation61_spill] sm:$0xff] %v17372_v10 }
 0x7f1   : > { %11113 = vmatmul.msk.f32.vlgmr.msrb.gmra.mxu0 %vm20629_vm13, %v11098_v22 }
 0x7f2   : > { %11108 = vmatmul.msk.f32.gmra.mxu2 %vm20628_vm15, %v11099_v6  ;;  %11111 = vmatmul.msk.f32.gmra.mxu3 %vm20630_vm8, %v11099_v6 }
 0x7f4   : > { %v17378_v62 = vpop.f32.mrf.mxu1 }
 0x7f5   : > { %20631 = vst [vmem:[#allocation15_spill] sm:$0xff] %v17378_v62  ;;  %v17380_v42 = vpop.f32.mrf.mxu2  ;;  %v17382_v51 = vpop.f32.mrf.mxu3 }
 0x7f6   : > { %20632 = vst [vmem:[#allocation63_spill] sm:$0xff] %v17380_v42  ;;  %v17384_v46 = vpop.f32.mrf.mxu0 }
 0x7f7   : > { %20633 = vst [vmem:[#allocation66_spill] sm:$0xff] %v17382_v51  ;;  %11116 = vmatmul.msk.f32.vlgmr.msrb.gmra.mxu1 %vm20634_vm7, %v11098_v22 }
 0x7f9   : > { %11114 = vmatmul.msk.f32.gmra.mxu0 %vm20636_vm6, %v11099_v6 }
 0x7fa   : > { %11109 = vmatmul.msk.f32.gmra.mxu2 %vm20635_vm1, %v11100_v28  ;;  %11112 = vmatmul.msk.f32.gmra.mxu3 %vm20402_vm0, %v11100_v28 }
 0x7fc   : > { %v17392_v27 = vpop.f32.mrf.mxu1 }
 0x7fd   : > { %v17390_v58 = vpop.f32.mrf.mxu2  ;;  %20638 = vst [vmem:[#allocation68_spill] sm:$0xff] %v17392_v27  ;;  %v17394_v40 = vpop.f32.mrf.mxu3  ;;  %v20699_v27 = vld [vmem:[#allocation64_spill] sm:$0xff] }
 0x7fe   : > { %20637 = vst [vmem:[#allocation67_spill] sm:$0xff] %v17390_v58  ;;  %v17396_v2 = vpop.f32.mrf.mxu0 }
 0x7ff   : > { %20639 = vst [vmem:[#allocation69_spill] sm:$0xff] %v17394_v40  ;;  %11117 = vmatmul.msk.f32.gmra.mxu1 %vm20641_vm2, %v11099_v6 }
 0x800   : > { %20640 = vst [vmem:[#allocation70_spill] sm:$0xff] %v17396_v2 }
 0x801   : > { %11115 = vmatmul.msk.f32.gmra.mxu0 %vm20642_vm11, %v11100_v28 }
 0x802   : > { %11119 = vmatmul.msk.f32.vlgmr.msra.gmra.mxu2 %vm20643_vm12, %v11098_v22  ;;  %11122 = vmatmul.msk.f32.vlgmr.msra.gmra.mxu3 %vm20644_vm4, %v11098_v22 }
 0x804   : > { %v17404_v42 = vpop.f32.mrf.mxu1 }
 0x805   : > { %v17402_v51 = vpop.f32.mrf.mxu2  ;;  %20646 = vst [vmem:[#allocation72_spill] sm:$0xff] %v17404_v42  ;;  %v17406_v16 = vpop.f32.mrf.mxu3 }
 0x806   : > { %20645 = vst [vmem:[#allocation71_spill] sm:$0xff] %v17402_v51  ;;  %v17408_v58 = vpop.f32.mrf.mxu0 }
 0x807   : > { %20647 = vst [vmem:[#allocation73_spill] sm:$0xff] %v17406_v16  ;;  %11118 = vmatmul.msk.f32.gmra.mxu1 %vm20649_vm3, %v11100_v28 }
 0x808   : > { %20648 = vst [vmem:[#allocation74_spill] sm:$0xff] %v17408_v58 }
 0x80a   : > { %11120 = vmatmul.msk.f32.gmra.mxu2 %vm20650_vm10, %v11099_v6  ;;  %11123 = vmatmul.msk.f32.gmra.mxu3 %vm20651_vm5, %v11099_v6 }
 0x80c   : > { %v17413_v40 = vpop.f32.mrf.mxu1 }
 0x80d   : > { %20652 = vst [vmem:[#allocation75_spill] sm:$0xff] %v17413_v40  ;;  %v17415_v62 = vpop.f32.mrf.mxu2  ;;  %v17417_v49 = vpop.f32.mrf.mxu3 }
 0x80e   : > { %v17419_v22 = vpop.f32.mrf.mxu0 }
 0x80f   : > { %20653 = vst [vmem:[#allocation76_spill] sm:$0xff] %v17419_v22  ;;  %v20723_v22 = vld [vmem:[#allocation58_spill] sm:$0xff] }
 0x812   : > { %11121 = vmatmul.msk.f32.gmra.mxu2 %vm20654_vm14, %v11100_v28  ;;  %11124 = vmatmul.msk.f32.gmra.mxu3 %vm20655_vm9, %v11100_v28 }
 0x814   : > { %v17425_v51 = vpop.f32.mrf.mxu1 }
 0x815   : > { %v17423_v16 = vpop.f32.mrf.mxu2  ;;  %20657 = vst [vmem:[#allocation78_spill] sm:$0xff] %v17425_v51  ;;  %v17427_v19 = vpop.f32.mrf.mxu3 }
 0x816   : > { %20656 = vst [vmem:[#allocation77_spill] sm:$0xff] %v17423_v16  ;;  %v17429_v58 = vpop.f32.mrf.mxu0 }
 0x817   : > { %20658 = vst [vmem:[#allocation79_spill] sm:$0xff] %v17427_v19 }
 0x818   : > { %20659 = vst [vmem:[#allocation80_spill] sm:$0xff] %v17429_v58 }
 0x81c   : > { %v17433_v40 = vpop.f32.mrf.mxu1 }
 0x81d   : > { %v17431_v6 = vpop.f32.mrf.mxu2  ;;  %20661 = vst [vmem:[#allocation82_spill] sm:$0xff] %v17433_v40  ;;  %v17435_v42 = vpop.f32.mrf.mxu3 }
 0x81e   : > { %20660 = vst [vmem:[#allocation81_spill] sm:$0xff] %v17431_v6  ;;  %v17437_v10 = vpop.f32.mrf.mxu0 }
 0x81f   : > { %20662 = vst [vmem:[#allocation83_spill] sm:$0xff] %v17435_v42 }
 0x820   : > { %20663 = vst [vmem:[#allocation84_spill] sm:$0xff] %v17437_v10 }
 0x824   : > { %v17439_v23 = vpop.f32.mrf.mxu1 }
 0x825   : > { %20664 = vst [vmem:[#allocation85_spill] sm:$0xff] %v17439_v23  ;;  %v17441_v55 = vpop.f32.mrf.mxu2  ;;  %v17443_v28 = vpop.f32.mrf.mxu3 }
 0x826   : > { %20665 = vst [vmem:[#allocation86_spill] sm:$0xff] %v17441_v55  ;;  %v17445_v8 = vpop.f32.mrf.mxu0 }
 0x827   : > { %20666 = vst [vmem:[#allocation87_spill] sm:$0xff] %v17443_v28 }
 0x828   : > { %20667 = vst [vmem:[#allocation88_spill] sm:$0xff] %v17445_v8 }
 0x82c   : > { %v17449_v53 = vpop.f32.mrf.mxu1 }
 0x82d   : > { %v17447_v3 = vpop.f32.mrf.mxu2  ;;  %20669 = vst [vmem:[#allocation90_spill] sm:$0xff] %v17449_v53  ;;  %v17451_v47 = vpop.f32.mrf.mxu3 }
 0x82e   : > { %20668 = vst [vmem:[#allocation89_spill] sm:$0xff] %v17447_v3  ;;  %v17453_v6 = vpop.f32.mrf.mxu0 }
 0x82f   : > { %20670 = vst [vmem:[#allocation91_spill] sm:$0xff] %v17451_v47 }
 0x830   : > { %20671 = vst [vmem:[#allocation92_spill] sm:$0xff] %v17453_v6 }
 0x834   : > { %v17457_v42 = vpop.f32.mrf.mxu1 }
 0x835   : > { %v17455_v40 = vpop.f32.mrf.mxu2  ;;  %20673 = vst [vmem:[#allocation94_spill] sm:$0xff] %v17457_v42  ;;  %v17459_v10 = vpop.f32.mrf.mxu3 }
 0x836   : > { %20672 = vst [vmem:[#allocation93_spill] sm:$0xff] %v17455_v40  ;;  %v17461_v23 = vpop.f32.mrf.mxu0 }
 0x837   : > { %20674 = vst [vmem:[#allocation95_spill] sm:$0xff] %v17459_v10 }
 0x838   : > { %20675 = vst [vmem:[#allocation96_spill] sm:$0xff] %v17461_v23 }
 0x83c   : > { %v17463_v55 = vpop.f32.mrf.mxu1 }
 0x83d   : > { %20676 = vst [vmem:[#allocation97_spill] sm:$0xff] %v17463_v55  ;;  %v17465_v28 = vpop.f32.mrf.mxu2  ;;  %v17467_v58 = vpop.f32.mrf.mxu3 }
 0x83e   : > { %20677 = vst [vmem:[#allocation98_spill] sm:$0xff] %v17465_v28  ;;  %v17469_v3 = vpop.f32.mrf.mxu0  ;;  %v20720_v28 = vld [vmem:[#allocation19_spill] sm:$0xff] }
 0x83f   : > { %20678 = vst [vmem:[#allocation99_spill] sm:$0xff] %v17467_v58  ;;  %v20713_v58 = vld [vmem:[#allocation51_spill] sm:$0xff] }
 0x840   : > { %20679 = vst [vmem:[#allocation100_spill] sm:$0xff] %v17469_v3  ;;  %v20709_v3 = vld [vmem:[#allocation25_spill] sm:$0xff] }
 0x844   : > { %v17473_v47 = vpop.f32.mrf.mxu1 }
 0x845   : > { %v17471_v19 = vpop.f32.mrf.mxu2  ;;  %20681 = vst [vmem:[#allocation102_spill] sm:$0xff] %v17473_v47  ;;  %v17475_v6 = vpop.f32.mrf.mxu3 }
 0x846   : > { %20680 = vst [vmem:[#allocation101_spill] sm:$0xff] %v17471_v19  ;;  %v17477_v40 = vpop.f32.mrf.mxu0 }
 0x847   : > { %20682 = vst [vmem:[#allocation103_spill] sm:$0xff] %v17475_v6 }
 0x848   : > { %20683 = vst [vmem:[#allocation104_spill] sm:$0xff] %v17477_v40 }
 0x84c   : > { %v17481_v10 = vpop.f32.mrf.mxu1 }
 0x84d   : > { %v17479_v42 = vpop.f32.mrf.mxu2  ;;  %20685 = vst [vmem:[#allocation106_spill] sm:$0xff] %v17481_v10  ;;  %v17483_v23 = vpop.f32.mrf.mxu3  ;;  %v20696_v10 = vld [vmem:[#allocation13_spill] sm:$0xff] }
 0x84e   : > { %20684 = vst [vmem:[#allocation105_spill] sm:$0xff] %v17479_v42  ;;  %v17485_v55 = vpop.f32.mrf.mxu0  ;;  %v20695_v42 = vld [vmem:[#allocation28_spill] sm:$0xff] }
 0x84f   : > { %20686 = vst [vmem:[#allocation107_spill] sm:$0xff] %v17483_v23  ;;  %v6286_v2 = vadd.f32 %v20696_v10, %v20695_v42  ;;  %v20697_v23 = vld [vmem:[#allocation65_spill] sm:$0xff]  ;;  %v20710_v42 = vld [vmem:[#allocation39_spill] sm:$0xff] }
 0x850   : > { %20687 = vst [vmem:[#allocation108_spill] sm:$0xff] %v17485_v55  ;;  %v6289_v55 = vadd.f32 %v20698_v44, %v20697_v23  ;;  %v6416_v44 = vadd.f32 %v20711_v17, %v20710_v42  ;;  %v20712_v23 = vld [vmem:[#allocation35_spill] sm:$0xff]  ;;  %v20724_v42 = vld [vmem:[#allocation57_spill] sm:$0xff] }
 0x854   : > { %v17487_v53 = vpop.f32.mrf.mxu1 }
 0x855   : > { %20688 = vst [vmem:[#allocation109_spill] sm:$0xff] %v17487_v53  ;;  %v17489_v51 = vpop.f32.mrf.mxu2  ;;  %v17491_v16 = vpop.f32.mrf.mxu3  ;;  %v20700_v53 = vld [vmem:[#allocation43_spill] sm:$0xff] }
 0x856   : > { %20689 = vst [vmem:[#allocation110_spill] sm:$0xff] %v17489_v51  ;;  %v17493_v19 = vpop.f32.mrf.mxu0  ;;  %v6312_v33 = vadd.f32 %v20700_v53, %v20699_v27  ;;  %v6393_v53 = vadd.f32 %v20713_v58, %v20712_v23  ;;  %v20714_v27 = vld [vmem:[#allocation31_spill] sm:$0xff]  ;;  %v6823_v23 = vadd.f32 %v16916_v35, %v6416_v44  ;;  %v20726_v35 = vld [vmem:[#allocation40_spill] sm:$0xff] }
 0x857   : > { %20690 = vst [vmem:[#allocation111_spill] sm:$0xff] %v17491_v16  ;;  %v20702_v16 = vld [vmem:[#allocation50_spill] sm:$0xff] }
 0x858   : > { %20691 = vst [vmem:[#allocation112_spill] sm:$0xff] %v17493_v19  ;;  %v6292_v29 = vadd.f32 %v20703_v45, %v20702_v16  ;;  %v20708_v19 = vld [vmem:[#allocation56_spill] sm:$0xff]  ;;  %v20717_v45 = vld [vmem:[#allocation23_spill] sm:$0xff] }
 0x859   : > { %v6390_v10 = vadd.f32 %v20709_v3, %v20708_v19  ;;  %v6396_v16 = vadd.f32 %v20717_v45, %v20716_v15  ;;  %v20722_v19 = vld [vmem:[#allocation33_spill] sm:$0xff]  ;;  %v20725_v15 = vld [vmem:[#allocation34_spill] sm:$0xff] }
 0x85a   : > { %v6826_v3 = vadd.f32 %v20722_v19, %v6289_v55  ;;  %v6834_v61 = vadd.f32 %v20724_v42, %v6292_v29  ;;  %v20736_v19 = vld [vmem:[#allocation100_spill] sm:$0xff] }
 0x85c   : > { %v17497_v6 = vpop.f32.mrf.mxu1  ;;  %v7143_v29 = vadd.f32 %v16995_v59, %v6826_v3 }
 0x85d   : > { %v17495_v47 = vpop.f32.mrf.mxu2  ;;  %20693 = vst [vmem:[#allocation114_spill] sm:$0xff] %v17497_v6  ;;  %v17499_v40 = vpop.f32.mrf.mxu3  ;;  %v20706_v6 = vld [vmem:[#allocation12_spill] sm:$0xff] }
 0x85e   : > { %20692 = vst [vmem:[#allocation113_spill] sm:$0xff] %v17495_v47  ;;  %v17507_v51 = vpop.f32.mrf.mxu0  ;;  %v20705_v47 = vld [vmem:[#allocation17_spill] sm:$0xff] }
 0x85f   : > { %20694 = vst [vmem:[#allocation115_spill] sm:$0xff] %v17499_v40  ;;  %v6315_v39 = vadd.f32 %v20705_v47, %v20704_v56  ;;  %v6318_v40 = vadd.f32 %v20707_v20, %v20706_v6  ;;  %v20719_v47 = vld [vmem:[#allocation54_spill] sm:$0xff]  ;;  %v6818_v20 = vadd.f32 %v20720_v28, %v6286_v2  ;;  %v20721_v6 = vld [vmem:[#allocation27_spill] sm:$0xff] }
 0x860   : > { %20701 = vst [vmem:[#allocation28_spill] sm:$0xff] %v17507_v51  ;;  %v20715_v51 = vld [vmem:[#allocation45_spill] sm:$0xff]  ;;  %v6422_v56 = vadd.f32 %v20719_v47, %v20718_v21  ;;  %v6819_v8 = vadd.f32 %v20721_v6, %v6312_v33  ;;  %v6838_v33 = vadd.f32 %v16951_v14, %v6396_v16 }
 0x861   : > { %v6419_v41 = vadd.f32 %v20715_v51, %v20714_v27  ;;  %v6827_v17 = vadd.f32 %v20723_v22, %v6315_v39  ;;  %v6835_v58 = vadd.f32 %v16889_v52, %v6318_v40  ;;  %v6822_v51 = vadd.f32 %v16895_v32, %v6390_v10 }
 0x862   : > { %v6830_v27 = vadd.f32 %v20725_v15, %v6393_v53  ;;  %v7135_v2 = vadd.f32 %v16973_v9, %v6818_v20  ;;  %v6839_v55 = vadd.f32 %v16967_v37, %v6422_v56  ;;  %v7136_v39 = vadd.f32 %v16989_v25, %v6819_v8  ;;  %v20738_v15 = vld [vmem:[#allocation52_spill] sm:$0xff] }
 0x863   : > { %v6831_v21 = vadd.f32 %v16944_v24, %v6419_v41  ;;  %v7144_v32 = vadd.f32 %v17008_v4, %v6827_v17  ;;  %v7151_v40 = vadd.f32 %v20726_v35, %v6834_v61  ;;  %v7139_v24 = vadd.f32 %v17048_v36, %v6822_v51  ;;  %v20737_v17 = vld [vmem:[#allocation112_spill] sm:$0xff] }
 0x864   : > { %v17544_v52 = vpop.f32.mrf.mxu1  ;;  %v7380_v9 = vadd.f32 %v17132_v38, %v7135_v2  ;;  %v7152_v14 = vadd.f32 %v17040_v11, %v6835_v58  ;;  %v7140_v37 = vadd.f32 %v17065_v5, %v6823_v23  ;;  %v7147_v25 = vadd.f32 %v17073_v60, %v6830_v27  ;;  %v17593_v23 = vpop.permute.xlu1 %8613  ;;  %v20740_v2 = vld [vmem:[#allocation14_spill] sm:$0xff]  ;;  %v20742_v35 = vld [vmem:[#allocation24_spill] sm:$0xff] }
 0x865   : > { %v17542_v22 = vpop.f32.mrf.mxu2  ;;  %v17550_v41 = vpop.f32.mrf.mxu3  ;;  %v7148_v59 = vadd.f32 %v17098_v57, %v6831_v21  ;;  %v7155_v4 = vadd.f32 %v17109_v34, %v6838_v33  ;;  %v7384_v61 = vadd.f32 %v17205_v54, %v7139_v24  ;;  %v7675_v38 = vadd.f32 %v17336_v1, %v17200_v7  ;;  %v20727_v1 = vld [vmem:[#allocation47_spill] sm:$0xff] }
 0x866   : > { %v17556_v8 = vpop.f32.mrf.mxu0  ;;  %v7673_v36 = vadd.f32 %v17277_v12, %v7380_v9  ;;  %v17564_v28 = vadd.f32 %v17121_v48, %v6839_v55  ;;  %v7381_v11 = vadd.f32 %v17144_v13, %v7136_v39  ;;  %v7388_v5 = vadd.f32 %v17152_v26, %v7143_v29  ;;  %v20739_v21 = vld [vmem:[#allocation7_spill] sm:$0xff]  ;;  %v20741_v55 = vld [vmem:[#allocation21_spill] sm:$0xff]  ;;  %v20744_v9 = vld [vmem:[#allocation68_spill] sm:$0xff] }
 0x867   : > { %v7676_v60 = vadd.f32 %v17338_v50, %v17203_v43  ;;  %v7389_v57 = vadd.f32 %v17172_v31, %v7144_v32  ;;  %v7677_v34 = vadd.f32 %v17340_v63, %v7384_v61  ;;  %v8000_v12 = vadd.f32 %v17415_v62, %v7675_v38  ;;  %v20728_v43 = vld [vmem:[#allocation76_spill] sm:$0xff]  ;;  %v20730_v63 = vld [vmem:[#allocation98_spill] sm:$0xff]  ;;  %v20747_v38 = vld [vmem:[#allocation77_spill] sm:$0xff] }
 0x868   : > { %v7998_v54 = vadd.f32 %v17384_v46, %v7673_v36  ;;  %v7396_v7 = vadd.f32 %v17180_v30, %v7151_v40  ;;  %v17576_v48 = vadd.f32 %v17197_v0, %v7152_v14  ;;  %v7385_v13 = vadd.f32 %v17222_v18, %v7140_v37  ;;  %v20729_v31 = vld [vmem:[#allocation88_spill] sm:$0xff]  ;;  %v20731_v46 = vld [vmem:[#allocation18_spill] sm:$0xff]  ;;  %v20734_v0 = vld [vmem:[#allocation99_spill] sm:$0xff] }
 0x869   : > { %v8001_v26 = vadd.f32 %v17417_v49, %v7676_v60  ;;  %v7392_v10 = vadd.f32 %v20727_v1, %v7147_v25  ;;  %v8002_v50 = vadd.f32 %v20728_v43, %v7677_v34  ;;  %v8293_v53 = vadd.f32 %v20730_v63, %v8000_v12  ;;  %v20732_v62 = vld [vmem:[#allocation46_spill] sm:$0xff]  ;;  %v20753_v63 = vld [vmem:[#allocation101_spill] sm:$0xff] }
 0x86a   : > { %v8291_v44 = vadd.f32 %v20729_v31, %v7998_v54  ;;  %v7393_v45 = vadd.f32 %v20731_v46, %v7148_v59  ;;  %v7400_v16 = vadd.f32 %v20732_v62, %v7155_v4  ;;  %v20733_v30 = vld [vmem:[#allocation10_spill] sm:$0xff]  ;;  %v7682_v27 = vadd.f32 %v20738_v15, %v7389_v57  ;;  %v20745_v59 = vld [vmem:[#allocation48_spill] sm:$0xff] }
 0x86b   : > { %v7674_v47 = vadd.f32 %v20733_v30, %v7381_v11  ;;  %v8294_v56 = vadd.f32 %v20734_v0, %v8001_v26  ;;  %v20735_v49 = vld [vmem:[#allocation22_spill] sm:$0xff]  ;;  %v8295_v3 = vadd.f32 %v20736_v19, %v8002_v50  ;;  %v7683_v33 = vadd.f32 %v20740_v2, %v20739_v21  ;;  %v20750_v26 = vld [vmem:[#allocation79_spill] sm:$0xff]  ;;  %v20752_v50 = vld [vmem:[#allocation92_spill] sm:$0xff] }
 0x86c   : > { %v17588_v20 = vpop.f32.mrf.mxu1  ;;  %v7681_v6 = vadd.f32 %v20735_v49, %v7388_v5  ;;  %v8584_v42 = vadd.f32 %v20737_v17, %v8291_v44  ;;  %v7678_v39 = vadd.f32 %v20741_v55, %v7385_v13  ;;  %v20743_v40 = vld [vmem:[#allocation42_spill] sm:$0xff]  ;;  %v7685_v4 = vadd.f32 %v20745_v59, %v7392_v10  ;;  %v20751_v10 = vld [vmem:[#allocation80_spill] sm:$0xff] }
 0x86d   : > { %v8445_v18 = vpop.f32.mrf.mxu2  ;;  %v8471_v51 = vpop.f32.mrf.mxu3  ;;  %v7684_v24 = vadd.f32 %v20743_v40, %v20742_v35  ;;  %v7999_v14 = vadd.f32 %v20744_v9, %v7674_v47  ;;  %v20746_v61 = vld [vmem:[#allocation70_spill] sm:$0xff]  ;;  %v8008_v11 = vadd.f32 %v20747_v38, %v7683_v33  ;;  %v20757_v49 = vld [vmem:[#allocation20_spill] sm:$0xff]  ;;  %v20764_v40 = vld [vmem:[#allocation9_spill] sm:$0xff] }
 0x86e   : > { %v8586_v58 = vadd.f32 %v8445_v18, %v8293_v53  ;;  %v8587_v29 = vadd.f32 %v8471_v51, %v8294_v56  ;;  %v8497_v32 = vpop.f32.mrf.mxu0  ;;  %v8006_v36 = vadd.f32 %v20746_v61, %v7681_v6  ;;  %v20748_v60 = vld [vmem:[#allocation78_spill] sm:$0xff]  ;;  %v17614_v12 = vadd.f32 %v17593_v23, %v8584_v42  ;;  %v20756_v56 = vld [vmem:[#allocation36_spill] sm:$0xff]  ;;  %v20760_v42 = vld [vmem:[#allocation103_spill] sm:$0xff] }
 0x86f   : > { %v8588_v25 = vadd.f32 %v8497_v32, %v8295_v3  ;;  %v8003_v57 = vadd.f32 %v20748_v60, %v7678_v39  ;;  %v20749_v34 = vld [vmem:[#allocation90_spill] sm:$0xff]  ;;  %v8009_v1 = vadd.f32 %v20750_v26, %v7684_v24  ;;  %v8010_v43 = vadd.f32 %v20751_v10, %v7685_v4  ;;  %v20758_v6 = vld [vmem:[#allocation44_spill] sm:$0xff]  ;;  %v20765_v24 = vld [vmem:[#allocation61_spill] sm:$0xff] }
 0x870   : > { %v17603_v37 = vadd.f32 %v17593_v23, %v8586_v58  ;;  %v17609_v5 = vadd.f32 %v17593_v23, %v8587_v29  ;;  %v8292_v54 = vadd.f32 %v20749_v34, %v7999_v14  ;;  %v8299_v31 = vadd.f32 %v20752_v50, %v8006_v36  ;;  %v20754_v46 = vld [vmem:[#allocation102_spill] sm:$0xff]  ;;  %v20761_v21 = vld [vmem:[#allocation104_spill] sm:$0xff]  ;;  %v20768_v34 = vld [vmem:[#allocation81_spill] sm:$0xff] }
 0x871   : > { %v17617_v13 = vadd.f32 %v17593_v23, %v8588_v25  ;;  %v8301_v53 = vadd.f32 %v20753_v63, %v8008_v11  ;;  %v8296_v62 = vadd.f32 %v20754_v46, %v8003_v57  ;;  %v20755_v30 = vld [vmem:[#allocation114_spill] sm:$0xff]  ;;  %v7689_v18 = vadd.f32 %v20756_v56, %v7396_v7  ;;  %v20762_v33 = vld [vmem:[#allocation28_spill] sm:$0xff]  ;;  %v17638_v7 = vpop.permute.xlu2 %8618 }
 0x872   : > { %v11304_v44 = vpack.i.bf16 %v17609_v5, %v17603_v37  ;;  %v8585_v47 = vadd.f32 %v20755_v30, %v8292_v54  ;;  %v7691_v19 = vadd.f32 %v20758_v6, %v20757_v49  ;;  %v20759_v3 = vld [vmem:[#allocation26_spill] sm:$0xff]  ;;  %v8302_v58 = vadd.f32 %v20760_v42, %v8009_v1  ;;  %v20766_v14 = vld [vmem:[#allocation72_spill] sm:$0xff]  ;;  %v20777_v42 = vld [vmem:[#allocation53_spill] sm:$0xff] }
 0x873   : > { %v11314_v0 = vpack.i.bf16 %v17614_v12, %v17617_v13  ;;  %v7686_v17 = vadd.f32 %v20759_v3, %v7393_v45  ;;  %v8303_v2 = vadd.f32 %v20761_v21, %v8010_v43  ;;  %v8592_v55 = vadd.f32 %v20762_v33, %v8299_v31  ;;  %v20763_v35 = vld [vmem:[#allocation38_spill] sm:$0xff]  ;;  %v20776_v3 = vld [vmem:[#allocation55_spill] sm:$0xff]  ;;  %v20779_v21 = vld [vmem:[#allocation108_spill] sm:$0xff] }
 0x874   : > { %11305 = vrot.lane.b32.xlu1 %v11304_v44, %s11448_s20  ;;  %v8523_v15 = vpop.f32.mrf.mxu1  ;;  %v7692_v45 = vadd.f32 %v20764_v40, %v20763_v35  ;;  %v7693_v9 = vadd.f32 %v20765_v24, %v7400_v16  ;;  %v8007_v25 = vadd.f32 %v20766_v14, %v7682_v27  ;;  %v17645_v61 = vadd.f32 %v17593_v23, %v8585_v47  ;;  %v20767_v60 = vld [vmem:[#allocation74_spill] sm:$0xff]  ;;  %v20771_v44 = vld [vmem:[#allocation83_spill] sm:$0xff]  ;;  %v20774_v47 = vld [vmem:[#allocation105_spill] sm:$0xff] }
 0x875   : > { %v8448_v51 = vpop.f32.mrf.mxu2  ;;  %v8474_v29 = vpop.f32.mrf.mxu3  ;;  %v8589_v32 = vadd.f32 %v8523_v15, %v8296_v62  ;;  %11315 = vrot.lane.b32.xlu2 %v11314_v0, %s11448_s20  ;;  %v8014_v57 = vadd.f32 %v20767_v60, %v7689_v18  ;;  %v8016_v54 = vadd.f32 %v20768_v34, %v7691_v19  ;;  %v20769_v26 = vld [vmem:[#allocation82_spill] sm:$0xff]  ;;  %v17661_v43 = vadd.f32 %v17638_v7, %v8592_v55  ;;  %v20773_v62 = vld [vmem:[#allocation96_spill] sm:$0xff]  ;;  %v20780_v35 = vld [vmem:[#allocation15_spill] sm:$0xff] }
 0x876   : > { %v8594_v39 = vadd.f32 %v8448_v51, %v8301_v53  ;;  %v8595_v59 = vadd.f32 %v8474_v29, %v8302_v58  ;;  %v8500_v4 = vpop.f32.mrf.mxu0  ;;  %v8011_v16 = vadd.f32 %v20769_v26, %v7686_v17  ;;  %v20770_v1 = vld [vmem:[#allocation94_spill] sm:$0xff]  ;;  %v8017_v63 = vadd.f32 %v20771_v44, %v7692_v45  ;;  %v20772_v53 = vld [vmem:[#allocation84_spill] sm:$0xff]  ;;  %v20778_v51 = vld [vmem:[#allocation107_spill] sm:$0xff] }
 0x877   : > { %v17651_v38 = vadd.f32 %v17593_v23, %v8589_v32  ;;  %v8596_v11 = vadd.f32 %v8500_v4, %v8303_v2  ;;  %v8300_v10 = vadd.f32 %v20770_v1, %v8007_v25  ;;  %v8018_v46 = vadd.f32 %v20772_v53, %v7693_v9  ;;  %v20775_v56 = vld [vmem:[#allocation106_spill] sm:$0xff]  ;;  %v20782_v24 = vld [vmem:[#allocation63_spill] sm:$0xff] }
 0x878   : > { %v17648_v36 = vadd.f32 %v17638_v7, %v8594_v39  ;;  %v17657_v27 = vadd.f32 %v17638_v7, %v8595_v59  ;;  %v8307_v30 = vadd.f32 %v20773_v62, %v8014_v57  ;;  %v8309_v0 = vadd.f32 %v20774_v47, %v8016_v54  ;;  %v8841_v55 = vld [vmem:[%s18772_s7 + $0x178] sm:$0xff]  ;;  %v17698_v59 = vpop.permute.xlu0 %8623  ;;  %v8839_v54 = vld [vmem:[%s18772_s7 + $0x168] sm:$0xff] }
 0x879   : > { %v11309_v50 = vpack.i.bf16 %v17651_v38, %v17645_v61  ;;  %v17666_v31 = vadd.f32 %v17638_v7, %v8596_v11  ;;  %v8304_v18 = vadd.f32 %v20775_v56, %v8011_v16  ;;  %v8593_v49 = vadd.f32 %v17544_v52, %v8300_v10  ;;  %v20781_v45 = vld [vmem:[#allocation6_spill] sm:$0xff]  ;;  %v20783_v14 = vld [vmem:[#allocation75_spill] sm:$0xff]  ;;  %8974 = vmatpush.msrb.mxu2 %v8841_v55  ;;  %v20786_v10 = vld [vmem:[#allocation85_spill] sm:$0xff] }
 0x87a   : > { %v11319_v6 = vpack.i.bf16 %v17657_v27, %v17648_v36  ;;  %v7401_v17 = vadd.f32 %v20776_v3, %v17564_v28  ;;  %v7690_v58 = vadd.f32 %v20777_v42, %v17576_v48  ;;  %v8310_v15 = vadd.f32 %v20778_v51, %v8017_v63  ;;  %v8840_v48 = vld [vmem:[%s18772_s7 + $0x170] sm:$0xff]  ;;  %v20784_v26 = vld [vmem:[#allocation11_spill] sm:$0xff] }
 0x87b   : > { %v11334_v19 = vpack.i.bf16 %v17661_v43, %v17666_v31  ;;  %v8311_v2 = vadd.f32 %v20779_v21, %v8018_v46  ;;  %v8600_v39 = vadd.f32 %v17556_v8, %v8307_v30  ;;  %v7679_v9 = vadd.f32 %v20782_v24, %v20781_v45  ;;  %v20785_v16 = vld [vmem:[#allocation66_spill] sm:$0xff]  ;;  %8975 = vmatpush.msrb.mxu2 %v8840_v48  ;;  %v20788_v46 = vld [vmem:[#allocation97_spill] sm:$0xff]  ;;  %v20789_v56 = vld [vmem:[#allocation87_spill] sm:$0xff] }
 0x87c   : > { %11310 = vrot.lane.b32.xlu1 %v11309_v50, %s11448_s20  ;;  %v8526_v52 = vpop.f32.mrf.mxu1  ;;  %v7694_v40 = vadd.f32 %v20780_v35, %v7401_v17  ;;  %v8015_v25 = vadd.f32 %v20783_v14, %v7690_v58  ;;  %v17701_v11 = vadd.f32 %v17638_v7, %v8593_v49  ;;  %v7680_v1 = vadd.f32 %v20785_v16, %v20784_v26  ;;  %v20787_v44 = vld [vmem:[#allocation86_spill] sm:$0xff]  ;;  %v20790_v49 = vld [vmem:[#allocation109_spill] sm:$0xff]  ;;  %v20792_v51 = vld [vmem:[#allocation111_spill] sm:$0xff] }
 0x87d   : > { %v8451_v33 = vpop.f32.mrf.mxu2  ;;  %v8477_v32 = vpop.f32.mrf.mxu3  ;;  %v8597_v28 = vadd.f32 %v8526_v52, %v8304_v18  ;;  %11335 = vrot.lane.b32.xlu0 %v11334_v19, %s11448_s20  ;;  %11320 = vrot.lane.b32.xlu2 %v11319_v6, %s11448_s20  ;;  %v8004_v63 = vadd.f32 %v20787_v44, %v7679_v9  ;;  %v17723_v47 = vadd.f32 %v17698_v59, %v8600_v39  ;;  %v20791_v19 = vld [vmem:[#allocation110_spill] sm:$0xff]  ;;  %v20793_v39 = vld [vmem:[#allocation32_spill] sm:$0xff]  ;;  %v20796_v45 = vld [vmem:[#allocation69_spill] sm:$0xff] }
 0x87e   : > { %v8602_v29 = vadd.f32 %v8451_v33, %v8309_v0  ;;  %v8603_v8 = vadd.f32 %v8477_v32, %v8310_v15  ;;  %v8503_v4 = vpop.f32.mrf.mxu0  ;;  %v8019_v50 = vadd.f32 %v20786_v10, %v7694_v40  ;;  %v8308_v62 = vadd.f32 %v20788_v46, %v8015_v25  ;;  %8976 = vmatpush.msrb.mxu2 %v8839_v54  ;;  %v20795_v40 = vld [vmem:[#allocation8_spill] sm:$0xff]  ;;  %v20797_v14 = vld [vmem:[#allocation89_spill] sm:$0xff]  ;;  %v20801_v46 = vld [vmem:[#allocation59_spill] sm:$0xff] }
 0x87f   : > { %v17707_v57 = vadd.f32 %v17638_v7, %v8597_v28  ;;  %v8604_v34 = vadd.f32 %v8503_v4, %v8311_v2  ;;  %v8005_v18 = vadd.f32 %v20789_v56, %v7680_v1  ;;  %v8297_v3 = vadd.f32 %v20791_v19, %v8004_v63  ;;  %v20798_v4 = vld [vmem:[#allocation91_spill] sm:$0xff]  ;;  %v20799_v54 = vld [vmem:[#allocation113_spill] sm:$0xff] }
 0x880   : > { %v17704_v60 = vadd.f32 %v17698_v59, %v8602_v29  ;;  %v17717_v53 = vadd.f32 %v17698_v59, %v8603_v8  ;;  %v8312_v6 = vadd.f32 %v20790_v49, %v8019_v50  ;;  %v8601_v17 = vadd.f32 %v17588_v20, %v8308_v62  ;;  %v20794_v29 = vld [vmem:[#allocation67_spill] sm:$0xff]  ;;  %v20804_v49 = vld [vmem:[#allocation73_spill] sm:$0xff] }
 0x881   : > { %v11324_v30 = vpack.i.bf16 %v17707_v57, %v17701_v11  ;;  %v17726_v0 = vadd.f32 %v17698_v59, %v8604_v34  ;;  %v8298_v15 = vadd.f32 %v20792_v51, %v8005_v18  ;;  %v7687_v32 = vadd.f32 %v20794_v29, %v20793_v39  ;;  %v20800_v1 = vld [vmem:[#allocation115_spill] sm:$0xff]  ;;  %v20803_v18 = vld [vmem:[#allocation62_spill] sm:$0xff] }
 0x882   : > { %v11329_v42 = vpack.i.bf16 %v17717_v53, %v17704_v60  ;;  %v17743_v28 = vadd.f32 %v17698_v59, %v8601_v17  ;;  %v7688_v24 = vadd.f32 %v20796_v45, %v20795_v40  ;;  %v20802_v62 = vld [vmem:[#allocation71_spill] sm:$0xff]  ;;  %v8824_v40 = vld [vmem:[%s18772_s7 + $0xf0] sm:$0xff] }
 0x883   : > { %v11339_v58 = vpack.i.bf16 %v17723_v47, %v17726_v0  ;;  %v8012_v25 = vadd.f32 %v20797_v14, %v7687_v32  ;;  %v8838_v29 = vld [vmem:[%s18772_s7 + $0x160] sm:$0xff]  ;;  %v8808_v32 = vld [vmem:[%s18772_s7 + $0x70] sm:$0xff]  ;;  %v8837_v45 = vld [vmem:[%s18772_s7 + $0x158] sm:$0xff] }
 0x884   : > { %11325 = vrot.lane.b32.xlu1 %v11324_v30, %s11448_s20  ;;  %v8529_v21 = vpop.f32.mrf.mxu1  ;;  %v8013_v34 = vadd.f32 %v20798_v4, %v7688_v24  ;;  %v7695_v30 = vadd.f32 %v20802_v62, %v20801_v46  ;;  %8977 = vmatpush.msrb.mxu2 %v8838_v29  ;;  %v8856_v24 = vld [vmem:[%s18772_s7 + $0x1f0] sm:$0xff]  ;;  %v8807_v14 = vld [vmem:[%s18772_s7 + $0x68] sm:$0xff]  ;;  %v8833_v46 = vld [vmem:[%s18772_s7 + $0x138] sm:$0xff] }
 0x885   : > { %v8549_v2 = vpop.f32.mrf.mxu2  ;;  %v8605_v33 = vadd.f32 %v8529_v21, %v8312_v6  ;;  %v8575_v55 = vpop.f32.mrf.mxu3  ;;  %11340 = vrot.lane.b32.xlu0 %v11339_v58, %s11448_s20  ;;  %11330 = vrot.lane.b32.xlu2 %v11329_v42, %s11448_s20  ;;  %v8305_v26 = vadd.f32 %v20799_v54, %v8012_v25  ;;  %v7696_v6 = vadd.f32 %v20804_v49, %v20803_v18  ;;  %v20806_v42 = vld [vmem:[#allocation95_spill] sm:$0xff]  ;;  %v8823_v25 = vld [vmem:[%s18772_s7 + $0xe8] sm:$0xff]  ;;  %v8852_v62 = vld [vmem:[%s18772_s7 + $0x1d0] sm:$0xff] }
 0x886   : > { %v8590_v52 = vadd.f32 %v8549_v2, %v8297_v3  ;;  %v8591_v20 = vadd.f32 %v8575_v55, %v8298_v15  ;;  %v8306_v10 = vadd.f32 %v20800_v1, %v8013_v34  ;;  %v20805_v3 = vld [vmem:[#allocation93_spill] sm:$0xff]  ;;  %8978 = vmatpush.msrb.mxu2 %v8837_v45  ;;  %v8806_v34 = vld [vmem:[%s18772_s7 + $0x60] sm:$0xff]  ;;  %v8805_v1 = vld [vmem:[%s18772_s7 + $0x58] sm:$0xff] }
 0x887   : > { %v17746_v48 = vadd.f32 %v17698_v59, %v8605_v33  ;;  %v8020_v17 = vadd.f32 %v20805_v3, %v7695_v30  ;;  %v8021_v58 = vadd.f32 %v20806_v42, %v7696_v6  ;;  %v8855_v4 = vld [vmem:[%s18772_s7 + $0x1e8] sm:$0xff]  ;;  %v8822_v54 = vld [vmem:[%s18772_s7 + $0xe0] sm:$0xff]  ;;  %v8832_v49 = vld [vmem:[%s18772_s7 + $0x130] sm:$0xff] }
 0x888   : > { %v17749_v35 = vadd.f32 %v17593_v23, %v8590_v52  ;;  %v17754_v9 = vadd.f32 %v17593_v23, %v8591_v20  ;;  %v8803_v30 = vld [vmem:[%s18772_s7 + $0x48] sm:$0xff]  ;;  %v8802_v3 = vld [vmem:[%s18772_s7 + $0x40] sm:$0xff]  ;;  %v8828_v29 = vld [vmem:[%s18772_s7 + $0x110] sm:$0xff] }
 0x889   : > { %v11344_v8 = vpack.i.bf16 %v17746_v48, %v17743_v28  ;;  %v8313_v15 = vadd.f32 %v17542_v22, %v8020_v17  ;;  %v8314_v21 = vadd.f32 %v17550_v41, %v8021_v58  ;;  %v8809_v22 = vld [vmem:[%s18772_s7 + $0x78] sm:$0xff]  ;;  %v8819_v18 = vld [vmem:[%s18772_s7 + $0xc8] sm:$0xff]  ;;  %v8818_v17 = vld [vmem:[%s18772_s7 + $0xc0] sm:$0xff] }
 0x88a   : > { %v11349_v16 = vpack.i.bf16 %v17754_v9, %v17749_v35  ;;  %v8825_v41 = vld [vmem:[%s18772_s7 + $0xf8] sm:$0xff]  ;;  %8922 = vmatpush.msra.mxu0 %v8809_v22  ;;  %v8851_v6 = vld [vmem:[%s18772_s7 + $0x1c8] sm:$0xff]  ;;  %v8850_v58 = vld [vmem:[%s18772_s7 + $0x1c0] sm:$0xff] }
 0x88b   : > { %8948 = vmatpush.msra.mxu1 %v8825_v41  ;;  %v8831_v42 = vld [vmem:[%s18772_s7 + $0x128] sm:$0xff] }
 0x88c   : > { %11345 = vrot.lane.b32.xlu1 %v11344_v8, %s11448_s20  ;;  %8923 = vmatpush.msra.mxu0 %v8808_v32  ;;  %v8836_v8 = vld [vmem:[%s18772_s7 + $0x150] sm:$0xff]  ;;  %v8799_v22 = vld [vmem:[%s18772_s7 + $0x28] sm:$0xff]  ;;  %v8798_v32 = vld [vmem:[%s18772_s7 + $0x20] sm:$0xff] }
 0x88d   : > { %v8552_v50 = vpop.f32.mrf.mxu2  ;;  %v8578_v23 = vpop.f32.mrf.mxu3  ;;  %11350 = vrot.lane.b32.xlu2 %v11349_v16, %s11448_s20  ;;  %8949 = vmatpush.msra.mxu1 %v8824_v40  ;;  %v8854_v16 = vld [vmem:[%s18772_s7 + $0x1e0] sm:$0xff]  ;;  %v8815_v41 = vld [vmem:[%s18772_s7 + $0xa8] sm:$0xff] }
 0x88e   : > { %v8598_v44 = vadd.f32 %v8552_v50, %v8305_v26  ;;  %v8599_v63 = vadd.f32 %v8578_v23, %v8306_v10  ;;  %8924 = vmatpush.msra.mxu0 %v8807_v14  ;;  %v8835_v26 = vld [vmem:[%s18772_s7 + $0x148] sm:$0xff]  ;;  %8979 = vmatpush.msrb.mxu2 %v8836_v8  ;;  %v8821_v10 = vld [vmem:[%s18772_s7 + $0xd8] sm:$0xff]  ;;  %v8834_v50 = vld [vmem:[%s18772_s7 + $0x140] sm:$0xff] }
 0x88f   : > { %8950 = vmatpush.msra.mxu1 %v8823_v25  ;;  %v8804_v23 = vld [vmem:[%s18772_s7 + $0x50] sm:$0xff]  ;;  %v8814_v40 = vld [vmem:[%s18772_s7 + $0xa0] sm:$0xff]  ;;  %v8827_v45 = vld [vmem:[%s18772_s7 + $0x108] sm:$0xff] }
 0x890   : > { %v17769_v56 = vadd.f32 %v17638_v7, %v8598_v44  ;;  %v17774_v19 = vadd.f32 %v17638_v7, %v8599_v63  ;;  %8925 = vmatpush.msra.mxu0 %v8806_v34  ;;  %8980 = vmatpush.msrb.mxu2 %v8835_v26  ;;  %v8853_v44 = vld [vmem:[%s18772_s7 + $0x1d8] sm:$0xff]  ;;  %v8820_v63 = vld [vmem:[%s18772_s7 + $0xd0] sm:$0xff]  ;;  %v8826_v8 = vld [vmem:[%s18772_s7 + $0x100] sm:$0xff] }
 0x891   : > { %8951 = vmatpush.msra.mxu1 %v8822_v54  ;;  %v8797_v14 = vld [vmem:[%s18772_s7 + $0x18] sm:$0xff]  ;;  %v8796_v54 = vld [vmem:[%s18772_s7 + $0x10] sm:$0xff] }
 0x892   : > { %v11354_v51 = vpack.i.bf16 %v17774_v19, %v17769_v56  ;;  %8926 = vmatpush.msra.mxu0 %v8805_v1  ;;  %8981 = vmatpush.msrb.mxu2 %v8834_v50  ;;  %v8813_v25 = vld [vmem:[%s18772_s7 + $0x98] sm:$0xff]  ;;  %v8812_v26 = vld [vmem:[%s18772_s7 + $0x90] sm:$0xff]  ;;  %v8811_v50 = vld [vmem:[%s18772_s7 + $0x88] sm:$0xff] }
 0x893   : > { %8952 = vmatpush.msra.mxu1 %v8821_v10  ;;  %v8905_v34 = vld [vmem:[%s18772_s7 + $0x378] sm:$0xff]  ;;  %v8904_v1 = vld [vmem:[%s18772_s7 + $0x370] sm:$0xff]  ;;  %v8795_v10 = vld [vmem:[%s18772_s7 + $0x8] sm:$0xff] }
 0x894   : > { %11355 = vrot.lane.b32.xlu0 %v11354_v51, %s11448_s20  ;;  %8927 = vmatpush.msra.mxu0 %v8804_v23  ;;  %v8801_v51 = vld [vmem:[%s18772_s7 + $0x38] sm:$0xff] }
 0x895   : > { %v8555_v2 = vpop.f32.mrf.mxu2  ;;  %v8581_v52 = vpop.f32.mrf.mxu3  ;;  %8953 = vmatpush.msra.mxu1 %v8820_v63  ;;  %8982 = vmatpush.msrb.mxu2 %v8833_v46  ;;  %v8903_v63 = vld [vmem:[%s18772_s7 + $0x368] sm:$0xff]  ;;  %v8794_v46 = vld [vmem:[%s18772_s7] sm:$0xff] }
 0x896   : > { %v8606_v33 = vadd.f32 %v8555_v2, %v8313_v15  ;;  %v8607_v55 = vadd.f32 %v8581_v52, %v8314_v21  ;;  %8928 = vmatpush.msra.mxu0 %v8803_v30  ;;  %v8817_v15 = vld [vmem:[%s18772_s7 + $0xb8] sm:$0xff]  ;;  %v8830_v21 = vld [vmem:[%s18772_s7 + $0x120] sm:$0xff]  ;;  %v8816_v52 = vld [vmem:[%s18772_s7 + $0xb0] sm:$0xff] }
 0x897   : > { %8954 = vmatpush.msra.mxu1 %v8819_v18  ;;  %8983 = vmatpush.msrb.mxu2 %v8832_v49  ;;  %v8849_v2 = vld [vmem:[%s18772_s7 + $0x1b8] sm:$0xff]  ;;  %v8810_v30 = vld [vmem:[%s18772_s7 + $0x80] sm:$0xff] }
 0x898   : > { %v17784_v7 = vadd.f32 %v17698_v59, %v8606_v33  ;;  %v17787_v20 = vadd.f32 %v17698_v59, %v8607_v55  ;;  %v8857_v59 = vld [vmem:[%s18772_s7 + $0x1f8] sm:$0xff]  ;;  %8929 = vmatpush.msra.mxu0 %v8802_v3  ;;  %v8800_v33 = vld [vmem:[%s18772_s7 + $0x30] sm:$0xff] }
 0x899   : > { %9000 = vmatpush.msrb.mxu3 %v8857_v59  ;;  %8955 = vmatpush.msra.mxu1 %v8818_v17  ;;  %v8829_v55 = vld [vmem:[%s18772_s7 + $0x118] sm:$0xff]  ;;  %v8847_v59 = vld [vmem:[%s18772_s7 + $0x1a8] sm:$0xff]  ;;  %v8872_v17 = vld [vmem:[%s18772_s7 + $0x270] sm:$0xff] }
 0x89a   : > { %v11359_v39 = vpack.i.bf16 %v17787_v20, %v17784_v7  ;;  %8984 = vmatpush.msrb.mxu2 %v8831_v42  ;;  %8930 = vmatpush.msra.mxu0 %v8801_v51  ;;  %v8873_v18 = vld [vmem:[%s18772_s7 + $0x278] sm:$0xff]  ;;  %v8888_v42 = vld [vmem:[%s18772_s7 + $0x2f0] sm:$0xff] }
 0x89b   : > { %9001 = vmatpush.msrb.mxu3 %v8856_v24  ;;  %8956 = vmatpush.msra.mxu1 %v8817_v15  ;;  %v8846_v24 = vld [vmem:[%s18772_s7 + $0x1a0] sm:$0xff]  ;;  %v8889_v49 = vld [vmem:[%s18772_s7 + $0x2f8] sm:$0xff]  ;;  %v8920_v51 = vld [vmem:[%s18772_s7 + $0x3f0] sm:$0xff] }
 0x89c   : > { %11360 = vrot.lane.b32.xlu1 %v11359_v39, %s11448_s20  ;;  %8985 = vmatpush.msrb.mxu2 %v8830_v21  ;;  %v8848_v39 = vld [vmem:[%s18772_s7 + $0x1b0] sm:$0xff]  ;;  %v8921_v3 = vld [vmem:[%s18772_s7 + $0x3f8] sm:$0xff]  ;;  %v8871_v15 = vld [vmem:[%s18772_s7 + $0x268] sm:$0xff]  ;;  %s10318_s20 = sshll.u32 %s405_s0, 4  ;;  %s10319_s20 = int_to_ptr.vmem [resolvable:$true] %s10318_s20 }
 0x89d   : > { %9002 = vmatpush.msrb.mxu3 %v8855_v4  ;;  %8931 = vmatpush.msra.mxu0 %v8800_v33  ;;  %v8845_v4 = vld [vmem:[%s18772_s7 + $0x198] sm:$0xff]  ;;  %v8887_v21 = vld [vmem:[%s18772_s7 + $0x2e8] sm:$0xff] }
 0x89e   : > { %8957 = vmatpush.msra.mxu1 %v8816_v52  ;;  %8986 = vmatpush.msrb.mxu2 %v8829_v55  ;;  %v8919_v33 = vld [vmem:[%s18772_s7 + $0x3e8] sm:$0xff]  ;;  %v8870_v52 = vld [vmem:[%s18772_s7 + $0x260] sm:$0xff] }
 0x89f   : > { %9003 = vmatpush.msrb.mxu3 %v8854_v16  ;;  %8932 = vmatpush.msra.mxu0 %v8799_v22  ;;  %v8844_v16 = vld [vmem:[%s18772_s7 + $0x190] sm:$0xff]  ;;  %v8886_v55 = vld [vmem:[%s18772_s7 + $0x2e0] sm:$0xff] }
 0x8a0   : > { %8958 = vmatpush.msra.mxu1 %v8815_v41  ;;  %8987 = vmatpush.msrb.mxu2 %v8828_v29  ;;  %v8918_v22 = vld [vmem:[%s18772_s7 + $0x3e0] sm:$0xff]  ;;  %v8869_v41 = vld [vmem:[%s18772_s7 + $0x258] sm:$0xff] }
 0x8a1   : > { %9004 = vmatpush.msrb.mxu3 %v8853_v44  ;;  %8933 = vmatpush.msra.mxu0 %v8798_v32  ;;  %v8843_v44 = vld [vmem:[%s18772_s7 + $0x188] sm:$0xff]  ;;  %v8885_v29 = vld [vmem:[%s18772_s7 + $0x2d8] sm:$0xff] }
 0x8a2   : > { %8959 = vmatpush.msra.mxu1 %v8814_v40  ;;  %8988 = vmatpush.msrb.mxu2 %v8827_v45  ;;  %v8917_v32 = vld [vmem:[%s18772_s7 + $0x3d8] sm:$0xff]  ;;  %v8868_v45 = vld [vmem:[%s18772_s7 + $0x250] sm:$0xff] }
 0x8a3   : > { %9005 = vmatpush.msrb.mxu3 %v8852_v62  ;;  %8934 = vmatpush.msra.mxu0 %v8797_v14  ;;  %v8842_v62 = vld [vmem:[%s18772_s7 + $0x180] sm:$0xff]  ;;  %v8897_v14 = vld [vmem:[%s18772_s7 + $0x338] sm:$0xff] }
 0x8a4   : > { %8960 = vmatpush.msra.mxu1 %v8813_v25  ;;  %8989 = vmatpush.msrb.mxu2 %v8826_v8  ;;  %v8916_v25 = vld [vmem:[%s18772_s7 + $0x3d0] sm:$0xff]  ;;  %v8867_v8 = vld [vmem:[%s18772_s7 + $0x248] sm:$0xff] }
 0x8a5   : > { %9006 = vmatpush.msrb.mxu3 %v8851_v6  ;;  %8935 = vmatpush.msra.mxu0 %v8796_v54  ;;  %v8902_v6 = vld [vmem:[%s18772_s7 + $0x360] sm:$0xff]  ;;  %v8915_v54 = vld [vmem:[%s18772_s7 + $0x3c8] sm:$0xff] }
 0x8a6   : > { %9078 = vmatpush.msra.mxu2 %v8905_v34  ;;  %8961 = vmatpush.msra.mxu1 %v8812_v26  ;;  %v8896_v34 = vld [vmem:[%s18772_s7 + $0x330] sm:$0xff]  ;;  %v8866_v26 = vld [vmem:[%s18772_s7 + $0x240] sm:$0xff] }
 0x8a7   : > { %9007 = vmatpush.msrb.mxu3 %v8850_v58  ;;  %8936 = vmatpush.msra.mxu0 %v8795_v10  ;;  %v8901_v58 = vld [vmem:[%s18772_s7 + $0x358] sm:$0xff]  ;;  %v8895_v10 = vld [vmem:[%s18772_s7 + $0x328] sm:$0xff] }
 0x8a8   : > { %9079 = vmatpush.msra.mxu2 %v8904_v1  ;;  %8962 = vmatpush.msra.mxu1 %v8811_v50  ;;  %v8914_v50 = vld [vmem:[%s18772_s7 + $0x3c0] sm:$0xff] }
 0x8a9   : > { %9008 = vmatpush.msrb.mxu3 %v8849_v2  ;;  %8937 = vmatpush.msra.mxu0 %v8794_v46  ;;  %v8900_v2 = vld [vmem:[%s18772_s7 + $0x350] sm:$0xff] }
 0x8aa   : > { %9080 = vmatpush.msra.mxu2 %v8903_v63  ;;  %8963 = vmatpush.msra.mxu1 %v8810_v30  ;;  %v8881_v30 = vld [vmem:[%s18772_s7 + $0x2b8] sm:$0xff] }
 0x8ab   : > { %9009 = vmatpush.msrb.mxu3 %v8848_v39  ;;  %9026 = vmatpush.msrb.mxu0 %v8873_v18  ;;  %v8899_v39 = vld [vmem:[%s18772_s7 + $0x348] sm:$0xff]  ;;  %v8894_v18 = vld [vmem:[%s18772_s7 + $0x320] sm:$0xff] }
 0x8ac   : > { %9052 = vmatpush.msrb.mxu1 %v8889_v49  ;;  %9081 = vmatpush.msra.mxu2 %v8902_v6  ;;  %v20807_v49 = vld [vmem:[#allocation5_spill] sm:$0xff] }
 0x8ad   : > { %9010 = vmatpush.msrb.mxu3 %v8847_v59  ;;  %9027 = vmatpush.msrb.mxu0 %v8872_v17  ;;  %v8898_v59 = vld [vmem:[%s18772_s7 + $0x340] sm:$0xff]  ;;  %vm20808_vm15 = vcmp.lt.s32.totalorder %v20807_v49, 124  ;;  %v8913_v17 = vld [vmem:[%s18772_s7 + $0x3b8] sm:$0xff] }
 0x8ae   : > { %9053 = vmatpush.msrb.mxu1 %v8888_v42  ;;  %9082 = vmatpush.msra.mxu2 %v8901_v58  ;;  %vm20809_vm13 = vmmov %vm20808_vm15  ;;  %v8864_v42 = vld [vmem:[%s18772_s7 + $0x230] sm:$0xff] }
 0x8af   : > { %9011 = vmatpush.msrb.mxu3 %v8846_v24  ;;  %9028 = vmatpush.msrb.mxu0 %v8871_v15  ;;  %v8884_v24 = vld [vmem:[%s18772_s7 + $0x2d0] sm:$0xff]  ;;  %vm20810_vm8 = vmmov %vm20809_vm13 }
 0x8b0   : > { %9054 = vmatpush.msrb.mxu1 %v8887_v21  ;;  %9083 = vmatpush.msra.mxu2 %v8900_v2  ;;  %v8880_v15 = vld [vmem:[%s18772_s7 + $0x2b0] sm:$0xff]  ;;  %v8893_v21 = vld [vmem:[%s18772_s7 + $0x318] sm:$0xff]  ;;  %vm20811_vm7 = vmmov %vm20810_vm8 }
 0x8b1   : > { %9012 = vmatpush.msrb.mxu3 %v8845_v4  ;;  %9029 = vmatpush.msrb.mxu0 %v8870_v52  ;;  %v8883_v4 = vld [vmem:[%s18772_s7 + $0x2c8] sm:$0xff]  ;;  %vm20812_vm1 = vmmov %vm20811_vm7 }
 0x8b2   : > { %9055 = vmatpush.msrb.mxu1 %v8886_v55  ;;  %9084 = vmatpush.msra.mxu2 %v8899_v39  ;;  %v8879_v52 = vld [vmem:[%s18772_s7 + $0x2a8] sm:$0xff]  ;;  %v8892_v55 = vld [vmem:[%s18772_s7 + $0x310] sm:$0xff]  ;;  %vm20813_vm6 = vmmov %vm20812_vm1 }
 0x8b3   : > { %9013 = vmatpush.msrb.mxu3 %v8844_v16  ;;  %9030 = vmatpush.msrb.mxu0 %v8869_v41  ;;  %v8882_v16 = vld [vmem:[%s18772_s7 + $0x2c0] sm:$0xff]  ;;  %v8911_v39 = vld [vmem:[%s18772_s7 + $0x3a8] sm:$0xff]  ;;  %vm20814_vm0 = vmmov %vm20812_vm1 }
 0x8b4   : > { %9056 = vmatpush.msrb.mxu1 %v8885_v29  ;;  %9085 = vmatpush.msra.mxu2 %v8898_v59  ;;  %v8862_v59 = vld [vmem:[%s18772_s7 + $0x220] sm:$0xff]  ;;  %vm20815_vm2 = vmmov %vm20814_vm0 }
 0x8b5   : > { %9014 = vmatpush.msrb.mxu3 %v8843_v44  ;;  %9031 = vmatpush.msrb.mxu0 %v8868_v45  ;;  %vm20816_vm11 = vmmov %vm20814_vm0 }
 0x8b6   : > { %9057 = vmatpush.msrb.mxu1 %v8884_v24  ;;  %9086 = vmatpush.msra.mxu2 %v8897_v14  ;;  %vm20817_vm12 = vmmov %vm20814_vm0 }
 0x8b7   : > { %9015 = vmatpush.msrb.mxu3 %v8842_v62  ;;  %9032 = vmatpush.msrb.mxu0 %v8867_v8  ;;  %v8865_v62 = vld [vmem:[%s18772_s7 + $0x238] sm:$0xff]  ;;  %v8878_v8 = vld [vmem:[%s18772_s7 + $0x2a0] sm:$0xff]  ;;  %vm20818_vm4 = vmmov %vm20814_vm0 }
 0x8b8   : > { %9058 = vmatpush.msrb.mxu1 %v8883_v4  ;;  %9087 = vmatpush.msra.mxu2 %v8896_v34  ;;  %v8891_v34 = vld [vmem:[%s18772_s7 + $0x308] sm:$0xff]  ;;  %vm20819_vm3 = vmmov %vm20814_vm0 }
 0x8b9   : > { %9104 = vmatpush.msra.mxu3 %v8921_v3  ;;  %9033 = vmatpush.msrb.mxu0 %v8866_v26  ;;  %vm20820_vm10 = vmmov %vm20814_vm0 }
 0x8ba   : > { %9059 = vmatpush.msrb.mxu1 %v8882_v16  ;;  %9088 = vmatpush.msra.mxu2 %v8895_v10  ;;  %v8861_v10 = vld [vmem:[%s18772_s7 + $0x218] sm:$0xff]  ;;  %vm20821_vm5 = vmmov %vm20814_vm0 }
 0x8bb   : > { %9105 = vmatpush.msra.mxu3 %v8920_v51  ;;  %9034 = vmatpush.msrb.mxu0 %v8865_v62  ;;  %v8890_v62 = vld [vmem:[%s18772_s7 + $0x300] sm:$0xff]  ;;  %vm20822_vm14 = vmmov %vm20814_vm0 }
 0x8bc   : > { %9060 = vmatpush.msrb.mxu1 %v8881_v30  ;;  %9089 = vmatpush.msra.mxu2 %v8894_v18  ;;  %v8860_v18 = vld [vmem:[%s18772_s7 + $0x210] sm:$0xff]  ;;  %vm20823_vm9 = vmmov %vm20814_vm0 }
 0x8bd   : > { %9106 = vmatpush.msra.mxu3 %v8919_v33  ;;  %9035 = vmatpush.msrb.mxu0 %v8864_v42 }
 0x8be   : > { %9061 = vmatpush.msrb.mxu1 %v8880_v15  ;;  %9090 = vmatpush.msra.mxu2 %v8893_v21  ;;  %v8876_v15 = vld [vmem:[%s18772_s7 + $0x290] sm:$0xff] }
 0x8bf   : > { %9107 = vmatpush.msra.mxu3 %v8918_v22 }
 0x8c0   : > { %9062 = vmatpush.msrb.mxu1 %v8879_v52  ;;  %9091 = vmatpush.msra.mxu2 %v8892_v55 }
 0x8c1   : > { %9108 = vmatpush.msra.mxu3 %v8917_v32 }
 0x8c2   : > { %9063 = vmatpush.msrb.mxu1 %v8878_v8  ;;  %9092 = vmatpush.msra.mxu2 %v8891_v34 }
 0x8c3   : > { %9109 = vmatpush.msra.mxu3 %v8916_v25 }
 0x8c4   : > { %9093 = vmatpush.msra.mxu2 %v8890_v62 }
 0x8c5   : > { %9110 = vmatpush.msra.mxu3 %v8915_v54  ;;  %v8910_v54 = vld [vmem:[%s18772_s7 + $0x3a0] sm:$0xff] }
 0x8c7   : > { %9111 = vmatpush.msra.mxu3 %v8914_v50 }
 0x8c9   : > { %9112 = vmatpush.msra.mxu3 %v8913_v17 }
 0x8cf   : > { %v17972_v23 = vpop.permute.xlu2 %11315 }
 0x8d0   : > { %v11317_v44 = vunpack.i.l.bf16 %v17972_v23  ;;  %v11318_v22 = vunpack.i.h.bf16 %v17972_v23 }
 0x8d7   : > { %v18046_v40 = vpop.permute.xlu2 %11320 }
 0x8d8   : > { %v11323_v32 = vunpack.i.h.bf16 %v18046_v40  ;;  %v11322_v45 = vunpack.i.l.bf16 %v18046_v40 }
 0x8df   : > { %v18116_v2 = vpop.permute.xlu2 %11330 }
 0x8e0   : > { %v11333_v30 = vunpack.i.h.bf16 %v18116_v2 }
 0x8e6   : > { %v11306_v1 = vpop.permute.xlu1 %11305 }
 0x8e7   : > { %v11308_v63 = vunpack.i.h.bf16 %v11306_v1  ;;  %v11307_v46 = vunpack.i.l.bf16 %v11306_v1  ;;  %v18204_v21 = vpop.permute.xlu2 %11350 }
 0x8e8   : > { %v11353_v8 = vunpack.i.h.bf16 %v18204_v21 }
 0x8e9   : > { %v8707_v6 = vsel %vm20808_vm15, %v11308_v63, %v11317_v44  ;;  %v8710_v3 = vsel %vm20809_vm13, %v11307_v46, %v11308_v63  ;;  %vm20824_vm15 = vmmov %vm20814_vm0 }
 0x8ea   : > { %v18105_v58 = vmax.f32 %v17603_v37, %v8710_v3  ;;  %v18108_v51 = vmax.f32 %v17609_v5, %v8707_v6  ;;  %v8912_v37 = vld [vmem:[%s18772_s7 + $0x3b0] sm:$0xff]  ;;  %v8863_v5 = vld [vmem:[%s18772_s7 + $0x228] sm:$0xff]  ;;  %v11332_v6 = vunpack.i.l.bf16 %v18116_v2  ;;  %vm20825_vm13 = vmmov %vm20814_vm0 }
 0x8eb   : > { %9113 = vmatpush.msra.mxu3 %v8912_v37  ;;  %9036 = vmatpush.msrb.mxu0 %v8863_v5 }
 0x8ec   : > { %v8748_v33 = vmax.f32 %v18105_v58, %v18108_v51 }
 0x8ed   : > { %9114 = vmatpush.msra.mxu3 %v8911_v39  ;;  %9037 = vmatpush.msrb.mxu0 %v8862_v59 }
 0x8ee   : > { %v8772_v41 = vmax.f32 %v8748_v33, 0.0  ;;  %v18136_v29 = vpop.permute.xlu1 %11310 }
 0x8ef   : > { %v11313_v24 = vunpack.i.h.bf16 %v18136_v29  ;;  %v11312_v14 = vunpack.i.l.bf16 %v18136_v29  ;;  %v18145_v25 = vpop.permute.xlu0 %11335  ;;  %9115 = vmatpush.msra.mxu3 %v8910_v54  ;;  %9038 = vmatpush.msrb.mxu0 %v8861_v10 }
 0x8f0   : > { %v11337_v4 = vunpack.i.l.bf16 %v18145_v25  ;;  %8990 = vmatmul.f32.vlgmr.msrb.gmra.mxu2 %v8772_v41  ;;  %v11338_v39 = vunpack.i.h.bf16 %v18145_v25 }
 0x8f1   : > { %v8704_v26 = vsel %vm20810_vm8, %v11317_v44, %v11313_v24  ;;  %v8713_v16 = vsel %vm20811_vm7, %v11312_v14, %v11307_v46  ;;  %v8716_v1 = vsel %vm20812_vm1, %v11318_v22, %v11312_v14  ;;  %v8877_v46 = vld [vmem:[%s18772_s7 + $0x298] sm:$0xff]  ;;  %9039 = vmatpush.msrb.mxu0 %v8860_v18  ;;  %v8712_v14 = vsel %vm20815_vm2, %v11332_v6, %v11333_v30  ;;  %vm20826_vm8 = vmmov %vm20814_vm0 }
 0x8f2   : > { %v18171_v50 = vmax.f32 %v17614_v12, %v8716_v1  ;;  %v8723_v63 = vmax.f32 %v17645_v61, %v8713_v16  ;;  %v18175_v44 = vmax.f32 %v17617_v13, %v8704_v26  ;;  %v8711_v12 = vsel %vm20813_vm6, %v11322_v45, %v11323_v32  ;;  %v8909_v61 = vld [vmem:[%s18772_s7 + $0x398] sm:$0xff]  ;;  %9064 = vmatpush.msrb.mxu1 %v8877_v46  ;;  %v8858_v26 = vld [vmem:[%s18772_s7 + $0x200] sm:$0xff]  ;;  %v8907_v46 = vld [vmem:[%s18772_s7 + $0x388] sm:$0xff] }
 0x8f3   : > { %v8708_v13 = vsel %vm20814_vm0, %v11323_v32, %v11337_v4  ;;  %9116 = vmatpush.msra.mxu3 %v8909_v61  ;;  %v8908_v32 = vld [vmem:[%s18772_s7 + $0x390] sm:$0xff]  ;;  %v11352_v16 = vunpack.i.l.bf16 %v18204_v21  ;;  %v8740_v61 = vmax.f32 %v17704_v60, %v8712_v14  ;;  %v8719_v60 = vsel %vm20821_vm5, %v11353_v8, %v11318_v22  ;;  %vm20827_vm7 = vmmov %vm20814_vm0 }
 0x8f4   : > { %v8746_v3 = vmax.f32 %v18171_v50, %v8723_v63  ;;  %v8747_v17 = vmax.f32 %v8723_v63, %v18105_v58  ;;  %v8749_v42 = vmax.f32 %v18108_v51, %v18175_v44  ;;  %v8733_v37 = vmax.f32 %v17657_v27, %v8708_v13  ;;  %v8859_v51 = vld [vmem:[%s18772_s7 + $0x208] sm:$0xff]  ;;  %9065 = vmatpush.msrb.mxu1 %v8876_v15  ;;  %vm20828_vm1 = vmmov %vm20814_vm0 }
 0x8f5   : > { %v8732_v58 = vmax.f32 %v17648_v36, %v8711_v12  ;;  %v8875_v36 = vld [vmem:[%s18772_s7 + $0x288] sm:$0xff]  ;;  %9040 = vmatpush.msrb.mxu0 %v8859_v51  ;;  %9117 = vmatpush.msra.mxu3 %v8908_v32  ;;  %v8874_v12 = vld [vmem:[%s18772_s7 + $0x280] sm:$0xff]  ;;  %vm20829_vm6 = vmmov %vm20814_vm0 }
 0x8f6   : > { %v8770_v5 = vmax.f32 %v8746_v3, 0.0  ;;  %v8771_v33 = vmax.f32 %v8747_v17, 0.0  ;;  %v8773_v52 = vmax.f32 %v8749_v42, 0.0  ;;  %v18207_v55 = vpop.permute.xlu1 %11325  ;;  %9066 = vmatpush.msrb.mxu1 %v8875_v36  ;;  %v8698_v3 = vsel %vm20820_vm10, %v11352_v16, %v11353_v8  ;;  %vm20830_vm2 = vmmov %vm20814_vm0 }
 0x8f7   : > { %v11328_v41 = vunpack.i.h.bf16 %v18207_v55  ;;  %v11327_v27 = vunpack.i.l.bf16 %v18207_v55  ;;  %v18216_v59 = vpop.permute.xlu0 %11340  ;;  %v8756_v54 = vmax.f32 %v8732_v58, %v8733_v37  ;;  %9041 = vmatpush.msrb.mxu0 %v8858_v26  ;;  %9118 = vmatpush.msra.mxu3 %v8907_v46 }
 0x8f8   : > { %v11342_v34 = vunpack.i.l.bf16 %v18216_v59  ;;  %8938 = vmatmul.f32.vlgmr.msra.gmra.mxu0 %v8770_v5  ;;  %8964 = vmatmul.f32.vlgmr.msra.gmra.mxu1 %v8771_v33  ;;  %v11343_v21 = vunpack.i.h.bf16 %v18216_v59 }
 0x8f9   : > { %v8705_v1 = vsel %vm20816_vm11, %v11337_v4, %v11328_v41  ;;  %v8714_v10 = vsel %vm20817_vm12, %v11327_v27, %v11322_v45  ;;  %v8717_v63 = vsel %vm20818_vm4, %v11338_v39, %v11327_v27  ;;  %9016 = vmatmul.f32.vlgmr.msrb.gmra.mxu3 %v8773_v52  ;;  %v8780_v4 = vmax.f32 %v8756_v54, 0.0  ;;  %9067 = vmatpush.msrb.mxu1 %v8874_v12 }
 0x8fa   : > { %v8709_v62 = vsel %vm20819_vm3, %v11333_v30, %v11342_v34  ;;  %v18252_v40 = vmax.f32 %v17661_v43, %v8717_v63  ;;  %v8731_v45 = vmax.f32 %v17701_v11, %v8714_v10  ;;  %v18259_v13 = vmax.f32 %v17666_v31, %v8705_v1  ;;  %v8906_v43 = vld [vmem:[%s18772_s7 + $0x380] sm:$0xff] }
 0x8fb   : > { %v8741_v18 = vmax.f32 %v17717_v53, %v8709_v62  ;;  %8993 = vmatmul.f32.gmra.mxu2 %v8780_v4  ;;  %9119 = vmatpush.msra.mxu3 %v8906_v43  ;;  %vm20831_vm11 = vcmask 130048  }
 0x8fc   : > { %v8754_v11 = vmax.f32 %v18252_v40, %v8731_v45  ;;  %v8755_v30 = vmax.f32 %v8731_v45, %v8732_v58  ;;  %v8757_v31 = vmax.f32 %v8733_v37, %v18259_v13  ;;  %v8728_v37 = vmax.f32 %v17749_v35, %v8698_v3  ;;  %vm20832_vm12 = vmmov %vm20831_vm11 }
 0x8fd   : > { %v8764_v17 = vmax.f32 %v8740_v61, %v8741_v18  ;;  %v8729_v58 = vmax.f32 %v17754_v9, %v8719_v60  ;;  %v8701_v35 = vsel %vm20825_vm13, %v11313_v24, %v11352_v16  ;;  %vm20833_vm4 = vmmov %vm20831_vm11 }
 0x8fe   : > { %v18274_v53 = vpop.permute.xlu1 %11345  ;;  %v8778_v42 = vmax.f32 %v8754_v11, 0.0  ;;  %v8779_v15 = vmax.f32 %v8755_v30, 0.0  ;;  %v8781_v52 = vmax.f32 %v8757_v31, 0.0  ;;  %v8727_v8 = vmax.f32 %v17651_v38, %v8701_v35  ;;  %vm20834_vm3 = vmmov %vm20833_vm4 }
 0x8ff   : > { %v11348_v5 = vunpack.i.h.bf16 %v18274_v53  ;;  %v11347_v33 = vunpack.i.l.bf16 %v18274_v53  ;;  %v8788_v23 = vmax.f32 %v8764_v17, 0.0  ;;  %v8752_v14 = vmax.f32 %v8728_v37, %v8729_v58  ;;  %vm20835_vm10 = vmmov %vm20834_vm3 }
 0x900   : > { %8941 = vmatmul.f32.gmra.mxu0 %v8778_v42  ;;  %8967 = vmatmul.f32.gmra.mxu1 %v8779_v15  ;;  %v8751_v38 = vmax.f32 %v8727_v8, %v8728_v37  ;;  %v9131_v37 = vld [vmem:[%s18773_s8] sm:$0xff]  ;;  %vm20836_vm5 = vmmov %vm20834_vm3 }
 0x901   : > { %v8706_v22 = vsel %vm20822_vm14, %v11342_v34, %v11348_v5  ;;  %v8715_v51 = vsel %vm20823_vm9, %v11347_v33, %v11332_v6  ;;  %v8718_v27 = vsel %vm20824_vm15, %v11343_v21, %v11347_v33  ;;  %9019 = vmatmul.f32.gmra.mxu3 %v8781_v52  ;;  %v9134_v33 = vld [vmem:[%s18773_s8 + $0x18] sm:$0xff]  ;;  %vm20837_vm14 = vmmov %vm20834_vm3 }
 0x902   : > { %v18294_v59 = vmax.f32 %v17723_v47, %v8718_v27  ;;  %v8739_v9 = vmax.f32 %v17743_v28, %v8715_v51  ;;  %v8742_v32 = vmax.f32 %v17726_v0, %v8706_v22  ;;  %v8776_v47 = vmax.f32 %v8752_v14, 0.0  ;;  %9172 = vmatpush.msra.mxu1 %v9134_v33  ;;  %v11130_v22 = vld [vmem:[%s18773_s8 + $0x38] sm:$0xff]  ;;  %v11127_v51 = vld [vmem:[%s18773_s8 + $0x20] sm:$0xff]  ;;  %v11128_v27 = vld [vmem:[%s18773_s8 + $0x28] sm:$0xff] }
 0x903   : > { %8996 = vmatmul.f32.gmra.mxu2 %v8788_v23  ;;  %v8750_v28 = vmax.f32 %v18175_v44, %v8727_v8  ;;  %v8753_v44 = vmax.f32 %v8729_v58, %v18171_v50  ;;  %v8775_v62 = vmax.f32 %v8751_v38, 0.0  ;;  %v9132_v23 = vld [vmem:[%s18773_s8 + $0x8] sm:$0xff]  ;;  %v11129_v58 = vld [vmem:[%s18773_s8 + $0x30] sm:$0xff]  ;;  %9227 = vmatpush.msrb.mxu3 %v11130_v22  ;;  %vm20838_vm9 = vmmov %vm20834_vm3 }
 0x904   : > { %v8762_v2 = vmax.f32 %v18294_v59, %v8739_v9  ;;  %v8763_v6 = vmax.f32 %v8739_v9, %v8740_v61  ;;  %v8765_v36 = vmax.f32 %v8741_v18, %v8742_v32  ;;  %9173 = vmatpush.msra.mxu1 %v9132_v23  ;;  %9207 = vmatpush.msrb.mxu2 %v11129_v58  ;;  %v11134_v14 = vld [vmem:[%s18773_s8 + $0x48] sm:$0xff]  ;;  %v11141_v8 = vld [vmem:[%s18773_s8 + $0x70] sm:$0xff]  ;;  %v11172_v33 = vld [vmem:[%s18773_s8 + $0x118] sm:$0xff] }
 0x905   : > { %v8777_v12 = vmax.f32 %v8753_v44, 0.0  ;;  %9228 = vmatpush.msrb.mxu3 %v11128_v27  ;;  %vm20839_vm15 = vmmov %vm20834_vm3  ;;  %v11169_v23 = vld [vmem:[%s18773_s8 + $0x100] sm:$0xff]  ;;  %v11170_v58 = vld [vmem:[%s18773_s8 + $0x108] sm:$0xff] }
 0x906   : > { %v11356_v34 = vpop.permute.xlu0 %11355  ;;  %v8786_v29 = vmax.f32 %v8762_v2, 0.0  ;;  %v8787_v54 = vmax.f32 %v8763_v6, 0.0  ;;  %v8789_v26 = vmax.f32 %v8765_v36, 0.0  ;;  %v11136_v2 = vld [vmem:[%s18773_s8 + $0x58] sm:$0xff]  ;;  %9208 = vmatpush.msrb.mxu2 %v11127_v51  ;;  %v11133_v36 = vld [vmem:[%s18773_s8 + $0x40] sm:$0xff]  ;;  %vm20840_vm13 = vmmov %vm20834_vm3 }
 0x907   : > { %v11358_v24 = vunpack.i.h.bf16 %v11356_v34  ;;  %v11357_v16 = vunpack.i.l.bf16 %v11356_v34  ;;  %v11142_v34 = vld [vmem:[%s18773_s8 + $0x78] sm:$0xff]  ;;  %v11177_v22 = vld [vmem:[%s18773_s8 + $0x130] sm:$0xff] }
 0x908   : > { %8944 = vmatmul.f32.gmra.mxu0 %v8786_v29  ;;  %8970 = vmatmul.f32.gmra.mxu1 %v8787_v54  ;;  %v11139_v29 = vld [vmem:[%s18773_s8 + $0x60] sm:$0xff]  ;;  %v11140_v54 = vld [vmem:[%s18773_s8 + $0x68] sm:$0xff]  ;;  %v11178_v51 = vld [vmem:[%s18773_s8 + $0x138] sm:$0xff] }
 0x909   : > { %v8720_v0 = vsel %vm20826_vm8, %v11358_v24, %v11338_v39  ;;  %v8699_v1 = vsel %vm20827_vm7, %v11357_v16, %v11358_v24  ;;  %9022 = vmatmul.f32.gmra.mxu3 %v8789_v26  ;;  %v8702_v10 = vsel %vm20828_vm1, %v11328_v41, %v11357_v16  ;;  %v8774_v39 = vmax.f32 %v8750_v28, 0.0  ;;  %vm20841_vm8 = vmmov %vm20834_vm3 }
 0x90a   : > { %v8736_v63 = vmax.f32 %v17769_v56, %v8699_v1  ;;  %v8737_v46 = vmax.f32 %v17774_v19, %v8720_v0  ;;  %v8735_v25 = vmax.f32 %v17707_v57, %v8702_v10  ;;  %vm20842_vm7 = vmmov %vm20834_vm3 }
 0x90b   : > { %9094 = vmatmul.f32.vlgmr.msra.gmra.mxu2 %v8776_v47  ;;  %vm20843_vm1 = vmmov %vm20834_vm3 }
 0x90c   : > { %v8760_v45 = vmax.f32 %v8736_v63, %v8737_v46  ;;  %v8758_v19 = vmax.f32 %v18259_v13, %v8735_v25  ;;  %v8759_v43 = vmax.f32 %v8735_v25, %v8736_v63  ;;  %v8761_v30 = vmax.f32 %v8737_v46, %v18252_v40  ;;  %9315 = vmatpush.msra.mxu2 %v11141_v8 }
 0x90e   : > { %v11361_v4 = vpop.permute.xlu1 %11360  ;;  %v8784_v41 = vmax.f32 %v8760_v45, 0.0  ;;  %v8782_v31 = vmax.f32 %v8758_v19, 0.0  ;;  %v8783_v17 = vmax.f32 %v8759_v43, 0.0  ;;  %v8785_v53 = vmax.f32 %v8761_v30, 0.0  ;;  %9316 = vmatpush.msra.mxu2 %v11139_v29  ;;  %v11145_v19 = vld [vmem:[%s18773_s8 + $0x80] sm:$0xff]  ;;  %v11182_v29 = vld [vmem:[%s18773_s8 + $0x148] sm:$0xff] }
 0x90f   : > { %v11363_v61 = vunpack.i.h.bf16 %v11361_v4  ;;  %v11362_v18 = vunpack.i.l.bf16 %v11361_v4  ;;  %v11151_v43 = vld [vmem:[%s18773_s8 + $0xa0] sm:$0xff] }
 0x910   : > { %9042 = vmatmul.f32.vlgmr.msrb.gmra.mxu0 %v8774_v39  ;;  %9068 = vmatmul.f32.vlgmr.msrb.gmra.mxu1 %v8775_v62 }
 0x911   : > { %v8721_v55 = vsel %vm20829_vm6, %v11363_v61, %v11343_v21  ;;  %v8700_v56 = vsel %vm20814_vm0, %v11362_v18, %v11363_v61  ;;  %9120 = vmatmul.f32.vlgmr.msra.gmra.mxu3 %v8777_v12  ;;  %v8703_v11 = vsel %vm20830_vm2, %v11348_v5, %v11362_v18  ;;  %v9133_v5 = vld [vmem:[%s18773_s8 + $0x10] sm:$0xff]  ;;  %9281 = vmatpush.msrb.mxu1 %v11136_v2  ;;  %vm20844_vm6 = vmmov %vm20843_vm1 }
 0x912   : > { %v8745_v57 = vmax.f32 %v17787_v20, %v8721_v55  ;;  %v8744_v50 = vmax.f32 %v17784_v7, %v8700_v56  ;;  %v8743_v3 = vmax.f32 %v17746_v48, %v8703_v11  ;;  %9152 = vmatpush.msra.mxu0 %v9133_v5  ;;  %9335 = vmatpush.msra.mxu3 %v11142_v34  ;;  %v11147_v18 = vld [vmem:[%s18773_s8 + $0x90] sm:$0xff]  ;;  %v11148_v55 = vld [vmem:[%s18773_s8 + $0x98] sm:$0xff]  ;;  %v11152_v11 = vld [vmem:[%s18773_s8 + $0xa8] sm:$0xff] }
 0x913   : > { %9097 = vmatmul.f32.gmra.mxu2 %v8784_v41  ;;  %9282 = vmatpush.msrb.mxu1 %v11134_v14  ;;  %v11154_v41 = vld [vmem:[%s18773_s8 + $0xb8] sm:$0xff]  ;;  %v11171_v5 = vld [vmem:[%s18773_s8 + $0x110] sm:$0xff]  ;;  %v11181_v34 = vld [vmem:[%s18773_s8 + $0x140] sm:$0xff] }
 0x914   : > { %v8768_v60 = vmax.f32 %v8744_v50, %v8745_v57  ;;  %v8766_v13 = vmax.f32 %v8742_v32, %v8743_v3  ;;  %v8767_v7 = vmax.f32 %v8743_v3, %v8744_v50  ;;  %v8769_v42 = vmax.f32 %v8745_v57, %v18294_v59  ;;  %9153 = vmatpush.msra.mxu0 %v9131_v37  ;;  %v11135_v32 = vld [vmem:[%s18773_s8 + $0x50] sm:$0xff]  ;;  %v11146_v57 = vld [vmem:[%s18773_s8 + $0x88] sm:$0xff]  ;;  %vm20845_vm0 = vmmov %vm20843_vm1 }
 0x915   : > { %9336 = vmatpush.msra.mxu3 %v11140_v54  ;;  %v11153_v50 = vld [vmem:[%s18773_s8 + $0xb0] sm:$0xff]  ;;  %vm20846_vm2 = vmmov %vm20845_vm0 }
 0x916   : > { %v8792_v20 = vmax.f32 %v8768_v60, 0.0  ;;  %v8790_v49 = vmax.f32 %v8766_v13, 0.0  ;;  %v8791_v15 = vmax.f32 %v8767_v7, 0.0  ;;  %v8793_v21 = vmax.f32 %v8769_v42, 0.0  ;;  %9261 = vmatpush.msrb.mxu0 %v11135_v32  ;;  %v11159_v3 = vld [vmem:[%s18773_s8 + $0xd0] sm:$0xff]  ;;  %v11166_v7 = vld [vmem:[%s18773_s8 + $0xf8] sm:$0xff] }
 0x917   : > { %v11165_v13 = vld [vmem:[%s18773_s8 + $0xf0] sm:$0xff]  ;;  %v11163_v42 = vld [vmem:[%s18773_s8 + $0xe0] sm:$0xff] }
 0x918   : > { %9045 = vmatmul.f32.gmra.mxu0 %v8782_v31  ;;  %9071 = vmatmul.f32.gmra.mxu1 %v8783_v17  ;;  %v11160_v31 = vld [vmem:[%s18773_s8 + $0xd8] sm:$0xff]  ;;  %v11183_v2 = vld [vmem:[%s18773_s8 + $0x150] sm:$0xff] }
 0x919   : > { %9123 = vmatmul.f32.gmra.mxu3 %v8785_v53  ;;  %9262 = vmatpush.msrb.mxu0 %v11133_v36  ;;  %v11157_v53 = vld [vmem:[%s18773_s8 + $0xc0] sm:$0xff] }
 0x91b   : > { %9100 = vmatmul.f32.gmra.mxu2 %v8792_v20  ;;  %v11158_v20 = vld [vmem:[%s18773_s8 + $0xc8] sm:$0xff] }
 0x920   : > { %9048 = vmatmul.f32.gmra.mxu0 %v8790_v49  ;;  %9074 = vmatmul.f32.gmra.mxu1 %v8791_v15  ;;  %v11164_v49 = vld [vmem:[%s18773_s8 + $0xe8] sm:$0xff] }
 0x921   : > { %9126 = vmatmul.f32.gmra.mxu3 %v8793_v21 }
 0x973   : > { %v8991_v52 = vpop.f32.mrf.mxu2 }
 0x975   : > { %v8939_v48 = vpop.f32.mrf.mxu0  ;;  %v8965_v40 = vpop.f32.mrf.mxu1 }
 0x976   : > { %v8966_v47 = vadd.f32 %v8965_v40, %v8939_v48 }
 0x978   : > { %v8992_v38 = vadd.f32 %v8991_v52, %v8966_v47  ;;  %v11188_v47 = vld [vmem:[%s18773_s8 + $0x168] sm:$0xff] }
 0x97c   : > { %v9017_v35 = vpop.f32.mrf.mxu3 }
 0x97d   : > { %v18351_v59 = vpop.f32.mrf.mxu0  ;;  %v18353_v9 = vpop.f32.mrf.mxu1  ;;  %v9018_v10 = vadd.f32 %v9017_v35, %v8992_v38  ;;  %v11175_v35 = vld [vmem:[%s18773_s8 + $0x120] sm:$0xff] }
 0x97e   : > { %v18361_v6 = vpop.f32.mrf.mxu2  ;;  %v8969_v17 = vadd.f32 %v18353_v9, %v18351_v59  ;;  %v11176_v59 = vld [vmem:[%s18773_s8 + $0x128] sm:$0xff] }
 0x980   : > { %v8995_v15 = vadd.f32 %v18361_v6, %v8969_v17  ;;  %v11184_v6 = vld [vmem:[%s18773_s8 + $0x158] sm:$0xff]  ;;  %v11217_v17 = vld [vmem:[%s18773_s8 + $0x200] sm:$0xff] }
 0x984   : > { %v18381_v26 = vpop.f32.mrf.mxu3 }
 0x985   : > { %v8945_v24 = vpop.f32.mrf.mxu0  ;;  %v8971_v16 = vpop.f32.mrf.mxu1  ;;  %v9021_v48 = vadd.f32 %v18381_v26, %v8995_v15  ;;  %v11189_v26 = vld [vmem:[%s18773_s8 + $0x170] sm:$0xff] }
 0x986   : > { %v8972_v28 = vadd.f32 %v8971_v16, %v8945_v24  ;;  %v8997_v0 = vpop.f32.mrf.mxu2  ;;  %v11190_v24 = vld [vmem:[%s18773_s8 + $0x178] sm:$0xff]  ;;  %v11187_v16 = vld [vmem:[%s18773_s8 + $0x160] sm:$0xff]  ;;  %v11231_v15 = vld [vmem:[%s18773_s8 + $0x250] sm:$0xff] }
 0x988   : > { %v8998_v1 = vadd.f32 %v8997_v0, %v8972_v28  ;;  %v11195_v0 = vld [vmem:[%s18773_s8 + $0x190] sm:$0xff] }
 0x98c   : > { %v9023_v63 = vpop.f32.mrf.mxu3 }
 0x98d   : > { %v18383_v46 = vadd.f32 %v9023_v63, %v8998_v1  ;;  %v9043_v44 = vpop.f32.mrf.mxu0  ;;  %v9069_v39 = vpop.f32.mrf.mxu1  ;;  %v11196_v1 = vld [vmem:[%s18773_s8 + $0x198] sm:$0xff]  ;;  %v11194_v63 = vld [vmem:[%s18773_s8 + $0x188] sm:$0xff] }
 0x98e   : > { %v9044_v25 = vadd.f32 %v9043_v44, %v9018_v10  ;;  %v9095_v4 = vpop.f32.mrf.mxu2  ;;  %v11193_v10 = vld [vmem:[%s18773_s8 + $0x180] sm:$0xff]  ;;  %v11201_v44 = vld [vmem:[%s18773_s8 + $0x1b0] sm:$0xff] }
 0x990   : > { %v9070_v62 = vadd.f32 %v9069_v39, %v9044_v25  ;;  %v11202_v25 = vld [vmem:[%s18773_s8 + $0x1b8] sm:$0xff]  ;;  %v11199_v39 = vld [vmem:[%s18773_s8 + $0x1a0] sm:$0xff] }
 0x992   : > { %v9096_v45 = vadd.f32 %v9095_v4, %v9070_v62  ;;  %v11200_v62 = vld [vmem:[%s18773_s8 + $0x1a8] sm:$0xff] }
 0x994   : > { %v9121_v12 = vpop.f32.mrf.mxu3 }
 0x995   : > { %v18385_v61 = vadd.f32 %v9121_v12, %v9096_v45  ;;  %v9046_v21 = vpop.f32.mrf.mxu0  ;;  %v9072_v27 = vpop.f32.mrf.mxu1  ;;  %v11207_v45 = vld [vmem:[%s18773_s8 + $0x1d0] sm:$0xff]  ;;  %v11208_v12 = vld [vmem:[%s18773_s8 + $0x1d8] sm:$0xff] }
 0x996   : > { %v9047_v52 = vadd.f32 %v9046_v21, %v9021_v48  ;;  %v9098_v36 = vpop.f32.mrf.mxu2  ;;  %v11232_v21 = vld [vmem:[%s18773_s8 + $0x258] sm:$0xff] }
 0x997   : > { %11125 = vmatmul.msk.f32.vlgmr.msra.gmra.mxu0 %vm20831_vm11, %v18385_v61  ;;  %11126 = vmatmul.msk.f32.vlgmr.msra.gmra.mxu1 %vm20832_vm12, %v18385_v61  ;;  %v9190_v56 = vrot.slane %v18385_v61, 1  ;;  %v9244_v30 = vrot.slane %v18385_v61, 2  ;;  %v9298_v60 = vrot.slane %v18385_v61, 3  ;;  %v9352_v40 = vrot.slane %v18385_v61, 4  ;;  %vm20847_vm11 = vmmov %vm20845_vm0 }
 0x998   : > { %9369 = vmatpush.msra.mxu0 %v11147_v18  ;;  %9389 = vmatpush.msra.mxu1 %v11148_v55  ;;  %v9406_v37 = vrot.slane %v18385_v61, 5  ;;  %v9073_v9 = vadd.f32 %v9072_v27, %v9047_v52  ;;  %v9460_v32 = vrot.slane %v18385_v61, 6  ;;  %v9514_v8 = vrot.slane %v18385_v61, 7  ;;  %vm20848_vm12 = vmmov %vm20845_vm0  ;;  %v11205_v18 = vld [vmem:[%s18773_s8 + $0x1c0] sm:$0xff]  ;;  %v11206_v55 = vld [vmem:[%s18773_s8 + $0x1c8] sm:$0xff] }
 0x999   : > { %11131 = vmatmul.msk.f32.vlgmr.msrb.gmra.mxu2 %vm20833_vm4, %v9190_v56  ;;  %11132 = vmatmul.msk.f32.vlgmr.msrb.gmra.mxu3 %vm20834_vm3, %v9190_v56  ;;  %vm20849_vm4 = vmmov %vm20845_vm0  ;;  %v11213_v56 = vld [vmem:[%s18773_s8 + $0x1f0] sm:$0xff]  ;;  %v11230_v52 = vld [vmem:[%s18773_s8 + $0x248] sm:$0xff] }
 0x99a   : > { %9370 = vmatpush.msra.mxu0 %v11145_v19  ;;  %9390 = vmatpush.msra.mxu1 %v11146_v57  ;;  %v9099_v14 = vadd.f32 %v9098_v36, %v9073_v9  ;;  %vm20850_vm3 = vmmov %vm20845_vm0  ;;  %v11214_v19 = vld [vmem:[%s18773_s8 + $0x1f8] sm:$0xff]  ;;  %v11211_v57 = vld [vmem:[%s18773_s8 + $0x1e0] sm:$0xff] }
 0x99b   : > { %9423 = vmatpush.msrb.mxu2 %v11153_v50  ;;  %9443 = vmatpush.msrb.mxu3 %v11154_v41  ;;  %v11212_v50 = vld [vmem:[%s18773_s8 + $0x1e8] sm:$0xff] }
 0x99c   : > { %v9124_v54 = vpop.f32.mrf.mxu3 }
 0x99d   : > { %9424 = vmatpush.msrb.mxu2 %v11151_v43  ;;  %9444 = vmatpush.msrb.mxu3 %v11152_v11  ;;  %v18512_v28 = vadd.f32 %v9124_v54, %v9099_v14  ;;  %v9049_v41 = vpop.f32.mrf.mxu0  ;;  %v11219_v11 = vld [vmem:[%s18773_s8 + $0x210] sm:$0xff] }
 0x99e   : > { %v9101_v48 = vpop.f32.mrf.mxu2 }
 0x99f   : > { %11137 = vmatmul.msk.f32.vlgmr.msrb.gmra.mxu0 %vm20835_vm10, %v9244_v30  ;;  %11138 = vmatmul.msk.f32.vlgmr.msrb.gmra.mxu1 %vm20836_vm5, %v9244_v30  ;;  %v9622_v38 = vrot.slane %v18512_v28, 1  ;;  %v9676_v4 = vrot.slane %v18512_v28, 2  ;;  %vm20851_vm10 = vmmov %vm20845_vm0  ;;  %v9730_v61 = vrot.slane %v18512_v28, 3  ;;  %v9784_v43 = vrot.slane %v18512_v28, 4  ;;  %v11220_v30 = vld [vmem:[%s18773_s8 + $0x218] sm:$0xff] }
 0x9a0   : > { %9477 = vmatpush.msrb.mxu0 %v11159_v3  ;;  %9497 = vmatpush.msrb.mxu1 %v11160_v31  ;;  %vm20852_vm5 = vmmov %vm20845_vm0  ;;  %v9050_v3 = vadd.f32 %v9049_v41, %v18383_v46  ;;  %v9838_v31 = vrot.slane %v18512_v28, 5  ;;  %v11225_v46 = vld [vmem:[%s18773_s8 + $0x230] sm:$0xff] }
 0x9a1   : > { %11143 = vmatmul.msk.f32.vlgmr.msra.gmra.mxu2 %vm20837_vm14, %v9298_v60  ;;  %11144 = vmatmul.msk.f32.vlgmr.msra.gmra.mxu3 %vm20838_vm9, %v9298_v60  ;;  %vm20853_vm14 = vmmov %vm20845_vm0  ;;  %v11218_v60 = vld [vmem:[%s18773_s8 + $0x208] sm:$0xff] }
 0x9a2   : > { %9478 = vmatpush.msrb.mxu0 %v11157_v53  ;;  %9498 = vmatpush.msrb.mxu1 %v11158_v20  ;;  %vm20854_vm9 = vmmov %vm20845_vm0  ;;  %v11226_v53 = vld [vmem:[%s18773_s8 + $0x238] sm:$0xff]  ;;  %v9075_v20 = vpop.f32.mrf.mxu1 }
 0x9a3   : > { %9531 = vmatpush.msra.mxu2 %v11165_v13  ;;  %9551 = vmatpush.msra.mxu3 %v11166_v7  ;;  %v11223_v13 = vld [vmem:[%s18773_s8 + $0x220] sm:$0xff]  ;;  %v11224_v7 = vld [vmem:[%s18773_s8 + $0x228] sm:$0xff] }
 0x9a5   : > { %9532 = vmatpush.msra.mxu2 %v11163_v42  ;;  %9552 = vmatpush.msra.mxu3 %v11164_v49  ;;  %v9076_v42 = vadd.f32 %v9075_v20, %v9050_v3  ;;  %v9892_v49 = vrot.slane %v18512_v28, 6  ;;  %v10223_v3 = vld [vmem:[%s18775_s10 + $0x58] sm:$0xff]  ;;  %v10222_v20 = vld [vmem:[%s18775_s10 + $0x50] sm:$0xff] }
 0x9a7   : > { %11149 = vmatmul.msk.f32.vlgmr.msra.gmra.mxu0 %vm20839_vm15, %v9352_v40  ;;  %11150 = vmatmul.msk.f32.vlgmr.msra.gmra.mxu1 %vm20840_vm13, %v9352_v40  ;;  %vm20855_vm15 = vmmov %vm20845_vm0  ;;  %v9102_v40 = vadd.f32 %v9101_v48, %v9076_v42 }
 0x9a8   : > { %9585 = vmatpush.msra.mxu0 %v11171_v5  ;;  %9605 = vmatpush.msra.mxu1 %v11172_v33  ;;  %vm20856_vm13 = vmmov %vm20845_vm0  ;;  %v9946_v5 = vrot.slane %v18512_v28, 7  ;;  %v11229_v33 = vld [vmem:[%s18773_s8 + $0x240] sm:$0xff] }
 0x9a9   : > { %11155 = vmatmul.msk.f32.vlgmr.msrb.gmra.mxu2 %vm20841_vm8, %v9406_v37  ;;  %11156 = vmatmul.msk.f32.vlgmr.msrb.gmra.mxu3 %vm20842_vm7, %v9406_v37  ;;  %vm20857_vm8 = vmmov %vm20845_vm0  ;;  %v9127_v37 = vpop.f32.mrf.mxu3 }
 0x9aa   : > { %9586 = vmatpush.msra.mxu0 %v11169_v23  ;;  %9606 = vmatpush.msra.mxu1 %v11170_v58  ;;  %vm20858_vm7 = vmmov %vm20845_vm0  ;;  %v11237_v23 = vld [vmem:[%s18773_s8 + $0x270] sm:$0xff]  ;;  %v11238_v58 = vld [vmem:[%s18773_s8 + $0x278] sm:$0xff]  ;;  %v9128_v27 = vadd.f32 %v9127_v37, %v9102_v40 }
 0x9ab   : > { %9639 = vmatpush.msrb.mxu2 %v11177_v22  ;;  %9659 = vmatpush.msrb.mxu3 %v11178_v51  ;;  %v11235_v22 = vld [vmem:[%s18773_s8 + $0x260] sm:$0xff]  ;;  %v11236_v51 = vld [vmem:[%s18773_s8 + $0x268] sm:$0xff] }
 0x9ac   : > { %v10162_v9 = vrot.slane %v9128_v27, 3 }
 0x9ad   : > { %9640 = vmatpush.msrb.mxu2 %v11175_v35  ;;  %9660 = vmatpush.msrb.mxu3 %v11176_v59  ;;  %v10054_v35 = vrot.slane %v9128_v27, 1  ;;  %v10108_v59 = vrot.slane %v9128_v27, 2 }
 0x9af   : > { %11161 = vmatmul.msk.f32.vlgmr.msrb.gmra.mxu0 %vm20843_vm1, %v9460_v32  ;;  %11162 = vmatmul.msk.f32.vlgmr.msrb.gmra.mxu1 %vm20844_vm6, %v9460_v32  ;;  %vm20859_vm1 = vmmov %vm20845_vm0 }
 0x9b0   : > { %9693 = vmatpush.msrb.mxu0 %v11183_v2  ;;  %9713 = vmatpush.msrb.mxu1 %v11184_v6  ;;  %vm20860_vm6 = vmmov %vm20845_vm0 }
 0x9b1   : > { %11167 = vmatmul.msk.f32.vlgmr.msra.gmra.mxu2 %vm20845_vm0, %v9514_v8  ;;  %11168 = vmatmul.msk.f32.vlgmr.msra.gmra.mxu3 %vm20846_vm2, %v9514_v8  ;;  %vm20861_vm2 = vmmov %vm20845_vm0 }
 0x9b2   : > { %9694 = vmatpush.msrb.mxu0 %v11181_v34  ;;  %9714 = vmatpush.msrb.mxu1 %v11182_v29 }
 0x9b3   : > { %9747 = vmatpush.msra.mxu2 %v11189_v26  ;;  %9767 = vmatpush.msra.mxu3 %v11190_v24 }
 0x9b5   : > { %9748 = vmatpush.msra.mxu2 %v11187_v16  ;;  %9768 = vmatpush.msra.mxu3 %v11188_v47 }
 0x9b7   : > { %11173 = vmatmul.msk.f32.vlgmr.msra.gmra.mxu0 %vm20847_vm11, %v18512_v28  ;;  %11174 = vmatmul.msk.f32.vlgmr.msra.gmra.mxu1 %vm20848_vm12, %v18512_v28  ;;  %vm20862_vm11 = vmmov %vm20845_vm0 }
 0x9b8   : > { %9801 = vmatpush.msra.mxu0 %v11195_v0  ;;  %9821 = vmatpush.msra.mxu1 %v11196_v1  ;;  %vm20863_vm12 = vmmov %vm20845_vm0  ;;  %v9130_v0 = vld [vmem:[%s18774_s9] sm:$0x3] }
 0x9b9   : > { %11179 = vmatmul.msk.f32.vlgmr.msrb.gmra.mxu2 %vm20849_vm4, %v9622_v38  ;;  %11180 = vmatmul.msk.f32.vlgmr.msrb.gmra.mxu3 %vm20850_vm3, %v9622_v38  ;;  %vm20864_vm4 = vmmov %vm20845_vm0 }
 0x9ba   : > { %9802 = vmatpush.msra.mxu0 %v11193_v10  ;;  %9822 = vmatpush.msra.mxu1 %v11194_v63  ;;  %vm20865_vm3 = vmmov %vm20845_vm0 }
 0x9bb   : > { %9855 = vmatpush.msrb.mxu2 %v11201_v44  ;;  %9875 = vmatpush.msrb.mxu3 %v11202_v25 }
 0x9bd   : > { %9856 = vmatpush.msrb.mxu2 %v11199_v39  ;;  %9876 = vmatpush.msrb.mxu3 %v11200_v62 }
 0x9bf   : > { %11185 = vmatmul.msk.f32.vlgmr.msrb.gmra.mxu0 %vm20851_vm10, %v9676_v4  ;;  %11186 = vmatmul.msk.f32.vlgmr.msrb.gmra.mxu1 %vm20852_vm5, %v9676_v4  ;;  %vm20866_vm10 = vmmov %vm20845_vm0  ;;  %v10227_v4 = vld [vmem:[%s18775_s10 + $0x78] sm:$0xff] }
 0x9c0   : > { %9909 = vmatpush.msrb.mxu0 %v11207_v45  ;;  %9929 = vmatpush.msrb.mxu1 %v11208_v12  ;;  %vm20867_vm5 = vmmov %vm20845_vm0  ;;  %v10226_v45 = vld [vmem:[%s18775_s10 + $0x70] sm:$0xff] }
 0x9c1   : > { %11191 = vmatmul.msk.f32.vlgmr.msra.gmra.mxu2 %vm20853_vm14, %v9730_v61  ;;  %11192 = vmatmul.msk.f32.vlgmr.msra.gmra.mxu3 %vm20854_vm9, %v9730_v61  ;;  %vm20868_vm14 = vmmov %vm20845_vm0 }
 0x9c2   : > { %9910 = vmatpush.msrb.mxu0 %v11205_v18  ;;  %9930 = vmatpush.msrb.mxu1 %v11206_v55  ;;  %vm20869_vm9 = vmmov %vm20845_vm0  ;;  %v10225_v18 = vld [vmem:[%s18775_s10 + $0x68] sm:$0xff] }
 0x9c3   : > { %9963 = vmatpush.msra.mxu2 %v11213_v56  ;;  %9983 = vmatpush.msra.mxu3 %v11214_v19 }
 0x9c5   : > { %9964 = vmatpush.msra.mxu2 %v11211_v57  ;;  %9984 = vmatpush.msra.mxu3 %v11212_v50 }
 0x9c7   : > { %11197 = vmatmul.msk.f32.vlgmr.msra.gmra.mxu0 %vm20855_vm15, %v9784_v43  ;;  %11198 = vmatmul.msk.f32.vlgmr.msra.gmra.mxu1 %vm20856_vm13, %v9784_v43  ;;  %vm9181_vm15 = vcmask 1040384   ;;  %vm10237_vm13 = vcmask 261120  }
 0x9c8   : > { %10017 = vmatpush.msra.mxu0 %v11219_v11  ;;  %10037 = vmatpush.msra.mxu1 %v11220_v30  ;;  %v10224_v30 = vld [vmem:[%s18775_s10 + $0x60] sm:$0xff] }
 0x9c9   : > { %11203 = vmatmul.msk.f32.vlgmr.msrb.gmra.mxu2 %vm20857_vm8, %v9838_v31  ;;  %11204 = vmatmul.msk.f32.vlgmr.msrb.gmra.mxu3 %vm20858_vm7, %v9838_v31  ;;  %vm10281_vm8 = vcmask 73728  }
 0x9ca   : > { %10018 = vmatpush.msra.mxu0 %v11217_v17  ;;  %10038 = vmatpush.msra.mxu1 %v11218_v60 }
 0x9cb   : > { %10071 = vmatpush.msrb.mxu2 %v11225_v46  ;;  %10091 = vmatpush.msrb.mxu3 %v11226_v53 }
 0x9cd   : > { %10072 = vmatpush.msrb.mxu2 %v11223_v13  ;;  %10092 = vmatpush.msrb.mxu3 %v11224_v7 }
 0x9cf   : > { %11209 = vmatmul.msk.f32.vlgmr.msrb.gmra.mxu0 %vm20859_vm1, %v9892_v49  ;;  %11210 = vmatmul.msk.f32.vlgmr.msrb.gmra.mxu1 %vm20860_vm6, %v9892_v49 }
 0x9d0   : > { %10125 = vmatpush.msrb.mxu0 %v11231_v15  ;;  %10145 = vmatpush.msrb.mxu1 %v11232_v21  ;;  %v10221_v21 = vld [vmem:[%s18775_s10 + $0x48] sm:$0xff] }
 0x9d1   : > { %11215 = vmatmul.msk.f32.vlgmr.msra.gmra.mxu2 %vm20845_vm0, %v9946_v5  ;;  %11216 = vmatmul.msk.f32.vlgmr.msra.gmra.mxu3 %vm20861_vm2, %v9946_v5 }
 0x9d2   : > { %10126 = vmatpush.msrb.mxu0 %v11229_v33  ;;  %10146 = vmatpush.msrb.mxu1 %v11230_v52  ;;  %v10220_v33 = vld [vmem:[%s18775_s10 + $0x40] sm:$0xff]  ;;  %v10219_v52 = vld [vmem:[%s18775_s10 + $0x38] sm:$0xff] }
 0x9d3   : > { %10179 = vmatpush.msra.mxu2 %v11237_v23  ;;  %10199 = vmatpush.msra.mxu3 %v11238_v58 }
 0x9d5   : > { %10180 = vmatpush.msra.mxu2 %v11235_v22  ;;  %10200 = vmatpush.msra.mxu3 %v11236_v51 }
 0x9d7   : > { %11221 = vmatmul.msk.f32.vlgmr.msra.gmra.mxu0 %vm20862_vm11, %v9128_v27  ;;  %11222 = vmatmul.msk.f32.vlgmr.msra.gmra.mxu1 %vm20863_vm12, %v9128_v27  ;;  %v10218_v27 = vld [vmem:[%s18775_s10 + $0x30] sm:$0xff] }
 0x9d8   : > { %10240 = vmatpush.msra.mxu0 %v10227_v4  ;;  %v10228_v4 = vld [vmem:[%s18775_s10 + $0x80] sm:$0xff] }
 0x9d9   : > { %11227 = vmatmul.msk.f32.vlgmr.msrb.gmra.mxu2 %vm20864_vm4, %v10054_v35  ;;  %11228 = vmatmul.msk.f32.vlgmr.msrb.gmra.mxu3 %vm20865_vm3, %v10054_v35 }
 0x9da   : > { %10241 = vmatpush.msra.mxu0 %v10226_v45  ;;  %v10212_v45 = vld [vmem:[%s18775_s10] sm:$0xff] }
 0x9dc   : > { %10242 = vmatpush.msra.mxu0 %v10225_v18 }
 0x9de   : > { %10243 = vmatpush.msra.mxu0 %v10224_v30 }
 0x9df   : > { %11233 = vmatmul.msk.f32.vlgmr.msrb.gmra.mxu0 %vm20866_vm10, %v10108_v59  ;;  %11234 = vmatmul.msk.f32.vlgmr.msrb.gmra.mxu1 %vm20867_vm5, %v10108_v59 }
 0x9e0   : > { %10244 = vmatpush.msra.mxu0 %v10223_v3 }
 0x9e1   : > { %11239 = vmatmul.msk.f32.vlgmr.msra.gmra.mxu2 %vm20868_vm14, %v10162_v9  ;;  %11240 = vmatmul.msk.f32.vlgmr.msra.gmra.mxu3 %vm20869_vm9, %v10162_v9  ;;  %v10217_v9 = vld [vmem:[%s18775_s10 + $0x28] sm:$0xff] }
 0x9e2   : > { %10245 = vmatpush.msra.mxu0 %v10222_v20 }
 0x9e4   : > { %10246 = vmatpush.msra.mxu0 %v10221_v21 }
 0x9e6   : > { %10247 = vmatpush.msra.mxu0 %v10220_v33 }
 0x9e8   : > { %10248 = vmatpush.msra.mxu0 %v10219_v52 }
 0x9ea   : > { %10249 = vmatpush.msra.mxu0 %v10218_v27  ;;  %v10232_v27 = vld [vmem:[%s18776_s11] sm:$0x1] }
 0x9ec   : > { %10250 = vmatpush.msra.mxu0 %v10217_v9 }
 0xa14   : > { %v9155_v32 = vpop.f32.mrf.mxu0  ;;  %v9175_v2 = vpop.f32.mrf.mxu1 }
 0xa15   : > { %v9180_v24 = vrot.slane %v9175_v2, 7 }
 0xa17   : > { %v9182_v1 = vsel %vm9181_vm15, %v9155_v32, %v9180_v24  ;;  %v10231_v24 = vld [vmem:[%s18775_s10 + $0x98] sm:$0xff] }
 0xa18   : > { %v9184_v44 = vadd.f32 %v9182_v1, %v9130_v0  ;;  %10272 = vmatpush.msra.mxu1 %v10231_v24  ;;  %v10230_v0 = vld [vmem:[%s18775_s10 + $0x90] sm:$0xff] }
 0xa1a   : > { %10273 = vmatpush.msra.mxu1 %v10230_v0 }
 0xa1c   : > { %v9210_v6 = vpop.f32.mrf.mxu2  ;;  %v9230_v36 = vpop.f32.mrf.mxu3 }
 0xa1d   : > { %v9264_v14 = vpop.f32.mrf.mxu0  ;;  %v9284_v8 = vpop.f32.mrf.mxu1  ;;  %v9235_v16 = vrot.slane %v9230_v36, 7 }
 0xa1e   : > { %v9289_v25 = vrot.slane %v9284_v8, 7 }
 0xa1f   : > { %v9236_v63 = vsel %vm9181_vm15, %v9210_v6, %v9235_v16 }
 0xa20   : > { %v9238_v62 = vadd.f32 %v9236_v63, %v9184_v44  ;;  %v9290_v55 = vsel %vm9181_vm15, %v9264_v14, %v9289_v25 }
 0xa22   : > { %v9292_v50 = vadd.f32 %v9290_v55, %v9238_v62  ;;  %v10213_v62 = vld [vmem:[%s18775_s10 + $0x8] sm:$0xff] }
 0xa24   : > { %v9318_v34 = vpop.f32.mrf.mxu2  ;;  %v9338_v29 = vpop.f32.mrf.mxu3 }
 0xa25   : > { %v9372_v54 = vpop.f32.mrf.mxu0  ;;  %v9392_v26 = vpop.f32.mrf.mxu1  ;;  %v9343_v39 = vrot.slane %v9338_v29, 7 }
 0xa26   : > { %v9397_v41 = vrot.slane %v9392_v26, 7  ;;  %v10215_v26 = vld [vmem:[%s18775_s10 + $0x18] sm:$0xff] }
 0xa27   : > { %v9344_v56 = vsel %vm9181_vm15, %v9318_v34, %v9343_v39 }
 0xa28   : > { %v9346_v11 = vadd.f32 %v9344_v56, %v9292_v50  ;;  %v9398_v31 = vsel %vm9181_vm15, %v9372_v54, %v9397_v41  ;;  %v10216_v54 = vld [vmem:[%s18775_s10 + $0x20] sm:$0xff] }
 0xa29   : > { %10251 = vmatpush.msra.mxu0 %v10216_v54 }
 0xa2a   : > { %v9400_v60 = vadd.f32 %v9398_v31, %v9346_v11 }
 0xa2b   : > { %10252 = vmatpush.msra.mxu0 %v10215_v26 }
 0xa2c   : > { %v9426_v47 = vpop.f32.mrf.mxu2  ;;  %v9446_v28 = vpop.f32.mrf.mxu3 }
 0xa2d   : > { %v9480_v38 = vpop.f32.mrf.mxu0  ;;  %v9500_v10 = vpop.f32.mrf.mxu1  ;;  %v9451_v43 = vrot.slane %v9446_v28, 7 }
 0xa2e   : > { %v9505_v13 = vrot.slane %v9500_v10, 7  ;;  %v10229_v10 = vld [vmem:[%s18775_s10 + $0x88] sm:$0xff] }
 0xa2f   : > { %v9452_v17 = vsel %vm9181_vm15, %v9426_v47, %v9451_v43  ;;  %10274 = vmatpush.msra.mxu1 %v10229_v10 }
 0xa30   : > { %v9454_v15 = vadd.f32 %v9452_v17, %v9400_v60  ;;  %v9506_v48 = vsel %vm9181_vm15, %v9480_v38, %v9505_v13  ;;  %v10214_v38 = vld [vmem:[%s18775_s10 + $0x10] sm:$0xff] }
 0xa31   : > { %10253 = vmatpush.msra.mxu0 %v10214_v38  ;;  %10275 = vmatpush.msra.mxu1 %v10228_v4 }
 0xa32   : > { %v9508_v5 = vadd.f32 %v9506_v48, %v9454_v15 }
 0xa33   : > { %10254 = vmatpush.msra.mxu0 %v10213_v62 }
 0xa34   : > { %v9534_v12 = vpop.f32.mrf.mxu2  ;;  %v9554_v61 = vpop.f32.mrf.mxu3 }
 0xa35   : > { %v9588_v19 = vpop.f32.mrf.mxu0  ;;  %v9608_v57 = vpop.f32.mrf.mxu1  ;;  %v9559_v7 = vrot.slane %v9554_v61, 7  ;;  %10255 = vmatpush.msra.mxu0 %v10212_v45 }
 0xa36   : > { %v9613_v37 = vrot.slane %v9608_v57, 7 }
 0xa37   : > { %v9560_v40 = vsel %vm9181_vm15, %v9534_v12, %v9559_v7 }
 0xa38   : > { %v9562_v58 = vadd.f32 %v9560_v40, %v9508_v5  ;;  %v9614_v32 = vsel %vm9181_vm15, %v9588_v19, %v9613_v37 }
 0xa3a   : > { %v9616_v6 = vadd.f32 %v9614_v32, %v9562_v58 }
 0xa3c   : > { %v9642_v46 = vpop.f32.mrf.mxu2  ;;  %v9662_v53 = vpop.f32.mrf.mxu3 }
 0xa3d   : > { %v9696_v42 = vpop.f32.mrf.mxu0  ;;  %v9716_v49 = vpop.f32.mrf.mxu1  ;;  %v9667_v23 = vrot.slane %v9662_v53, 7 }
 0xa3e   : > { %v9721_v36 = vrot.slane %v9716_v49, 7 }
 0xa3f   : > { %v9668_v2 = vsel %vm9181_vm15, %v9642_v46, %v9667_v23 }
 0xa40   : > { %v9670_v8 = vadd.f32 %v9668_v2, %v9616_v6  ;;  %v9722_v16 = vsel %vm9181_vm15, %v9696_v42, %v9721_v36 }
 0xa42   : > { %v9724_v1 = vadd.f32 %v9722_v16, %v9670_v8 }
 0xa44   : > { %v9750_v22 = vpop.f32.mrf.mxu2  ;;  %v9770_v51 = vpop.f32.mrf.mxu3 }
 0xa45   : > { %v9824_v35 = vpop.f32.mrf.mxu1  ;;  %v9804_v59 = vpop.f32.mrf.mxu0  ;;  %v9775_v14 = vrot.slane %v9770_v51, 7 }
 0xa46   : > { %v9829_v63 = vrot.slane %v9824_v35, 7 }
 0xa47   : > { %v9776_v47 = vsel %vm9181_vm15, %v9750_v22, %v9775_v14 }
 0xa48   : > { %v9778_v25 = vadd.f32 %v9776_v47, %v9724_v1  ;;  %v9830_v12 = vsel %vm9181_vm15, %v9804_v59, %v9829_v63 }
 0xa4a   : > { %v9832_v18 = vadd.f32 %v9830_v12, %v9778_v25 }
 0xa4c   : > { %v9858_v34 = vpop.f32.mrf.mxu2  ;;  %v9878_v29 = vpop.f32.mrf.mxu3 }
 0xa4d   : > { %v9932_v28 = vpop.f32.mrf.mxu1  ;;  %v9883_v44 = vrot.slane %v9878_v29, 7  ;;  %v9912_v39 = vpop.f32.mrf.mxu0 }
 0xa4e   : > { %v9937_v19 = vrot.slane %v9932_v28, 7 }
 0xa4f   : > { %v9884_v61 = vsel %vm9181_vm15, %v9858_v34, %v9883_v44 }
 0xa50   : > { %v9886_v41 = vadd.f32 %v9884_v61, %v9832_v18  ;;  %v9938_v43 = vsel %vm9181_vm15, %v9912_v39, %v9937_v19 }
 0xa52   : > { %v9940_v30 = vadd.f32 %v9938_v43, %v9886_v41 }
 0xa54   : > { %v9966_v55 = vpop.f32.mrf.mxu2  ;;  %v9986_v56 = vpop.f32.mrf.mxu3 }
 0xa55   : > { %v9991_v57 = vrot.slane %v9986_v56, 7  ;;  %v10040_v50 = vpop.f32.mrf.mxu1  ;;  %v10020_v3 = vpop.f32.mrf.mxu0 }
 0xa56   : > { %v10045_v31 = vrot.slane %v10040_v50, 7 }
 0xa57   : > { %v9992_v11 = vsel %vm9181_vm15, %v9966_v55, %v9991_v57 }
 0xa58   : > { %v9994_v17 = vadd.f32 %v9992_v11, %v9940_v30  ;;  %v10046_v13 = vsel %vm9181_vm15, %v10020_v3, %v10045_v31 }
 0xa5a   : > { %v10048_v42 = vadd.f32 %v10046_v13, %v9994_v17 }
 0xa5c   : > { %v10074_v60 = vpop.f32.mrf.mxu2  ;;  %v10094_v46 = vpop.f32.mrf.mxu3 }
 0xa5d   : > { %v10099_v53 = vrot.slane %v10094_v46, 7  ;;  %v10148_v20 = vpop.f32.mrf.mxu1  ;;  %v10128_v21 = vpop.f32.mrf.mxu0 }
 0xa5e   : > { %v10153_v49 = vrot.slane %v10148_v20, 7 }
 0xa5f   : > { %v10100_v7 = vsel %vm9181_vm15, %v10074_v60, %v10099_v53 }
 0xa60   : > { %v10102_v15 = vadd.f32 %v10100_v7, %v10048_v42  ;;  %v10154_v40 = vsel %vm9181_vm15, %v10128_v21, %v10153_v49 }
 0xa62   : > { %v10156_v33 = vadd.f32 %v10154_v40, %v10102_v15 }
 0xa64   : > { %v10202_v48 = vpop.f32.mrf.mxu3  ;;  %v10182_v52 = vpop.f32.mrf.mxu2 }
 0xa65   : > { %v10207_v5 = vrot.slane %v10202_v48, 7 }
 0xa67   : > { %v10208_v37 = vsel %vm9181_vm15, %v10182_v52, %v10207_v5 }
 0xa68   : > { %v10210_v23 = vadd.f32 %v10208_v37, %v10156_v33 }
 0xa6a   : > { %v10211_v58 = vmax.f32 %v10210_v23, 0.0 }
 0xa6c   : > { %v10234_v22 = vperm.slane %v10211_v58, 0  ;;  %v10235_v51 = vperm.slane %v10211_v58, 1 }
 0xa6e   : > { %10256 = vmatmul.f32.vlgmr.msra.gmra.mxu0 %v10234_v22  ;;  %11241 = vmatmul.msk.f32.vlgmr.msra.gmra.mxu1 %vm10237_vm13, %v10235_v51 }
 0xaeb   : > { %v10257_v35 = vpop.f32.mrf.mxu0  ;;  %v10277_v9 = vpop.f32.mrf.mxu1 }
 0xaec   : > { %v10258_v59 = vadd.f32 %v10257_v35, %v10232_v27 }
 0xaee   : > { %v10278_v32 = vadd.f32 %v10277_v9, %v10258_v59 }
 0xaf0   : > { %v10280_v2 = vmax.f32 %v10278_v32, 0.0 }
 0xaf2   : > { %v10282_v6 = vsel %vm10281_vm8, %v10280_v2, -inf }
 0xaf3   : > { %10283 = vmax.xlane.f32.xlu2 %v10282_v6 }
 0xb66   : > { %v10284_v36 = vpop.xlane.xlu2 %10283 }
 0xb67   : > { %v10285_v14 = vsub.f32 %v10280_v2, %v10284_v36 }
 0xb69   : > { %v10286_v8 = vmul.f32 1.442695, %v10285_v14 }
 0xb6b   : > { %11364 = vpow2.f32 %v10286_v8 }
 0xb71   : > { %v11365_v34 = vpop.eup %11364 }
 0xb72   : > { %v10288_v29 = vsel %vm10281_vm8, %v11365_v34, 0.0 }
 0xb73   : > { %10289 = vadd.xlane.f32.xlu0 %v10288_v29 }
 0xbe6   : > { %v10290_v54 = vpop.xlane.xlu0 %10289 }
 0xbe7   : > { %11366 = vrcp.f32 %v10290_v54  ;;  %v10302_v47 = vand.u32 2147483648, %v10290_v54  ;;  %v10300_v0 = vand.u32 2147483647, %v10290_v54  ;;  %vm10296_vm1 = vweird.f32 %v10290_v54 }
 0xbe9   : > { %v10303_v38 = vor.u32 1.1754944e-38, %v10302_v47  ;;  %vm10301_vm0 = vcmp.eq.f32.partialorder %v10300_v0, 8.507059e+37 }
 0xbed   : > { %v11367_v26 = vpop.eup %11366 }
 0xbee   : > { %v10292_v24 = vmul.f32 %v11367_v26, %v10290_v54  ;;  %vm10297_vm7 = vweird.f32 %v11367_v26 }
 0xbef   : > { %vm10298_vm6 = vmor %vm10296_vm1, %vm10297_vm7 }
 0xbf0   : > { %v10293_v16 = vsub.f32 1.0, %v10292_v24 }
 0xbf2   : > { %v10294_v28 = vmul.f32 %v11367_v26, %v10293_v16 }
 0xbf4   : > { %v10295_v1 = vadd.f32 %v11367_v26, %v10294_v28 }
 0xbf6   : > { %v10299_v10 = vsel %vm10298_vm6, %v11367_v26, %v10295_v1 }
 0xbf7   : > { %v10304_v63 = vsel %vm10301_vm0, %v10303_v38, %v10299_v10 }
 0xbf8   : > { %v10305_v44 = vmul.f32 %v11365_v34, %v10304_v63 }
 0xbfa   : > { %10306 = vst.msk [vmem:[%s405_s0] sm:$0x1] %vm10281_vm8, %v10305_v44 }
 0xbfb   : > { %11395 = shalt.err (!%p11392_p3)
}
 0xbfc   : > { %11245 = dma.vmem_to_hbm [thread:$0]  (%p11552_p5), %s10319_s20, 16, %s10321_s26, %s10308_s28  }
 0xbfd PF: > { %p11251_p4 = scmp.ge.s32.totalorder %s11430_s24, 2  ;;  %s10332_s19 = sand.u32 1, %s11418_s21  }
 0xbfe   : > { %s10333_s0 = scalar_lea.sflag [#allocation3], %s10332_s19 }
 0xbff   : > { %p11248_p7 = pnand %p11251_p4, %p11556_p6 }
 0xc01   : > { %p11249_p8 = pneg %p11248_p7 }
 0xc03   : > { %11413 = dma.done.wait (%p11249_p8), %s10333_s0, 16  }
 0xc04   : > { %11415 = vsyncadd (%p11249_p8), %s10333_s0, 4294967280  ;;  %p22_p9 = scmp.ge.s32.totalorder %s11539_s27, 4   ;;  %s20870_s21 = smov %s11422_s22 }
 0xc05   : > { %s20871_s22 = smov %s11426_s23  ;;  %s20872_s23 = smov %s11550_s30 }
 0xc06   : > { %s20873_s24 = smov %s11539_s27  ;;  %24 = sbr.rel (!%p22_p9) target bundleno = 6 (0x6), region = 173 }
 0xc0b   :  { %10338 = vsyncpa [#allocation3], 1 }
 0xc0c   :  { %10340 = vsyncpa [#allocation3 + $0x1], 1 }

</bundles_post_ra>
